<compile_context>
chip_gen: v7x
topology: tpu7x:2x2x1
jax: 0.10.0
libtpu: 0.0.40
codegen_flags: <defaults>
</compile_context>

<pallas_src>
import functools

import jax
import jax.numpy as jnp
from jax import lax
from jax.experimental import pallas as pl
from jax.experimental.pallas import tpu as pltpu


def _round_up(x, m):
    return ((x + m - 1) // m) * m


@functools.lru_cache(maxsize=None)
def _vmem_limit_bytes():
    """Generation-aware scoped-VMEM budget (64 MiB-class chips get 32 MiB)."""
    try:
        cap = int(pltpu.get_tpu_info().vmem_capacity_bytes)
        return max(32 * 1024 * 1024, min(64 * 1024 * 1024, cap // 2))
    except Exception:
        return 32 * 1024 * 1024


@functools.lru_cache(maxsize=None)
def _default_tm():
    """Bigger M tiles where VMEM allows (v5e/v6e: 128 MiB -> tm=512)."""
    return 512 if _vmem_limit_bytes() >= 64 * 1024 * 1024 else 256


# --------------------------------------------------------------------------
# Gridded fused Linear (+ optional activation) kernel (bf16 MXU, f32 acc)
# --------------------------------------------------------------------------
def linear_kernel(x_ref, w_ref, b_ref, o_ref, *, activation):
    y = jnp.dot(x_ref[...], w_ref[...],
                preferred_element_type=jnp.float32) + b_ref[...]
    if activation == "relu":
        y = jnp.maximum(y, 0.0)
    elif activation == "tanh":
        y = jnp.tanh(y)
    o_ref[...] = y.astype(o_ref.dtype)


def linear(x, w, b, activation="none", out_dtype=jnp.float32, tm=None):
    """y = act(x @ w + b). Grid over M tiles; N padded lane-dense to 128."""
    M, K = x.shape
    N = w.shape[1]
    if tm is None:
        tm = _default_tm()
    Np = _round_up(N, 128)
    tm = min(tm, _round_up(M, 8))
    Mp = _round_up(M, tm)

    x16 = x.astype(jnp.bfloat16)          # pre-cast: halves HBM->VMEM DMA
    w16 = w.astype(jnp.bfloat16)
    b32 = b.astype(jnp.float32).reshape(1, N)
    if Np != N:
        w16 = jnp.pad(w16, ((0, 0), (0, Np - N)))
        b32 = jnp.pad(b32, ((0, 0), (0, Np - N)))
    if Mp != M:
        x16 = jnp.pad(x16, ((0, Mp - M), (0, 0)))

    out = pl.pallas_call(
        functools.partial(linear_kernel, activation=activation),
        out_shape=jax.ShapeDtypeStruct((Mp, Np), out_dtype),
        grid=(Mp // tm,),
        in_specs=[pl.BlockSpec((tm, K), lambda i: (i, 0)),
                  pl.BlockSpec((K, Np), lambda i: (0, 0)),
                  pl.BlockSpec((1, Np), lambda i: (0, 0))],
        out_specs=pl.BlockSpec((tm, Np), lambda i: (i, 0)),
        compiler_params=pltpu.CompilerParams(
            dimension_semantics=("parallel",),
            vmem_limit_bytes=_vmem_limit_bytes()),
    )(x16, w16, b32)
    if Mp != M or Np != N:
        out = out[:M, :N]
    return out


# --------------------------------------------------------------------------
# Bidirectional LSTM recurrent kernel (input projection precomputed),
# batch-gridded, single fused (T, bb, 2H) output.
# --------------------------------------------------------------------------
def bilstm_recurrent_kernel(xw_ref, len_ref, whh_f_ref, whh_r_ref, out_ref,
                            hf, cf, hr, cr):
    # xw_ref : (T, bb, 8H) bf16 -- x @ [wih_f | wih_r] + [b_f | b_r]
    # len_ref: (bb, 1) int32
    # whh_*  : (H, 4H) bf16
    # out_ref: (T, bb, 2H) f32 (fwd in lanes [0:H], rev in [H:2H])
    T = xw_ref.shape[0]
    H = whh_f_ref.shape[0]
    G = 4 * H

    # hoisted loads (kept live across the whole loop)
    whh_f = whh_f_ref[...]
    whh_r = whh_r_ref[...]
    lengths = len_ref[...]                      # (bb, 1) int32

    hf[...] = jnp.zeros_like(hf)
    cf[...] = jnp.zeros_like(cf)
    hr[...] = jnp.zeros_like(hr)
    cr[...] = jnp.zeros_like(cr)

    def gates_to_hc(g, c):
        # TODO(synk): pad H to a multiple of 128 so these lane slices are
        #             vreg-aligned for production hidden sizes.
        i_g = jax.nn.sigmoid(g[:, 0:H])
        f_g = jax.nn.sigmoid(g[:, H:2 * H])
        g_g = jnp.tanh(g[:, 2 * H:3 * H])
        o_g = jax.nn.sigmoid(g[:, 3 * H:4 * H])
        c_new = f_g * c + i_g * g_g
        h_new = o_g * jnp.tanh(c_new)
        return h_new, c_new

    def body(t, carry):
        rt = T - 1 - t
        xw_t = xw_ref[t]                        # (bb, 8H) bf16
        xw_rt = xw_ref[rt]
        # Two independent recurrent matmuls per step (fwd + rev interleaved).
        gf = (xw_t[:, 0:G].astype(jnp.float32)
              + jnp.dot(hf[...].astype(jnp.bfloat16), whh_f,
                        preferred_element_type=jnp.float32))
        gr = (xw_rt[:, G:2 * G].astype(jnp.float32)
              + jnp.dot(hr[...].astype(jnp.bfloat16), whh_r,
                        preferred_element_type=jnp.float32))
        hf_new, cf_new = gates_to_hc(gf, cf[...])
        hr_new, cr_new = gates_to_hc(gr, cr[...])
        vf = t < lengths                        # (bb, 1) bool
        vr = rt < lengths
        hf[...] = jnp.where(vf, hf_new, hf[...])
        cf[...] = jnp.where(vf, cf_new, cf[...])
        hr[...] = jnp.where(vr, hr_new, hr[...])
        cr[...] = jnp.where(vr, cr_new, cr[...])
        # Fused output: zeros at padded steps (matches pad_packed_sequence).
        out_ref[t, :, 0:H] = jnp.where(vf, hf_new, 0.0)
        out_ref[rt, :, H:2 * H] = jnp.where(vr, hr_new, 0.0)
        return carry

    unroll = True if T <= 32 else 4
    lax.fori_loop(0, T, body, 0, unroll=unroll)


def bilstm(x_tm, lengths, p, bb=8):
    """x_tm: time-major (T, B2, D) -> time-major (T, B2, 2H) f32."""
    T, B2, D = x_tm.shape
    H = p["whh_f"].shape[0]

    # Hoisted input projection for both directions in one big gridded GEMM,
    # emitted bf16 to halve the activation's HBM/VMEM footprint.
    xw = linear(x_tm.reshape(T * B2, D), p["wih"], p["b"],
                out_dtype=jnp.bfloat16)
    xw = xw.reshape(T, B2, 8 * H)

    lens = lengths.reshape(B2, 1).astype(jnp.int32)
    bb = bb if B2 % bb == 0 else B2

    return pl.pallas_call(
        bilstm_recurrent_kernel,
        out_shape=jax.ShapeDtypeStruct((T, B2, 2 * H), jnp.float32),
        grid=(B2 // bb,),
        in_specs=[pl.BlockSpec((T, bb, 8 * H), lambda i: (0, i, 0)),
                  pl.BlockSpec((bb, 1), lambda i: (i, 0)),
                  pl.BlockSpec((H, 4 * H), lambda i: (0, 0)),
                  pl.BlockSpec((H, 4 * H), lambda i: (0, 0))],
        out_specs=pl.BlockSpec((T, bb, 2 * H), lambda i: (0, i, 0)),
        scratch_shapes=[pltpu.VMEM((bb, H), jnp.float32)] * 4,
        compiler_params=pltpu.CompilerParams(
            dimension_semantics=("parallel",),
            vmem_limit_bytes=_vmem_limit_bytes()),
    )(xw, lens,
      p["whh_f"].astype(jnp.bfloat16), p["whh_r"].astype(jnp.bfloat16))


# --------------------------------------------------------------------------
# SoftmaxAttention kernel: several batch elements per grid step, batched
# einsums on the MXU, additive mask, approx reciprocal for the denominators.
# --------------------------------------------------------------------------
def attention_kernel(p_ref, h_ref, mp_row_ref, mp_col_ref, mh_row_ref,
                     mh_col_ref, ap_ref, ah_ref):
    p16 = p_ref[...].astype(jnp.bfloat16)       # (bb, Tp, D)
    h16 = h_ref[...].astype(jnp.bfloat16)       # (bb, Th, D)

    sim = jnp.einsum('bqd,bkd->bqk', p16, h16,
                     preferred_element_type=jnp.float32)     # (bb, Tp, Th)
    sim_t = jnp.einsum('bkd,bqd->bkq', h16, p16,
                       preferred_element_type=jnp.float32)   # (bb, Th, Tp)

    def masked_softmax(x, mask_row):
        # Additive mask: identical to the reference mul-mask+renormalize form
        # for rows with at least one valid token.
        x = x + (mask_row - 1.0) * 1e9
        x = x - jnp.max(x, axis=-1, keepdims=True)
        e = jnp.exp(x)
        return e * pl.reciprocal(jnp.sum(e, axis=-1, keepdims=True),
                                 approx=True)

    ph_attn = masked_softmax(sim, mh_row_ref[...])     # (bb, Tp, Th)
    hp_attn = masked_softmax(sim_t, mp_row_ref[...])   # (bb, Th, Tp)

    ap_ref[...] = jnp.einsum('bqk,bkd->bqd', ph_attn.astype(jnp.bfloat16),
                             h16, preferred_element_type=jnp.float32
                             ) * mp_col_ref[...]
    ah_ref[...] = jnp.einsum('bqk,bkd->bqd', hp_attn.astype(jnp.bfloat16),
                             p16, preferred_element_type=jnp.float32
                             ) * mh_col_ref[...]


def soft_attention(enc_p, enc_h, mask_p, mask_h, bb=8):
    B, Tp, D = enc_p.shape
    Th = enc_h.shape[1]
    bb = bb if B % bb == 0 else B
    mp_row = mask_p[:, None, :].astype(jnp.float32)   # (B, 1, Tp)
    mp_col = mask_p[:, :, None].astype(jnp.float32)   # (B, Tp, 1)
    mh_row = mask_h[:, None, :].astype(jnp.float32)
    mh_col = mask_h[:, :, None].astype(jnp.float32)
    att_p, att_h = pl.pallas_call(
        attention_kernel,
        out_shape=(jax.ShapeDtypeStruct((B, Tp, D), jnp.float32),
                   jax.ShapeDtypeStruct((B, Th, D), jnp.float32)),
        grid=(B // bb,),
        in_specs=[
            pl.BlockSpec((bb, Tp, D), lambda i: (i, 0, 0)),
            pl.BlockSpec((bb, Th, D), lambda i: (i, 0, 0)),
            pl.BlockSpec((bb, 1, Tp), lambda i: (i, 0, 0)),
            pl.BlockSpec((bb, Tp, 1), lambda i: (i, 0, 0)),
            pl.BlockSpec((bb, 1, Th), lambda i: (i, 0, 0)),
            pl.BlockSpec((bb, Th, 1), lambda i: (i, 0, 0)),
        ],
        out_specs=(pl.BlockSpec((bb, Tp, D), lambda i: (i, 0, 0)),
                   pl.BlockSpec((bb, Th, D), lambda i: (i, 0, 0))),
        compiler_params=pltpu.CompilerParams(
            dimension_semantics=("parallel",),
            vmem_limit_bytes=_vmem_limit_bytes()),
    )(enc_p, enc_h, mp_row, mp_col, mh_row, mh_col)
    return att_p, att_h


# --------------------------------------------------------------------------
# Fused enhancement + projection kernel (3-matmul folded form):
#   relu(enc@(We+Ws) + att@(Wa-Ws) + (enc*att)@Wm + b)
# == relu([enc, att, enc-att, enc*att] @ W + b)  (never materialized in HBM)
# --------------------------------------------------------------------------
def enhance_project_kernel(enc_ref, att_ref, w1_ref, w2_ref, wm_ref, b_ref,
                           o_ref):
    enc = enc_ref[...]
    att = att_ref[...]
    y = (jnp.dot(enc.astype(jnp.bfloat16), w1_ref[...],
                 preferred_element_type=jnp.float32)
         + jnp.dot(att.astype(jnp.bfloat16), w2_ref[...],
                   preferred_element_type=jnp.float32)
         + jnp.dot((enc * att).astype(jnp.bfloat16), wm_ref[...],
                   preferred_element_type=jnp.float32)
         + b_ref[...])
    o_ref[...] = jnp.maximum(y, 0.0).astype(o_ref.dtype)


def enhance_project(enc_flat, att_flat, proj_w, proj_b,
                    out_dtype=jnp.float32, tm=None):
    M, D2 = enc_flat.shape          # D2 = 2H
    H = proj_w.shape[1]
    if tm is None:
        tm = _default_tm()
    w = proj_w.astype(jnp.float32)
    we, wa = w[0:D2], w[D2:2 * D2]
    ws, wm = w[2 * D2:3 * D2], w[3 * D2:4 * D2]
    w1 = (we + ws).astype(jnp.bfloat16)   # coefficient of enc
    w2 = (wa - ws).astype(jnp.bfloat16)   # coefficient of att
    wm16 = wm.astype(jnp.bfloat16)

    tm = min(tm, _round_up(M, 8))
    Mp = _round_up(M, tm)
    if Mp != M:
        enc_flat = jnp.pad(enc_flat, ((0, Mp - M), (0, 0)))
        att_flat = jnp.pad(att_flat, ((0, Mp - M), (0, 0)))

    out = pl.pallas_call(
        enhance_project_kernel,
        out_shape=jax.ShapeDtypeStruct((Mp, H), out_dtype),
        grid=(Mp // tm,),
        in_specs=[pl.BlockSpec((tm, D2), lambda i: (i, 0)),
                  pl.BlockSpec((tm, D2), lambda i: (i, 0)),
                  pl.BlockSpec((D2, H), lambda i: (0, 0)),
                  pl.BlockSpec((D2, H), lambda i: (0, 0)),
                  pl.BlockSpec((D2, H), lambda i: (0, 0)),
                  pl.BlockSpec((1, H), lambda i: (0, 0))],
        out_specs=pl.BlockSpec((tm, H), lambda i: (i, 0)),
        compiler_params=pltpu.CompilerParams(
            dimension_semantics=("parallel",),
            vmem_limit_bytes=_vmem_limit_bytes()),
    )(enc_flat, att_flat, w1, w2, wm16, proj_b.astype(jnp.float32))
    if Mp != M:
        out = out[:M]
    return out


# --------------------------------------------------------------------------
# Masked average + masked max pooling kernel (time-major input, batch grid)
# --------------------------------------------------------------------------
def pool_kernel(v_ref, m_ref, avg_ref, max_ref):
    v = v_ref[...]          # (T, bb, D)
    m = m_ref[...]          # (T, bb, 1)
    vm = v * m
    denom = jnp.maximum(jnp.sum(m, axis=0), 1.0)        # (bb, 1)
    avg_ref[...] = jnp.sum(vm, axis=0) * pl.reciprocal(denom, approx=True)
    max_ref[...] = jnp.max(vm + (-1e7) * (1.0 - m), axis=0)


def masked_pool(v_tm, mask_tm, bb=8):
    T, B2, D = v_tm.shape
    bb = bb if B2 % bb == 0 else B2
    return pl.pallas_call(
        pool_kernel,
        out_shape=(jax.ShapeDtypeStruct((B2, D), jnp.float32),
                   jax.ShapeDtypeStruct((B2, D), jnp.float32)),
        grid=(B2 // bb,),
        in_specs=[pl.BlockSpec((T, bb, D), lambda i: (0, i, 0)),
                  pl.BlockSpec((T, bb, 1), lambda i: (0, i, 0))],
        out_specs=(pl.BlockSpec((bb, D), lambda i: (i, 0)),
                   pl.BlockSpec((bb, D), lambda i: (i, 0))),
        compiler_params=pltpu.CompilerParams(
            dimension_semantics=("parallel",)),
    )(v_tm.astype(jnp.float32), mask_tm.astype(jnp.float32))


# --------------------------------------------------------------------------
# Parameter construction (deterministic, mirrors _init_esim_weights shapes)
# --------------------------------------------------------------------------
def xavier_uniform(key, shape):
    bound = (6.0 / (shape[0] + shape[1])) ** 0.5
    return jax.random.uniform(key, shape, jnp.float32, -bound, bound)


def orthogonal(key, rows, cols):
    a = jax.random.normal(key, (rows, cols), jnp.float32)
    q, _ = jnp.linalg.qr(a)
    return q


def make_lstm_params(key, D, H):
    k1, k2, k3, k4 = jax.random.split(key, 4)
    # b = b_ih (0) + b_hh (forget gate slice = 1), gate order [i, f, g, o]
    b_dir = jnp.zeros((1, 4 * H), jnp.float32).at[0, H:2 * H].set(1.0)
    return dict(
        # forward and reverse input weights / biases fused for one big GEMM
        wih=jnp.concatenate([xavier_uniform(k1, (D, 4 * H)),
                             xavier_uniform(k3, (D, 4 * H))], axis=1),
        b=jnp.concatenate([b_dir, b_dir], axis=1),            # (1, 8H)
        whh_f=jnp.transpose(orthogonal(k2, 4 * H, H)),         # (H, 4H)
        whh_r=jnp.transpose(orthogonal(k4, 4 * H, H)),
    )


def make_esim_params(key, vocab, emb_dim, hidden, num_classes):
    keys = jax.random.split(key, 8)
    embedding = jax.random.normal(keys[0], (vocab, emb_dim), jnp.float32)
    embedding = embedding.at[0].set(0.0)    # padding_idx = 0
    return dict(
        embedding=embedding,
        enc=make_lstm_params(keys[1], emb_dim, hidden),
        proj_w=xavier_uniform(keys[2], (4 * 2 * hidden, hidden)),
        proj_b=jnp.zeros((1, hidden), jnp.float32),
        comp=make_lstm_params(keys[3], hidden, hidden),
        cls_w1=xavier_uniform(keys[4], (2 * 4 * hidden, hidden)),
        cls_b1=jnp.zeros((1, hidden), jnp.float32),
        cls_w2=xavier_uniform(keys[5], (hidden, num_classes)),
        cls_b2=jnp.zeros((1, num_classes), jnp.float32),
    )


# --------------------------------------------------------------------------
# Full ESIM forward
# --------------------------------------------------------------------------
@jax.jit
def esim_forward(params, premises, prem_lengths, hypotheses, hyp_lengths,
                 labels):
    B, Tp = premises.shape
    Th = hypotheses.shape[1]
    T = max(Tp, Th)
    if Tp < T:
        premises = jnp.pad(premises, ((0, 0), (0, T - Tp)))
    if Th < T:
        hypotheses = jnp.pad(hypotheses, ((0, 0), (0, T - Th)))

    # Pad per-side batch to a multiple of 8 so every batch-gridded kernel
    # (BiLSTM, attention, pooling) gets aligned blocks; padded rows have
    # length 0 and are sliced away before the classifier.
    Bp = _round_up(B, 8)
    if Bp != B:
        premises = jnp.pad(premises, ((0, Bp - B), (0, 0)))
        hypotheses = jnp.pad(hypotheses, ((0, Bp - B), (0, 0)))
        prem_lengths = jnp.pad(prem_lengths, (0, Bp - B))
        hyp_lengths = jnp.pad(hyp_lengths, (0, Bp - B))

    # Premise + hypothesis batched together (shared weights everywhere).
    tokens = jnp.concatenate([premises, hypotheses], axis=0)        # (2Bp, T)
    lengths = jnp.concatenate([prem_lengths, hyp_lengths], axis=0)  # (2Bp,)
    mask = (tokens != 0).astype(jnp.float32)                        # (2Bp, T)

    # Embedding lookup directly in time-major layout (gather kept in glue).
    emb_tm = params["embedding"][tokens.T]                          # (T,2Bp,E)
    # RNNDropout: identity in eval mode.

    enc_tm = bilstm(emb_tm, lengths, params["enc"])                 # (T,2Bp,2H)
    # TODO(synk): fold this transpose (and the one after projection) into the
    #             adjacent kernels' BlockSpecs to avoid two HBM round trips.
    enc_bm = jnp.transpose(enc_tm, (1, 0, 2))                       # (2Bp,T,2H)

    att_p, att_h = soft_attention(enc_bm[:Bp], enc_bm[Bp:],
                                  mask[:Bp], mask[Bp:])             # batch-major
    att_bm = jnp.concatenate([att_p, att_h], axis=0)                # (2Bp,T,2H)

    D2 = enc_bm.shape[-1]
    Hh = params["proj_w"].shape[1]
    M = 2 * Bp * T
    proj = enhance_project(enc_bm.reshape(M, D2), att_bm.reshape(M, D2),
                           params["proj_w"], params["proj_b"],
                           out_dtype=jnp.bfloat16)                  # (M, H)
    proj_tm = jnp.transpose(proj.reshape(2 * Bp, T, Hh), (1, 0, 2)) # (T,2Bp,H)
    # RNNDropout: identity in eval mode.

    comp_tm = bilstm(proj_tm, lengths, params["comp"])              # (T,2Bp,2H)

    mask_tm = jnp.transpose(mask, (1, 0))[:, :, None]               # (T,2Bp,1)
    avg, mx = masked_pool(comp_tm, mask_tm)                         # (2Bp,2H) x2

    v = jnp.concatenate([avg[:B], mx[:B],
                         avg[Bp:Bp + B], mx[Bp:Bp + B]], axis=1)    # (B, 8H)

    h1 = linear(v, params["cls_w1"], params["cls_b1"], "tanh")
    logits = linear(h1, params["cls_w2"], params["cls_b2"], "none")

    # cross-entropy (mean reduction) -- tiny, kept as JAX glue
    logp = logits - jax.nn.logsumexp(logits, axis=-1, keepdims=True)
    loss = -jnp.mean(jnp.take_along_axis(logp, labels[:, None], axis=1))
    return loss, logits


# --------------------------------------------------------------------------
if __name__ == "__main__":
    B, T, E, H, VOCAB, NCLS = 2, 8, 32, 32, 64, 3
    key = jax.random.PRNGKey(0)
    kp, kh, kparams = jax.random.split(key, 3)

    prem_lengths = jnp.array([8, 5], dtype=jnp.int32)   # max == T
    hyp_lengths = jnp.array([8, 6], dtype=jnp.int32)

    premises = jax.random.randint(kp, (B, T), 1, VOCAB, dtype=jnp.int32)
    hypotheses = jax.random.randint(kh, (B, T), 1, VOCAB, dtype=jnp.int32)
    pos = jnp.arange(T)[None, :]
    premises = jnp.where(pos < prem_lengths[:, None], premises, 0)
    hypotheses = jnp.where(pos < hyp_lengths[:, None], hypotheses, 0)

    labels = jnp.array([0, 2], dtype=jnp.int32)

    params = make_esim_params(kparams, VOCAB, E, H, NCLS)

    loss, logits = esim_forward(params, premises, prem_lengths,
                                hypotheses, hyp_lengths, labels)
    jax.block_until_ready((loss, logits))
    assert logits.shape == (B, NCLS)
    assert bool(jnp.isfinite(loss))
    print("KERNEL_OK")
</pallas_src>

<mosaic_0001>
module attributes {stable_mosaic.version = 11 : i64} {
  func.func @linear_kernel(%arg0: i32, %arg1: memref<128x32xbf16, #tpu.memory_space<vmem>>, %arg2: memref<32x256xbf16, #tpu.memory_space<vmem>>, %arg3: memref<1x256xf32, #tpu.memory_space<vmem>>, %arg4: memref<128x256xbf16, #tpu.memory_space<vmem>>) attributes {dimension_semantics = [#tpu.dimension_semantics<parallel>], iteration_bounds = array<i64: 1>, scalar_prefetch = 0 : i64, scratch_operands = 0 : i64, tpu.core_type = #tpu.core_type<tc>, window_params = [{transform_indices = @transform_0, window_bounds = array<i64: 128, 32>}, {pipeline_mode = #tpu.pipeline_mode<synchronous>, transform_indices = @transform_1, window_bounds = array<i64: 32, 256>}, {pipeline_mode = #tpu.pipeline_mode<synchronous>, transform_indices = @transform_2, window_bounds = array<i64: 1, 256>}, {transform_indices = @transform_3, window_bounds = array<i64: 128, 256>}]} {
    %c0 = arith.constant 0 : index
    %c0_0 = arith.constant 0 : index
    %0 = vector.load %arg1[%c0, %c0_0] : memref<128x32xbf16, #tpu.memory_space<vmem>>, vector<128x32xbf16>
    %c0_1 = arith.constant 0 : index
    %c0_2 = arith.constant 0 : index
    %1 = vector.load %arg2[%c0_1, %c0_2] : memref<32x256xbf16, #tpu.memory_space<vmem>>, vector<32x256xbf16>
    %cst = arith.constant dense<0.000000e+00> : vector<128x256xf32>
    %2 = tpu.matmul %0, %1, %cst {dimension_numbers = #tpu.dot_dimension_numbers<[1], [0], [0], [1], [0, 0, 1, 1], [], []>} : vector<128x32xbf16>, vector<32x256xbf16>, vector<128x256xf32> -> vector<128x256xf32>
    %c0_3 = arith.constant 0 : index
    %c0_4 = arith.constant 0 : index
    %3 = vector.load %arg3[%c0_3, %c0_4] : memref<1x256xf32, #tpu.memory_space<vmem>>, vector<1x256xf32>
    %4 = vector.broadcast %3 : vector<1x256xf32> to vector<128x256xf32>
    %5 = arith.addf %2, %4 : vector<128x256xf32>
    %6 = arith.truncf %5 : vector<128x256xf32> to vector<128x256xbf16>
    %c0_5 = arith.constant 0 : index
    %c0_6 = arith.constant 0 : index
    %7 = vector.load %arg4[%c0_5, %c0_6] : memref<128x256xbf16, #tpu.memory_space<vmem>>, vector<128x256xbf16>
    tpu.vector_store %arg4[%c0_5, %c0_6], %6 {strides = array<i32>} : memref<128x256xbf16, #tpu.memory_space<vmem>>, vector<128x256xbf16>,
    return
  }
  func.func @transform_0(%arg0: i32) -> (i32, i32) {
    %c0_i32 = arith.constant 0 : i32
    %c0_i32_0 = arith.constant 0 : i32
    return %arg0, %c0_i32 : i32, i32
  }
  func.func @transform_1(%arg0: i32) -> (i32, i32) {
    %c0_i32 = arith.constant 0 : i32
    %c0_i32_0 = arith.constant 0 : i32
    %c0_i32_1 = arith.constant 0 : i32
    return %c0_i32, %c0_i32_0 : i32, i32
  }
  func.func @transform_2(%arg0: i32) -> (i32, i32) {
    %c0_i32 = arith.constant 0 : i32
    %c0_i32_0 = arith.constant 0 : i32
    %c0_i32_1 = arith.constant 0 : i32
    return %c0_i32, %c0_i32_0 : i32, i32
  }
  func.func @transform_3(%arg0: i32) -> (i32, i32) {
    %c0_i32 = arith.constant 0 : i32
    %c0_i32_0 = arith.constant 0 : i32
    return %arg0, %c0_i32 : i32, i32
  }
}

module attributes {stable_mosaic.version = 11 : i64} {
  func.func @bilstm_recurrent_kernel(%arg0: i32, %arg1: memref<8x8x256xbf16, #tpu.memory_space<vmem>>, %arg2: memref<8x1xi32, #tpu.memory_space<vmem>>, %arg3: memref<32x128xbf16, #tpu.memory_space<vmem>>, %arg4: memref<32x128xbf16, #tpu.memory_space<vmem>>, %arg5: memref<8x8x64xf32, #tpu.memory_space<vmem>>, %arg6: memref<8x32xf32, #tpu.memory_space<vmem>>, %arg7: memref<8x32xf32, #tpu.memory_space<vmem>>, %arg8: memref<8x32xf32, #tpu.memory_space<vmem>>, %arg9: memref<8x32xf32, #tpu.memory_space<vmem>>) attributes {dimension_semantics = [#tpu.dimension_semantics<parallel>], iteration_bounds = array<i64: 2>, scalar_prefetch = 0 : i64, scratch_operands = 4 : i64, tpu.core_type = #tpu.core_type<tc>, window_params = [{transform_indices = @transform_0, window_bounds = array<i64: 8, 8, 256>}, {transform_indices = @transform_1, window_bounds = array<i64: 8, 1>}, {pipeline_mode = #tpu.pipeline_mode<synchronous>, transform_indices = @transform_2, window_bounds = array<i64: 32, 128>}, {pipeline_mode = #tpu.pipeline_mode<synchronous>, transform_indices = @transform_3, window_bounds = array<i64: 32, 128>}, {transform_indices = @transform_4, window_bounds = array<i64: 8, 8, 64>}]} {
    %c0 = arith.constant 0 : index
    %c0_0 = arith.constant 0 : index
    %0 = vector.load %arg3[%c0, %c0_0] : memref<32x128xbf16, #tpu.memory_space<vmem>>, vector<32x128xbf16>
    %c0_1 = arith.constant 0 : index
    %c0_2 = arith.constant 0 : index
    %1 = vector.load %arg4[%c0_1, %c0_2] : memref<32x128xbf16, #tpu.memory_space<vmem>>, vector<32x128xbf16>
    %c0_3 = arith.constant 0 : index
    %c0_4 = arith.constant 0 : index
    %2 = vector.load %arg2[%c0_3, %c0_4] : memref<8x1xi32, #tpu.memory_space<vmem>>, vector<8x1xi32>
    %cst = arith.constant 0.000000e+00 : f32
    %3 = vector.broadcast %cst : f32 to vector<8x32xf32>
    %c0_5 = arith.constant 0 : index
    %c0_6 = arith.constant 0 : index
    %4 = vector.load %arg6[%c0_5, %c0_6] : memref<8x32xf32, #tpu.memory_space<vmem>>, vector<8x32xf32>
    tpu.vector_store %arg6[%c0_5, %c0_6], %3 {strides = array<i32>} : memref<8x32xf32, #tpu.memory_space<vmem>>, vector<8x32xf32>,
    %cst_7 = arith.constant 0.000000e+00 : f32
    %5 = vector.broadcast %cst_7 : f32 to vector<8x32xf32>
    %c0_8 = arith.constant 0 : index
    %c0_9 = arith.constant 0 : index
    %6 = vector.load %arg7[%c0_8, %c0_9] : memref<8x32xf32, #tpu.memory_space<vmem>>, vector<8x32xf32>
    tpu.vector_store %arg7[%c0_8, %c0_9], %5 {strides = array<i32>} : memref<8x32xf32, #tpu.memory_space<vmem>>, vector<8x32xf32>,
    %cst_10 = arith.constant 0.000000e+00 : f32
    %7 = vector.broadcast %cst_10 : f32 to vector<8x32xf32>
    %c0_11 = arith.constant 0 : index
    %c0_12 = arith.constant 0 : index
    %8 = vector.load %arg8[%c0_11, %c0_12] : memref<8x32xf32, #tpu.memory_space<vmem>>, vector<8x32xf32>
    tpu.vector_store %arg8[%c0_11, %c0_12], %7 {strides = array<i32>} : memref<8x32xf32, #tpu.memory_space<vmem>>, vector<8x32xf32>,
    %cst_13 = arith.constant 0.000000e+00 : f32
    %9 = vector.broadcast %cst_13 : f32 to vector<8x32xf32>
    %c0_14 = arith.constant 0 : index
    %c0_15 = arith.constant 0 : index
    %10 = vector.load %arg9[%c0_14, %c0_15] : memref<8x32xf32, #tpu.memory_space<vmem>>, vector<8x32xf32>
    tpu.vector_store %arg9[%c0_14, %c0_15], %9 {strides = array<i32>} : memref<8x32xf32, #tpu.memory_space<vmem>>, vector<8x32xf32>,
    %c0_i32 = arith.constant 0 : i32
    %c7_i32 = arith.constant 7 : i32
    %11 = arith.subi %c7_i32, %c0_i32 : i32
    %12 = arith.index_cast %c0_i32 : i32 to index
    %c0_16 = arith.constant 0 : index
    %c0_17 = arith.constant 0 : index
    %13 = vector.load %arg1[%12, %c0_16, %c0_17] : memref<8x8x256xbf16, #tpu.memory_space<vmem>>, vector<1x8x256xbf16>
    %14 = vector.shape_cast %13 : vector<1x8x256xbf16> to vector<8x256xbf16>
    %15 = arith.index_cast %11 : i32 to index
    %c0_18 = arith.constant 0 : index
    %c0_19 = arith.constant 0 : index
    %16 = vector.load %arg1[%15, %c0_18, %c0_19] : memref<8x8x256xbf16, #tpu.memory_space<vmem>>, vector<1x8x256xbf16>
    %17 = vector.shape_cast %16 : vector<1x8x256xbf16> to vector<8x256xbf16>
    %18 = vector.extract_strided_slice %14 {offsets = [0, 0], sizes = [8, 128], strides = [1, 1]} : vector<8x256xbf16> to vector<8x128xbf16>
    %19 = arith.extf %18 : vector<8x128xbf16> to vector<8x128xf32>
    %c0_20 = arith.constant 0 : index
    %c0_21 = arith.constant 0 : index
    %20 = vector.load %arg6[%c0_20, %c0_21] : memref<8x32xf32, #tpu.memory_space<vmem>>, vector<8x32xf32>
    %21 = arith.truncf %20 : vector<8x32xf32> to vector<8x32xbf16>
    %cst_22 = arith.constant dense<0.000000e+00> : vector<8x128xf32>
    %22 = tpu.matmul %21, %0, %cst_22 {dimension_numbers = #tpu.dot_dimension_numbers<[1], [0], [0], [1], [0, 0, 1, 1], [], []>} : vector<8x32xbf16>, vector<32x128xbf16>, vector<8x128xf32> -> vector<8x128xf32>
    %23 = arith.addf %19, %22 : vector<8x128xf32>
    %24 = vector.extract_strided_slice %17 {offsets = [0, 128], sizes = [8, 128], strides = [1, 1]} : vector<8x256xbf16> to vector<8x128xbf16>
    %25 = arith.extf %24 : vector<8x128xbf16> to vector<8x128xf32>
    %c0_23 = arith.constant 0 : index
    %c0_24 = arith.constant 0 : index
    %26 = vector.load %arg8[%c0_23, %c0_24] : memref<8x32xf32, #tpu.memory_space<vmem>>, vector<8x32xf32>
    %27 = arith.truncf %26 : vector<8x32xf32> to vector<8x32xbf16>
    %cst_25 = arith.constant dense<0.000000e+00> : vector<8x128xf32>
    %28 = tpu.matmul %27, %1, %cst_25 {dimension_numbers = #tpu.dot_dimension_numbers<[1], [0], [0], [1], [0, 0, 1, 1], [], []>} : vector<8x32xbf16>, vector<32x128xbf16>, vector<8x128xf32> -> vector<8x128xf32>
    %29 = arith.addf %25, %28 : vector<8x128xf32>
    %c0_26 = arith.constant 0 : index
    %c0_27 = arith.constant 0 : index
    %30 = vector.load %arg7[%c0_26, %c0_27] : memref<8x32xf32, #tpu.memory_space<vmem>>, vector<8x32xf32>
    %31 = vector.extract_strided_slice %23 {offsets = [0, 0], sizes = [8, 32], strides = [1, 1]} : vector<8x128xf32> to vector<8x32xf32>
    %32 = arith.negf %31 : vector<8x32xf32>
    %33 = math.exp %32 : vector<8x32xf32>
    %cst_28 = arith.constant 1.000000e+00 : f32
    %34 = vector.broadcast %cst_28 : f32 to vector<8x32xf32>
    %35 = arith.addf %34, %33 : vector<8x32xf32>
    %36 = arith.divf %34, %35 : vector<8x32xf32>
    %37 = vector.extract_strided_slice %23 {offsets = [0, 32], sizes = [8, 32], strides = [1, 1]} : vector<8x128xf32> to vector<8x32xf32>
    %38 = arith.negf %37 : vector<8x32xf32>
    %39 = math.exp %38 : vector<8x32xf32>
    %cst_29 = arith.constant 1.000000e+00 : f32
    %40 = vector.broadcast %cst_29 : f32 to vector<8x32xf32>
    %41 = arith.addf %40, %39 : vector<8x32xf32>
    %42 = arith.divf %40, %41 : vector<8x32xf32>
    %43 = vector.extract_strided_slice %23 {offsets = [0, 64], sizes = [8, 32], strides = [1, 1]} : vector<8x128xf32> to vector<8x32xf32>
    %44 = math.tanh %43 : vector<8x32xf32>
    %45 = vector.extract_strided_slice %23 {offsets = [0, 96], sizes = [8, 32], strides = [1, 1]} : vector<8x128xf32> to vector<8x32xf32>
    %46 = arith.negf %45 : vector<8x32xf32>
    %47 = math.exp %46 : vector<8x32xf32>
    %cst_30 = arith.constant 1.000000e+00 : f32
    %48 = vector.broadcast %cst_30 : f32 to vector<8x32xf32>
    %49 = arith.addf %48, %47 : vector<8x32xf32>
    %50 = arith.divf %48, %49 : vector<8x32xf32>
    %51 = arith.mulf %42, %30 : vector<8x32xf32>
    %52 = arith.mulf %36, %44 : vector<8x32xf32>
    %53 = arith.addf %51, %52 : vector<8x32xf32>
    %54 = math.tanh %53 : vector<8x32xf32>
    %55 = arith.mulf %50, %54 : vector<8x32xf32>
    %c0_31 = arith.constant 0 : index
    %c0_32 = arith.constant 0 : index
    %56 = vector.load %arg9[%c0_31, %c0_32] : memref<8x32xf32, #tpu.memory_space<vmem>>, vector<8x32xf32>
    %57 = vector.extract_strided_slice %29 {offsets = [0, 0], sizes = [8, 32], strides = [1, 1]} : vector<8x128xf32> to vector<8x32xf32>
    %58 = arith.negf %57 : vector<8x32xf32>
    %59 = math.exp %58 : vector<8x32xf32>
    %cst_33 = arith.constant 1.000000e+00 : f32
    %60 = vector.broadcast %cst_33 : f32 to vector<8x32xf32>
    %61 = arith.addf %60, %59 : vector<8x32xf32>
    %62 = arith.divf %60, %61 : vector<8x32xf32>
    %63 = vector.extract_strided_slice %29 {offsets = [0, 32], sizes = [8, 32], strides = [1, 1]} : vector<8x128xf32> to vector<8x32xf32>
    %64 = arith.negf %63 : vector<8x32xf32>
    %65 = math.exp %64 : vector<8x32xf32>
    %cst_34 = arith.constant 1.000000e+00 : f32
    %66 = vector.broadcast %cst_34 : f32 to vector<8x32xf32>
    %67 = arith.addf %66, %65 : vector<8x32xf32>
    %68 = arith.divf %66, %67 : vector<8x32xf32>
    %69 = vector.extract_strided_slice %29 {offsets = [0, 64], sizes = [8, 32], strides = [1, 1]} : vector<8x128xf32> to vector<8x32xf32>
    %70 = math.tanh %69 : vector<8x32xf32>
    %71 = vector.extract_strided_slice %29 {offsets = [0, 96], sizes = [8, 32], strides = [1, 1]} : vector<8x128xf32> to vector<8x32xf32>
    %72 = arith.negf %71 : vector<8x32xf32>
    %73 = math.exp %72 : vector<8x32xf32>
    %cst_35 = arith.constant 1.000000e+00 : f32
    %74 = vector.broadcast %cst_35 : f32 to vector<8x32xf32>
    %75 = arith.addf %74, %73 : vector<8x32xf32>
    %76 = arith.divf %74, %75 : vector<8x32xf32>
    %77 = arith.mulf %68, %56 : vector<8x32xf32>
    %78 = arith.mulf %62, %70 : vector<8x32xf32>
    %79 = arith.addf %77, %78 : vector<8x32xf32>
    %80 = math.tanh %79 : vector<8x32xf32>
    %81 = arith.mulf %76, %80 : vector<8x32xf32>
    %82 = vector.broadcast %c0_i32 : i32 to vector<8x1xi32>
    %83 = arith.cmpi slt, %82, %2 : vector<8x1xi32>
    %84 = vector.broadcast %11 : i32 to vector<8x1xi32>
    %85 = arith.cmpi slt, %84, %2 : vector<8x1xi32>
    %c0_36 = arith.constant 0 : index
    %c0_37 = arith.constant 0 : index
    %86 = vector.load %arg6[%c0_36, %c0_37] : memref<8x32xf32, #tpu.memory_space<vmem>>, vector<8x32xf32>
    %87 = vector.shape_cast %83 : vector<8x1xi1> to vector<8x1xi1>
    %88 = vector.broadcast %87 : vector<8x1xi1> to vector<8x32xi1>
    %89 = arith.select %88, %55, %86 : vector<8x32xi1>, vector<8x32xf32>
    %c0_38 = arith.constant 0 : index
    %c0_39 = arith.constant 0 : index
    %90 = vector.load %arg6[%c0_38, %c0_39] : memref<8x32xf32, #tpu.memory_space<vmem>>, vector<8x32xf32>
    tpu.vector_store %arg6[%c0_38, %c0_39], %89 {strides = array<i32>} : memref<8x32xf32, #tpu.memory_space<vmem>>, vector<8x32xf32>,
    %c0_40 = arith.constant 0 : index
    %c0_41 = arith.constant 0 : index
    %91 = vector.load %arg7[%c0_40, %c0_41] : memref<8x32xf32, #tpu.memory_space<vmem>>, vector<8x32xf32>
    %92 = vector.shape_cast %83 : vector<8x1xi1> to vector<8x1xi1>
    %93 = vector.broadcast %92 : vector<8x1xi1> to vector<8x32xi1>
    %94 = arith.select %93, %53, %91 : vector<8x32xi1>, vector<8x32xf32>
    %c0_42 = arith.constant 0 : index
    %c0_43 = arith.constant 0 : index
    %95 = vector.load %arg7[%c0_42, %c0_43] : memref<8x32xf32, #tpu.memory_space<vmem>>, vector<8x32xf32>
    tpu.vector_store %arg7[%c0_42, %c0_43], %94 {strides = array<i32>} : memref<8x32xf32, #tpu.memory_space<vmem>>, vector<8x32xf32>,
    %c0_44 = arith.constant 0 : index
    %c0_45 = arith.constant 0 : index
    %96 = vector.load %arg8[%c0_44, %c0_45] : memref<8x32xf32, #tpu.memory_space<vmem>>, vector<8x32xf32>
    %97 = vector.shape_cast %85 : vector<8x1xi1> to vector<8x1xi1>
    %98 = vector.broadcast %97 : vector<8x1xi1> to vector<8x32xi1>
    %99 = arith.select %98, %81, %96 : vector<8x32xi1>, vector<8x32xf32>
    %c0_46 = arith.constant 0 : index
    %c0_47 = arith.constant 0 : index
    %100 = vector.load %arg8[%c0_46, %c0_47] : memref<8x32xf32, #tpu.memory_space<vmem>>, vector<8x32xf32>
    tpu.vector_store %arg8[%c0_46, %c0_47], %99 {strides = array<i32>} : memref<8x32xf32, #tpu.memory_space<vmem>>, vector<8x32xf32>,
    %c0_48 = arith.constant 0 : index
    %c0_49 = arith.constant 0 : index
    %101 = vector.load %arg9[%c0_48, %c0_49] : memref<8x32xf32, #tpu.memory_space<vmem>>, vector<8x32xf32>
    %102 = vector.shape_cast %85 : vector<8x1xi1> to vector<8x1xi1>
    %103 = vector.broadcast %102 : vector<8x1xi1> to vector<8x32xi1>
    %104 = arith.select %103, %79, %101 : vector<8x32xi1>, vector<8x32xf32>
    %c0_50 = arith.constant 0 : index
    %c0_51 = arith.constant 0 : index
    %105 = vector.load %arg9[%c0_50, %c0_51] : memref<8x32xf32, #tpu.memory_space<vmem>>, vector<8x32xf32>
    tpu.vector_store %arg9[%c0_50, %c0_51], %104 {strides = array<i32>} : memref<8x32xf32, #tpu.memory_space<vmem>>, vector<8x32xf32>,
    %cst_52 = arith.constant 0.000000e+00 : f32
    %106 = vector.shape_cast %83 : vector<8x1xi1> to vector<8x1xi1>
    %107 = vector.broadcast %106 : vector<8x1xi1> to vector<8x32xi1>
    %108 = vector.broadcast %cst_52 : f32 to vector<8x32xf32>
    %109 = arith.select %107, %55, %108 : vector<8x32xi1>, vector<8x32xf32>
    %110 = arith.index_cast %c0_i32 : i32 to index
    %c0_53 = arith.constant 0 : index
    %c0_54 = arith.constant 0 : index
    %111 = vector.load %arg5[%110, %c0_53, %c0_54] : memref<8x8x64xf32, #tpu.memory_space<vmem>>, vector<1x8x32xf32>
    %112 = vector.shape_cast %111 : vector<1x8x32xf32> to vector<8x32xf32>
    %113 = vector.shape_cast %109 : vector<8x32xf32> to vector<1x8x32xf32>
    tpu.vector_store %arg5[%110, %c0_53, %c0_54], %113 {strides = array<i32>} : memref<8x8x64xf32, #tpu.memory_space<vmem>>, vector<1x8x32xf32>,
    %cst_55 = arith.constant 0.000000e+00 : f32
    %114 = vector.shape_cast %85 : vector<8x1xi1> to vector<8x1xi1>
    %115 = vector.broadcast %114 : vector<8x1xi1> to vector<8x32xi1>
    %116 = vector.broadcast %cst_55 : f32 to vector<8x32xf32>
    %117 = arith.select %115, %81, %116 : vector<8x32xi1>, vector<8x32xf32>
    %118 = arith.index_cast %11 : i32 to index
    %c0_56 = arith.constant 0 : index
    %c32 = arith.constant 32 : index
    %119 = vector.load %arg5[%118, %c0_56, %c32] : memref<8x8x64xf32, #tpu.memory_space<vmem>>, vector<1x8x32xf32>
    %120 = vector.shape_cast %119 : vector<1x8x32xf32> to vector<8x32xf32>
    %121 = vector.shape_cast %117 : vector<8x32xf32> to vector<1x8x32xf32>
    tpu.vector_store %arg5[%118, %c0_56, %c32], %121 {strides = array<i32>} : memref<8x8x64xf32, #tpu.memory_space<vmem>>, vector<1x8x32xf32>,
    %c1_i32 = arith.constant 1 : i32
    %c7_i32_57 = arith.constant 7 : i32
    %122 = arith.subi %c7_i32_57, %c1_i32 : i32
    %123 = arith.index_cast %c1_i32 : i32 to index
    %c0_58 = arith.constant 0 : index
    %c0_59 = arith.constant 0 : index
    %124 = vector.load %arg1[%123, %c0_58, %c0_59] : memref<8x8x256xbf16, #tpu.memory_space<vmem>>, vector<1x8x256xbf16>
    %125 = vector.shape_cast %124 : vector<1x8x256xbf16> to vector<8x256xbf16>
    %126 = arith.index_cast %122 : i32 to index
    %c0_60 = arith.constant 0 : index
    %c0_61 = arith.constant 0 : index
    %127 = vector.load %arg1[%126, %c0_60, %c0_61] : memref<8x8x256xbf16, #tpu.memory_space<vmem>>, vector<1x8x256xbf16>
    %128 = vector.shape_cast %127 : vector<1x8x256xbf16> to vector<8x256xbf16>
    %129 = vector.extract_strided_slice %125 {offsets = [0, 0], sizes = [8, 128], strides = [1, 1]} : vector<8x256xbf16> to vector<8x128xbf16>
    %130 = arith.extf %129 : vector<8x128xbf16> to vector<8x128xf32>
    %c0_62 = arith.constant 0 : index
    %c0_63 = arith.constant 0 : index
    %131 = vector.load %arg6[%c0_62, %c0_63] : memref<8x32xf32, #tpu.memory_space<vmem>>, vector<8x32xf32>
    %132 = arith.truncf %131 : vector<8x32xf32> to vector<8x32xbf16>
    %cst_64 = arith.constant dense<0.000000e+00> : vector<8x128xf32>
    %133 = tpu.matmul %132, %0, %cst_64 {dimension_numbers = #tpu.dot_dimension_numbers<[1], [0], [0], [1], [0, 0, 1, 1], [], []>} : vector<8x32xbf16>, vector<32x128xbf16>, vector<8x128xf32> -> vector<8x128xf32>
    %134 = arith.addf %130, %133 : vector<8x128xf32>
    %135 = vector.extract_strided_slice %128 {offsets = [0, 128], sizes = [8, 128], strides = [1, 1]} : vector<8x256xbf16> to vector<8x128xbf16>
    %136 = arith.extf %135 : vector<8x128xbf16> to vector<8x128xf32>
    %c0_65 = arith.constant 0 : index
    %c0_66 = arith.constant 0 : index
    %137 = vector.load %arg8[%c0_65, %c0_66] : memref<8x32xf32, #tpu.memory_space<vmem>>, vector<8x32xf32>
    %138 = arith.truncf %137 : vector<8x32xf32> to vector<8x32xbf16>
    %cst_67 = arith.constant dense<0.000000e+00> : vector<8x128xf32>
    %139 = tpu.matmul %138, %1, %cst_67 {dimension_numbers = #tpu.dot_dimension_numbers<[1], [0], [0], [1], [0, 0, 1, 1], [], []>} : vector<8x32xbf16>, vector<32x128xbf16>, vector<8x128xf32> -> vector<8x128xf32>
    %140 = arith.addf %136, %139 : vector<8x128xf32>
    %c0_68 = arith.constant 0 : index
    %c0_69 = arith.constant 0 : index
    %141 = vector.load %arg7[%c0_68, %c0_69] : memref<8x32xf32, #tpu.memory_space<vmem>>, vector<8x32xf32>
    %142 = vector.extract_strided_slice %134 {offsets = [0, 0], sizes = [8, 32], strides = [1, 1]} : vector<8x128xf32> to vector<8x32xf32>
    %143 = arith.negf %142 : vector<8x32xf32>
    %144 = math.exp %143 : vector<8x32xf32>
    %cst_70 = arith.constant 1.000000e+00 : f32
    %145 = vector.broadcast %cst_70 : f32 to vector<8x32xf32>
    %146 = arith.addf %145, %144 : vector<8x32xf32>
    %147 = arith.divf %145, %146 : vector<8x32xf32>
    %148 = vector.extract_strided_slice %134 {offsets = [0, 32], sizes = [8, 32], strides = [1, 1]} : vector<8x128xf32> to vector<8x32xf32>
    %149 = arith.negf %148 : vector<8x32xf32>
    %150 = math.exp %149 : vector<8x32xf32>
    %cst_71 = arith.constant 1.000000e+00 : f32
    %151 = vector.broadcast %cst_71 : f32 to vector<8x32xf32>
    %152 = arith.addf %151, %150 : vector<8x32xf32>
    %153 = arith.divf %151, %152 : vector<8x32xf32>
    %154 = vector.extract_strided_slice %134 {offsets = [0, 64], sizes = [8, 32], strides = [1, 1]} : vector<8x128xf32> to vector<8x32xf32>
    %155 = math.tanh %154 : vector<8x32xf32>
    %156 = vector.extract_strided_slice %134 {offsets = [0, 96], sizes = [8, 32], strides = [1, 1]} : vector<8x128xf32> to vector<8x32xf32>
    %157 = arith.negf %156 : vector<8x32xf32>
    %158 = math.exp %157 : vector<8x32xf32>
    %cst_72 = arith.constant 1.000000e+00 : f32
    %159 = vector.broadcast %cst_72 : f32 to vector<8x32xf32>
    %160 = arith.addf %159, %158 : vector<8x32xf32>
    %161 = arith.divf %159, %160 : vector<8x32xf32>
    %162 = arith.mulf %153, %141 : vector<8x32xf32>
    %163 = arith.mulf %147, %155 : vector<8x32xf32>
    %164 = arith.addf %162, %163 : vector<8x32xf32>
    %165 = math.tanh %164 : vector<8x32xf32>
    %166 = arith.mulf %161, %165 : vector<8x32xf32>
    %c0_73 = arith.constant 0 : index
    %c0_74 = arith.constant 0 : index
    %167 = vector.load %arg9[%c0_73, %c0_74] : memref<8x32xf32, #tpu.memory_space<vmem>>, vector<8x32xf32>
    %168 = vector.extract_strided_slice %140 {offsets = [0, 0], sizes = [8, 32], strides = [1, 1]} : vector<8x128xf32> to vector<8x32xf32>
    %169 = arith.negf %168 : vector<8x32xf32>
    %170 = math.exp %169 : vector<8x32xf32>
    %cst_75 = arith.constant 1.000000e+00 : f32
    %171 = vector.broadcast %cst_75 : f32 to vector<8x32xf32>
    %172 = arith.addf %171, %170 : vector<8x32xf32>
    %173 = arith.divf %171, %172 : vector<8x32xf32>
    %174 = vector.extract_strided_slice %140 {offsets = [0, 32], sizes = [8, 32], strides = [1, 1]} : vector<8x128xf32> to vector<8x32xf32>
    %175 = arith.negf %174 : vector<8x32xf32>
    %176 = math.exp %175 : vector<8x32xf32>
    %cst_76 = arith.constant 1.000000e+00 : f32
    %177 = vector.broadcast %cst_76 : f32 to vector<8x32xf32>
    %178 = arith.addf %177, %176 : vector<8x32xf32>
    %179 = arith.divf %177, %178 : vector<8x32xf32>
    %180 = vector.extract_strided_slice %140 {offsets = [0, 64], sizes = [8, 32], strides = [1, 1]} : vector<8x128xf32> to vector<8x32xf32>
    %181 = math.tanh %180 : vector<8x32xf32>
    %182 = vector.extract_strided_slice %140 {offsets = [0, 96], sizes = [8, 32], strides = [1, 1]} : vector<8x128xf32> to vector<8x32xf32>
    %183 = arith.negf %182 : vector<8x32xf32>
    %184 = math.exp %183 : vector<8x32xf32>
    %cst_77 = arith.constant 1.000000e+00 : f32
    %185 = vector.broadcast %cst_77 : f32 to vector<8x32xf32>
    %186 = arith.addf %185, %184 : vector<8x32xf32>
    %187 = arith.divf %185, %186 : vector<8x32xf32>
    %188 = arith.mulf %179, %167 : vector<8x32xf32>
    %189 = arith.mulf %173, %181 : vector<8x32xf32>
    %190 = arith.addf %188, %189 : vector<8x32xf32>
    %191 = math.tanh %190 : vector<8x32xf32>
    %192 = arith.mulf %187, %191 : vector<8x32xf32>
    %193 = vector.broadcast %c1_i32 : i32 to vector<8x1xi32>
    %194 = arith.cmpi slt, %193, %2 : vector<8x1xi32>
    %195 = vector.broadcast %122 : i32 to vector<8x1xi32>
    %196 = arith.cmpi slt, %195, %2 : vector<8x1xi32>
    %c0_78 = arith.constant 0 : index
    %c0_79 = arith.constant 0 : index
    %197 = vector.load %arg6[%c0_78, %c0_79] : memref<8x32xf32, #tpu.memory_space<vmem>>, vector<8x32xf32>
    %198 = vector.shape_cast %194 : vector<8x1xi1> to vector<8x1xi1>
    %199 = vector.broadcast %198 : vector<8x1xi1> to vector<8x32xi1>
    %200 = arith.select %199, %166, %197 : vector<8x32xi1>, vector<8x32xf32>
    %c0_80 = arith.constant 0 : index
    %c0_81 = arith.constant 0 : index
    %201 = vector.load %arg6[%c0_80, %c0_81] : memref<8x32xf32, #tpu.memory_space<vmem>>, vector<8x32xf32>
    tpu.vector_store %arg6[%c0_80, %c0_81], %200 {strides = array<i32>} : memref<8x32xf32, #tpu.memory_space<vmem>>, vector<8x32xf32>,
    %c0_82 = arith.constant 0 : index
    %c0_83 = arith.constant 0 : index
    %202 = vector.load %arg7[%c0_82, %c0_83] : memref<8x32xf32, #tpu.memory_space<vmem>>, vector<8x32xf32>
    %203 = vector.shape_cast %194 : vector<8x1xi1> to vector<8x1xi1>
    %204 = vector.broadcast %203 : vector<8x1xi1> to vector<8x32xi1>
    %205 = arith.select %204, %164, %202 : vector<8x32xi1>, vector<8x32xf32>
    %c0_84 = arith.constant 0 : index
    %c0_85 = arith.constant 0 : index
    %206 = vector.load %arg7[%c0_84, %c0_85] : memref<8x32xf32, #tpu.memory_space<vmem>>, vector<8x32xf32>
    tpu.vector_store %arg7[%c0_84, %c0_85], %205 {strides = array<i32>} : memref<8x32xf32, #tpu.memory_space<vmem>>, vector<8x32xf32>,
    %c0_86 = arith.constant 0 : index
    %c0_87 = arith.constant 0 : index
    %207 = vector.load %arg8[%c0_86, %c0_87] : memref<8x32xf32, #tpu.memory_space<vmem>>, vector<8x32xf32>
    %208 = vector.shape_cast %196 : vector<8x1xi1> to vector<8x1xi1>
    %209 = vector.broadcast %208 : vector<8x1xi1> to vector<8x32xi1>
    %210 = arith.select %209, %192, %207 : vector<8x32xi1>, vector<8x32xf32>
    %c0_88 = arith.constant 0 : index
    %c0_89 = arith.constant 0 : index
    %211 = vector.load %arg8[%c0_88, %c0_89] : memref<8x32xf32, #tpu.memory_space<vmem>>, vector<8x32xf32>
    tpu.vector_store %arg8[%c0_88, %c0_89], %210 {strides = array<i32>} : memref<8x32xf32, #tpu.memory_space<vmem>>, vector<8x32xf32>,
    %c0_90 = arith.constant 0 : index
    %c0_91 = arith.constant 0 : index
    %212 = vector.load %arg9[%c0_90, %c0_91] : memref<8x32xf32, #tpu.memory_space<vmem>>, vector<8x32xf32>
    %213 = vector.shape_cast %196 : vector<8x1xi1> to vector<8x1xi1>
    %214 = vector.broadcast %213 : vector<8x1xi1> to vector<8x32xi1>
    %215 = arith.select %214, %190, %212 : vector<8x32xi1>, vector<8x32xf32>
    %c0_92 = arith.constant 0 : index
    %c0_93 = arith.constant 0 : index
    %216 = vector.load %arg9[%c0_92, %c0_93] : memref<8x32xf32, #tpu.memory_space<vmem>>, vector<8x32xf32>
    tpu.vector_store %arg9[%c0_92, %c0_93], %215 {strides = array<i32>} : memref<8x32xf32, #tpu.memory_space<vmem>>, vector<8x32xf32>,
    %cst_94 = arith.constant 0.000000e+00 : f32
    %217 = vector.shape_cast %194 : vector<8x1xi1> to vector<8x1xi1>
    %218 = vector.broadcast %217 : vector<8x1xi1> to vector<8x32xi1>
    %219 = vector.broadcast %cst_94 : f32 to vector<8x32xf32>
    %220 = arith.select %218, %166, %219 : vector<8x32xi1>, vector<8x32xf32>
    %221 = arith.index_cast %c1_i32 : i32 to index
    %c0_95 = arith.constant 0 : index
    %c0_96 = arith.constant 0 : index
    %222 = vector.load %arg5[%221, %c0_95, %c0_96] : memref<8x8x64xf32, #tpu.memory_space<vmem>>, vector<1x8x32xf32>
    %223 = vector.shape_cast %222 : vector<1x8x32xf32> to vector<8x32xf32>
    %224 = vector.shape_cast %220 : vector<8x32xf32> to vector<1x8x32xf32>
    tpu.vector_store %arg5[%221, %c0_95, %c0_96], %224 {strides = array<i32>} : memref<8x8x64xf32, #tpu.memory_space<vmem>>, vector<1x8x32xf32>,
    %cst_97 = arith.constant 0.000000e+00 : f32
    %225 = vector.shape_cast %196 : vector<8x1xi1> to vector<8x1xi1>
    %226 = vector.broadcast %225 : vector<8x1xi1> to vector<8x32xi1>
    %227 = vector.broadcast %cst_97 : f32 to vector<8x32xf32>
    %228 = arith.select %226, %192, %227 : vector<8x32xi1>, vector<8x32xf32>
    %229 = arith.index_cast %122 : i32 to index
    %c0_98 = arith.constant 0 : index
    %c32_99 = arith.constant 32 : index
    %230 = vector.load %arg5[%229, %c0_98, %c32_99] : memref<8x8x64xf32, #tpu.memory_space<vmem>>, vector<1x8x32xf32>
    %231 = vector.shape_cast %230 : vector<1x8x32xf32> to vector<8x32xf32>
    %232 = vector.shape_cast %228 : vector<8x32xf32> to vector<1x8x32xf32>
    tpu.vector_store %arg5[%229, %c0_98, %c32_99], %232 {strides = array<i32>} : memref<8x8x64xf32, #tpu.memory_space<vmem>>, vector<1x8x32xf32>,
    %c2_i32 = arith.constant 2 : i32
    %c7_i32_100 = arith.constant 7 : i32
    %233 = arith.subi %c7_i32_100, %c2_i32 : i32
    %234 = arith.index_cast %c2_i32 : i32 to index
    %c0_101 = arith.constant 0 : index
    %c0_102 = arith.constant 0 : index
    %235 = vector.load %arg1[%234, %c0_101, %c0_102] : memref<8x8x256xbf16, #tpu.memory_space<vmem>>, vector<1x8x256xbf16>
    %236 = vector.shape_cast %235 : vector<1x8x256xbf16> to vector<8x256xbf16>
    %237 = arith.index_cast %233 : i32 to index
    %c0_103 = arith.constant 0 : index
    %c0_104 = arith.constant 0 : index
    %238 = vector.load %arg1[%237, %c0_103, %c0_104] : memref<8x8x256xbf16, #tpu.memory_space<vmem>>, vector<1x8x256xbf16>
    %239 = vector.shape_cast %238 : vector<1x8x256xbf16> to vector<8x256xbf16>
    %240 = vector.extract_strided_slice %236 {offsets = [0, 0], sizes = [8, 128], strides = [1, 1]} : vector<8x256xbf16> to vector<8x128xbf16>
    %241 = arith.extf %240 : vector<8x128xbf16> to vector<8x128xf32>
    %c0_105 = arith.constant 0 : index
    %c0_106 = arith.constant 0 : index
    %242 = vector.load %arg6[%c0_105, %c0_106] : memref<8x32xf32, #tpu.memory_space<vmem>>, vector<8x32xf32>
    %243 = arith.truncf %242 : vector<8x32xf32> to vector<8x32xbf16>
    %cst_107 = arith.constant dense<0.000000e+00> : vector<8x128xf32>
    %244 = tpu.matmul %243, %0, %cst_107 {dimension_numbers = #tpu.dot_dimension_numbers<[1], [0], [0], [1], [0, 0, 1, 1], [], []>} : vector<8x32xbf16>, vector<32x128xbf16>, vector<8x128xf32> -> vector<8x128xf32>
    %245 = arith.addf %241, %244 : vector<8x128xf32>
    %246 = vector.extract_strided_slice %239 {offsets = [0, 128], sizes = [8, 128], strides = [1, 1]} : vector<8x256xbf16> to vector<8x128xbf16>
    %247 = arith.extf %246 : vector<8x128xbf16> to vector<8x128xf32>
    %c0_108 = arith.constant 0 : index
    %c0_109 = arith.constant 0 : index
    %248 = vector.load %arg8[%c0_108, %c0_109] : memref<8x32xf32, #tpu.memory_space<vmem>>, vector<8x32xf32>
    %249 = arith.truncf %248 : vector<8x32xf32> to vector<8x32xbf16>
    %cst_110 = arith.constant dense<0.000000e+00> : vector<8x128xf32>
    %250 = tpu.matmul %249, %1, %cst_110 {dimension_numbers = #tpu.dot_dimension_numbers<[1], [0], [0], [1], [0, 0, 1, 1], [], []>} : vector<8x32xbf16>, vector<32x128xbf16>, vector<8x128xf32> -> vector<8x128xf32>
    %251 = arith.addf %247, %250 : vector<8x128xf32>
    %c0_111 = arith.constant 0 : index
    %c0_112 = arith.constant 0 : index
    %252 = vector.load %arg7[%c0_111, %c0_112] : memref<8x32xf32, #tpu.memory_space<vmem>>, vector<8x32xf32>
    %253 = vector.extract_strided_slice %245 {offsets = [0, 0], sizes = [8, 32], strides = [1, 1]} : vector<8x128xf32> to vector<8x32xf32>
    %254 = arith.negf %253 : vector<8x32xf32>
    %255 = math.exp %254 : vector<8x32xf32>
    %cst_113 = arith.constant 1.000000e+00 : f32
    %256 = vector.broadcast %cst_113 : f32 to vector<8x32xf32>
    %257 = arith.addf %256, %255 : vector<8x32xf32>
    %258 = arith.divf %256, %257 : vector<8x32xf32>
    %259 = vector.extract_strided_slice %245 {offsets = [0, 32], sizes = [8, 32], strides = [1, 1]} : vector<8x128xf32> to vector<8x32xf32>
    %260 = arith.negf %259 : vector<8x32xf32>
    %261 = math.exp %260 : vector<8x32xf32>
    %cst_114 = arith.constant 1.000000e+00 : f32
    %262 = vector.broadcast %cst_114 : f32 to vector<8x32xf32>
    %263 = arith.addf %262, %261 : vector<8x32xf32>
    %264 = arith.divf %262, %263 : vector<8x32xf32>
    %265 = vector.extract_strided_slice %245 {offsets = [0, 64], sizes = [8, 32], strides = [1, 1]} : vector<8x128xf32> to vector<8x32xf32>
    %266 = math.tanh %265 : vector<8x32xf32>
    %267 = vector.extract_strided_slice %245 {offsets = [0, 96], sizes = [8, 32], strides = [1, 1]} : vector<8x128xf32> to vector<8x32xf32>
    %268 = arith.negf %267 : vector<8x32xf32>
    %269 = math.exp %268 : vector<8x32xf32>
    %cst_115 = arith.constant 1.000000e+00 : f32
    %270 = vector.broadcast %cst_115 : f32 to vector<8x32xf32>
    %271 = arith.addf %270, %269 : vector<8x32xf32>
    %272 = arith.divf %270, %271 : vector<8x32xf32>
    %273 = arith.mulf %264, %252 : vector<8x32xf32>
    %274 = arith.mulf %258, %266 : vector<8x32xf32>
    %275 = arith.addf %273, %274 : vector<8x32xf32>
    %276 = math.tanh %275 : vector<8x32xf32>
    %277 = arith.mulf %272, %276 : vector<8x32xf32>
    %c0_116 = arith.constant 0 : index
    %c0_117 = arith.constant 0 : index
    %278 = vector.load %arg9[%c0_116, %c0_117] : memref<8x32xf32, #tpu.memory_space<vmem>>, vector<8x32xf32>
    %279 = vector.extract_strided_slice %251 {offsets = [0, 0], sizes = [8, 32], strides = [1, 1]} : vector<8x128xf32> to vector<8x32xf32>
    %280 = arith.negf %279 : vector<8x32xf32>
    %281 = math.exp %280 : vector<8x32xf32>
    %cst_118 = arith.constant 1.000000e+00 : f32
    %282 = vector.broadcast %cst_118 : f32 to vector<8x32xf32>
    %283 = arith.addf %282, %281 : vector<8x32xf32>
    %284 = arith.divf %282, %283 : vector<8x32xf32>
    %285 = vector.extract_strided_slice %251 {offsets = [0, 32], sizes = [8, 32], strides = [1, 1]} : vector<8x128xf32> to vector<8x32xf32>
    %286 = arith.negf %285 : vector<8x32xf32>
    %287 = math.exp %286 : vector<8x32xf32>
    %cst_119 = arith.constant 1.000000e+00 : f32
    %288 = vector.broadcast %cst_119 : f32 to vector<8x32xf32>
    %289 = arith.addf %288, %287 : vector<8x32xf32>
    %290 = arith.divf %288, %289 : vector<8x32xf32>
    %291 = vector.extract_strided_slice %251 {offsets = [0, 64], sizes = [8, 32], strides = [1, 1]} : vector<8x128xf32> to vector<8x32xf32>
    %292 = math.tanh %291 : vector<8x32xf32>
    %293 = vector.extract_strided_slice %251 {offsets = [0, 96], sizes = [8, 32], strides = [1, 1]} : vector<8x128xf32> to vector<8x32xf32>
    %294 = arith.negf %293 : vector<8x32xf32>
    %295 = math.exp %294 : vector<8x32xf32>
    %cst_120 = arith.constant 1.000000e+00 : f32
    %296 = vector.broadcast %cst_120 : f32 to vector<8x32xf32>
    %297 = arith.addf %296, %295 : vector<8x32xf32>
    %298 = arith.divf %296, %297 : vector<8x32xf32>
    %299 = arith.mulf %290, %278 : vector<8x32xf32>
    %300 = arith.mulf %284, %292 : vector<8x32xf32>
    %301 = arith.addf %299, %300 : vector<8x32xf32>
    %302 = math.tanh %301 : vector<8x32xf32>
    %303 = arith.mulf %298, %302 : vector<8x32xf32>
    %304 = vector.broadcast %c2_i32 : i32 to vector<8x1xi32>
    %305 = arith.cmpi slt, %304, %2 : vector<8x1xi32>
    %306 = vector.broadcast %233 : i32 to vector<8x1xi32>
    %307 = arith.cmpi slt, %306, %2 : vector<8x1xi32>
    %c0_121 = arith.constant 0 : index
    %c0_122 = arith.constant 0 : index
    %308 = vector.load %arg6[%c0_121, %c0_122] : memref<8x32xf32, #tpu.memory_space<vmem>>, vector<8x32xf32>
    %309 = vector.shape_cast %305 : vector<8x1xi1> to vector<8x1xi1>
    %310 = vector.broadcast %309 : vector<8x1xi1> to vector<8x32xi1>
    %311 = arith.select %310, %277, %308 : vector<8x32xi1>, vector<8x32xf32>
    %c0_123 = arith.constant 0 : index
    %c0_124 = arith.constant 0 : index
    %312 = vector.load %arg6[%c0_123, %c0_124] : memref<8x32xf32, #tpu.memory_space<vmem>>, vector<8x32xf32>
    tpu.vector_store %arg6[%c0_123, %c0_124], %311 {strides = array<i32>} : memref<8x32xf32, #tpu.memory_space<vmem>>, vector<8x32xf32>,
    %c0_125 = arith.constant 0 : index
    %c0_126 = arith.constant 0 : index
    %313 = vector.load %arg7[%c0_125, %c0_126] : memref<8x32xf32, #tpu.memory_space<vmem>>, vector<8x32xf32>
    %314 = vector.shape_cast %305 : vector<8x1xi1> to vector<8x1xi1>
    %315 = vector.broadcast %314 : vector<8x1xi1> to vector<8x32xi1>
    %316 = arith.select %315, %275, %313 : vector<8x32xi1>, vector<8x32xf32>
    %c0_127 = arith.constant 0 : index
    %c0_128 = arith.constant 0 : index
    %317 = vector.load %arg7[%c0_127, %c0_128] : memref<8x32xf32, #tpu.memory_space<vmem>>, vector<8x32xf32>
    tpu.vector_store %arg7[%c0_127, %c0_128], %316 {strides = array<i32>} : memref<8x32xf32, #tpu.memory_space<vmem>>, vector<8x32xf32>,
    %c0_129 = arith.constant 0 : index
    %c0_130 = arith.constant 0 : index
    %318 = vector.load %arg8[%c0_129, %c0_130] : memref<8x32xf32, #tpu.memory_space<vmem>>, vector<8x32xf32>
    %319 = vector.shape_cast %307 : vector<8x1xi1> to vector<8x1xi1>
    %320 = vector.broadcast %319 : vector<8x1xi1> to vector<8x32xi1>
    %321 = arith.select %320, %303, %318 : vector<8x32xi1>, vector<8x32xf32>
    %c0_131 = arith.constant 0 : index
    %c0_132 = arith.constant 0 : index
    %322 = vector.load %arg8[%c0_131, %c0_132] : memref<8x32xf32, #tpu.memory_space<vmem>>, vector<8x32xf32>
    tpu.vector_store %arg8[%c0_131, %c0_132], %321 {strides = array<i32>} : memref<8x32xf32, #tpu.memory_space<vmem>>, vector<8x32xf32>,
    %c0_133 = arith.constant 0 : index
    %c0_134 = arith.constant 0 : index
    %323 = vector.load %arg9[%c0_133, %c0_134] : memref<8x32xf32, #tpu.memory_space<vmem>>, vector<8x32xf32>
    %324 = vector.shape_cast %307 : vector<8x1xi1> to vector<8x1xi1>
    %325 = vector.broadcast %324 : vector<8x1xi1> to vector<8x32xi1>
    %326 = arith.select %325, %301, %323 : vector<8x32xi1>, vector<8x32xf32>
    %c0_135 = arith.constant 0 : index
    %c0_136 = arith.constant 0 : index
    %327 = vector.load %arg9[%c0_135, %c0_136] : memref<8x32xf32, #tpu.memory_space<vmem>>, vector<8x32xf32>
    tpu.vector_store %arg9[%c0_135, %c0_136], %326 {strides = array<i32>} : memref<8x32xf32, #tpu.memory_space<vmem>>, vector<8x32xf32>,
    %cst_137 = arith.constant 0.000000e+00 : f32
    %328 = vector.shape_cast %305 : vector<8x1xi1> to vector<8x1xi1>
    %329 = vector.broadcast %328 : vector<8x1xi1> to vector<8x32xi1>
    %330 = vector.broadcast %cst_137 : f32 to vector<8x32xf32>
    %331 = arith.select %329, %277, %330 : vector<8x32xi1>, vector<8x32xf32>
    %332 = arith.index_cast %c2_i32 : i32 to index
    %c0_138 = arith.constant 0 : index
    %c0_139 = arith.constant 0 : index
    %333 = vector.load %arg5[%332, %c0_138, %c0_139] : memref<8x8x64xf32, #tpu.memory_space<vmem>>, vector<1x8x32xf32>
    %334 = vector.shape_cast %333 : vector<1x8x32xf32> to vector<8x32xf32>
    %335 = vector.shape_cast %331 : vector<8x32xf32> to vector<1x8x32xf32>
    tpu.vector_store %arg5[%332, %c0_138, %c0_139], %335 {strides = array<i32>} : memref<8x8x64xf32, #tpu.memory_space<vmem>>, vector<1x8x32xf32>,
    %cst_140 = arith.constant 0.000000e+00 : f32
    %336 = vector.shape_cast %307 : vector<8x1xi1> to vector<8x1xi1>
    %337 = vector.broadcast %336 : vector<8x1xi1> to vector<8x32xi1>
    %338 = vector.broadcast %cst_140 : f32 to vector<8x32xf32>
    %339 = arith.select %337, %303, %338 : vector<8x32xi1>, vector<8x32xf32>
    %340 = arith.index_cast %233 : i32 to index
    %c0_141 = arith.constant 0 : index
    %c32_142 = arith.constant 32 : index
    %341 = vector.load %arg5[%340, %c0_141, %c32_142] : memref<8x8x64xf32, #tpu.memory_space<vmem>>, vector<1x8x32xf32>
    %342 = vector.shape_cast %341 : vector<1x8x32xf32> to vector<8x32xf32>
    %343 = vector.shape_cast %339 : vector<8x32xf32> to vector<1x8x32xf32>
    tpu.vector_store %arg5[%340, %c0_141, %c32_142], %343 {strides = array<i32>} : memref<8x8x64xf32, #tpu.memory_space<vmem>>, vector<1x8x32xf32>,
    %c3_i32 = arith.constant 3 : i32
    %c7_i32_143 = arith.constant 7 : i32
    %344 = arith.subi %c7_i32_143, %c3_i32 : i32
    %345 = arith.index_cast %c3_i32 : i32 to index
    %c0_144 = arith.constant 0 : index
    %c0_145 = arith.constant 0 : index
    %346 = vector.load %arg1[%345, %c0_144, %c0_145] : memref<8x8x256xbf16, #tpu.memory_space<vmem>>, vector<1x8x256xbf16>
    %347 = vector.shape_cast %346 : vector<1x8x256xbf16> to vector<8x256xbf16>
    %348 = arith.index_cast %344 : i32 to index
    %c0_146 = arith.constant 0 : index
    %c0_147 = arith.constant 0 : index
    %349 = vector.load %arg1[%348, %c0_146, %c0_147] : memref<8x8x256xbf16, #tpu.memory_space<vmem>>, vector<1x8x256xbf16>
    %350 = vector.shape_cast %349 : vector<1x8x256xbf16> to vector<8x256xbf16>
    %351 = vector.extract_strided_slice %347 {offsets = [0, 0], sizes = [8, 128], strides = [1, 1]} : vector<8x256xbf16> to vector<8x128xbf16>
    %352 = arith.extf %351 : vector<8x128xbf16> to vector<8x128xf32>
    %c0_148 = arith.constant 0 : index
    %c0_149 = arith.constant 0 : index
    %353 = vector.load %arg6[%c0_148, %c0_149] : memref<8x32xf32, #tpu.memory_space<vmem>>, vector<8x32xf32>
    %354 = arith.truncf %353 : vector<8x32xf32> to vector<8x32xbf16>
    %cst_150 = arith.constant dense<0.000000e+00> : vector<8x128xf32>
    %355 = tpu.matmul %354, %0, %cst_150 {dimension_numbers = #tpu.dot_dimension_numbers<[1], [0], [0], [1], [0, 0, 1, 1], [], []>} : vector<8x32xbf16>, vector<32x128xbf16>, vector<8x128xf32> -> vector<8x128xf32>
    %356 = arith.addf %352, %355 : vector<8x128xf32>
    %357 = vector.extract_strided_slice %350 {offsets = [0, 128], sizes = [8, 128], strides = [1, 1]} : vector<8x256xbf16> to vector<8x128xbf16>
    %358 = arith.extf %357 : vector<8x128xbf16> to vector<8x128xf32>
    %c0_151 = arith.constant 0 : index
    %c0_152 = arith.constant 0 : index
    %359 = vector.load %arg8[%c0_151, %c0_152] : memref<8x32xf32, #tpu.memory_space<vmem>>, vector<8x32xf32>
    %360 = arith.truncf %359 : vector<8x32xf32> to vector<8x32xbf16>
    %cst_153 = arith.constant dense<0.000000e+00> : vector<8x128xf32>
    %361 = tpu.matmul %360, %1, %cst_153 {dimension_numbers = #tpu.dot_dimension_numbers<[1], [0], [0], [1], [0, 0, 1, 1], [], []>} : vector<8x32xbf16>, vector<32x128xbf16>, vector<8x128xf32> -> vector<8x128xf32>
    %362 = arith.addf %358, %361 : vector<8x128xf32>
    %c0_154 = arith.constant 0 : index
    %c0_155 = arith.constant 0 : index
    %363 = vector.load %arg7[%c0_154, %c0_155] : memref<8x32xf32, #tpu.memory_space<vmem>>, vector<8x32xf32>
    %364 = vector.extract_strided_slice %356 {offsets = [0, 0], sizes = [8, 32], strides = [1, 1]} : vector<8x128xf32> to vector<8x32xf32>
    %365 = arith.negf %364 : vector<8x32xf32>
    %366 = math.exp %365 : vector<8x32xf32>
    %cst_156 = arith.constant 1.000000e+00 : f32
    %367 = vector.broadcast %cst_156 : f32 to vector<8x32xf32>
    %368 = arith.addf %367, %366 : vector<8x32xf32>
    %369 = arith.divf %367, %368 : vector<8x32xf32>
    %370 = vector.extract_strided_slice %356 {offsets = [0, 32], sizes = [8, 32], strides = [1, 1]} : vector<8x128xf32> to vector<8x32xf32>
    %371 = arith.negf %370 : vector<8x32xf32>
    %372 = math.exp %371 : vector<8x32xf32>
    %cst_157 = arith.constant 1.000000e+00 : f32
    %373 = vector.broadcast %cst_157 : f32 to vector<8x32xf32>
    %374 = arith.addf %373, %372 : vector<8x32xf32>
    %375 = arith.divf %373, %374 : vector<8x32xf32>
    %376 = vector.extract_strided_slice %356 {offsets = [0, 64], sizes = [8, 32], strides = [1, 1]} : vector<8x128xf32> to vector<8x32xf32>
    %377 = math.tanh %376 : vector<8x32xf32>
    %378 = vector.extract_strided_slice %356 {offsets = [0, 96], sizes = [8, 32], strides = [1, 1]} : vector<8x128xf32> to vector<8x32xf32>
    %379 = arith.negf %378 : vector<8x32xf32>
    %380 = math.exp %379 : vector<8x32xf32>
    %cst_158 = arith.constant 1.000000e+00 : f32
    %381 = vector.broadcast %cst_158 : f32 to vector<8x32xf32>
    %382 = arith.addf %381, %380 : vector<8x32xf32>
    %383 = arith.divf %381, %382 : vector<8x32xf32>
    %384 = arith.mulf %375, %363 : vector<8x32xf32>
    %385 = arith.mulf %369, %377 : vector<8x32xf32>
    %386 = arith.addf %384, %385 : vector<8x32xf32>
    %387 = math.tanh %386 : vector<8x32xf32>
    %388 = arith.mulf %383, %387 : vector<8x32xf32>
    %c0_159 = arith.constant 0 : index
    %c0_160 = arith.constant 0 : index
    %389 = vector.load %arg9[%c0_159, %c0_160] : memref<8x32xf32, #tpu.memory_space<vmem>>, vector<8x32xf32>
    %390 = vector.extract_strided_slice %362 {offsets = [0, 0], sizes = [8, 32], strides = [1, 1]} : vector<8x128xf32> to vector<8x32xf32>
    %391 = arith.negf %390 : vector<8x32xf32>
    %392 = math.exp %391 : vector<8x32xf32>
    %cst_161 = arith.constant 1.000000e+00 : f32
    %393 = vector.broadcast %cst_161 : f32 to vector<8x32xf32>
    %394 = arith.addf %393, %392 : vector<8x32xf32>
    %395 = arith.divf %393, %394 : vector<8x32xf32>
    %396 = vector.extract_strided_slice %362 {offsets = [0, 32], sizes = [8, 32], strides = [1, 1]} : vector<8x128xf32> to vector<8x32xf32>
    %397 = arith.negf %396 : vector<8x32xf32>
    %398 = math.exp %397 : vector<8x32xf32>
    %cst_162 = arith.constant 1.000000e+00 : f32
    %399 = vector.broadcast %cst_162 : f32 to vector<8x32xf32>
    %400 = arith.addf %399, %398 : vector<8x32xf32>
    %401 = arith.divf %399, %400 : vector<8x32xf32>
    %402 = vector.extract_strided_slice %362 {offsets = [0, 64], sizes = [8, 32], strides = [1, 1]} : vector<8x128xf32> to vector<8x32xf32>
    %403 = math.tanh %402 : vector<8x32xf32>
    %404 = vector.extract_strided_slice %362 {offsets = [0, 96], sizes = [8, 32], strides = [1, 1]} : vector<8x128xf32> to vector<8x32xf32>
    %405 = arith.negf %404 : vector<8x32xf32>
    %406 = math.exp %405 : vector<8x32xf32>
    %cst_163 = arith.constant 1.000000e+00 : f32
    %407 = vector.broadcast %cst_163 : f32 to vector<8x32xf32>
    %408 = arith.addf %407, %406 : vector<8x32xf32>
    %409 = arith.divf %407, %408 : vector<8x32xf32>
    %410 = arith.mulf %401, %389 : vector<8x32xf32>
    %411 = arith.mulf %395, %403 : vector<8x32xf32>
    %412 = arith.addf %410, %411 : vector<8x32xf32>
    %413 = math.tanh %412 : vector<8x32xf32>
    %414 = arith.mulf %409, %413 : vector<8x32xf32>
    %415 = vector.broadcast %c3_i32 : i32 to vector<8x1xi32>
    %416 = arith.cmpi slt, %415, %2 : vector<8x1xi32>
    %417 = vector.broadcast %344 : i32 to vector<8x1xi32>
    %418 = arith.cmpi slt, %417, %2 : vector<8x1xi32>
    %c0_164 = arith.constant 0 : index
    %c0_165 = arith.constant 0 : index
    %419 = vector.load %arg6[%c0_164, %c0_165] : memref<8x32xf32, #tpu.memory_space<vmem>>, vector<8x32xf32>
    %420 = vector.shape_cast %416 : vector<8x1xi1> to vector<8x1xi1>
    %421 = vector.broadcast %420 : vector<8x1xi1> to vector<8x32xi1>
    %422 = arith.select %421, %388, %419 : vector<8x32xi1>, vector<8x32xf32>
    %c0_166 = arith.constant 0 : index
    %c0_167 = arith.constant 0 : index
    %423 = vector.load %arg6[%c0_166, %c0_167] : memref<8x32xf32, #tpu.memory_space<vmem>>, vector<8x32xf32>
    tpu.vector_store %arg6[%c0_166, %c0_167], %422 {strides = array<i32>} : memref<8x32xf32, #tpu.memory_space<vmem>>, vector<8x32xf32>,
    %c0_168 = arith.constant 0 : index
    %c0_169 = arith.constant 0 : index
    %424 = vector.load %arg7[%c0_168, %c0_169] : memref<8x32xf32, #tpu.memory_space<vmem>>, vector<8x32xf32>
    %425 = vector.shape_cast %416 : vector<8x1xi1> to vector<8x1xi1>
    %426 = vector.broadcast %425 : vector<8x1xi1> to vector<8x32xi1>
    %427 = arith.select %426, %386, %424 : vector<8x32xi1>, vector<8x32xf32>
    %c0_170 = arith.constant 0 : index
    %c0_171 = arith.constant 0 : index
    %428 = vector.load %arg7[%c0_170, %c0_171] : memref<8x32xf32, #tpu.memory_space<vmem>>, vector<8x32xf32>
    tpu.vector_store %arg7[%c0_170, %c0_171], %427 {strides = array<i32>} : memref<8x32xf32, #tpu.memory_space<vmem>>, vector<8x32xf32>,
    %c0_172 = arith.constant 0 : index
    %c0_173 = arith.constant 0 : index
    %429 = vector.load %arg8[%c0_172, %c0_173] : memref<8x32xf32, #tpu.memory_space<vmem>>, vector<8x32xf32>
    %430 = vector.shape_cast %418 : vector<8x1xi1> to vector<8x1xi1>
    %431 = vector.broadcast %430 : vector<8x1xi1> to vector<8x32xi1>
    %432 = arith.select %431, %414, %429 : vector<8x32xi1>, vector<8x32xf32>
    %c0_174 = arith.constant 0 : index
    %c0_175 = arith.constant 0 : index
    %433 = vector.load %arg8[%c0_174, %c0_175] : memref<8x32xf32, #tpu.memory_space<vmem>>, vector<8x32xf32>
    tpu.vector_store %arg8[%c0_174, %c0_175], %432 {strides = array<i32>} : memref<8x32xf32, #tpu.memory_space<vmem>>, vector<8x32xf32>,
    %c0_176 = arith.constant 0 : index
    %c0_177 = arith.constant 0 : index
    %434 = vector.load %arg9[%c0_176, %c0_177] : memref<8x32xf32, #tpu.memory_space<vmem>>, vector<8x32xf32>
    %435 = vector.shape_cast %418 : vector<8x1xi1> to vector<8x1xi1>
    %436 = vector.broadcast %435 : vector<8x1xi1> to vector<8x32xi1>
    %437 = arith.select %436, %412, %434 : vector<8x32xi1>, vector<8x32xf32>
    %c0_178 = arith.constant 0 : index
    %c0_179 = arith.constant 0 : index
    %438 = vector.load %arg9[%c0_178, %c0_179] : memref<8x32xf32, #tpu.memory_space<vmem>>, vector<8x32xf32>
    tpu.vector_store %arg9[%c0_178, %c0_179], %437 {strides = array<i32>} : memref<8x32xf32, #tpu.memory_space<vmem>>, vector<8x32xf32>,
    %cst_180 = arith.constant 0.000000e+00 : f32
    %439 = vector.shape_cast %416 : vector<8x1xi1> to vector<8x1xi1>
    %440 = vector.broadcast %439 : vector<8x1xi1> to vector<8x32xi1>
    %441 = vector.broadcast %cst_180 : f32 to vector<8x32xf32>
    %442 = arith.select %440, %388, %441 : vector<8x32xi1>, vector<8x32xf32>
    %443 = arith.index_cast %c3_i32 : i32 to index
    %c0_181 = arith.constant 0 : index
    %c0_182 = arith.constant 0 : index
    %444 = vector.load %arg5[%443, %c0_181, %c0_182] : memref<8x8x64xf32, #tpu.memory_space<vmem>>, vector<1x8x32xf32>
    %445 = vector.shape_cast %444 : vector<1x8x32xf32> to vector<8x32xf32>
    %446 = vector.shape_cast %442 : vector<8x32xf32> to vector<1x8x32xf32>
    tpu.vector_store %arg5[%443, %c0_181, %c0_182], %446 {strides = array<i32>} : memref<8x8x64xf32, #tpu.memory_space<vmem>>, vector<1x8x32xf32>,
    %cst_183 = arith.constant 0.000000e+00 : f32
    %447 = vector.shape_cast %418 : vector<8x1xi1> to vector<8x1xi1>
    %448 = vector.broadcast %447 : vector<8x1xi1> to vector<8x32xi1>
    %449 = vector.broadcast %cst_183 : f32 to vector<8x32xf32>
    %450 = arith.select %448, %414, %449 : vector<8x32xi1>, vector<8x32xf32>
    %451 = arith.index_cast %344 : i32 to index
    %c0_184 = arith.constant 0 : index
    %c32_185 = arith.constant 32 : index
    %452 = vector.load %arg5[%451, %c0_184, %c32_185] : memref<8x8x64xf32, #tpu.memory_space<vmem>>, vector<1x8x32xf32>
    %453 = vector.shape_cast %452 : vector<1x8x32xf32> to vector<8x32xf32>
    %454 = vector.shape_cast %450 : vector<8x32xf32> to vector<1x8x32xf32>
    tpu.vector_store %arg5[%451, %c0_184, %c32_185], %454 {strides = array<i32>} : memref<8x8x64xf32, #tpu.memory_space<vmem>>, vector<1x8x32xf32>,
    %c4_i32 = arith.constant 4 : i32
    %c7_i32_186 = arith.constant 7 : i32
    %455 = arith.subi %c7_i32_186, %c4_i32 : i32
    %456 = arith.index_cast %c4_i32 : i32 to index
    %c0_187 = arith.constant 0 : index
    %c0_188 = arith.constant 0 : index
    %457 = vector.load %arg1[%456, %c0_187, %c0_188] : memref<8x8x256xbf16, #tpu.memory_space<vmem>>, vector<1x8x256xbf16>
    %458 = vector.shape_cast %457 : vector<1x8x256xbf16> to vector<8x256xbf16>
    %459 = arith.index_cast %455 : i32 to index
    %c0_189 = arith.constant 0 : index
    %c0_190 = arith.constant 0 : index
    %460 = vector.load %arg1[%459, %c0_189, %c0_190] : memref<8x8x256xbf16, #tpu.memory_space<vmem>>, vector<1x8x256xbf16>
    %461 = vector.shape_cast %460 : vector<1x8x256xbf16> to vector<8x256xbf16>
    %462 = vector.extract_strided_slice %458 {offsets = [0, 0], sizes = [8, 128], strides = [1, 1]} : vector<8x256xbf16> to vector<8x128xbf16>
    %463 = arith.extf %462 : vector<8x128xbf16> to vector<8x128xf32>
    %c0_191 = arith.constant 0 : index
    %c0_192 = arith.constant 0 : index
    %464 = vector.load %arg6[%c0_191, %c0_192] : memref<8x32xf32, #tpu.memory_space<vmem>>, vector<8x32xf32>
    %465 = arith.truncf %464 : vector<8x32xf32> to vector<8x32xbf16>
    %cst_193 = arith.constant dense<0.000000e+00> : vector<8x128xf32>
    %466 = tpu.matmul %465, %0, %cst_193 {dimension_numbers = #tpu.dot_dimension_numbers<[1], [0], [0], [1], [0, 0, 1, 1], [], []>} : vector<8x32xbf16>, vector<32x128xbf16>, vector<8x128xf32> -> vector<8x128xf32>
    %467 = arith.addf %463, %466 : vector<8x128xf32>
    %468 = vector.extract_strided_slice %461 {offsets = [0, 128], sizes = [8, 128], strides = [1, 1]} : vector<8x256xbf16> to vector<8x128xbf16>
    %469 = arith.extf %468 : vector<8x128xbf16> to vector<8x128xf32>
    %c0_194 = arith.constant 0 : index
    %c0_195 = arith.constant 0 : index
    %470 = vector.load %arg8[%c0_194, %c0_195] : memref<8x32xf32, #tpu.memory_space<vmem>>, vector<8x32xf32>
    %471 = arith.truncf %470 : vector<8x32xf32> to vector<8x32xbf16>
    %cst_196 = arith.constant dense<0.000000e+00> : vector<8x128xf32>
    %472 = tpu.matmul %471, %1, %cst_196 {dimension_numbers = #tpu.dot_dimension_numbers<[1], [0], [0], [1], [0, 0, 1, 1], [], []>} : vector<8x32xbf16>, vector<32x128xbf16>, vector<8x128xf32> -> vector<8x128xf32>
    %473 = arith.addf %469, %472 : vector<8x128xf32>
    %c0_197 = arith.constant 0 : index
    %c0_198 = arith.constant 0 : index
    %474 = vector.load %arg7[%c0_197, %c0_198] : memref<8x32xf32, #tpu.memory_space<vmem>>, vector<8x32xf32>
    %475 = vector.extract_strided_slice %467 {offsets = [0, 0], sizes = [8, 32], strides = [1, 1]} : vector<8x128xf32> to vector<8x32xf32>
    %476 = arith.negf %475 : vector<8x32xf32>
    %477 = math.exp %476 : vector<8x32xf32>
    %cst_199 = arith.constant 1.000000e+00 : f32
    %478 = vector.broadcast %cst_199 : f32 to vector<8x32xf32>
    %479 = arith.addf %478, %477 : vector<8x32xf32>
    %480 = arith.divf %478, %479 : vector<8x32xf32>
    %481 = vector.extract_strided_slice %467 {offsets = [0, 32], sizes = [8, 32], strides = [1, 1]} : vector<8x128xf32> to vector<8x32xf32>
    %482 = arith.negf %481 : vector<8x32xf32>
    %483 = math.exp %482 : vector<8x32xf32>
    %cst_200 = arith.constant 1.000000e+00 : f32
    %484 = vector.broadcast %cst_200 : f32 to vector<8x32xf32>
    %485 = arith.addf %484, %483 : vector<8x32xf32>
    %486 = arith.divf %484, %485 : vector<8x32xf32>
    %487 = vector.extract_strided_slice %467 {offsets = [0, 64], sizes = [8, 32], strides = [1, 1]} : vector<8x128xf32> to vector<8x32xf32>
    %488 = math.tanh %487 : vector<8x32xf32>
    %489 = vector.extract_strided_slice %467 {offsets = [0, 96], sizes = [8, 32], strides = [1, 1]} : vector<8x128xf32> to vector<8x32xf32>
    %490 = arith.negf %489 : vector<8x32xf32>
    %491 = math.exp %490 : vector<8x32xf32>
    %cst_201 = arith.constant 1.000000e+00 : f32
    %492 = vector.broadcast %cst_201 : f32 to vector<8x32xf32>
    %493 = arith.addf %492, %491 : vector<8x32xf32>
    %494 = arith.divf %492, %493 : vector<8x32xf32>
    %495 = arith.mulf %486, %474 : vector<8x32xf32>
    %496 = arith.mulf %480, %488 : vector<8x32xf32>
    %497 = arith.addf %495, %496 : vector<8x32xf32>
    %498 = math.tanh %497 : vector<8x32xf32>
    %499 = arith.mulf %494, %498 : vector<8x32xf32>
    %c0_202 = arith.constant 0 : index
    %c0_203 = arith.constant 0 : index
    %500 = vector.load %arg9[%c0_202, %c0_203] : memref<8x32xf32, #tpu.memory_space<vmem>>, vector<8x32xf32>
    %501 = vector.extract_strided_slice %473 {offsets = [0, 0], sizes = [8, 32], strides = [1, 1]} : vector<8x128xf32> to vector<8x32xf32>
    %502 = arith.negf %501 : vector<8x32xf32>
    %503 = math.exp %502 : vector<8x32xf32>
    %cst_204 = arith.constant 1.000000e+00 : f32
    %504 = vector.broadcast %cst_204 : f32 to vector<8x32xf32>
    %505 = arith.addf %504, %503 : vector<8x32xf32>
    %506 = arith.divf %504, %505 : vector<8x32xf32>
    %507 = vector.extract_strided_slice %473 {offsets = [0, 32], sizes = [8, 32], strides = [1, 1]} : vector<8x128xf32> to vector<8x32xf32>
    %508 = arith.negf %507 : vector<8x32xf32>
    %509 = math.exp %508 : vector<8x32xf32>
    %cst_205 = arith.constant 1.000000e+00 : f32
    %510 = vector.broadcast %cst_205 : f32 to vector<8x32xf32>
    %511 = arith.addf %510, %509 : vector<8x32xf32>
    %512 = arith.divf %510, %511 : vector<8x32xf32>
    %513 = vector.extract_strided_slice %473 {offsets = [0, 64], sizes = [8, 32], strides = [1, 1]} : vector<8x128xf32> to vector<8x32xf32>
    %514 = math.tanh %513 : vector<8x32xf32>
    %515 = vector.extract_strided_slice %473 {offsets = [0, 96], sizes = [8, 32], strides = [1, 1]} : vector<8x128xf32> to vector<8x32xf32>
    %516 = arith.negf %515 : vector<8x32xf32>
    %517 = math.exp %516 : vector<8x32xf32>
    %cst_206 = arith.constant 1.000000e+00 : f32
    %518 = vector.broadcast %cst_206 : f32 to vector<8x32xf32>
    %519 = arith.addf %518, %517 : vector<8x32xf32>
    %520 = arith.divf %518, %519 : vector<8x32xf32>
    %521 = arith.mulf %512, %500 : vector<8x32xf32>
    %522 = arith.mulf %506, %514 : vector<8x32xf32>
    %523 = arith.addf %521, %522 : vector<8x32xf32>
    %524 = math.tanh %523 : vector<8x32xf32>
    %525 = arith.mulf %520, %524 : vector<8x32xf32>
    %526 = vector.broadcast %c4_i32 : i32 to vector<8x1xi32>
    %527 = arith.cmpi slt, %526, %2 : vector<8x1xi32>
    %528 = vector.broadcast %455 : i32 to vector<8x1xi32>
    %529 = arith.cmpi slt, %528, %2 : vector<8x1xi32>
    %c0_207 = arith.constant 0 : index
    %c0_208 = arith.constant 0 : index
    %530 = vector.load %arg6[%c0_207, %c0_208] : memref<8x32xf32, #tpu.memory_space<vmem>>, vector<8x32xf32>
    %531 = vector.shape_cast %527 : vector<8x1xi1> to vector<8x1xi1>
    %532 = vector.broadcast %531 : vector<8x1xi1> to vector<8x32xi1>
    %533 = arith.select %532, %499, %530 : vector<8x32xi1>, vector<8x32xf32>
    %c0_209 = arith.constant 0 : index
    %c0_210 = arith.constant 0 : index
    %534 = vector.load %arg6[%c0_209, %c0_210] : memref<8x32xf32, #tpu.memory_space<vmem>>, vector<8x32xf32>
    tpu.vector_store %arg6[%c0_209, %c0_210], %533 {strides = array<i32>} : memref<8x32xf32, #tpu.memory_space<vmem>>, vector<8x32xf32>,
    %c0_211 = arith.constant 0 : index
    %c0_212 = arith.constant 0 : index
    %535 = vector.load %arg7[%c0_211, %c0_212] : memref<8x32xf32, #tpu.memory_space<vmem>>, vector<8x32xf32>
    %536 = vector.shape_cast %527 : vector<8x1xi1> to vector<8x1xi1>
    %537 = vector.broadcast %536 : vector<8x1xi1> to vector<8x32xi1>
    %538 = arith.select %537, %497, %535 : vector<8x32xi1>, vector<8x32xf32>
    %c0_213 = arith.constant 0 : index
    %c0_214 = arith.constant 0 : index
    %539 = vector.load %arg7[%c0_213, %c0_214] : memref<8x32xf32, #tpu.memory_space<vmem>>, vector<8x32xf32>
    tpu.vector_store %arg7[%c0_213, %c0_214], %538 {strides = array<i32>} : memref<8x32xf32, #tpu.memory_space<vmem>>, vector<8x32xf32>,
    %c0_215 = arith.constant 0 : index
    %c0_216 = arith.constant 0 : index
    %540 = vector.load %arg8[%c0_215, %c0_216] : memref<8x32xf32, #tpu.memory_space<vmem>>, vector<8x32xf32>
    %541 = vector.shape_cast %529 : vector<8x1xi1> to vector<8x1xi1>
    %542 = vector.broadcast %541 : vector<8x1xi1> to vector<8x32xi1>
    %543 = arith.select %542, %525, %540 : vector<8x32xi1>, vector<8x32xf32>
    %c0_217 = arith.constant 0 : index
    %c0_218 = arith.constant 0 : index
    %544 = vector.load %arg8[%c0_217, %c0_218] : memref<8x32xf32, #tpu.memory_space<vmem>>, vector<8x32xf32>
    tpu.vector_store %arg8[%c0_217, %c0_218], %543 {strides = array<i32>} : memref<8x32xf32, #tpu.memory_space<vmem>>, vector<8x32xf32>,
    %c0_219 = arith.constant 0 : index
    %c0_220 = arith.constant 0 : index
    %545 = vector.load %arg9[%c0_219, %c0_220] : memref<8x32xf32, #tpu.memory_space<vmem>>, vector<8x32xf32>
    %546 = vector.shape_cast %529 : vector<8x1xi1> to vector<8x1xi1>
    %547 = vector.broadcast %546 : vector<8x1xi1> to vector<8x32xi1>
    %548 = arith.select %547, %523, %545 : vector<8x32xi1>, vector<8x32xf32>
    %c0_221 = arith.constant 0 : index
    %c0_222 = arith.constant 0 : index
    %549 = vector.load %arg9[%c0_221, %c0_222] : memref<8x32xf32, #tpu.memory_space<vmem>>, vector<8x32xf32>
    tpu.vector_store %arg9[%c0_221, %c0_222], %548 {strides = array<i32>} : memref<8x32xf32, #tpu.memory_space<vmem>>, vector<8x32xf32>,
    %cst_223 = arith.constant 0.000000e+00 : f32
    %550 = vector.shape_cast %527 : vector<8x1xi1> to vector<8x1xi1>
    %551 = vector.broadcast %550 : vector<8x1xi1> to vector<8x32xi1>
    %552 = vector.broadcast %cst_223 : f32 to vector<8x32xf32>
    %553 = arith.select %551, %499, %552 : vector<8x32xi1>, vector<8x32xf32>
    %554 = arith.index_cast %c4_i32 : i32 to index
    %c0_224 = arith.constant 0 : index
    %c0_225 = arith.constant 0 : index
    %555 = vector.load %arg5[%554, %c0_224, %c0_225] : memref<8x8x64xf32, #tpu.memory_space<vmem>>, vector<1x8x32xf32>
    %556 = vector.shape_cast %555 : vector<1x8x32xf32> to vector<8x32xf32>
    %557 = vector.shape_cast %553 : vector<8x32xf32> to vector<1x8x32xf32>
    tpu.vector_store %arg5[%554, %c0_224, %c0_225], %557 {strides = array<i32>} : memref<8x8x64xf32, #tpu.memory_space<vmem>>, vector<1x8x32xf32>,
    %cst_226 = arith.constant 0.000000e+00 : f32
    %558 = vector.shape_cast %529 : vector<8x1xi1> to vector<8x1xi1>
    %559 = vector.broadcast %558 : vector<8x1xi1> to vector<8x32xi1>
    %560 = vector.broadcast %cst_226 : f32 to vector<8x32xf32>
    %561 = arith.select %559, %525, %560 : vector<8x32xi1>, vector<8x32xf32>
    %562 = arith.index_cast %455 : i32 to index
    %c0_227 = arith.constant 0 : index
    %c32_228 = arith.constant 32 : index
    %563 = vector.load %arg5[%562, %c0_227, %c32_228] : memref<8x8x64xf32, #tpu.memory_space<vmem>>, vector<1x8x32xf32>
    %564 = vector.shape_cast %563 : vector<1x8x32xf32> to vector<8x32xf32>
    %565 = vector.shape_cast %561 : vector<8x32xf32> to vector<1x8x32xf32>
    tpu.vector_store %arg5[%562, %c0_227, %c32_228], %565 {strides = array<i32>} : memref<8x8x64xf32, #tpu.memory_space<vmem>>, vector<1x8x32xf32>,
    %c5_i32 = arith.constant 5 : i32
    %c7_i32_229 = arith.constant 7 : i32
    %566 = arith.subi %c7_i32_229, %c5_i32 : i32
    %567 = arith.index_cast %c5_i32 : i32 to index
    %c0_230 = arith.constant 0 : index
    %c0_231 = arith.constant 0 : index
    %568 = vector.load %arg1[%567, %c0_230, %c0_231] : memref<8x8x256xbf16, #tpu.memory_space<vmem>>, vector<1x8x256xbf16>
    %569 = vector.shape_cast %568 : vector<1x8x256xbf16> to vector<8x256xbf16>
    %570 = arith.index_cast %566 : i32 to index
    %c0_232 = arith.constant 0 : index
    %c0_233 = arith.constant 0 : index
    %571 = vector.load %arg1[%570, %c0_232, %c0_233] : memref<8x8x256xbf16, #tpu.memory_space<vmem>>, vector<1x8x256xbf16>
    %572 = vector.shape_cast %571 : vector<1x8x256xbf16> to vector<8x256xbf16>
    %573 = vector.extract_strided_slice %569 {offsets = [0, 0], sizes = [8, 128], strides = [1, 1]} : vector<8x256xbf16> to vector<8x128xbf16>
    %574 = arith.extf %573 : vector<8x128xbf16> to vector<8x128xf32>
    %c0_234 = arith.constant 0 : index
    %c0_235 = arith.constant 0 : index
    %575 = vector.load %arg6[%c0_234, %c0_235] : memref<8x32xf32, #tpu.memory_space<vmem>>, vector<8x32xf32>
    %576 = arith.truncf %575 : vector<8x32xf32> to vector<8x32xbf16>
    %cst_236 = arith.constant dense<0.000000e+00> : vector<8x128xf32>
    %577 = tpu.matmul %576, %0, %cst_236 {dimension_numbers = #tpu.dot_dimension_numbers<[1], [0], [0], [1], [0, 0, 1, 1], [], []>} : vector<8x32xbf16>, vector<32x128xbf16>, vector<8x128xf32> -> vector<8x128xf32>
    %578 = arith.addf %574, %577 : vector<8x128xf32>
    %579 = vector.extract_strided_slice %572 {offsets = [0, 128], sizes = [8, 128], strides = [1, 1]} : vector<8x256xbf16> to vector<8x128xbf16>
    %580 = arith.extf %579 : vector<8x128xbf16> to vector<8x128xf32>
    %c0_237 = arith.constant 0 : index
    %c0_238 = arith.constant 0 : index
    %581 = vector.load %arg8[%c0_237, %c0_238] : memref<8x32xf32, #tpu.memory_space<vmem>>, vector<8x32xf32>
    %582 = arith.truncf %581 : vector<8x32xf32> to vector<8x32xbf16>
    %cst_239 = arith.constant dense<0.000000e+00> : vector<8x128xf32>
    %583 = tpu.matmul %582, %1, %cst_239 {dimension_numbers = #tpu.dot_dimension_numbers<[1], [0], [0], [1], [0, 0, 1, 1], [], []>} : vector<8x32xbf16>, vector<32x128xbf16>, vector<8x128xf32> -> vector<8x128xf32>
    %584 = arith.addf %580, %583 : vector<8x128xf32>
    %c0_240 = arith.constant 0 : index
    %c0_241 = arith.constant 0 : index
    %585 = vector.load %arg7[%c0_240, %c0_241] : memref<8x32xf32, #tpu.memory_space<vmem>>, vector<8x32xf32>
    %586 = vector.extract_strided_slice %578 {offsets = [0, 0], sizes = [8, 32], strides = [1, 1]} : vector<8x128xf32> to vector<8x32xf32>
    %587 = arith.negf %586 : vector<8x32xf32>
    %588 = math.exp %587 : vector<8x32xf32>
    %cst_242 = arith.constant 1.000000e+00 : f32
    %589 = vector.broadcast %cst_242 : f32 to vector<8x32xf32>
    %590 = arith.addf %589, %588 : vector<8x32xf32>
    %591 = arith.divf %589, %590 : vector<8x32xf32>
    %592 = vector.extract_strided_slice %578 {offsets = [0, 32], sizes = [8, 32], strides = [1, 1]} : vector<8x128xf32> to vector<8x32xf32>
    %593 = arith.negf %592 : vector<8x32xf32>
    %594 = math.exp %593 : vector<8x32xf32>
    %cst_243 = arith.constant 1.000000e+00 : f32
    %595 = vector.broadcast %cst_243 : f32 to vector<8x32xf32>
    %596 = arith.addf %595, %594 : vector<8x32xf32>
    %597 = arith.divf %595, %596 : vector<8x32xf32>
    %598 = vector.extract_strided_slice %578 {offsets = [0, 64], sizes = [8, 32], strides = [1, 1]} : vector<8x128xf32> to vector<8x32xf32>
    %599 = math.tanh %598 : vector<8x32xf32>
    %600 = vector.extract_strided_slice %578 {offsets = [0, 96], sizes = [8, 32], strides = [1, 1]} : vector<8x128xf32> to vector<8x32xf32>
    %601 = arith.negf %600 : vector<8x32xf32>
    %602 = math.exp %601 : vector<8x32xf32>
    %cst_244 = arith.constant 1.000000e+00 : f32
    %603 = vector.broadcast %cst_244 : f32 to vector<8x32xf32>
    %604 = arith.addf %603, %602 : vector<8x32xf32>
    %605 = arith.divf %603, %604 : vector<8x32xf32>
    %606 = arith.mulf %597, %585 : vector<8x32xf32>
    %607 = arith.mulf %591, %599 : vector<8x32xf32>
    %608 = arith.addf %606, %607 : vector<8x32xf32>
    %609 = math.tanh %608 : vector<8x32xf32>
    %610 = arith.mulf %605, %609 : vector<8x32xf32>
    %c0_245 = arith.constant 0 : index
    %c0_246 = arith.constant 0 : index
    %611 = vector.load %arg9[%c0_245, %c0_246] : memref<8x32xf32, #tpu.memory_space<vmem>>, vector<8x32xf32>
    %612 = vector.extract_strided_slice %584 {offsets = [0, 0], sizes = [8, 32], strides = [1, 1]} : vector<8x128xf32> to vector<8x32xf32>
    %613 = arith.negf %612 : vector<8x32xf32>
    %614 = math.exp %613 : vector<8x32xf32>
    %cst_247 = arith.constant 1.000000e+00 : f32
    %615 = vector.broadcast %cst_247 : f32 to vector<8x32xf32>
    %616 = arith.addf %615, %614 : vector<8x32xf32>
    %617 = arith.divf %615, %616 : vector<8x32xf32>
    %618 = vector.extract_strided_slice %584 {offsets = [0, 32], sizes = [8, 32], strides = [1, 1]} : vector<8x128xf32> to vector<8x32xf32>
    %619 = arith.negf %618 : vector<8x32xf32>
    %620 = math.exp %619 : vector<8x32xf32>
    %cst_248 = arith.constant 1.000000e+00 : f32
    %621 = vector.broadcast %cst_248 : f32 to vector<8x32xf32>
    %622 = arith.addf %621, %620 : vector<8x32xf32>
    %623 = arith.divf %621, %622 : vector<8x32xf32>
    %624 = vector.extract_strided_slice %584 {offsets = [0, 64], sizes = [8, 32], strides = [1, 1]} : vector<8x128xf32> to vector<8x32xf32>
    %625 = math.tanh %624 : vector<8x32xf32>
    %626 = vector.extract_strided_slice %584 {offsets = [0, 96], sizes = [8, 32], strides = [1, 1]} : vector<8x128xf32> to vector<8x32xf32>
    %627 = arith.negf %626 : vector<8x32xf32>
    %628 = math.exp %627 : vector<8x32xf32>
    %cst_249 = arith.constant 1.000000e+00 : f32
    %629 = vector.broadcast %cst_249 : f32 to vector<8x32xf32>
    %630 = arith.addf %629, %628 : vector<8x32xf32>
    %631 = arith.divf %629, %630 : vector<8x32xf32>
    %632 = arith.mulf %623, %611 : vector<8x32xf32>
    %633 = arith.mulf %617, %625 : vector<8x32xf32>
    %634 = arith.addf %632, %633 : vector<8x32xf32>
    %635 = math.tanh %634 : vector<8x32xf32>
    %636 = arith.mulf %631, %635 : vector<8x32xf32>
    %637 = vector.broadcast %c5_i32 : i32 to vector<8x1xi32>
    %638 = arith.cmpi slt, %637, %2 : vector<8x1xi32>
    %639 = vector.broadcast %566 : i32 to vector<8x1xi32>
    %640 = arith.cmpi slt, %639, %2 : vector<8x1xi32>
    %c0_250 = arith.constant 0 : index
    %c0_251 = arith.constant 0 : index
    %641 = vector.load %arg6[%c0_250, %c0_251] : memref<8x32xf32, #tpu.memory_space<vmem>>, vector<8x32xf32>
    %642 = vector.shape_cast %638 : vector<8x1xi1> to vector<8x1xi1>
    %643 = vector.broadcast %642 : vector<8x1xi1> to vector<8x32xi1>
    %644 = arith.select %643, %610, %641 : vector<8x32xi1>, vector<8x32xf32>
    %c0_252 = arith.constant 0 : index
    %c0_253 = arith.constant 0 : index
    %645 = vector.load %arg6[%c0_252, %c0_253] : memref<8x32xf32, #tpu.memory_space<vmem>>, vector<8x32xf32>
    tpu.vector_store %arg6[%c0_252, %c0_253], %644 {strides = array<i32>} : memref<8x32xf32, #tpu.memory_space<vmem>>, vector<8x32xf32>,
    %c0_254 = arith.constant 0 : index
    %c0_255 = arith.constant 0 : index
    %646 = vector.load %arg7[%c0_254, %c0_255] : memref<8x32xf32, #tpu.memory_space<vmem>>, vector<8x32xf32>
    %647 = vector.shape_cast %638 : vector<8x1xi1> to vector<8x1xi1>
    %648 = vector.broadcast %647 : vector<8x1xi1> to vector<8x32xi1>
    %649 = arith.select %648, %608, %646 : vector<8x32xi1>, vector<8x32xf32>
    %c0_256 = arith.constant 0 : index
    %c0_257 = arith.constant 0 : index
    %650 = vector.load %arg7[%c0_256, %c0_257] : memref<8x32xf32, #tpu.memory_space<vmem>>, vector<8x32xf32>
    tpu.vector_store %arg7[%c0_256, %c0_257], %649 {strides = array<i32>} : memref<8x32xf32, #tpu.memory_space<vmem>>, vector<8x32xf32>,
    %c0_258 = arith.constant 0 : index
    %c0_259 = arith.constant 0 : index
    %651 = vector.load %arg8[%c0_258, %c0_259] : memref<8x32xf32, #tpu.memory_space<vmem>>, vector<8x32xf32>
    %652 = vector.shape_cast %640 : vector<8x1xi1> to vector<8x1xi1>
    %653 = vector.broadcast %652 : vector<8x1xi1> to vector<8x32xi1>
    %654 = arith.select %653, %636, %651 : vector<8x32xi1>, vector<8x32xf32>
    %c0_260 = arith.constant 0 : index
    %c0_261 = arith.constant 0 : index
    %655 = vector.load %arg8[%c0_260, %c0_261] : memref<8x32xf32, #tpu.memory_space<vmem>>, vector<8x32xf32>
    tpu.vector_store %arg8[%c0_260, %c0_261], %654 {strides = array<i32>} : memref<8x32xf32, #tpu.memory_space<vmem>>, vector<8x32xf32>,
    %c0_262 = arith.constant 0 : index
    %c0_263 = arith.constant 0 : index
    %656 = vector.load %arg9[%c0_262, %c0_263] : memref<8x32xf32, #tpu.memory_space<vmem>>, vector<8x32xf32>
    %657 = vector.shape_cast %640 : vector<8x1xi1> to vector<8x1xi1>
    %658 = vector.broadcast %657 : vector<8x1xi1> to vector<8x32xi1>
    %659 = arith.select %658, %634, %656 : vector<8x32xi1>, vector<8x32xf32>
    %c0_264 = arith.constant 0 : index
    %c0_265 = arith.constant 0 : index
    %660 = vector.load %arg9[%c0_264, %c0_265] : memref<8x32xf32, #tpu.memory_space<vmem>>, vector<8x32xf32>
    tpu.vector_store %arg9[%c0_264, %c0_265], %659 {strides = array<i32>} : memref<8x32xf32, #tpu.memory_space<vmem>>, vector<8x32xf32>,
    %cst_266 = arith.constant 0.000000e+00 : f32
    %661 = vector.shape_cast %638 : vector<8x1xi1> to vector<8x1xi1>
    %662 = vector.broadcast %661 : vector<8x1xi1> to vector<8x32xi1>
    %663 = vector.broadcast %cst_266 : f32 to vector<8x32xf32>
    %664 = arith.select %662, %610, %663 : vector<8x32xi1>, vector<8x32xf32>
    %665 = arith.index_cast %c5_i32 : i32 to index
    %c0_267 = arith.constant 0 : index
    %c0_268 = arith.constant 0 : index
    %666 = vector.load %arg5[%665, %c0_267, %c0_268] : memref<8x8x64xf32, #tpu.memory_space<vmem>>, vector<1x8x32xf32>
    %667 = vector.shape_cast %666 : vector<1x8x32xf32> to vector<8x32xf32>
    %668 = vector.shape_cast %664 : vector<8x32xf32> to vector<1x8x32xf32>
    tpu.vector_store %arg5[%665, %c0_267, %c0_268], %668 {strides = array<i32>} : memref<8x8x64xf32, #tpu.memory_space<vmem>>, vector<1x8x32xf32>,
    %cst_269 = arith.constant 0.000000e+00 : f32
    %669 = vector.shape_cast %640 : vector<8x1xi1> to vector<8x1xi1>
    %670 = vector.broadcast %669 : vector<8x1xi1> to vector<8x32xi1>
    %671 = vector.broadcast %cst_269 : f32 to vector<8x32xf32>
    %672 = arith.select %670, %636, %671 : vector<8x32xi1>, vector<8x32xf32>
    %673 = arith.index_cast %566 : i32 to index
    %c0_270 = arith.constant 0 : index
    %c32_271 = arith.constant 32 : index
    %674 = vector.load %arg5[%673, %c0_270, %c32_271] : memref<8x8x64xf32, #tpu.memory_space<vmem>>, vector<1x8x32xf32>
    %675 = vector.shape_cast %674 : vector<1x8x32xf32> to vector<8x32xf32>
    %676 = vector.shape_cast %672 : vector<8x32xf32> to vector<1x8x32xf32>
    tpu.vector_store %arg5[%673, %c0_270, %c32_271], %676 {strides = array<i32>} : memref<8x8x64xf32, #tpu.memory_space<vmem>>, vector<1x8x32xf32>,
    %c6_i32 = arith.constant 6 : i32
    %c7_i32_272 = arith.constant 7 : i32
    %677 = arith.subi %c7_i32_272, %c6_i32 : i32
    %678 = arith.index_cast %c6_i32 : i32 to index
    %c0_273 = arith.constant 0 : index
    %c0_274 = arith.constant 0 : index
    %679 = vector.load %arg1[%678, %c0_273, %c0_274] : memref<8x8x256xbf16, #tpu.memory_space<vmem>>, vector<1x8x256xbf16>
    %680 = vector.shape_cast %679 : vector<1x8x256xbf16> to vector<8x256xbf16>
    %681 = arith.index_cast %677 : i32 to index
    %c0_275 = arith.constant 0 : index
    %c0_276 = arith.constant 0 : index
    %682 = vector.load %arg1[%681, %c0_275, %c0_276] : memref<8x8x256xbf16, #tpu.memory_space<vmem>>, vector<1x8x256xbf16>
    %683 = vector.shape_cast %682 : vector<1x8x256xbf16> to vector<8x256xbf16>
    %684 = vector.extract_strided_slice %680 {offsets = [0, 0], sizes = [8, 128], strides = [1, 1]} : vector<8x256xbf16> to vector<8x128xbf16>
    %685 = arith.extf %684 : vector<8x128xbf16> to vector<8x128xf32>
    %c0_277 = arith.constant 0 : index
    %c0_278 = arith.constant 0 : index
    %686 = vector.load %arg6[%c0_277, %c0_278] : memref<8x32xf32, #tpu.memory_space<vmem>>, vector<8x32xf32>
    %687 = arith.truncf %686 : vector<8x32xf32> to vector<8x32xbf16>
    %cst_279 = arith.constant dense<0.000000e+00> : vector<8x128xf32>
    %688 = tpu.matmul %687, %0, %cst_279 {dimension_numbers = #tpu.dot_dimension_numbers<[1], [0], [0], [1], [0, 0, 1, 1], [], []>} : vector<8x32xbf16>, vector<32x128xbf16>, vector<8x128xf32> -> vector<8x128xf32>
    %689 = arith.addf %685, %688 : vector<8x128xf32>
    %690 = vector.extract_strided_slice %683 {offsets = [0, 128], sizes = [8, 128], strides = [1, 1]} : vector<8x256xbf16> to vector<8x128xbf16>
    %691 = arith.extf %690 : vector<8x128xbf16> to vector<8x128xf32>
    %c0_280 = arith.constant 0 : index
    %c0_281 = arith.constant 0 : index
    %692 = vector.load %arg8[%c0_280, %c0_281] : memref<8x32xf32, #tpu.memory_space<vmem>>, vector<8x32xf32>
    %693 = arith.truncf %692 : vector<8x32xf32> to vector<8x32xbf16>
    %cst_282 = arith.constant dense<0.000000e+00> : vector<8x128xf32>
    %694 = tpu.matmul %693, %1, %cst_282 {dimension_numbers = #tpu.dot_dimension_numbers<[1], [0], [0], [1], [0, 0, 1, 1], [], []>} : vector<8x32xbf16>, vector<32x128xbf16>, vector<8x128xf32> -> vector<8x128xf32>
    %695 = arith.addf %691, %694 : vector<8x128xf32>
    %c0_283 = arith.constant 0 : index
    %c0_284 = arith.constant 0 : index
    %696 = vector.load %arg7[%c0_283, %c0_284] : memref<8x32xf32, #tpu.memory_space<vmem>>, vector<8x32xf32>
    %697 = vector.extract_strided_slice %689 {offsets = [0, 0], sizes = [8, 32], strides = [1, 1]} : vector<8x128xf32> to vector<8x32xf32>
    %698 = arith.negf %697 : vector<8x32xf32>
    %699 = math.exp %698 : vector<8x32xf32>
    %cst_285 = arith.constant 1.000000e+00 : f32
    %700 = vector.broadcast %cst_285 : f32 to vector<8x32xf32>
    %701 = arith.addf %700, %699 : vector<8x32xf32>
    %702 = arith.divf %700, %701 : vector<8x32xf32>
    %703 = vector.extract_strided_slice %689 {offsets = [0, 32], sizes = [8, 32], strides = [1, 1]} : vector<8x128xf32> to vector<8x32xf32>
    %704 = arith.negf %703 : vector<8x32xf32>
    %705 = math.exp %704 : vector<8x32xf32>
    %cst_286 = arith.constant 1.000000e+00 : f32
    %706 = vector.broadcast %cst_286 : f32 to vector<8x32xf32>
    %707 = arith.addf %706, %705 : vector<8x32xf32>
    %708 = arith.divf %706, %707 : vector<8x32xf32>
    %709 = vector.extract_strided_slice %689 {offsets = [0, 64], sizes = [8, 32], strides = [1, 1]} : vector<8x128xf32> to vector<8x32xf32>
    %710 = math.tanh %709 : vector<8x32xf32>
    %711 = vector.extract_strided_slice %689 {offsets = [0, 96], sizes = [8, 32], strides = [1, 1]} : vector<8x128xf32> to vector<8x32xf32>
    %712 = arith.negf %711 : vector<8x32xf32>
    %713 = math.exp %712 : vector<8x32xf32>
    %cst_287 = arith.constant 1.000000e+00 : f32
    %714 = vector.broadcast %cst_287 : f32 to vector<8x32xf32>
    %715 = arith.addf %714, %713 : vector<8x32xf32>
    %716 = arith.divf %714, %715 : vector<8x32xf32>
    %717 = arith.mulf %708, %696 : vector<8x32xf32>
    %718 = arith.mulf %702, %710 : vector<8x32xf32>
    %719 = arith.addf %717, %718 : vector<8x32xf32>
    %720 = math.tanh %719 : vector<8x32xf32>
    %721 = arith.mulf %716, %720 : vector<8x32xf32>
    %c0_288 = arith.constant 0 : index
    %c0_289 = arith.constant 0 : index
    %722 = vector.load %arg9[%c0_288, %c0_289] : memref<8x32xf32, #tpu.memory_space<vmem>>, vector<8x32xf32>
    %723 = vector.extract_strided_slice %695 {offsets = [0, 0], sizes = [8, 32], strides = [1, 1]} : vector<8x128xf32> to vector<8x32xf32>
    %724 = arith.negf %723 : vector<8x32xf32>
    %725 = math.exp %724 : vector<8x32xf32>
    %cst_290 = arith.constant 1.000000e+00 : f32
    %726 = vector.broadcast %cst_290 : f32 to vector<8x32xf32>
    %727 = arith.addf %726, %725 : vector<8x32xf32>
    %728 = arith.divf %726, %727 : vector<8x32xf32>
    %729 = vector.extract_strided_slice %695 {offsets = [0, 32], sizes = [8, 32], strides = [1, 1]} : vector<8x128xf32> to vector<8x32xf32>
    %730 = arith.negf %729 : vector<8x32xf32>
    %731 = math.exp %730 : vector<8x32xf32>
    %cst_291 = arith.constant 1.000000e+00 : f32
    %732 = vector.broadcast %cst_291 : f32 to vector<8x32xf32>
    %733 = arith.addf %732, %731 : vector<8x32xf32>
    %734 = arith.divf %732, %733 : vector<8x32xf32>
    %735 = vector.extract_strided_slice %695 {offsets = [0, 64], sizes = [8, 32], strides = [1, 1]} : vector<8x128xf32> to vector<8x32xf32>
    %736 = math.tanh %735 : vector<8x32xf32>
    %737 = vector.extract_strided_slice %695 {offsets = [0, 96], sizes = [8, 32], strides = [1, 1]} : vector<8x128xf32> to vector<8x32xf32>
    %738 = arith.negf %737 : vector<8x32xf32>
    %739 = math.exp %738 : vector<8x32xf32>
    %cst_292 = arith.constant 1.000000e+00 : f32
    %740 = vector.broadcast %cst_292 : f32 to vector<8x32xf32>
    %741 = arith.addf %740, %739 : vector<8x32xf32>
    %742 = arith.divf %740, %741 : vector<8x32xf32>
    %743 = arith.mulf %734, %722 : vector<8x32xf32>
    %744 = arith.mulf %728, %736 : vector<8x32xf32>
    %745 = arith.addf %743, %744 : vector<8x32xf32>
    %746 = math.tanh %745 : vector<8x32xf32>
    %747 = arith.mulf %742, %746 : vector<8x32xf32>
    %748 = vector.broadcast %c6_i32 : i32 to vector<8x1xi32>
    %749 = arith.cmpi slt, %748, %2 : vector<8x1xi32>
    %750 = vector.broadcast %677 : i32 to vector<8x1xi32>
    %751 = arith.cmpi slt, %750, %2 : vector<8x1xi32>
    %c0_293 = arith.constant 0 : index
    %c0_294 = arith.constant 0 : index
    %752 = vector.load %arg6[%c0_293, %c0_294] : memref<8x32xf32, #tpu.memory_space<vmem>>, vector<8x32xf32>
    %753 = vector.shape_cast %749 : vector<8x1xi1> to vector<8x1xi1>
    %754 = vector.broadcast %753 : vector<8x1xi1> to vector<8x32xi1>
    %755 = arith.select %754, %721, %752 : vector<8x32xi1>, vector<8x32xf32>
    %c0_295 = arith.constant 0 : index
    %c0_296 = arith.constant 0 : index
    %756 = vector.load %arg6[%c0_295, %c0_296] : memref<8x32xf32, #tpu.memory_space<vmem>>, vector<8x32xf32>
    tpu.vector_store %arg6[%c0_295, %c0_296], %755 {strides = array<i32>} : memref<8x32xf32, #tpu.memory_space<vmem>>, vector<8x32xf32>,
    %c0_297 = arith.constant 0 : index
    %c0_298 = arith.constant 0 : index
    %757 = vector.load %arg7[%c0_297, %c0_298] : memref<8x32xf32, #tpu.memory_space<vmem>>, vector<8x32xf32>
    %758 = vector.shape_cast %749 : vector<8x1xi1> to vector<8x1xi1>
    %759 = vector.broadcast %758 : vector<8x1xi1> to vector<8x32xi1>
    %760 = arith.select %759, %719, %757 : vector<8x32xi1>, vector<8x32xf32>
    %c0_299 = arith.constant 0 : index
    %c0_300 = arith.constant 0 : index
    %761 = vector.load %arg7[%c0_299, %c0_300] : memref<8x32xf32, #tpu.memory_space<vmem>>, vector<8x32xf32>
    tpu.vector_store %arg7[%c0_299, %c0_300], %760 {strides = array<i32>} : memref<8x32xf32, #tpu.memory_space<vmem>>, vector<8x32xf32>,
    %c0_301 = arith.constant 0 : index
    %c0_302 = arith.constant 0 : index
    %762 = vector.load %arg8[%c0_301, %c0_302] : memref<8x32xf32, #tpu.memory_space<vmem>>, vector<8x32xf32>
    %763 = vector.shape_cast %751 : vector<8x1xi1> to vector<8x1xi1>
    %764 = vector.broadcast %763 : vector<8x1xi1> to vector<8x32xi1>
    %765 = arith.select %764, %747, %762 : vector<8x32xi1>, vector<8x32xf32>
    %c0_303 = arith.constant 0 : index
    %c0_304 = arith.constant 0 : index
    %766 = vector.load %arg8[%c0_303, %c0_304] : memref<8x32xf32, #tpu.memory_space<vmem>>, vector<8x32xf32>
    tpu.vector_store %arg8[%c0_303, %c0_304], %765 {strides = array<i32>} : memref<8x32xf32, #tpu.memory_space<vmem>>, vector<8x32xf32>,
    %c0_305 = arith.constant 0 : index
    %c0_306 = arith.constant 0 : index
    %767 = vector.load %arg9[%c0_305, %c0_306] : memref<8x32xf32, #tpu.memory_space<vmem>>, vector<8x32xf32>
    %768 = vector.shape_cast %751 : vector<8x1xi1> to vector<8x1xi1>
    %769 = vector.broadcast %768 : vector<8x1xi1> to vector<8x32xi1>
    %770 = arith.select %769, %745, %767 : vector<8x32xi1>, vector<8x32xf32>
    %c0_307 = arith.constant 0 : index
    %c0_308 = arith.constant 0 : index
    %771 = vector.load %arg9[%c0_307, %c0_308] : memref<8x32xf32, #tpu.memory_space<vmem>>, vector<8x32xf32>
    tpu.vector_store %arg9[%c0_307, %c0_308], %770 {strides = array<i32>} : memref<8x32xf32, #tpu.memory_space<vmem>>, vector<8x32xf32>,
    %cst_309 = arith.constant 0.000000e+00 : f32
    %772 = vector.shape_cast %749 : vector<8x1xi1> to vector<8x1xi1>
    %773 = vector.broadcast %772 : vector<8x1xi1> to vector<8x32xi1>
    %774 = vector.broadcast %cst_309 : f32 to vector<8x32xf32>
    %775 = arith.select %773, %721, %774 : vector<8x32xi1>, vector<8x32xf32>
    %776 = arith.index_cast %c6_i32 : i32 to index
    %c0_310 = arith.constant 0 : index
    %c0_311 = arith.constant 0 : index
    %777 = vector.load %arg5[%776, %c0_310, %c0_311] : memref<8x8x64xf32, #tpu.memory_space<vmem>>, vector<1x8x32xf32>
    %778 = vector.shape_cast %777 : vector<1x8x32xf32> to vector<8x32xf32>
    %779 = vector.shape_cast %775 : vector<8x32xf32> to vector<1x8x32xf32>
    tpu.vector_store %arg5[%776, %c0_310, %c0_311], %779 {strides = array<i32>} : memref<8x8x64xf32, #tpu.memory_space<vmem>>, vector<1x8x32xf32>,
    %cst_312 = arith.constant 0.000000e+00 : f32
    %780 = vector.shape_cast %751 : vector<8x1xi1> to vector<8x1xi1>
    %781 = vector.broadcast %780 : vector<8x1xi1> to vector<8x32xi1>
    %782 = vector.broadcast %cst_312 : f32 to vector<8x32xf32>
    %783 = arith.select %781, %747, %782 : vector<8x32xi1>, vector<8x32xf32>
    %784 = arith.index_cast %677 : i32 to index
    %c0_313 = arith.constant 0 : index
    %c32_314 = arith.constant 32 : index
    %785 = vector.load %arg5[%784, %c0_313, %c32_314] : memref<8x8x64xf32, #tpu.memory_space<vmem>>, vector<1x8x32xf32>
    %786 = vector.shape_cast %785 : vector<1x8x32xf32> to vector<8x32xf32>
    %787 = vector.shape_cast %783 : vector<8x32xf32> to vector<1x8x32xf32>
    tpu.vector_store %arg5[%784, %c0_313, %c32_314], %787 {strides = array<i32>} : memref<8x8x64xf32, #tpu.memory_space<vmem>>, vector<1x8x32xf32>,
    %c7_i32_315 = arith.constant 7 : i32
    %c7_i32_316 = arith.constant 7 : i32
    %788 = arith.subi %c7_i32_316, %c7_i32_315 : i32
    %789 = arith.index_cast %c7_i32_315 : i32 to index
    %c0_317 = arith.constant 0 : index
    %c0_318 = arith.constant 0 : index
    %790 = vector.load %arg1[%789, %c0_317, %c0_318] : memref<8x8x256xbf16, #tpu.memory_space<vmem>>, vector<1x8x256xbf16>
    %791 = vector.shape_cast %790 : vector<1x8x256xbf16> to vector<8x256xbf16>
    %792 = arith.index_cast %788 : i32 to index
    %c0_319 = arith.constant 0 : index
    %c0_320 = arith.constant 0 : index
    %793 = vector.load %arg1[%792, %c0_319, %c0_320] : memref<8x8x256xbf16, #tpu.memory_space<vmem>>, vector<1x8x256xbf16>
    %794 = vector.shape_cast %793 : vector<1x8x256xbf16> to vector<8x256xbf16>
    %795 = vector.extract_strided_slice %791 {offsets = [0, 0], sizes = [8, 128], strides = [1, 1]} : vector<8x256xbf16> to vector<8x128xbf16>
    %796 = arith.extf %795 : vector<8x128xbf16> to vector<8x128xf32>
    %c0_321 = arith.constant 0 : index
    %c0_322 = arith.constant 0 : index
    %797 = vector.load %arg6[%c0_321, %c0_322] : memref<8x32xf32, #tpu.memory_space<vmem>>, vector<8x32xf32>
    %798 = arith.truncf %797 : vector<8x32xf32> to vector<8x32xbf16>
    %cst_323 = arith.constant dense<0.000000e+00> : vector<8x128xf32>
    %799 = tpu.matmul %798, %0, %cst_323 {dimension_numbers = #tpu.dot_dimension_numbers<[1], [0], [0], [1], [0, 0, 1, 1], [], []>} : vector<8x32xbf16>, vector<32x128xbf16>, vector<8x128xf32> -> vector<8x128xf32>
    %800 = arith.addf %796, %799 : vector<8x128xf32>
    %801 = vector.extract_strided_slice %794 {offsets = [0, 128], sizes = [8, 128], strides = [1, 1]} : vector<8x256xbf16> to vector<8x128xbf16>
    %802 = arith.extf %801 : vector<8x128xbf16> to vector<8x128xf32>
    %c0_324 = arith.constant 0 : index
    %c0_325 = arith.constant 0 : index
    %803 = vector.load %arg8[%c0_324, %c0_325] : memref<8x32xf32, #tpu.memory_space<vmem>>, vector<8x32xf32>
    %804 = arith.truncf %803 : vector<8x32xf32> to vector<8x32xbf16>
    %cst_326 = arith.constant dense<0.000000e+00> : vector<8x128xf32>
    %805 = tpu.matmul %804, %1, %cst_326 {dimension_numbers = #tpu.dot_dimension_numbers<[1], [0], [0], [1], [0, 0, 1, 1], [], []>} : vector<8x32xbf16>, vector<32x128xbf16>, vector<8x128xf32> -> vector<8x128xf32>
    %806 = arith.addf %802, %805 : vector<8x128xf32>
    %c0_327 = arith.constant 0 : index
    %c0_328 = arith.constant 0 : index
    %807 = vector.load %arg7[%c0_327, %c0_328] : memref<8x32xf32, #tpu.memory_space<vmem>>, vector<8x32xf32>
    %808 = vector.extract_strided_slice %800 {offsets = [0, 0], sizes = [8, 32], strides = [1, 1]} : vector<8x128xf32> to vector<8x32xf32>
    %809 = arith.negf %808 : vector<8x32xf32>
    %810 = math.exp %809 : vector<8x32xf32>
    %cst_329 = arith.constant 1.000000e+00 : f32
    %811 = vector.broadcast %cst_329 : f32 to vector<8x32xf32>
    %812 = arith.addf %811, %810 : vector<8x32xf32>
    %813 = arith.divf %811, %812 : vector<8x32xf32>
    %814 = vector.extract_strided_slice %800 {offsets = [0, 32], sizes = [8, 32], strides = [1, 1]} : vector<8x128xf32> to vector<8x32xf32>
    %815 = arith.negf %814 : vector<8x32xf32>
    %816 = math.exp %815 : vector<8x32xf32>
    %cst_330 = arith.constant 1.000000e+00 : f32
    %817 = vector.broadcast %cst_330 : f32 to vector<8x32xf32>
    %818 = arith.addf %817, %816 : vector<8x32xf32>
    %819 = arith.divf %817, %818 : vector<8x32xf32>
    %820 = vector.extract_strided_slice %800 {offsets = [0, 64], sizes = [8, 32], strides = [1, 1]} : vector<8x128xf32> to vector<8x32xf32>
    %821 = math.tanh %820 : vector<8x32xf32>
    %822 = vector.extract_strided_slice %800 {offsets = [0, 96], sizes = [8, 32], strides = [1, 1]} : vector<8x128xf32> to vector<8x32xf32>
    %823 = arith.negf %822 : vector<8x32xf32>
    %824 = math.exp %823 : vector<8x32xf32>
    %cst_331 = arith.constant 1.000000e+00 : f32
    %825 = vector.broadcast %cst_331 : f32 to vector<8x32xf32>
    %826 = arith.addf %825, %824 : vector<8x32xf32>
    %827 = arith.divf %825, %826 : vector<8x32xf32>
    %828 = arith.mulf %819, %807 : vector<8x32xf32>
    %829 = arith.mulf %813, %821 : vector<8x32xf32>
    %830 = arith.addf %828, %829 : vector<8x32xf32>
    %831 = math.tanh %830 : vector<8x32xf32>
    %832 = arith.mulf %827, %831 : vector<8x32xf32>
    %c0_332 = arith.constant 0 : index
    %c0_333 = arith.constant 0 : index
    %833 = vector.load %arg9[%c0_332, %c0_333] : memref<8x32xf32, #tpu.memory_space<vmem>>, vector<8x32xf32>
    %834 = vector.extract_strided_slice %806 {offsets = [0, 0], sizes = [8, 32], strides = [1, 1]} : vector<8x128xf32> to vector<8x32xf32>
    %835 = arith.negf %834 : vector<8x32xf32>
    %836 = math.exp %835 : vector<8x32xf32>
    %cst_334 = arith.constant 1.000000e+00 : f32
    %837 = vector.broadcast %cst_334 : f32 to vector<8x32xf32>
    %838 = arith.addf %837, %836 : vector<8x32xf32>
    %839 = arith.divf %837, %838 : vector<8x32xf32>
    %840 = vector.extract_strided_slice %806 {offsets = [0, 32], sizes = [8, 32], strides = [1, 1]} : vector<8x128xf32> to vector<8x32xf32>
    %841 = arith.negf %840 : vector<8x32xf32>
    %842 = math.exp %841 : vector<8x32xf32>
    %cst_335 = arith.constant 1.000000e+00 : f32
    %843 = vector.broadcast %cst_335 : f32 to vector<8x32xf32>
    %844 = arith.addf %843, %842 : vector<8x32xf32>
    %845 = arith.divf %843, %844 : vector<8x32xf32>
    %846 = vector.extract_strided_slice %806 {offsets = [0, 64], sizes = [8, 32], strides = [1, 1]} : vector<8x128xf32> to vector<8x32xf32>
    %847 = math.tanh %846 : vector<8x32xf32>
    %848 = vector.extract_strided_slice %806 {offsets = [0, 96], sizes = [8, 32], strides = [1, 1]} : vector<8x128xf32> to vector<8x32xf32>
    %849 = arith.negf %848 : vector<8x32xf32>
    %850 = math.exp %849 : vector<8x32xf32>
    %cst_336 = arith.constant 1.000000e+00 : f32
    %851 = vector.broadcast %cst_336 : f32 to vector<8x32xf32>
    %852 = arith.addf %851, %850 : vector<8x32xf32>
    %853 = arith.divf %851, %852 : vector<8x32xf32>
    %854 = arith.mulf %845, %833 : vector<8x32xf32>
    %855 = arith.mulf %839, %847 : vector<8x32xf32>
    %856 = arith.addf %854, %855 : vector<8x32xf32>
    %857 = math.tanh %856 : vector<8x32xf32>
    %858 = arith.mulf %853, %857 : vector<8x32xf32>
    %859 = vector.broadcast %c7_i32_315 : i32 to vector<8x1xi32>
    %860 = arith.cmpi slt, %859, %2 : vector<8x1xi32>
    %861 = vector.broadcast %788 : i32 to vector<8x1xi32>
    %862 = arith.cmpi slt, %861, %2 : vector<8x1xi32>
    %c0_337 = arith.constant 0 : index
    %c0_338 = arith.constant 0 : index
    %863 = vector.load %arg6[%c0_337, %c0_338] : memref<8x32xf32, #tpu.memory_space<vmem>>, vector<8x32xf32>
    %864 = vector.shape_cast %860 : vector<8x1xi1> to vector<8x1xi1>
    %865 = vector.broadcast %864 : vector<8x1xi1> to vector<8x32xi1>
    %866 = arith.select %865, %832, %863 : vector<8x32xi1>, vector<8x32xf32>
    %c0_339 = arith.constant 0 : index
    %c0_340 = arith.constant 0 : index
    %867 = vector.load %arg6[%c0_339, %c0_340] : memref<8x32xf32, #tpu.memory_space<vmem>>, vector<8x32xf32>
    tpu.vector_store %arg6[%c0_339, %c0_340], %866 {strides = array<i32>} : memref<8x32xf32, #tpu.memory_space<vmem>>, vector<8x32xf32>,
    %c0_341 = arith.constant 0 : index
    %c0_342 = arith.constant 0 : index
    %868 = vector.load %arg7[%c0_341, %c0_342] : memref<8x32xf32, #tpu.memory_space<vmem>>, vector<8x32xf32>
    %869 = vector.shape_cast %860 : vector<8x1xi1> to vector<8x1xi1>
    %870 = vector.broadcast %869 : vector<8x1xi1> to vector<8x32xi1>
    %871 = arith.select %870, %830, %868 : vector<8x32xi1>, vector<8x32xf32>
    %c0_343 = arith.constant 0 : index
    %c0_344 = arith.constant 0 : index
    %872 = vector.load %arg7[%c0_343, %c0_344] : memref<8x32xf32, #tpu.memory_space<vmem>>, vector<8x32xf32>
    tpu.vector_store %arg7[%c0_343, %c0_344], %871 {strides = array<i32>} : memref<8x32xf32, #tpu.memory_space<vmem>>, vector<8x32xf32>,
    %c0_345 = arith.constant 0 : index
    %c0_346 = arith.constant 0 : index
    %873 = vector.load %arg8[%c0_345, %c0_346] : memref<8x32xf32, #tpu.memory_space<vmem>>, vector<8x32xf32>
    %874 = vector.shape_cast %862 : vector<8x1xi1> to vector<8x1xi1>
    %875 = vector.broadcast %874 : vector<8x1xi1> to vector<8x32xi1>
    %876 = arith.select %875, %858, %873 : vector<8x32xi1>, vector<8x32xf32>
    %c0_347 = arith.constant 0 : index
    %c0_348 = arith.constant 0 : index
    %877 = vector.load %arg8[%c0_347, %c0_348] : memref<8x32xf32, #tpu.memory_space<vmem>>, vector<8x32xf32>
    tpu.vector_store %arg8[%c0_347, %c0_348], %876 {strides = array<i32>} : memref<8x32xf32, #tpu.memory_space<vmem>>, vector<8x32xf32>,
    %c0_349 = arith.constant 0 : index
    %c0_350 = arith.constant 0 : index
    %878 = vector.load %arg9[%c0_349, %c0_350] : memref<8x32xf32, #tpu.memory_space<vmem>>, vector<8x32xf32>
    %879 = vector.shape_cast %862 : vector<8x1xi1> to vector<8x1xi1>
    %880 = vector.broadcast %879 : vector<8x1xi1> to vector<8x32xi1>
    %881 = arith.select %880, %856, %878 : vector<8x32xi1>, vector<8x32xf32>
    %c0_351 = arith.constant 0 : index
    %c0_352 = arith.constant 0 : index
    %882 = vector.load %arg9[%c0_351, %c0_352] : memref<8x32xf32, #tpu.memory_space<vmem>>, vector<8x32xf32>
    tpu.vector_store %arg9[%c0_351, %c0_352], %881 {strides = array<i32>} : memref<8x32xf32, #tpu.memory_space<vmem>>, vector<8x32xf32>,
    %cst_353 = arith.constant 0.000000e+00 : f32
    %883 = vector.shape_cast %860 : vector<8x1xi1> to vector<8x1xi1>
    %884 = vector.broadcast %883 : vector<8x1xi1> to vector<8x32xi1>
    %885 = vector.broadcast %cst_353 : f32 to vector<8x32xf32>
    %886 = arith.select %884, %832, %885 : vector<8x32xi1>, vector<8x32xf32>
    %887 = arith.index_cast %c7_i32_315 : i32 to index
    %c0_354 = arith.constant 0 : index
    %c0_355 = arith.constant 0 : index
    %888 = vector.load %arg5[%887, %c0_354, %c0_355] : memref<8x8x64xf32, #tpu.memory_space<vmem>>, vector<1x8x32xf32>
    %889 = vector.shape_cast %888 : vector<1x8x32xf32> to vector<8x32xf32>
    %890 = vector.shape_cast %886 : vector<8x32xf32> to vector<1x8x32xf32>
    tpu.vector_store %arg5[%887, %c0_354, %c0_355], %890 {strides = array<i32>} : memref<8x8x64xf32, #tpu.memory_space<vmem>>, vector<1x8x32xf32>,
    %cst_356 = arith.constant 0.000000e+00 : f32
    %891 = vector.shape_cast %862 : vector<8x1xi1> to vector<8x1xi1>
    %892 = vector.broadcast %891 : vector<8x1xi1> to vector<8x32xi1>
    %893 = vector.broadcast %cst_356 : f32 to vector<8x32xf32>
    %894 = arith.select %892, %858, %893 : vector<8x32xi1>, vector<8x32xf32>
    %895 = arith.index_cast %788 : i32 to index
    %c0_357 = arith.constant 0 : index
    %c32_358 = arith.constant 32 : index
    %896 = vector.load %arg5[%895, %c0_357, %c32_358] : memref<8x8x64xf32, #tpu.memory_space<vmem>>, vector<1x8x32xf32>
    %897 = vector.shape_cast %896 : vector<1x8x32xf32> to vector<8x32xf32>
    %898 = vector.shape_cast %894 : vector<8x32xf32> to vector<1x8x32xf32>
    tpu.vector_store %arg5[%895, %c0_357, %c32_358], %898 {strides = array<i32>} : memref<8x8x64xf32, #tpu.memory_space<vmem>>, vector<1x8x32xf32>,
    %c8_i32 = arith.constant 8 : i32
    return
  }
  func.func @transform_0(%arg0: i32) -> (i32, i32, i32) {
    %c0_i32 = arith.constant 0 : i32
    %c0_i32_0 = arith.constant 0 : i32
    %c0_i32_1 = arith.constant 0 : i32
    return %c0_i32, %arg0, %c0_i32_0 : i32, i32, i32
  }
  func.func @transform_1(%arg0: i32) -> (i32, i32) {
    %c0_i32 = arith.constant 0 : i32
    %c0_i32_0 = arith.constant 0 : i32
    return %arg0, %c0_i32 : i32, i32
  }
  func.func @transform_2(%arg0: i32) -> (i32, i32) {
    %c0_i32 = arith.constant 0 : i32
    %c0_i32_0 = arith.constant 0 : i32
    %c0_i32_1 = arith.constant 0 : i32
    return %c0_i32, %c0_i32_0 : i32, i32
  }
  func.func @transform_3(%arg0: i32) -> (i32, i32) {
    %c0_i32 = arith.constant 0 : i32
    %c0_i32_0 = arith.constant 0 : i32
    %c0_i32_1 = arith.constant 0 : i32
    return %c0_i32, %c0_i32_0 : i32, i32
  }
  func.func @transform_4(%arg0: i32) -> (i32, i32, i32) {
    %c0_i32 = arith.constant 0 : i32
    %c0_i32_0 = arith.constant 0 : i32
    %c0_i32_1 = arith.constant 0 : i32
    return %c0_i32, %arg0, %c0_i32_0 : i32, i32, i32
  }
}

module attributes {stable_mosaic.version = 11 : i64} {
  func.func @attention_kernel(%arg0: i32, %arg1: memref<8x8x64xf32, #tpu.memory_space<vmem>>, %arg2: memref<8x8x64xf32, #tpu.memory_space<vmem>>, %arg3: memref<8x1x8xf32, #tpu.memory_space<vmem>>, %arg4: memref<8x8x1xf32, #tpu.memory_space<vmem>>, %arg5: memref<8x1x8xf32, #tpu.memory_space<vmem>>, %arg6: memref<8x8x1xf32, #tpu.memory_space<vmem>>, %arg7: memref<8x8x64xf32, #tpu.memory_space<vmem>>, %arg8: memref<8x8x64xf32, #tpu.memory_space<vmem>>) attributes {dimension_semantics = [#tpu.dimension_semantics<parallel>], iteration_bounds = array<i64: 1>, scalar_prefetch = 0 : i64, scratch_operands = 0 : i64, tpu.core_type = #tpu.core_type<tc>, window_params = [{transform_indices = @transform_0, window_bounds = array<i64: 8, 8, 64>}, {transform_indices = @transform_1, window_bounds = array<i64: 8, 8, 64>}, {transform_indices = @transform_2, window_bounds = array<i64: 8, 1, 8>}, {transform_indices = @transform_3, window_bounds = array<i64: 8, 8, 1>}, {transform_indices = @transform_4, window_bounds = array<i64: 8, 1, 8>}, {transform_indices = @transform_5, window_bounds = array<i64: 8, 8, 1>}, {transform_indices = @transform_6, window_bounds = array<i64: 8, 8, 64>}, {transform_indices = @transform_7, window_bounds = array<i64: 8, 8, 64>}]} {
    %c0 = arith.constant 0 : index
    %c0_0 = arith.constant 0 : index
    %c0_1 = arith.constant 0 : index
    %0 = vector.load %arg1[%c0, %c0_0, %c0_1] : memref<8x8x64xf32, #tpu.memory_space<vmem>>, vector<8x8x64xf32>
    %1 = arith.truncf %0 : vector<8x8x64xf32> to vector<8x8x64xbf16>
    %c0_2 = arith.constant 0 : index
    %c0_3 = arith.constant 0 : index
    %c0_4 = arith.constant 0 : index
    %2 = vector.load %arg2[%c0_2, %c0_3, %c0_4] : memref<8x8x64xf32, #tpu.memory_space<vmem>>, vector<8x8x64xf32>
    %3 = arith.truncf %2 : vector<8x8x64xf32> to vector<8x8x64xbf16>
    "tpu.trace_start"() <{level = 10 : i32, message = "bqd,bkd->bqk"}> : () -> ()
    %cst = arith.constant dense<0.000000e+00> : vector<8x8x8xf32>
    %4 = tpu.matmul %1, %3, %cst {dimension_numbers = #tpu.dot_dimension_numbers<[2], [2], [1], [1], [0, 0, 0, 1, 1, 1], [0], [0]>} : vector<8x8x64xbf16>, vector<8x8x64xbf16>, vector<8x8x8xf32> -> vector<8x8x8xf32>
    "tpu.trace_stop"() : () -> ()
    "tpu.trace_start"() <{level = 10 : i32, message = "bkd,bqd->bkq"}> : () -> ()
    %cst_5 = arith.constant dense<0.000000e+00> : vector<8x8x8xf32>
    %5 = tpu.matmul %3, %1, %cst_5 {dimension_numbers = #tpu.dot_dimension_numbers<[2], [2], [1], [1], [0, 0, 0, 1, 1, 1], [0], [0]>} : vector<8x8x64xbf16>, vector<8x8x64xbf16>, vector<8x8x8xf32> -> vector<8x8x8xf32>
    "tpu.trace_stop"() : () -> ()
    %c0_6 = arith.constant 0 : index
    %c0_7 = arith.constant 0 : index
    %c0_8 = arith.constant 0 : index
    %6 = vector.load %arg5[%c0_6, %c0_7, %c0_8] : memref<8x1x8xf32, #tpu.memory_space<vmem>>, vector<8x1x8xf32>
    %cst_9 = arith.constant 1.000000e+00 : f32
    %7 = vector.broadcast %cst_9 : f32 to vector<8x1x8xf32>
    %8 = arith.subf %6, %7 : vector<8x1x8xf32>
    %cst_10 = arith.constant 1.000000e+09 : f32
    %9 = vector.broadcast %cst_10 : f32 to vector<8x1x8xf32>
    %10 = arith.mulf %8, %9 : vector<8x1x8xf32>
    %11 = vector.broadcast %10 : vector<8x1x8xf32> to vector<8x8x8xf32>
    %12 = arith.addf %4, %11 : vector<8x8x8xf32>
    %cst_11 = arith.constant dense<0xFF800000> : vector<8x8xf32>
    %13 = vector.multi_reduction <maximumf>, %12, %cst_11 [2] : vector<8x8x8xf32> to vector<8x8xf32>
    %14 = vector.shape_cast %13 : vector<8x8xf32> to vector<8x8x1xf32>
    %15 = vector.broadcast %14 : vector<8x8x1xf32> to vector<8x8x8xf32>
    %16 = arith.subf %12, %15 : vector<8x8x8xf32>
    %17 = math.exp %16 : vector<8x8x8xf32>
    %cst_12 = arith.constant dense<0.000000e+00> : vector<8x8xf32>
    %18 = vector.multi_reduction <add>, %17, %cst_12 [2] : vector<8x8x8xf32> to vector<8x8xf32>
    %19 = vector.shape_cast %18 : vector<8x8xf32> to vector<8x8x1xf32>
    %20 = tpu.reciprocal %19 {approx = true} : vector<8x8x1xf32> -> vector<8x8x1xf32>
    %21 = vector.broadcast %20 : vector<8x8x1xf32> to vector<8x8x8xf32>
    %22 = arith.mulf %17, %21 : vector<8x8x8xf32>
    %c0_13 = arith.constant 0 : index
    %c0_14 = arith.constant 0 : index
    %c0_15 = arith.constant 0 : index
    %23 = vector.load %arg3[%c0_13, %c0_14, %c0_15] : memref<8x1x8xf32, #tpu.memory_space<vmem>>, vector<8x1x8xf32>
    %cst_16 = arith.constant 1.000000e+00 : f32
    %24 = vector.broadcast %cst_16 : f32 to vector<8x1x8xf32>
    %25 = arith.subf %23, %24 : vector<8x1x8xf32>
    %cst_17 = arith.constant 1.000000e+09 : f32
    %26 = vector.broadcast %cst_17 : f32 to vector<8x1x8xf32>
    %27 = arith.mulf %25, %26 : vector<8x1x8xf32>
    %28 = vector.broadcast %27 : vector<8x1x8xf32> to vector<8x8x8xf32>
    %29 = arith.addf %5, %28 : vector<8x8x8xf32>
    %cst_18 = arith.constant dense<0xFF800000> : vector<8x8xf32>
    %30 = vector.multi_reduction <maximumf>, %29, %cst_18 [2] : vector<8x8x8xf32> to vector<8x8xf32>
    %31 = vector.shape_cast %30 : vector<8x8xf32> to vector<8x8x1xf32>
    %32 = vector.broadcast %31 : vector<8x8x1xf32> to vector<8x8x8xf32>
    %33 = arith.subf %29, %32 : vector<8x8x8xf32>
    %34 = math.exp %33 : vector<8x8x8xf32>
    %cst_19 = arith.constant dense<0.000000e+00> : vector<8x8xf32>
    %35 = vector.multi_reduction <add>, %34, %cst_19 [2] : vector<8x8x8xf32> to vector<8x8xf32>
    %36 = vector.shape_cast %35 : vector<8x8xf32> to vector<8x8x1xf32>
    %37 = tpu.reciprocal %36 {approx = true} : vector<8x8x1xf32> -> vector<8x8x1xf32>
    %38 = vector.broadcast %37 : vector<8x8x1xf32> to vector<8x8x8xf32>
    %39 = arith.mulf %34, %38 : vector<8x8x8xf32>
    %40 = arith.truncf %22 : vector<8x8x8xf32> to vector<8x8x8xbf16>
    "tpu.trace_start"() <{level = 10 : i32, message = "bqk,bkd->bqd"}> : () -> ()
    %cst_20 = arith.constant dense<0.000000e+00> : vector<8x8x64xf32>
    %41 = tpu.matmul %40, %3, %cst_20 {dimension_numbers = #tpu.dot_dimension_numbers<[2], [1], [1], [2], [0, 0, 0, 1, 1, 2], [0], [0]>} : vector<8x8x8xbf16>, vector<8x8x64xbf16>, vector<8x8x64xf32> -> vector<8x8x64xf32>
    "tpu.trace_stop"() : () -> ()
    %c0_21 = arith.constant 0 : index
    %c0_22 = arith.constant 0 : index
    %c0_23 = arith.constant 0 : index
    %42 = vector.load %arg4[%c0_21, %c0_22, %c0_23] : memref<8x8x1xf32, #tpu.memory_space<vmem>>, vector<8x8x1xf32>
    %43 = vector.broadcast %42 : vector<8x8x1xf32> to vector<8x8x64xf32>
    %44 = arith.mulf %41, %43 : vector<8x8x64xf32>
    %c0_24 = arith.constant 0 : index
    %c0_25 = arith.constant 0 : index
    %c0_26 = arith.constant 0 : index
    %45 = vector.load %arg7[%c0_24, %c0_25, %c0_26] : memref<8x8x64xf32, #tpu.memory_space<vmem>>, vector<8x8x64xf32>
    tpu.vector_store %arg7[%c0_24, %c0_25, %c0_26], %44 {strides = array<i32>} : memref<8x8x64xf32, #tpu.memory_space<vmem>>, vector<8x8x64xf32>,
    %46 = arith.truncf %39 : vector<8x8x8xf32> to vector<8x8x8xbf16>
    "tpu.trace_start"() <{level = 10 : i32, message = "bqk,bkd->bqd"}> : () -> ()
    %cst_27 = arith.constant dense<0.000000e+00> : vector<8x8x64xf32>
    %47 = tpu.matmul %46, %1, %cst_27 {dimension_numbers = #tpu.dot_dimension_numbers<[2], [1], [1], [2], [0, 0, 0, 1, 1, 2], [0], [0]>} : vector<8x8x8xbf16>, vector<8x8x64xbf16>, vector<8x8x64xf32> -> vector<8x8x64xf32>
    "tpu.trace_stop"() : () -> ()
    %c0_28 = arith.constant 0 : index
    %c0_29 = arith.constant 0 : index
    %c0_30 = arith.constant 0 : index
    %48 = vector.load %arg6[%c0_28, %c0_29, %c0_30] : memref<8x8x1xf32, #tpu.memory_space<vmem>>, vector<8x8x1xf32>
    %49 = vector.broadcast %48 : vector<8x8x1xf32> to vector<8x8x64xf32>
    %50 = arith.mulf %47, %49 : vector<8x8x64xf32>
    %c0_31 = arith.constant 0 : index
    %c0_32 = arith.constant 0 : index
    %c0_33 = arith.constant 0 : index
    %51 = vector.load %arg8[%c0_31, %c0_32, %c0_33] : memref<8x8x64xf32, #tpu.memory_space<vmem>>, vector<8x8x64xf32>
    tpu.vector_store %arg8[%c0_31, %c0_32, %c0_33], %50 {strides = array<i32>} : memref<8x8x64xf32, #tpu.memory_space<vmem>>, vector<8x8x64xf32>,
    return
  }
  func.func @transform_0(%arg0: i32) -> (i32, i32, i32) {
    %c0_i32 = arith.constant 0 : i32
    %c0_i32_0 = arith.constant 0 : i32
    %c0_i32_1 = arith.constant 0 : i32
    return %arg0, %c0_i32, %c0_i32_0 : i32, i32, i32
  }
  func.func @transform_1(%arg0: i32) -> (i32, i32, i32) {
    %c0_i32 = arith.constant 0 : i32
    %c0_i32_0 = arith.constant 0 : i32
    %c0_i32_1 = arith.constant 0 : i32
    return %arg0, %c0_i32, %c0_i32_0 : i32, i32, i32
  }
  func.func @transform_2(%arg0: i32) -> (i32, i32, i32) {
    %c0_i32 = arith.constant 0 : i32
    %c0_i32_0 = arith.constant 0 : i32
    %c0_i32_1 = arith.constant 0 : i32
    return %arg0, %c0_i32, %c0_i32_0 : i32, i32, i32
  }
  func.func @transform_3(%arg0: i32) -> (i32, i32, i32) {
    %c0_i32 = arith.constant 0 : i32
    %c0_i32_0 = arith.constant 0 : i32
    %c0_i32_1 = arith.constant 0 : i32
    return %arg0, %c0_i32, %c0_i32_0 : i32, i32, i32
  }
  func.func @transform_4(%arg0: i32) -> (i32, i32, i32) {
    %c0_i32 = arith.constant 0 : i32
    %c0_i32_0 = arith.constant 0 : i32
    %c0_i32_1 = arith.constant 0 : i32
    return %arg0, %c0_i32, %c0_i32_0 : i32, i32, i32
  }
  func.func @transform_5(%arg0: i32) -> (i32, i32, i32) {
    %c0_i32 = arith.constant 0 : i32
    %c0_i32_0 = arith.constant 0 : i32
    %c0_i32_1 = arith.constant 0 : i32
    return %arg0, %c0_i32, %c0_i32_0 : i32, i32, i32
  }
  func.func @transform_6(%arg0: i32) -> (i32, i32, i32) {
    %c0_i32 = arith.constant 0 : i32
    %c0_i32_0 = arith.constant 0 : i32
    %c0_i32_1 = arith.constant 0 : i32
    return %arg0, %c0_i32, %c0_i32_0 : i32, i32, i32
  }
  func.func @transform_7(%arg0: i32) -> (i32, i32, i32) {
    %c0_i32 = arith.constant 0 : i32
    %c0_i32_0 = arith.constant 0 : i32
    %c0_i32_1 = arith.constant 0 : i32
    return %arg0, %c0_i32, %c0_i32_0 : i32, i32, i32
  }
}

module attributes {stable_mosaic.version = 11 : i64} {
  func.func @enhance_project_kernel(%arg0: i32, %arg1: memref<128x64xf32, #tpu.memory_space<vmem>>, %arg2: memref<128x64xf32, #tpu.memory_space<vmem>>, %arg3: memref<64x32xbf16, #tpu.memory_space<vmem>>, %arg4: memref<64x32xbf16, #tpu.memory_space<vmem>>, %arg5: memref<64x32xbf16, #tpu.memory_space<vmem>>, %arg6: memref<1x32xf32, #tpu.memory_space<vmem>>, %arg7: memref<128x32xbf16, #tpu.memory_space<vmem>>) attributes {dimension_semantics = [#tpu.dimension_semantics<parallel>], iteration_bounds = array<i64: 1>, scalar_prefetch = 0 : i64, scratch_operands = 0 : i64, tpu.core_type = #tpu.core_type<tc>, window_params = [{transform_indices = @transform_0, window_bounds = array<i64: 128, 64>}, {transform_indices = @transform_1, window_bounds = array<i64: 128, 64>}, {pipeline_mode = #tpu.pipeline_mode<synchronous>, transform_indices = @transform_2, window_bounds = array<i64: 64, 32>}, {pipeline_mode = #tpu.pipeline_mode<synchronous>, transform_indices = @transform_3, window_bounds = array<i64: 64, 32>}, {pipeline_mode = #tpu.pipeline_mode<synchronous>, transform_indices = @transform_4, window_bounds = array<i64: 64, 32>}, {pipeline_mode = #tpu.pipeline_mode<synchronous>, transform_indices = @transform_5, window_bounds = array<i64: 1, 32>}, {transform_indices = @transform_6, window_bounds = array<i64: 128, 32>}]} {
    %c0 = arith.constant 0 : index
    %c0_0 = arith.constant 0 : index
    %0 = vector.load %arg1[%c0, %c0_0] : memref<128x64xf32, #tpu.memory_space<vmem>>, vector<128x64xf32>
    %c0_1 = arith.constant 0 : index
    %c0_2 = arith.constant 0 : index
    %1 = vector.load %arg2[%c0_1, %c0_2] : memref<128x64xf32, #tpu.memory_space<vmem>>, vector<128x64xf32>
    %2 = arith.truncf %0 : vector<128x64xf32> to vector<128x64xbf16>
    %c0_3 = arith.constant 0 : index
    %c0_4 = arith.constant 0 : index
    %3 = vector.load %arg3[%c0_3, %c0_4] : memref<64x32xbf16, #tpu.memory_space<vmem>>, vector<64x32xbf16>
    %cst = arith.constant dense<0.000000e+00> : vector<128x32xf32>
    %4 = tpu.matmul %2, %3, %cst {dimension_numbers = #tpu.dot_dimension_numbers<[1], [0], [0], [1], [0, 0, 1, 1], [], []>} : vector<128x64xbf16>, vector<64x32xbf16>, vector<128x32xf32> -> vector<128x32xf32>
    %5 = arith.truncf %1 : vector<128x64xf32> to vector<128x64xbf16>
    %c0_5 = arith.constant 0 : index
    %c0_6 = arith.constant 0 : index
    %6 = vector.load %arg4[%c0_5, %c0_6] : memref<64x32xbf16, #tpu.memory_space<vmem>>, vector<64x32xbf16>
    %cst_7 = arith.constant dense<0.000000e+00> : vector<128x32xf32>
    %7 = tpu.matmul %5, %6, %cst_7 {dimension_numbers = #tpu.dot_dimension_numbers<[1], [0], [0], [1], [0, 0, 1, 1], [], []>} : vector<128x64xbf16>, vector<64x32xbf16>, vector<128x32xf32> -> vector<128x32xf32>
    %8 = arith.addf %4, %7 : vector<128x32xf32>
    %9 = arith.mulf %0, %1 : vector<128x64xf32>
    %10 = arith.truncf %9 : vector<128x64xf32> to vector<128x64xbf16>
    %c0_8 = arith.constant 0 : index
    %c0_9 = arith.constant 0 : index
    %11 = vector.load %arg5[%c0_8, %c0_9] : memref<64x32xbf16, #tpu.memory_space<vmem>>, vector<64x32xbf16>
    %cst_10 = arith.constant dense<0.000000e+00> : vector<128x32xf32>
    %12 = tpu.matmul %10, %11, %cst_10 {dimension_numbers = #tpu.dot_dimension_numbers<[1], [0], [0], [1], [0, 0, 1, 1], [], []>} : vector<128x64xbf16>, vector<64x32xbf16>, vector<128x32xf32> -> vector<128x32xf32>
    %13 = arith.addf %8, %12 : vector<128x32xf32>
    %c0_11 = arith.constant 0 : index
    %c0_12 = arith.constant 0 : index
    %14 = vector.load %arg6[%c0_11, %c0_12] : memref<1x32xf32, #tpu.memory_space<vmem>>, vector<1x32xf32>
    %15 = vector.broadcast %14 : vector<1x32xf32> to vector<128x32xf32>
    %16 = arith.addf %13, %15 : vector<128x32xf32>
    %cst_13 = arith.constant 0.000000e+00 : f32
    %17 = vector.broadcast %cst_13 : f32 to vector<128x32xf32>
    %18 = arith.maximumf %16, %17 : vector<128x32xf32>
    %19 = arith.truncf %18 : vector<128x32xf32> to vector<128x32xbf16>
    %c0_14 = arith.constant 0 : index
    %c0_15 = arith.constant 0 : index
    %20 = vector.load %arg7[%c0_14, %c0_15] : memref<128x32xbf16, #tpu.memory_space<vmem>>, vector<128x32xbf16>
    tpu.vector_store %arg7[%c0_14, %c0_15], %19 {strides = array<i32>} : memref<128x32xbf16, #tpu.memory_space<vmem>>, vector<128x32xbf16>,
    return
  }
  func.func @transform_0(%arg0: i32) -> (i32, i32) {
    %c0_i32 = arith.constant 0 : i32
    %c0_i32_0 = arith.constant 0 : i32
    return %arg0, %c0_i32 : i32, i32
  }
  func.func @transform_1(%arg0: i32) -> (i32, i32) {
    %c0_i32 = arith.constant 0 : i32
    %c0_i32_0 = arith.constant 0 : i32
    return %arg0, %c0_i32 : i32, i32
  }
  func.func @transform_2(%arg0: i32) -> (i32, i32) {
    %c0_i32 = arith.constant 0 : i32
    %c0_i32_0 = arith.constant 0 : i32
    %c0_i32_1 = arith.constant 0 : i32
    return %c0_i32, %c0_i32_0 : i32, i32
  }
  func.func @transform_3(%arg0: i32) -> (i32, i32) {
    %c0_i32 = arith.constant 0 : i32
    %c0_i32_0 = arith.constant 0 : i32
    %c0_i32_1 = arith.constant 0 : i32
    return %c0_i32, %c0_i32_0 : i32, i32
  }
  func.func @transform_4(%arg0: i32) -> (i32, i32) {
    %c0_i32 = arith.constant 0 : i32
    %c0_i32_0 = arith.constant 0 : i32
    %c0_i32_1 = arith.constant 0 : i32
    return %c0_i32, %c0_i32_0 : i32, i32
  }
  func.func @transform_5(%arg0: i32) -> (i32, i32) {
    %c0_i32 = arith.constant 0 : i32
    %c0_i32_0 = arith.constant 0 : i32
    %c0_i32_1 = arith.constant 0 : i32
    return %c0_i32, %c0_i32_0 : i32, i32
  }
  func.func @transform_6(%arg0: i32) -> (i32, i32) {
    %c0_i32 = arith.constant 0 : i32
    %c0_i32_0 = arith.constant 0 : i32
    return %arg0, %c0_i32 : i32, i32
  }
}

module attributes {stable_mosaic.version = 11 : i64} {
  func.func @pool_kernel(%arg0: i32, %arg1: memref<8x8x64xf32, #tpu.memory_space<vmem>>, %arg2: memref<8x8x1xf32, #tpu.memory_space<vmem>>, %arg3: memref<8x64xf32, #tpu.memory_space<vmem>>, %arg4: memref<8x64xf32, #tpu.memory_space<vmem>>) attributes {dimension_semantics = [#tpu.dimension_semantics<parallel>], iteration_bounds = array<i64: 2>, scalar_prefetch = 0 : i64, scratch_operands = 0 : i64, tpu.core_type = #tpu.core_type<tc>, window_params = [{transform_indices = @transform_0, window_bounds = array<i64: 8, 8, 64>}, {transform_indices = @transform_1, window_bounds = array<i64: 8, 8, 1>}, {transform_indices = @transform_2, window_bounds = array<i64: 8, 64>}, {transform_indices = @transform_3, window_bounds = array<i64: 8, 64>}]} {
    %c0 = arith.constant 0 : index
    %c0_0 = arith.constant 0 : index
    %c0_1 = arith.constant 0 : index
    %0 = vector.load %arg1[%c0, %c0_0, %c0_1] : memref<8x8x64xf32, #tpu.memory_space<vmem>>, vector<8x8x64xf32>
    %c0_2 = arith.constant 0 : index
    %c0_3 = arith.constant 0 : index
    %c0_4 = arith.constant 0 : index
    %1 = vector.load %arg2[%c0_2, %c0_3, %c0_4] : memref<8x8x1xf32, #tpu.memory_space<vmem>>, vector<8x8x1xf32>
    %2 = vector.broadcast %1 : vector<8x8x1xf32> to vector<8x8x64xf32>
    %3 = arith.mulf %0, %2 : vector<8x8x64xf32>
    %cst = arith.constant dense<0.000000e+00> : vector<8x1xf32>
    %4 = vector.multi_reduction <add>, %1, %cst [0] : vector<8x8x1xf32> to vector<8x1xf32>
    %cst_5 = arith.constant 1.000000e+00 : f32
    %5 = vector.broadcast %cst_5 : f32 to vector<8x1xf32>
    %6 = arith.maximumf %4, %5 : vector<8x1xf32>
    %cst_6 = arith.constant dense<0.000000e+00> : vector<8x64xf32>
    %7 = vector.multi_reduction <add>, %3, %cst_6 [0] : vector<8x8x64xf32> to vector<8x64xf32>
    %8 = tpu.reciprocal %6 {approx = true} : vector<8x1xf32> -> vector<8x1xf32>
    %9 = vector.broadcast %8 : vector<8x1xf32> to vector<8x64xf32>
    %10 = arith.mulf %7, %9 : vector<8x64xf32>
    %c0_7 = arith.constant 0 : index
    %c0_8 = arith.constant 0 : index
    %11 = vector.load %arg3[%c0_7, %c0_8] : memref<8x64xf32, #tpu.memory_space<vmem>>, vector<8x64xf32>
    tpu.vector_store %arg3[%c0_7, %c0_8], %10 {strides = array<i32>} : memref<8x64xf32, #tpu.memory_space<vmem>>, vector<8x64xf32>,
    %cst_9 = arith.constant 1.000000e+00 : f32
    %12 = vector.broadcast %cst_9 : f32 to vector<8x8x1xf32>
    %13 = arith.subf %12, %1 : vector<8x8x1xf32>
    %cst_10 = arith.constant -1.000000e+07 : f32
    %14 = vector.broadcast %cst_10 : f32 to vector<8x8x1xf32>
    %15 = arith.mulf %14, %13 : vector<8x8x1xf32>
    %16 = vector.broadcast %15 : vector<8x8x1xf32> to vector<8x8x64xf32>
    %17 = arith.addf %3, %16 : vector<8x8x64xf32>
    %cst_11 = arith.constant dense<0xFF800000> : vector<8x64xf32>
    %18 = vector.multi_reduction <maximumf>, %17, %cst_11 [0] : vector<8x8x64xf32> to vector<8x64xf32>
    %c0_12 = arith.constant 0 : index
    %c0_13 = arith.constant 0 : index
    %19 = vector.load %arg4[%c0_12, %c0_13] : memref<8x64xf32, #tpu.memory_space<vmem>>, vector<8x64xf32>
    tpu.vector_store %arg4[%c0_12, %c0_13], %18 {strides = array<i32>} : memref<8x64xf32, #tpu.memory_space<vmem>>, vector<8x64xf32>,
    return
  }
  func.func @transform_0(%arg0: i32) -> (i32, i32, i32) {
    %c0_i32 = arith.constant 0 : i32
    %c0_i32_0 = arith.constant 0 : i32
    %c0_i32_1 = arith.constant 0 : i32
    return %c0_i32, %arg0, %c0_i32_0 : i32, i32, i32
  }
  func.func @transform_1(%arg0: i32) -> (i32, i32, i32) {
    %c0_i32 = arith.constant 0 : i32
    %c0_i32_0 = arith.constant 0 : i32
    %c0_i32_1 = arith.constant 0 : i32
    return %c0_i32, %arg0, %c0_i32_0 : i32, i32, i32
  }
  func.func @transform_2(%arg0: i32) -> (i32, i32) {
    %c0_i32 = arith.constant 0 : i32
    %c0_i32_0 = arith.constant 0 : i32
    return %arg0, %c0_i32 : i32, i32
  }
  func.func @transform_3(%arg0: i32) -> (i32, i32) {
    %c0_i32 = arith.constant 0 : i32
    %c0_i32_0 = arith.constant 0 : i32
    return %arg0, %c0_i32 : i32, i32
  }
}

module attributes {stable_mosaic.version = 11 : i64} {
  func.func @linear_kernel(%arg0: i32, %arg1: memref<8x256xbf16, #tpu.memory_space<vmem>>, %arg2: memref<256x128xbf16, #tpu.memory_space<vmem>>, %arg3: memref<1x128xf32, #tpu.memory_space<vmem>>, %arg4: memref<8x128xf32, #tpu.memory_space<vmem>>) attributes {dimension_semantics = [#tpu.dimension_semantics<parallel>], iteration_bounds = array<i64: 1>, scalar_prefetch = 0 : i64, scratch_operands = 0 : i64, tpu.core_type = #tpu.core_type<tc>, window_params = [{transform_indices = @transform_0, window_bounds = array<i64: 8, 256>}, {pipeline_mode = #tpu.pipeline_mode<synchronous>, transform_indices = @transform_1, window_bounds = array<i64: 256, 128>}, {pipeline_mode = #tpu.pipeline_mode<synchronous>, transform_indices = @transform_2, window_bounds = array<i64: 1, 128>}, {transform_indices = @transform_3, window_bounds = array<i64: 8, 128>}]} {
    %c0 = arith.constant 0 : index
    %c0_0 = arith.constant 0 : index
    %0 = vector.load %arg1[%c0, %c0_0] : memref<8x256xbf16, #tpu.memory_space<vmem>>, vector<8x256xbf16>
    %c0_1 = arith.constant 0 : index
    %c0_2 = arith.constant 0 : index
    %1 = vector.load %arg2[%c0_1, %c0_2] : memref<256x128xbf16, #tpu.memory_space<vmem>>, vector<256x128xbf16>
    %cst = arith.constant dense<0.000000e+00> : vector<8x128xf32>
    %2 = tpu.matmul %0, %1, %cst {dimension_numbers = #tpu.dot_dimension_numbers<[1], [0], [0], [1], [0, 0, 1, 1], [], []>} : vector<8x256xbf16>, vector<256x128xbf16>, vector<8x128xf32> -> vector<8x128xf32>
    %c0_3 = arith.constant 0 : index
    %c0_4 = arith.constant 0 : index
    %3 = vector.load %arg3[%c0_3, %c0_4] : memref<1x128xf32, #tpu.memory_space<vmem>>, vector<1x128xf32>
    %4 = vector.broadcast %3 : vector<1x128xf32> to vector<8x128xf32>
    %5 = arith.addf %2, %4 : vector<8x128xf32>
    %6 = math.tanh %5 : vector<8x128xf32>
    %c0_5 = arith.constant 0 : index
    %c0_6 = arith.constant 0 : index
    %7 = vector.load %arg4[%c0_5, %c0_6] : memref<8x128xf32, #tpu.memory_space<vmem>>, vector<8x128xf32>
    tpu.vector_store %arg4[%c0_5, %c0_6], %6 {strides = array<i32>} : memref<8x128xf32, #tpu.memory_space<vmem>>, vector<8x128xf32>,
    return
  }
  func.func @transform_0(%arg0: i32) -> (i32, i32) {
    %c0_i32 = arith.constant 0 : i32
    %c0_i32_0 = arith.constant 0 : i32
    return %arg0, %c0_i32 : i32, i32
  }
  func.func @transform_1(%arg0: i32) -> (i32, i32) {
    %c0_i32 = arith.constant 0 : i32
    %c0_i32_0 = arith.constant 0 : i32
    %c0_i32_1 = arith.constant 0 : i32
    return %c0_i32, %c0_i32_0 : i32, i32
  }
  func.func @transform_2(%arg0: i32) -> (i32, i32) {
    %c0_i32 = arith.constant 0 : i32
    %c0_i32_0 = arith.constant 0 : i32
    %c0_i32_1 = arith.constant 0 : i32
    return %c0_i32, %c0_i32_0 : i32, i32
  }
  func.func @transform_3(%arg0: i32) -> (i32, i32) {
    %c0_i32 = arith.constant 0 : i32
    %c0_i32_0 = arith.constant 0 : i32
    return %arg0, %c0_i32 : i32, i32
  }
}

module attributes {stable_mosaic.version = 11 : i64} {
  func.func @linear_kernel(%arg0: i32, %arg1: memref<8x32xbf16, #tpu.memory_space<vmem>>, %arg2: memref<32x128xbf16, #tpu.memory_space<vmem>>, %arg3: memref<1x128xf32, #tpu.memory_space<vmem>>, %arg4: memref<8x128xf32, #tpu.memory_space<vmem>>) attributes {dimension_semantics = [#tpu.dimension_semantics<parallel>], iteration_bounds = array<i64: 1>, scalar_prefetch = 0 : i64, scratch_operands = 0 : i64, tpu.core_type = #tpu.core_type<tc>, window_params = [{transform_indices = @transform_0, window_bounds = array<i64: 8, 32>}, {pipeline_mode = #tpu.pipeline_mode<synchronous>, transform_indices = @transform_1, window_bounds = array<i64: 32, 128>}, {pipeline_mode = #tpu.pipeline_mode<synchronous>, transform_indices = @transform_2, window_bounds = array<i64: 1, 128>}, {transform_indices = @transform_3, window_bounds = array<i64: 8, 128>}]} {
    %c0 = arith.constant 0 : index
    %c0_0 = arith.constant 0 : index
    %0 = vector.load %arg1[%c0, %c0_0] : memref<8x32xbf16, #tpu.memory_space<vmem>>, vector<8x32xbf16>
    %c0_1 = arith.constant 0 : index
    %c0_2 = arith.constant 0 : index
    %1 = vector.load %arg2[%c0_1, %c0_2] : memref<32x128xbf16, #tpu.memory_space<vmem>>, vector<32x128xbf16>
    %cst = arith.constant dense<0.000000e+00> : vector<8x128xf32>
    %2 = tpu.matmul %0, %1, %cst {dimension_numbers = #tpu.dot_dimension_numbers<[1], [0], [0], [1], [0, 0, 1, 1], [], []>} : vector<8x32xbf16>, vector<32x128xbf16>, vector<8x128xf32> -> vector<8x128xf32>
    %c0_3 = arith.constant 0 : index
    %c0_4 = arith.constant 0 : index
    %3 = vector.load %arg3[%c0_3, %c0_4] : memref<1x128xf32, #tpu.memory_space<vmem>>, vector<1x128xf32>
    %4 = vector.broadcast %3 : vector<1x128xf32> to vector<8x128xf32>
    %5 = arith.addf %2, %4 : vector<8x128xf32>
    %c0_5 = arith.constant 0 : index
    %c0_6 = arith.constant 0 : index
    %6 = vector.load %arg4[%c0_5, %c0_6] : memref<8x128xf32, #tpu.memory_space<vmem>>, vector<8x128xf32>
    tpu.vector_store %arg4[%c0_5, %c0_6], %5 {strides = array<i32>} : memref<8x128xf32, #tpu.memory_space<vmem>>, vector<8x128xf32>,
    return
  }
  func.func @transform_0(%arg0: i32) -> (i32, i32) {
    %c0_i32 = arith.constant 0 : i32
    %c0_i32_0 = arith.constant 0 : i32
    return %arg0, %c0_i32 : i32, i32
  }
  func.func @transform_1(%arg0: i32) -> (i32, i32) {
    %c0_i32 = arith.constant 0 : i32
    %c0_i32_0 = arith.constant 0 : i32
    %c0_i32_1 = arith.constant 0 : i32
    return %c0_i32, %c0_i32_0 : i32, i32
  }
  func.func @transform_2(%arg0: i32) -> (i32, i32) {
    %c0_i32 = arith.constant 0 : i32
    %c0_i32_0 = arith.constant 0 : i32
    %c0_i32_1 = arith.constant 0 : i32
    return %c0_i32, %c0_i32_0 : i32, i32
  }
  func.func @transform_3(%arg0: i32) -> (i32, i32) {
    %c0_i32 = arith.constant 0 : i32
    %c0_i32_0 = arith.constant 0 : i32
    return %arg0, %c0_i32 : i32, i32
  }
}

</mosaic_0001>

<bundles_post_ra>
// kernel: esim_forward.9
= control target key start
LH: loop header
LB: loop body
LE: loop exit
PB: predicated region body
PF: predicated region fallthrough
CT: control target
= control target key end

     0   :  { %v432_v1 = vmov 0   ;;  %vm107_vm0 = vcmask 261120   ;;  %v37_v13 = vlaneseq  ;;  %s584_s1 = inlined_call_operand.vmem [shape: bf16[32,256], index: 1, kind: input, shape index: {}]   ;;  %s585_s0 = inlined_call_operand.vmem [shape: bf16[128,32], index: 0, kind: input, shape index: {}]   ;;  %s586_s2 = inlined_call_operand.vmem [shape: f32[1,256], index: 2, kind: input, shape index: {}]   ;;  %s587_s3 = inlined_call_operand.vmem [shape: bf16[128,256], index: 3, kind: output, shape index: {}]  }
   0x1   :  { %v418_v0 = vld [vmem:[%s584_s1 + $0x4] ss:$8 sps:$4 sm:$0xff]   ;;  %164 = vmatprep.mubr.bf16.mxu0 %v432_v1  ;;  %204 = vmatprep.mubr.bf16.mxu1 %v432_v1  ;;  %v420_v2 = vld [vmem:[%s584_s1] ss:$8 sps:$4 sm:$0xff]   ;;  %v421_v3 = vld [vmem:[%s584_s1 + $0x14] ss:$8 sps:$4 sm:$0xff]  }
   0x2   :  { %132 = vmatprep.subr.bf16.mxu0 %v418_v0  ;;  %413 = vmatprep.subr.bf16.mxu1 %v418_v0  ;;  %v423_v4 = vld [vmem:[%s584_s1 + $0x10] ss:$8 sps:$4 sm:$0xff]   ;;  %v424_v5 = vld [vmem:[%s585_s0] sm:$0xff]   ;;  %v426_v7 = vld [vmem:[%s585_s0 + $0x8] sm:$0xff]   ;;  %v38_v14 = vshrl.u32 %v37_v13, 7 }
   0x3   :  { %133 = vmatpush1.bf16.msra.mxu0 %v420_v2  ;;  %415 = vmatpush1.bf16.msra.mxu1 %v420_v2  ;;  %v425_v6 = vld [vmem:[%s585_s0 + $0x20] sm:$0xff]   ;;  %v427_v8 = vld [vmem:[%s585_s0 + $0x28] sm:$0xff]   ;;  %v428_v9 = vld [vmem:[%s585_s0 + $0x10] sm:$0xff]  }
   0x4   :  { %134 = vmatprep.subr.bf16.mxu0 %v421_v3  ;;  %414 = vmatprep.subr.bf16.mxu1 %v421_v3  ;;  %v429_v10 = vld [vmem:[%s585_s0 + $0x30] sm:$0xff]   ;;  %v430_v11 = vld [vmem:[%s585_s0 + $0x18] sm:$0xff]   ;;  %v39_v15 = vsub.s32 0, %v38_v14  ;;  %v35_v16 = vld [vmem:[%s586_s2] sm:$0x3]  ;;  %v43_v17 = vsub.s32 1, %v38_v14 }
   0x5   :  { %v431_v12 = vld [vmem:[%s585_s0 + $0x38] sm:$0xff]  }
   0x6   :  { %v500_v18 = vrot.slane %v35_v16, %v39_v15  ;;  %v502_v19 = vrot.slane %v35_v16, %v43_v17 }
   0x7   :  { %135 = vmatpush1.bf16.msra.mxu0 %v423_v4  ;;  %416 = vmatpush1.bf16.msra.mxu1 %v423_v4 }
   0xa   :  { %373 = vmatmul.mubr.msk.bf16.vlgmr.msra.gmra.mrb[0].mxu0 %vm107_vm0, %v424_v5  ;;  %377 = vmatmul.mubr.msk.bf16.vlgmr.msra.gmra.mrb[0].mxu1 %vm107_vm0, %v425_v6 }
   0xb   :  { %174 = vmatprep.mubr.bf16.mxu0 %v432_v1  ;;  %214 = vmatprep.mubr.bf16.mxu1 %v432_v1 }
  0x12   :  { %374 = vmatmul.mubr.msk.bf16.gmra.mrb[4].mxu0 %vm107_vm0, %v426_v7  ;;  %378 = vmatmul.mubr.msk.bf16.gmra.mrb[4].mxu1 %vm107_vm0, %v427_v8 }
  0x13   :  { %184 = vmatprep.mubr.bf16.mxu0 %v432_v1  ;;  %224 = vmatprep.mubr.bf16.mxu1 %v432_v1 }
  0x1a   :  { %375 = vmatmul.mubr.msk.bf16.gmra.mrb[8].mxu0 %vm107_vm0, %v428_v9  ;;  %379 = vmatmul.mubr.msk.bf16.gmra.mrb[8].mxu1 %vm107_vm0, %v429_v10 }
  0x1b   :  { %194 = vmatprep.mubr.bf16.mxu0 %v432_v1  ;;  %234 = vmatprep.mubr.bf16.mxu1 %v432_v1 }
  0x22   :  { %376 = vmatmul.mubr.msk.bf16.gmra.mrb[12].mxu0 %vm107_vm0, %v430_v11  ;;  %380 = vmatmul.mubr.msk.bf16.gmra.mrb[12].mxu1 %vm107_vm0, %v431_v12 }
  0xdd   :  { %v166_v20 = vpop.f32.mrb[0].mxu0  ;;  %v206_v21 = vpop.f32.mrb[0].mxu1 }
  0xde   :  { %v167_v22 = vadd.f32 %v166_v20, %v500_v18  ;;  %v207_v23 = vadd.f32 %v206_v21, %v500_v18  ;;  %v168_v24 = vpop.f32.mrb[1].mxu0  ;;  %v208_v25 = vpop.f32.mrb[1].mxu1 }
  0xdf   :  { %v169_v26 = vadd.f32 %v168_v24, %v502_v19  ;;  %v209_v27 = vadd.f32 %v208_v25, %v502_v19  ;;  %v170_v28 = vpop.f32.mrb[2].mxu0  ;;  %v210_v29 = vpop.f32.mrb[2].mxu1 }
  0xe0   :  { %v171_v30 = vadd.f32 %v170_v28, %v500_v18  ;;  %v211_v31 = vadd.f32 %v210_v29, %v500_v18  ;;  %v172_v32 = vpop.f32.mrb[3].mxu0  ;;  %v212_v33 = vpop.f32.mrb[3].mxu1 }
  0xe1   :  { %v397_v34 = vpack.c.bf16 %v169_v26, %v167_v22  ;;  %v405_v35 = vpack.c.bf16 %v209_v27, %v207_v23  ;;  %v173_v36 = vadd.f32 %v172_v32, %v502_v19  ;;  %v213_v37 = vadd.f32 %v212_v33, %v502_v19 }
  0xe3   :  { %341 = vst [vmem:[%s587_s3] sm:$0xff] %v397_v34  ;;  %349 = vst [vmem:[%s587_s3 + $0x40] sm:$0xff] %v405_v35  ;;  %v398_v38 = vpack.c.bf16 %v173_v36, %v171_v30  ;;  %v406_v39 = vpack.c.bf16 %v213_v37, %v211_v31 }
  0xe5   :  { %342 = vst [vmem:[%s587_s3 + $0x8] sm:$0xff] %v398_v38  ;;  %350 = vst [vmem:[%s587_s3 + $0x48] sm:$0xff] %v406_v39  ;;  %v176_v40 = vpop.f32.mrb[4].mxu0  ;;  %v216_v41 = vpop.f32.mrb[4].mxu1 }
  0xe6   :  { %v177_v42 = vadd.f32 %v176_v40, %v500_v18  ;;  %v217_v43 = vadd.f32 %v216_v41, %v500_v18  ;;  %v178_v44 = vpop.f32.mrb[5].mxu0  ;;  %v218_v45 = vpop.f32.mrb[5].mxu1 }
  0xe7   :  { %v179_v46 = vadd.f32 %v178_v44, %v502_v19  ;;  %v219_v47 = vadd.f32 %v218_v45, %v502_v19  ;;  %v180_v48 = vpop.f32.mrb[6].mxu0  ;;  %v220_v49 = vpop.f32.mrb[6].mxu1 }
  0xe8   :  { %v181_v50 = vadd.f32 %v180_v48, %v500_v18  ;;  %v221_v51 = vadd.f32 %v220_v49, %v500_v18  ;;  %v182_v52 = vpop.f32.mrb[7].mxu0  ;;  %v222_v53 = vpop.f32.mrb[7].mxu1 }
  0xe9   :  { %v399_v54 = vpack.c.bf16 %v179_v46, %v177_v42  ;;  %v407_v55 = vpack.c.bf16 %v219_v47, %v217_v43  ;;  %v183_v56 = vadd.f32 %v182_v52, %v502_v19  ;;  %v223_v57 = vadd.f32 %v222_v53, %v502_v19 }
  0xeb   :  { %343 = vst [vmem:[%s587_s3 + $0x10] sm:$0xff] %v399_v54  ;;  %351 = vst [vmem:[%s587_s3 + $0x50] sm:$0xff] %v407_v55  ;;  %v400_v58 = vpack.c.bf16 %v183_v56, %v181_v50  ;;  %v408_v59 = vpack.c.bf16 %v223_v57, %v221_v51 }
  0xed   :  { %344 = vst [vmem:[%s587_s3 + $0x18] sm:$0xff] %v400_v58  ;;  %352 = vst [vmem:[%s587_s3 + $0x58] sm:$0xff] %v408_v59  ;;  %v186_v60 = vpop.f32.mrb[8].mxu0  ;;  %v226_v61 = vpop.f32.mrb[8].mxu1 }
  0xee   :  { %v187_v62 = vadd.f32 %v186_v60, %v500_v18  ;;  %v227_v63 = vadd.f32 %v226_v61, %v500_v18  ;;  %v188_v0 = vpop.f32.mrb[9].mxu0  ;;  %v228_v1 = vpop.f32.mrb[9].mxu1 }
  0xef   :  { %v189_v2 = vadd.f32 %v188_v0, %v502_v19  ;;  %v229_v3 = vadd.f32 %v228_v1, %v502_v19  ;;  %v190_v4 = vpop.f32.mrb[10].mxu0  ;;  %v230_v5 = vpop.f32.mrb[10].mxu1 }
  0xf0   :  { %v191_v6 = vadd.f32 %v190_v4, %v500_v18  ;;  %v231_v7 = vadd.f32 %v230_v5, %v500_v18  ;;  %v192_v8 = vpop.f32.mrb[11].mxu0  ;;  %v232_v9 = vpop.f32.mrb[11].mxu1 }
  0xf1   :  { %v401_v10 = vpack.c.bf16 %v189_v2, %v187_v62  ;;  %v409_v11 = vpack.c.bf16 %v229_v3, %v227_v63  ;;  %v193_v12 = vadd.f32 %v192_v8, %v502_v19  ;;  %v233_v13 = vadd.f32 %v232_v9, %v502_v19 }
  0xf3   :  { %345 = vst [vmem:[%s587_s3 + $0x20] sm:$0xff] %v401_v10  ;;  %353 = vst [vmem:[%s587_s3 + $0x60] sm:$0xff] %v409_v11  ;;  %v402_v14 = vpack.c.bf16 %v193_v12, %v191_v6  ;;  %v410_v15 = vpack.c.bf16 %v233_v13, %v231_v7 }
  0xf5   :  { %346 = vst [vmem:[%s587_s3 + $0x28] sm:$0xff] %v402_v14  ;;  %354 = vst [vmem:[%s587_s3 + $0x68] sm:$0xff] %v410_v15  ;;  %v196_v16 = vpop.f32.mrb[12].mxu0  ;;  %v236_v17 = vpop.f32.mrb[12].mxu1 }
  0xf6   :  { %v197_v20 = vadd.f32 %v196_v16, %v500_v18  ;;  %v237_v21 = vadd.f32 %v236_v17, %v500_v18  ;;  %v198_v22 = vpop.f32.mrb[13].mxu0  ;;  %v238_v23 = vpop.f32.mrb[13].mxu1 }
  0xf7   :  { %v199_v24 = vadd.f32 %v198_v22, %v502_v19  ;;  %v239_v25 = vadd.f32 %v238_v23, %v502_v19  ;;  %v200_v26 = vpop.f32.mrb[14].mxu0  ;;  %v240_v27 = vpop.f32.mrb[14].mxu1 }
  0xf8   :  { %v201_v28 = vadd.f32 %v200_v26, %v500_v18  ;;  %v241_v29 = vadd.f32 %v240_v27, %v500_v18  ;;  %v202_v30 = vpop.f32.mrb[15].mxu0  ;;  %v242_v31 = vpop.f32.mrb[15].mxu1 }
  0xf9   :  { %v403_v32 = vpack.c.bf16 %v199_v24, %v197_v20  ;;  %v411_v33 = vpack.c.bf16 %v239_v25, %v237_v21  ;;  %v203_v34 = vadd.f32 %v202_v30, %v502_v19  ;;  %v243_v35 = vadd.f32 %v242_v31, %v502_v19 }
  0xfb   :  { %347 = vst [vmem:[%s587_s3 + $0x30] sm:$0xff] %v403_v32  ;;  %355 = vst [vmem:[%s587_s3 + $0x70] sm:$0xff] %v411_v33  ;;  %v404_v36 = vpack.c.bf16 %v203_v34, %v201_v28  ;;  %v412_v37 = vpack.c.bf16 %v243_v35, %v241_v29 }
  0xfd   :  { %348 = vst [vmem:[%s587_s3 + $0x38] sm:$0xff] %v404_v36  ;;  %356 = vst [vmem:[%s587_s3 + $0x78] sm:$0xff] %v412_v37 }

// kernel: esim_forward.12
= control target key start
LH: loop header
LB: loop body
LE: loop exit
PB: predicated region body
PF: predicated region fallthrough
CT: control target
= control target key end

     0   :  { %vm112_vm0 = vcmask 523264   ;;  %vm675_vm1 = vcmask 257024   ;;  %s1219_s3 = inlined_call_operand.vmem [shape: bf16[64,32], index: 3, kind: input, shape index: {}]   ;;  %s1220_s2 = inlined_call_operand.vmem [shape: bf16[64,32], index: 2, kind: input, shape index: {}]   ;;  %s1221_s1 = inlined_call_operand.vmem [shape: f32[128,64], index: 1, kind: input, shape index: {}]   ;;  %s1222_s0 = inlined_call_operand.vmem [shape: f32[128,64], index: 0, kind: input, shape index: {}]   ;;  %s1223_s4 = inlined_call_operand.vmem [shape: bf16[64,32], index: 4, kind: input, shape index: {}]   ;;  %s1224_s5 = inlined_call_operand.vmem [shape: f32[1,32], index: 5, kind: input, shape index: {}]   ;;  %s1225_s6 = inlined_call_operand.vmem [shape: bf16[128,32], index: 6, kind: output, shape index: {}]  }
   0x1   :  { %v913_v0 = vld [vmem:[%s1219_s3] sm:$0xff]   ;;  %v915_v2 = vld [vmem:[%s1219_s3 + $0x8] sm:$0xff]   ;;  %v917_v4 = vld [vmem:[%s1219_s3 + $0x10] sm:$0xff]  }
   0x2   :  { %v914_v1 = vld [vmem:[%s1220_s2] sm:$0xff]   ;;  %801 = vmatprep.subr.bf16.mxu1 %v913_v0  ;;  %v972_v3 = vld [vmem:[%s1220_s2 + $0x8] sm:$0xff]   ;;  %v981_v5 = vld [vmem:[%s1220_s2 + $0x10] sm:$0xff]  }
   0x3   :  { %825 = vmatprep.subr.bf16.mxu0 %v914_v1  ;;  %802 = vmatpush3.bf16.msra.mxu1 %v913_v0  ;;  %v919_v6 = vld [vmem:[%s1219_s3 + $0x18] sm:$0xff]   ;;  %v40_v7 = vld [vmem:[%s1221_s1] sm:$0xff]  ;;  %v41_v8 = vld [vmem:[%s1221_s1 + $0x8] sm:$0xff] }
   0x4   :  { %826 = vmatpush3.bf16.msra.mxu0 %v914_v1  ;;  %803 = vmatprep.subr.bf16.mxu1 %v915_v2  ;;  %v24_v9 = vld [vmem:[%s1222_s0] sm:$0xff]  ;;  %v1000_v10 = vld [vmem:[%s1220_s2 + $0x18] sm:$0xff]   ;;  %v72_v11 = vpack.c.bf16 %v41_v8, %v40_v7  ;;  %v25_v12 = vld [vmem:[%s1222_s0 + $0x8] sm:$0xff] }
   0x5   :  { %827 = vmatprep.subr.bf16.mxu0 %v972_v3  ;;  %v56_v13 = vpack.c.bf16 %v25_v12, %v24_v9  ;;  %v42_v14 = vld [vmem:[%s1221_s1 + $0x10] sm:$0xff]  ;;  %v43_v15 = vld [vmem:[%s1221_s1 + $0x18] sm:$0xff]  ;;  %v921_v18 = vld [vmem:[%s1223_s4] sm:$0xff]   ;;  %v379_v31 = vmul.f32 %v40_v7, %v24_v9  ;;  %v380_v32 = vmul.f32 %v41_v8, %v25_v12 }
   0x6   :  { %809 = vmatprep.mubr.msk.bf16.mxu1 %vm112_vm0, %v72_v11  ;;  %v26_v16 = vld [vmem:[%s1222_s0 + $0x10] sm:$0xff]  ;;  %v27_v17 = vld [vmem:[%s1222_s0 + $0x18] sm:$0xff]  ;;  %v44_v19 = vld [vmem:[%s1221_s1 + $0x20] sm:$0xff]  ;;  %v73_v21 = vpack.c.bf16 %v43_v15, %v42_v14 }
   0x7   :  { %804 = vmatpush3.bf16.msra.mxu1 %v915_v2  ;;  %833 = vmatprep.mubr.msk.bf16.mxu0 %vm112_vm0, %v56_v13  ;;  %v45_v20 = vld [vmem:[%s1221_s1 + $0x28] sm:$0xff]  ;;  %v28_v22 = vld [vmem:[%s1222_s0 + $0x20] sm:$0xff]  ;;  %v57_v24 = vpack.c.bf16 %v27_v17, %v26_v16  ;;  %v46_v28 = vld [vmem:[%s1221_s1 + $0x30] sm:$0xff]  ;;  %v395_v40 = vpack.c.bf16 %v380_v32, %v379_v31  ;;  %v381_v42 = vmul.f32 %v42_v14, %v26_v16 }
   0x8   :  { %828 = vmatpush3.bf16.msra.mxu0 %v972_v3  ;;  %805 = vmatprep.subr.bf16.mxu1 %v917_v4  ;;  %v29_v23 = vld [vmem:[%s1222_s0 + $0x28] sm:$0xff]  ;;  %v74_v25 = vpack.c.bf16 %v45_v20, %v44_v19  ;;  %v47_v29 = vld [vmem:[%s1221_s1 + $0x38] sm:$0xff]  ;;  %v30_v30 = vld [vmem:[%s1222_s0 + $0x30] sm:$0xff]  ;;  %v382_v43 = vmul.f32 %v43_v15, %v27_v17  ;;  %v383_v48 = vmul.f32 %v44_v19, %v28_v22 }
   0x9   :  { %829 = vmatprep.subr.bf16.mxu0 %v981_v5  ;;  %v922_v26 = vld [vmem:[%s1223_s4 + $0x8] sm:$0xff]   ;;  %v58_v27 = vpack.c.bf16 %v29_v23, %v28_v22  ;;  %v31_v33 = vld [vmem:[%s1222_s0 + $0x38] sm:$0xff]  ;;  %v48_v34 = vld [vmem:[%s1221_s1 + $0x40] sm:$0xff]  ;;  %v75_v37 = vpack.c.bf16 %v47_v29, %v46_v28  ;;  %v384_v49 = vmul.f32 %v45_v20, %v29_v23  ;;  %v385_v58 = vmul.f32 %v46_v28, %v30_v30 }
   0xa   :  { %v49_v35 = vld [vmem:[%s1221_s1 + $0x48] sm:$0xff]  ;;  %v923_v36 = vld [vmem:[%s1223_s4 + $0x10] sm:$0xff]   ;;  %v59_v38 = vpack.c.bf16 %v31_v33, %v30_v30  ;;  %v924_v41 = vld [vmem:[%s1223_s4 + $0x18] sm:$0xff]   ;;  %v396_v51 = vpack.c.bf16 %v382_v43, %v381_v42  ;;  %v386_v59 = vmul.f32 %v47_v29, %v31_v33 }
   0xb   :  { %806 = vmatpush3.bf16.msra.mxu1 %v917_v4  ;;  %v76_v39 = vpack.c.bf16 %v49_v35, %v48_v34  ;;  %v50_v44 = vld [vmem:[%s1221_s1 + $0x50] sm:$0xff]  ;;  %v51_v45 = vld [vmem:[%s1221_s1 + $0x58] sm:$0xff]  ;;  %v52_v46 = vld [vmem:[%s1221_s1 + $0x60] sm:$0xff]  ;;  %v397_v53 = vpack.c.bf16 %v384_v49, %v383_v48 }
   0xc   :  { %830 = vmatpush3.bf16.msra.mxu0 %v981_v5  ;;  %807 = vmatprep.subr.bf16.mxu1 %v919_v6  ;;  %v53_v47 = vld [vmem:[%s1221_s1 + $0x68] sm:$0xff]  ;;  %v77_v50 = vpack.c.bf16 %v51_v45, %v50_v44  ;;  %v32_v54 = vld [vmem:[%s1222_s0 + $0x40] sm:$0xff]  ;;  %v54_v56 = vld [vmem:[%s1221_s1 + $0x70] sm:$0xff]  ;;  %v398_v63 = vpack.c.bf16 %v386_v59, %v385_v58 }
   0xd   :  { %831 = vmatprep.subr.bf16.mxu0 %v1000_v10  ;;  %v78_v52 = vpack.c.bf16 %v53_v47, %v52_v46  ;;  %v33_v55 = vld [vmem:[%s1222_s0 + $0x48] sm:$0xff]  ;;  %v55_v57 = vld [vmem:[%s1221_s1 + $0x78] sm:$0xff]  ;;  %v387_v60 = vmul.f32 %v48_v34, %v32_v54  ;;  %v34_v2 = vld [vmem:[%s1222_s0 + $0x50] sm:$0xff] }
   0xe   :  { %v388_v61 = vmul.f32 %v49_v35, %v33_v55  ;;  %v79_v62 = vpack.c.bf16 %v55_v57, %v54_v56  ;;  %v60_v0 = vpack.c.bf16 %v33_v55, %v32_v54  ;;  %v36_v4 = vld [vmem:[%s1222_s0 + $0x60] sm:$0xff]  ;;  %v38_v14 = vld [vmem:[%s1222_s0 + $0x70] sm:$0xff]  ;;  %v39_v15 = vld [vmem:[%s1222_s0 + $0x78] sm:$0xff] }
   0xf   :  { %808 = vmatpush3.bf16.msra.mxu1 %v919_v6  ;;  %v389_v6 = vmul.f32 %v50_v44, %v34_v2  ;;  %v391_v8 = vmul.f32 %v52_v46, %v36_v4  ;;  %v393_v16 = vmul.f32 %v54_v56, %v38_v14  ;;  %v394_v17 = vmul.f32 %v55_v57, %v39_v15  ;;  %v1137_v29 = vld [vmem:[%s1224_s5] ss:$0 sm:$0xff] }
  0x10   :  { %832 = vmatpush3.bf16.msra.mxu0 %v1000_v10  ;;  %873 = vmatprep.subr.bf16.mxu1 %v914_v1 }
  0x11   :  { %849 = vmatprep.subr.bf16.mxu0 %v921_v18  ;;  %v402_v19 = vpack.c.bf16 %v394_v17, %v393_v16 }
  0x12   :  { %810 = vmatmul.mubr.msk.bf16.vlgmr.msra.gmra.mrb[0].mxu1 %vm112_vm0, %v73_v21 }
  0x13   :  { %834 = vmatmul.mubr.msk.bf16.vlgmr.msra.gmra.mrb[0].mxu0 %vm112_vm0, %v57_v24  ;;  %877 = vmatpush3.bf16.msra.mxu1 %v914_v1  ;;  %v399_v1 = vpack.c.bf16 %v388_v61, %v387_v60 }
  0x14   :  { %850 = vmatpush3.bf16.msra.mxu0 %v921_v18  ;;  %813 = vmatprep.mubr.msk.bf16.mxu1 %vm112_vm0, %v74_v25  ;;  %v63_v18 = vpack.c.bf16 %v39_v15, %v38_v14 }
  0x15   :  { %851 = vmatprep.subr.bf16.mxu0 %v922_v26  ;;  %837 = vmatprep.mubr.msk.bf16.mxu0 %vm112_vm0, %v58_v27 }
  0x16   :  { %874 = vmatprep.subr.bf16.mxu1 %v972_v3 }
  0x17   :  { %878 = vmatpush3.bf16.msra.mxu1 %v972_v3  ;;  %v35_v3 = vld [vmem:[%s1222_s0 + $0x58] sm:$0xff] }
  0x18   :  { %852 = vmatpush3.bf16.msra.mxu0 %v922_v26  ;;  %875 = vmatprep.subr.bf16.mxu1 %v981_v5  ;;  %v390_v7 = vmul.f32 %v51_v45, %v35_v3 }
  0x19   :  { %853 = vmatprep.subr.bf16.mxu0 %v923_v36 }
  0x1a   :  { %814 = vmatmul.mubr.msk.bf16.gmra.mrb[4].mxu1 %vm112_vm0, %v75_v37  ;;  %v400_v11 = vpack.c.bf16 %v390_v7, %v389_v6 }
  0x1b   :  { %838 = vmatmul.mubr.msk.bf16.gmra.mrb[4].mxu0 %vm112_vm0, %v59_v38  ;;  %817 = vmatprep.mubr.msk.bf16.mxu1 %vm112_vm0, %v76_v39 }
  0x1c   :  { %854 = vmatpush3.bf16.msra.mxu0 %v923_v36  ;;  %857 = vmatprep.mubr.msk.bf16.mxu0 %vm112_vm0, %v395_v40 }
  0x1d   :  { %855 = vmatprep.subr.bf16.mxu0 %v924_v41  ;;  %879 = vmatpush3.bf16.msra.mxu1 %v981_v5  ;;  %v37_v5 = vld [vmem:[%s1222_s0 + $0x68] sm:$0xff] }
  0x1e   :  { %876 = vmatprep.subr.bf16.mxu1 %v1000_v10  ;;  %v392_v9 = vmul.f32 %v53_v47, %v37_v5  ;;  %v62_v12 = vpack.c.bf16 %v37_v5, %v36_v4 }
  0x20   :  { %856 = vmatpush3.bf16.msra.mxu0 %v924_v41  ;;  %v401_v13 = vpack.c.bf16 %v392_v9, %v391_v8 }
  0x21   :  { %880 = vmatpush3.bf16.msra.mxu1 %v1000_v10  ;;  %v61_v10 = vpack.c.bf16 %v35_v3, %v34_v2 }
  0x22   :  { %818 = vmatmul.mubr.msk.bf16.gmra.mrb[8].mxu1 %vm112_vm0, %v77_v50 }
  0x23   :  { %858 = vmatmul.mubr.msk.bf16.vlgmr.msra.gmra.mrb[0].mxu0 %vm112_vm0, %v396_v51  ;;  %821 = vmatprep.mubr.msk.bf16.mxu1 %vm112_vm0, %v78_v52 }
  0x24   :  { %861 = vmatprep.mubr.msk.bf16.mxu0 %vm112_vm0, %v397_v53 }
  0x2a   :  { %822 = vmatmul.mubr.msk.bf16.gmra.mrb[12].mxu1 %vm112_vm0, %v79_v62 }
  0x2b   :  { %862 = vmatmul.mubr.msk.bf16.gmra.mrb[4].mxu0 %vm112_vm0, %v398_v63  ;;  %841 = vmatprep.mubr.msk.bf16.mxu1 %vm112_vm0, %v60_v0 }
  0x2c   :  { %865 = vmatprep.mubr.msk.bf16.mxu0 %vm112_vm0, %v399_v1 }
  0x32   :  { %842 = vmatmul.mubr.msk.bf16.vlgmr.msra.gmra.mrb[8].mxu1 %vm112_vm0, %v61_v10 }
  0x33   :  { %866 = vmatmul.mubr.msk.bf16.gmra.mrb[8].mxu0 %vm112_vm0, %v400_v11  ;;  %845 = vmatprep.mubr.msk.bf16.mxu1 %vm112_vm0, %v62_v12 }
  0x34   :  { %869 = vmatprep.mubr.msk.bf16.mxu0 %vm112_vm0, %v401_v13 }
  0x3a   :  { %846 = vmatmul.mubr.msk.bf16.gmra.mrb[12].mxu1 %vm112_vm0, %v63_v18 }
  0x3b   :  { %870 = vmatmul.mubr.msk.bf16.gmra.mrb[12].mxu0 %vm112_vm0, %v402_v19 }
  0xe5   :  { %v811_v20 = vpop.f32.mrb[0].mxu1 }
  0xe6   :  { %v171_v21 = vpop.f32.mrb[1].mxu1 }
  0xe7   :  { %v812_v22 = vpop.f32.mrb[2].mxu1 }
  0xe8   :  { %v174_v23 = vpop.f32.mrb[3].mxu1 }
  0xed   :  { %v815_v24 = vpop.f32.mrb[4].mxu1 }
  0xee   :  { %v187_v25 = vpop.f32.mrb[5].mxu1 }
  0xef   :  { %v816_v26 = vpop.f32.mrb[6].mxu1 }
  0xf0   :  { %v190_v27 = vpop.f32.mrb[7].mxu1 }
  0xf6   :  { %v859_v28 = vpop.f32.mrb[0].mxu0 }
  0xf7   :  { %v881_v30 = vadd.f32 %v859_v28, %v811_v20  ;;  %v493_v31 = vpop.f32.mrb[1].mxu0 }
  0xf8   :  { %v882_v32 = vadd.f32 %v493_v31, %v171_v21  ;;  %v860_v33 = vpop.f32.mrb[2].mxu0 }
  0xf9   :  { %v581_v34 = vadd.f32 %v881_v30, %v1137_v29  ;;  %v883_v35 = vadd.f32 %v860_v33, %v812_v22  ;;  %v496_v36 = vpop.f32.mrb[3].mxu0 }
  0xfa   :  { %v579_v37 = vadd.f32 %v882_v32, %v1137_v29  ;;  %v884_v38 = vadd.f32 %v496_v36, %v174_v23 }
  0xfb   :  { %v597_v39 = vmax.f32 %v581_v34, 0.0  ;;  %v582_v40 = vadd.f32 %v883_v35, %v1137_v29 }
  0xfc   :  { %v595_v41 = vmax.f32 %v579_v37, 0.0  ;;  %v580_v42 = vadd.f32 %v884_v38, %v1137_v29 }
  0xfd   :  { %v751_v43 = vpack.c.bf16 %v597_v39, %v597_v39  ;;  %v598_v44 = vmax.f32 %v582_v40, 0.0 }
  0xfe   :  { %v749_v45 = vpack.c.bf16 %v595_v41, %v595_v41  ;;  %v596_v46 = vmax.f32 %v580_v42, 0.0  ;;  %v863_v47 = vpop.f32.mrb[4].mxu0 }
  0xff   :  { %678 = vst.msk [vmem:[%s1225_s6 + $0x8] sm:$0xf] %vm675_vm1, %v751_v43  ;;  %v752_v48 = vpack.c.bf16 %v598_v44, %v598_v44  ;;  %v885_v49 = vadd.f32 %v863_v47, %v815_v24  ;;  %v509_v50 = vpop.f32.mrb[5].mxu0 }
 0x100   :  { %676 = vst.msk [vmem:[%s1225_s6] sm:$0xf] %vm675_vm1, %v749_v45  ;;  %v750_v51 = vpack.c.bf16 %v596_v46, %v596_v46  ;;  %v886_v52 = vadd.f32 %v509_v50, %v187_v25  ;;  %v864_v53 = vpop.f32.mrb[6].mxu0 }
 0x101   :  { %679 = vst.msk [vmem:[%s1225_s6 + $0xc] sm:$0xf] %vm675_vm1, %v752_v48  ;;  %v585_v54 = vadd.f32 %v885_v49, %v1137_v29  ;;  %v887_v55 = vadd.f32 %v864_v53, %v816_v26  ;;  %v512_v56 = vpop.f32.mrb[7].mxu0 }
 0x102   :  { %677 = vst.msk [vmem:[%s1225_s6 + $0x4] sm:$0xf] %vm675_vm1, %v750_v51  ;;  %v583_v57 = vadd.f32 %v886_v52, %v1137_v29  ;;  %v888_v58 = vadd.f32 %v512_v56, %v190_v27 }
 0x103   :  { %v601_v59 = vmax.f32 %v585_v54, 0.0  ;;  %v586_v60 = vadd.f32 %v887_v55, %v1137_v29 }
 0x104   :  { %v599_v61 = vmax.f32 %v583_v57, 0.0  ;;  %v584_v62 = vadd.f32 %v888_v58, %v1137_v29 }
 0x105   :  { %v755_v63 = vpack.c.bf16 %v601_v59, %v601_v59  ;;  %v602_v0 = vmax.f32 %v586_v60, 0.0  ;;  %v843_v1 = vpop.f32.mrb[8].mxu1 }
 0x106   :  { %v753_v2 = vpack.c.bf16 %v599_v61, %v599_v61  ;;  %v600_v3 = vmax.f32 %v584_v62, 0.0  ;;  %v867_v4 = vpop.f32.mrb[8].mxu0  ;;  %v348_v5 = vpop.f32.mrb[9].mxu1 }
 0x107   :  { %682 = vst.msk [vmem:[%s1225_s6 + $0x18] sm:$0xf] %vm675_vm1, %v755_v63  ;;  %v756_v6 = vpack.c.bf16 %v602_v0, %v602_v0  ;;  %v889_v7 = vadd.f32 %v867_v4, %v843_v1  ;;  %v525_v8 = vpop.f32.mrb[9].mxu0  ;;  %v844_v9 = vpop.f32.mrb[10].mxu1 }
 0x108   :  { %680 = vst.msk [vmem:[%s1225_s6 + $0x10] sm:$0xf] %vm675_vm1, %v753_v2  ;;  %v754_v10 = vpack.c.bf16 %v600_v3, %v600_v3  ;;  %v890_v11 = vadd.f32 %v525_v8, %v348_v5  ;;  %v868_v12 = vpop.f32.mrb[10].mxu0  ;;  %v351_v13 = vpop.f32.mrb[11].mxu1 }
 0x109   :  { %683 = vst.msk [vmem:[%s1225_s6 + $0x1c] sm:$0xf] %vm675_vm1, %v756_v6  ;;  %v589_v14 = vadd.f32 %v889_v7, %v1137_v29  ;;  %v891_v15 = vadd.f32 %v868_v12, %v844_v9  ;;  %v528_v16 = vpop.f32.mrb[11].mxu0 }
 0x10a   :  { %681 = vst.msk [vmem:[%s1225_s6 + $0x14] sm:$0xf] %vm675_vm1, %v754_v10  ;;  %v587_v17 = vadd.f32 %v890_v11, %v1137_v29  ;;  %v892_v18 = vadd.f32 %v528_v16, %v351_v13 }
 0x10b   :  { %v605_v19 = vmax.f32 %v589_v14, 0.0  ;;  %v590_v20 = vadd.f32 %v891_v15, %v1137_v29 }
 0x10c   :  { %v603_v21 = vmax.f32 %v587_v17, 0.0  ;;  %v588_v22 = vadd.f32 %v892_v18, %v1137_v29 }
 0x10d   :  { %v759_v23 = vpack.c.bf16 %v605_v19, %v605_v19  ;;  %v606_v24 = vmax.f32 %v590_v20, 0.0  ;;  %v847_v25 = vpop.f32.mrb[12].mxu1 }
 0x10e   :  { %v757_v26 = vpack.c.bf16 %v603_v21, %v603_v21  ;;  %v604_v27 = vmax.f32 %v588_v22, 0.0  ;;  %v871_v28 = vpop.f32.mrb[12].mxu0  ;;  %v364_v30 = vpop.f32.mrb[13].mxu1 }
 0x10f   :  { %686 = vst.msk [vmem:[%s1225_s6 + $0x28] sm:$0xf] %vm675_vm1, %v759_v23  ;;  %v760_v31 = vpack.c.bf16 %v606_v24, %v606_v24  ;;  %v893_v32 = vadd.f32 %v871_v28, %v847_v25  ;;  %v541_v33 = vpop.f32.mrb[13].mxu0  ;;  %v848_v34 = vpop.f32.mrb[14].mxu1 }
 0x110   :  { %684 = vst.msk [vmem:[%s1225_s6 + $0x20] sm:$0xf] %vm675_vm1, %v757_v26  ;;  %v758_v35 = vpack.c.bf16 %v604_v27, %v604_v27  ;;  %v894_v36 = vadd.f32 %v541_v33, %v364_v30  ;;  %v872_v37 = vpop.f32.mrb[14].mxu0  ;;  %v367_v38 = vpop.f32.mrb[15].mxu1 }
 0x111   :  { %687 = vst.msk [vmem:[%s1225_s6 + $0x2c] sm:$0xf] %vm675_vm1, %v760_v31  ;;  %v593_v39 = vadd.f32 %v893_v32, %v1137_v29  ;;  %v895_v40 = vadd.f32 %v872_v37, %v848_v34  ;;  %v544_v41 = vpop.f32.mrb[15].mxu0 }
 0x112   :  { %685 = vst.msk [vmem:[%s1225_s6 + $0x24] sm:$0xf] %vm675_vm1, %v758_v35  ;;  %v591_v42 = vadd.f32 %v894_v36, %v1137_v29  ;;  %v896_v43 = vadd.f32 %v544_v41, %v367_v38 }
 0x113   :  { %v609_v44 = vmax.f32 %v593_v39, 0.0  ;;  %v594_v45 = vadd.f32 %v895_v40, %v1137_v29 }
 0x114   :  { %v607_v46 = vmax.f32 %v591_v42, 0.0  ;;  %v592_v47 = vadd.f32 %v896_v43, %v1137_v29 }
 0x115   :  { %v763_v48 = vpack.c.bf16 %v609_v44, %v609_v44  ;;  %v610_v49 = vmax.f32 %v594_v45, 0.0 }
 0x116   :  { %v761_v50 = vpack.c.bf16 %v607_v46, %v607_v46  ;;  %v608_v51 = vmax.f32 %v592_v47, 0.0 }
 0x117   :  { %690 = vst.msk [vmem:[%s1225_s6 + $0x38] sm:$0xf] %vm675_vm1, %v763_v48  ;;  %v764_v52 = vpack.c.bf16 %v610_v49, %v610_v49 }
 0x118   :  { %688 = vst.msk [vmem:[%s1225_s6 + $0x30] sm:$0xf] %vm675_vm1, %v761_v50  ;;  %v762_v53 = vpack.c.bf16 %v608_v51, %v608_v51 }
 0x119   :  { %691 = vst.msk [vmem:[%s1225_s6 + $0x3c] sm:$0xf] %vm675_vm1, %v764_v52 }
 0x11a   :  { %689 = vst.msk [vmem:[%s1225_s6 + $0x34] sm:$0xf] %vm675_vm1, %v762_v53 }

// kernel: esim_forward.11
= control target key start
LH: loop header
LB: loop body
LE: loop exit
PB: predicated region body
PF: predicated region fallthrough
CT: control target
= control target key end

     0   :  { %v2314_v0 = vmov 0.0   ;;  %vm130_vm0 = vcmask 523264   ;;  %vm2315_vm1 = vmmov 0   ;;  %v90_v49 = vlaneseq  ;;  %s2983_s1 = inlined_call_operand.vmem [shape: f32[8,8,64], index: 1, kind: input, shape index: {}]   ;;  %s2984_s0 = inlined_call_operand.vmem [shape: f32[8,8,64], index: 0, kind: input, shape index: {}]   ;;  %s2985_s4 = inlined_call_operand.vmem [shape: f32[8,1,8], index: 4, kind: input, shape index: {}]   ;;  %s2986_s2 = inlined_call_operand.vmem [shape: f32[8,1,8], index: 2, kind: input, shape index: {}]   ;;  %s2987_s3 = inlined_call_operand.vmem [shape: f32[8,8,1], index: 3, kind: input, shape index: {}]   ;;  %s2988_s5 = inlined_call_operand.vmem [shape: f32[8,8,1], index: 5, kind: input, shape index: {}]   ;;  %s2989_s6 = inlined_call_operand.vmem [shape: f32[8,8,64], index: 6, kind: output, shape index: {0}]   ;;  %s2990_s7 = inlined_call_operand.vmem [shape: f32[8,8,64], index: 7, kind: output, shape index: {1}]  }
   0x1   :  { %2053 = vmatprep.subr.bf16.mxu0 %v2314_v0  ;;  %2059 = vmatprep.subr.bf16.mxu1 %v2314_v0  ;;  %v42_v1 = vld [vmem:[%s2983_s1] sm:$0xff]  ;;  %v43_v2 = vld [vmem:[%s2983_s1 + $0x8] sm:$0xff]  ;;  %v44_v5 = vld [vmem:[%s2983_s1 + $0x10] sm:$0xff]  ;;  %vm499_vm2 = vcmask 64512   ;;  %vm1079_vm3 = vcmask 1043456  }
   0x2   :  { %v2365_v3 = vpack.c.bf16 %v42_v1, %v42_v1  ;;  %v2367_v4 = vpack.c.bf16 %v43_v2, %v43_v2  ;;  %2055 = vmatprep.mubr.msk.bf16.mxu0 %vm2315_vm1, %v2314_v0  ;;  %2061 = vmatprep.mubr.msk.bf16.mxu1 %vm2315_vm1, %v2314_v0  ;;  %v45_v6 = vld [vmem:[%s2983_s1 + $0x18] sm:$0xff]  ;;  %v26_v9 = vld [vmem:[%s2984_s0] sm:$0xff]  ;;  %v27_v10 = vld [vmem:[%s2984_s0 + $0x8] sm:$0xff]  ;;  %v2391_v11 = vpack.c.bf16 %v44_v5, %v44_v5  ;;  %v91_v52 = vshrl.u32 %v90_v49, 7 }
   0x3   :  { %v2393_v12 = vpack.c.bf16 %v45_v6, %v45_v6  ;;  %v2395_v13 = vpack.c.bf16 %v26_v9, %v26_v9  ;;  %v2397_v14 = vpack.c.bf16 %v27_v10, %v27_v10  ;;  %v46_v17 = vld [vmem:[%s2983_s1 + $0x20] sm:$0xff]  ;;  %v47_v18 = vld [vmem:[%s2983_s1 + $0x28] sm:$0xff]  ;;  %v28_v19 = vld [vmem:[%s2984_s0 + $0x10] sm:$0xff] }
   0x4   :  { %v135_v7 = vsel %vm130_vm0, %v2365_v3, 0  ;;  %v181_v8 = vsel %vm130_vm0, %v2367_v4, 0  ;;  %v227_v15 = vsel %vm130_vm0, %v2391_v11, 0  ;;  %v29_v20 = vld [vmem:[%s2984_s0 + $0x18] sm:$0xff]  ;;  %v2423_v21 = vpack.c.bf16 %v46_v17, %v46_v17  ;;  %v48_v27 = vld [vmem:[%s2983_s1 + $0x30] sm:$0xff]  ;;  %v30_v29 = vld [vmem:[%s2984_s0 + $0x20] sm:$0xff] }
   0x5   :  { %2054 = vmatpush3.bf16.xpose.msra.mxu0 %v135_v7  ;;  %2060 = vmatpush3.bf16.xpose.msra.mxu1 %v181_v8  ;;  %v273_v16 = vsel %vm130_vm0, %v2393_v12, 0  ;;  %v2425_v22 = vpack.c.bf16 %v47_v18, %v47_v18  ;;  %v2429_v23 = vpack.c.bf16 %v28_v19, %v28_v19  ;;  %v2431_v24 = vpack.c.bf16 %v29_v20, %v29_v20  ;;  %v49_v28 = vld [vmem:[%s2983_s1 + $0x38] sm:$0xff]  ;;  %v31_v30 = vld [vmem:[%s2984_s0 + $0x28] sm:$0xff]  ;;  %v32_v37 = vld [vmem:[%s2984_s0 + $0x30] sm:$0xff] }
   0x6   :  { %2065 = vmatprep.subr.bf16.mxu0 %v2314_v0  ;;  %2071 = vmatprep.subr.bf16.mxu1 %v2314_v0  ;;  %v319_v25 = vsel %vm130_vm0, %v2423_v21, 0  ;;  %v2457_v31 = vpack.c.bf16 %v48_v27, %v48_v27  ;;  %v2459_v32 = vpack.c.bf16 %v49_v28, %v49_v28  ;;  %v2463_v33 = vpack.c.bf16 %v30_v29, %v30_v29  ;;  %v33_v38 = vld [vmem:[%s2984_s0 + $0x38] sm:$0xff]  ;;  %v58_v50 = vld [vmem:[%s2985_s4] sm:$0x1]  ;;  %v59_v51 = vld [vmem:[%s2985_s4 + $0x1] sm:$0x1] }
   0x7   :  { %v365_v26 = vsel %vm130_vm0, %v2425_v22, 0  ;;  %v2465_v34 = vpack.c.bf16 %v31_v30, %v31_v30  ;;  %v2487_v39 = vpack.c.bf16 %v32_v37, %v32_v37  ;;  %v2489_v40 = vpack.c.bf16 %v33_v38, %v33_v38  ;;  %v60_v58 = vld [vmem:[%s2985_s4 + $0x2] sm:$0x1]  ;;  %v61_v59 = vld [vmem:[%s2985_s4 + $0x3] sm:$0x1] }
   0x8   :  { %v411_v35 = vsel %vm130_vm0, %v2457_v31, 0  ;;  %v457_v36 = vsel %vm130_vm0, %v2459_v32, 0  ;;  %v132_v41 = vsel %vm130_vm0, %v2395_v13, 0  ;;  %v178_v42 = vsel %vm130_vm0, %v2397_v14, 0  ;;  %v62_v18 = vld [vmem:[%s2985_s4 + $0x4] sm:$0x1] }
   0x9   :  { %v224_v43 = vsel %vm130_vm0, %v2429_v23, 0  ;;  %v270_v44 = vsel %vm130_vm0, %v2431_v24, 0  ;;  %v316_v45 = vsel %vm130_vm0, %v2463_v33, 0  ;;  %v362_v46 = vsel %vm130_vm0, %v2465_v34, 0 }
   0xa   :  { %v408_v47 = vsel %vm130_vm0, %v2487_v39, 0  ;;  %v454_v48 = vsel %vm130_vm0, %v2489_v40, 0  ;;  %v1941_v53 = vadd.f32 -1.0, %v58_v50  ;;  %v1942_v54 = vadd.f32 -1.0, %v59_v51 }
   0xb   :  { %v2561_v55 = vsub.s32 0, %v91_v52  ;;  %v1943_v60 = vadd.f32 -1.0, %v60_v58  ;;  %v1944_v63 = vadd.f32 -1.0, %v61_v59  ;;  %v1945_v30 = vadd.f32 -1.0, %v62_v18 }
   0xc   :  { %2056 = vmatmul.mubr.msk.bf16.vlgmr.msra.gmra.mrb[0].mxu0 %vm130_vm0, %v2395_v13  ;;  %2062 = vmatmul.mubr.msk.bf16.vlgmr.msra.gmra.mrb[0].mxu1 %vm130_vm0, %v2397_v14  ;;  %v74_v56 = vmul.f32 1e+09, %v1941_v53  ;;  %v75_v57 = vmul.f32 1e+09, %v1942_v54 }
   0xd   :  { %2066 = vmatpush3.bf16.xpose.msra.mxu0 %v227_v15  ;;  %2072 = vmatpush3.bf16.xpose.msra.mxu1 %v273_v16  ;;  %v76_v5 = vmul.f32 1e+09, %v1943_v60  ;;  %v77_v10 = vmul.f32 1e+09, %v1944_v63  ;;  %v63_v15 = vld [vmem:[%s2985_s4 + $0x5] sm:$0x1] }
   0xe   :  { %2067 = vmatprep.mubr.msk.bf16.mxu0 %vm2315_vm1, %v2314_v0  ;;  %2073 = vmatprep.mubr.msk.bf16.mxu1 %vm2315_vm1, %v2314_v0  ;;  %v93_v61 = vrot.slane %v74_v56, %v2561_v55  ;;  %v97_v62 = vrot.slane %v75_v57, %v2561_v55 }
   0xf   :  { %2077 = vmatprep.subr.bf16.mxu0 %v2314_v0  ;;  %2083 = vmatprep.subr.bf16.mxu1 %v2314_v0  ;;  %v101_v28 = vrot.slane %v76_v5, %v2561_v55  ;;  %v105_v29 = vrot.slane %v77_v10, %v2561_v55  ;;  %v589_v10 = vld [vmem:[%s2986_s2 + $0x1] sm:$0x1] }
  0x14   :  { %2068 = vmatmul.mubr.msk.bf16.vlgmr.msra.gmra.mrb[4].mxu0 %vm130_vm0, %v2429_v23  ;;  %2074 = vmatmul.mubr.msk.bf16.vlgmr.msra.gmra.mrb[4].mxu1 %vm130_vm0, %v2431_v24 }
  0x15   :  { %2078 = vmatpush3.bf16.xpose.msra.mxu0 %v319_v25  ;;  %2084 = vmatpush3.bf16.xpose.msra.mxu1 %v365_v26  ;;  %v1946_v26 = vadd.f32 -1.0, %v63_v15 }
  0x16   :  { %2079 = vmatprep.mubr.msk.bf16.mxu0 %vm2315_vm1, %v2314_v0  ;;  %2085 = vmatprep.mubr.msk.bf16.mxu1 %vm2315_vm1, %v2314_v0 }
  0x17   :  { %2089 = vmatprep.subr.bf16.mxu0 %v2314_v0  ;;  %2095 = vmatprep.subr.bf16.mxu1 %v2314_v0  ;;  %v79_v37 = vmul.f32 1e+09, %v1946_v26  ;;  %v1958_v26 = vadd.f32 -1.0, %v589_v10  ;;  %v593_v10 = vld [vmem:[%s2986_s2 + $0x5] sm:$0x1] }
  0x19   :  { %v113_v52 = vrot.slane %v79_v37, %v2561_v55 }
  0x1c   :  { %2080 = vmatmul.mubr.msk.bf16.vlgmr.msra.gmra.mrb[8].mxu0 %vm130_vm0, %v2463_v33  ;;  %2086 = vmatmul.mubr.msk.bf16.vlgmr.msra.gmra.mrb[8].mxu1 %vm130_vm0, %v2465_v34 }
  0x1d   :  { %2090 = vmatpush3.bf16.xpose.msra.mxu0 %v411_v35  ;;  %2096 = vmatpush3.bf16.xpose.msra.mxu1 %v457_v36 }
  0x1e   :  { %2091 = vmatprep.mubr.msk.bf16.mxu0 %vm2315_vm1, %v2314_v0  ;;  %2097 = vmatprep.mubr.msk.bf16.mxu1 %vm2315_vm1, %v2314_v0 }
  0x1f   :  { %2101 = vmatprep.subr.bf16.mxu0 %v2314_v0  ;;  %2107 = vmatprep.subr.bf16.mxu1 %v2314_v0 }
  0x24   :  { %2092 = vmatmul.mubr.msk.bf16.vlgmr.msra.gmra.mrb[12].mxu0 %vm130_vm0, %v2487_v39  ;;  %2098 = vmatmul.mubr.msk.bf16.vlgmr.msra.gmra.mrb[12].mxu1 %vm130_vm0, %v2489_v40 }
  0x25   :  { %2102 = vmatpush3.bf16.xpose.msra.mxu0 %v132_v41  ;;  %2108 = vmatpush3.bf16.xpose.msra.mxu1 %v178_v42 }
  0x26   :  { %2103 = vmatprep.mubr.msk.bf16.mxu0 %vm2315_vm1, %v2314_v0  ;;  %2109 = vmatprep.mubr.msk.bf16.mxu1 %vm2315_vm1, %v2314_v0 }
  0x27   :  { %2113 = vmatprep.subr.bf16.mxu0 %v2314_v0  ;;  %2119 = vmatprep.subr.bf16.mxu1 %v2314_v0 }
  0x2c   :  { %2104 = vmatmul.mubr.msk.bf16.vlgmr.msra.gmra.mrb[16].mxu0 %vm130_vm0, %v2365_v3  ;;  %2110 = vmatmul.mubr.msk.bf16.vlgmr.msra.gmra.mrb[16].mxu1 %vm130_vm0, %v2367_v4 }
  0x2d   :  { %2114 = vmatpush3.bf16.xpose.msra.mxu0 %v224_v43  ;;  %2120 = vmatpush3.bf16.xpose.msra.mxu1 %v270_v44  ;;  %v78_v44 = vmul.f32 1e+09, %v1945_v30 }
  0x2e   :  { %2115 = vmatprep.mubr.msk.bf16.mxu0 %vm2315_vm1, %v2314_v0  ;;  %2121 = vmatprep.mubr.msk.bf16.mxu1 %vm2315_vm1, %v2314_v0 }
  0x2f   :  { %2125 = vmatprep.subr.bf16.mxu0 %v2314_v0  ;;  %2131 = vmatprep.subr.bf16.mxu1 %v2314_v0  ;;  %v109_v54 = vrot.slane %v78_v44, %v2561_v55 }
  0x34   :  { %2116 = vmatmul.mubr.msk.bf16.vlgmr.msra.gmra.mrb[20].mxu0 %vm130_vm0, %v2391_v11  ;;  %2122 = vmatmul.mubr.msk.bf16.vlgmr.msra.gmra.mrb[20].mxu1 %vm130_vm0, %v2393_v12 }
  0x35   :  { %2126 = vmatpush3.bf16.xpose.msra.mxu0 %v316_v45  ;;  %2132 = vmatpush3.bf16.xpose.msra.mxu1 %v362_v46 }
  0x36   :  { %2127 = vmatprep.mubr.msk.bf16.mxu0 %vm2315_vm1, %v2314_v0  ;;  %2133 = vmatprep.mubr.msk.bf16.mxu1 %vm2315_vm1, %v2314_v0 }
  0x37   :  { %2137 = vmatprep.subr.bf16.mxu0 %v2314_v0  ;;  %2143 = vmatprep.subr.bf16.mxu1 %v2314_v0 }
  0x3c   :  { %2128 = vmatmul.mubr.msk.bf16.vlgmr.msra.gmra.mrb[24].mxu0 %vm130_vm0, %v2423_v21  ;;  %2134 = vmatmul.mubr.msk.bf16.vlgmr.msra.gmra.mrb[24].mxu1 %vm130_vm0, %v2425_v22 }
  0x3d   :  { %2138 = vmatpush3.bf16.xpose.msra.mxu0 %v408_v47  ;;  %2144 = vmatpush3.bf16.xpose.msra.mxu1 %v454_v48  ;;  %v64_v47 = vld [vmem:[%s2985_s4 + $0x6] sm:$0x1]  ;;  %v65_v48 = vld [vmem:[%s2985_s4 + $0x7] sm:$0x1] }
  0x3e   :  { %2139 = vmatprep.mubr.msk.bf16.mxu0 %vm2315_vm1, %v2314_v0  ;;  %2145 = vmatprep.mubr.msk.bf16.mxu1 %vm2315_vm1, %v2314_v0  ;;  %v1947_v56 = vadd.f32 -1.0, %v64_v47  ;;  %v1948_v57 = vadd.f32 -1.0, %v65_v48 }
  0x3f   :  { %2155 = vmatprep.subr.bf16.mxu1 %v2314_v0  ;;  %2149 = vmatprep.subr.bf16.mxu0 %v2314_v0 }
  0x44   :  { %2140 = vmatmul.mubr.msk.bf16.vlgmr.msra.gmra.mrb[28].mxu0 %vm130_vm0, %v2457_v31  ;;  %2146 = vmatmul.mubr.msk.bf16.vlgmr.msra.gmra.mrb[28].mxu1 %vm130_vm0, %v2459_v32 }
  0x45   :  { %2151 = vmatprep.mubr.msk.bf16.mxu0 %vm2315_vm1, %v2314_v0  ;;  %2157 = vmatprep.mubr.msk.bf16.mxu1 %vm2315_vm1, %v2314_v0 }
  0xdf   :  { %v171_v1 = vpop.f32.mrb[0].mxu0  ;;  %v217_v2 = vpop.f32.mrb[0].mxu1 }
  0xe0   :  { %v2571_v6 = vadd.f32 %v171_v1, %v93_v61  ;;  %v2057_v7 = vpop.f32.mrb[1].mxu0  ;;  %v2573_v8 = vadd.f32 %v217_v2, %v97_v62  ;;  %v2063_v9 = vpop.f32.mrb[1].mxu1  ;;  %v80_v1 = vmul.f32 1e+09, %v1947_v56  ;;  %v81_v2 = vmul.f32 1e+09, %v1948_v57 }
  0xe1   :  { %v174_v16 = vpop.f32.mrb[2].mxu0  ;;  %v220_v17 = vpop.f32.mrb[2].mxu1  ;;  %v588_v9 = vld [vmem:[%s2986_s2] sm:$0x1] }
  0xe2   :  { %v2058_v19 = vpop.f32.mrb[3].mxu0  ;;  %v500_v20 = vsel %vm499_vm2, %v2571_v6, -inf  ;;  %v2064_v25 = vpop.f32.mrb[3].mxu1  ;;  %v503_v27 = vsel %vm499_vm2, %v2573_v8, -inf }
  0xe3   :  { %501 = vmax.xlane.f32.xlu0 %v500_v20  ;;  %v117_v19 = vrot.slane %v80_v1, %v2561_v55  ;;  %v121_v20 = vrot.slane %v81_v2, %v2561_v55  ;;  %v1957_v25 = vadd.f32 -1.0, %v588_v9  ;;  %v592_v9 = vld [vmem:[%s2986_s2 + $0x4] sm:$0x1] }
  0xe5   :  { %v604_v37 = vmul.f32 1e+09, %v1957_v25  ;;  %v1961_v25 = vadd.f32 -1.0, %v592_v9 }
  0xe7   :  { %504 = vmax.xlane.f32.xlu0 %v503_v27  ;;  %v263_v35 = vpop.f32.mrb[4].mxu0  ;;  %v309_v36 = vpop.f32.mrb[4].mxu1 }
  0xe8   :  { %v2587_v38 = vadd.f32 %v263_v35, %v101_v28  ;;  %v2069_v41 = vpop.f32.mrb[5].mxu0  ;;  %v2589_v42 = vadd.f32 %v309_v36, %v105_v29  ;;  %v2075_v43 = vpop.f32.mrb[5].mxu1 }
  0xe9   :  { %v266_v45 = vpop.f32.mrb[6].mxu0  ;;  %v312_v46 = vpop.f32.mrb[6].mxu1  ;;  %v605_v41 = vmul.f32 1e+09, %v1958_v26  ;;  %v1962_v26 = vadd.f32 -1.0, %v593_v10 }
  0xea   :  { %v2070_v49 = vpop.f32.mrb[7].mxu0  ;;  %v506_v50 = vsel %vm499_vm2, %v2587_v38, -inf  ;;  %v2076_v51 = vpop.f32.mrb[7].mxu1  ;;  %v509_v53 = vsel %vm499_vm2, %v2589_v42, -inf  ;;  %v590_v45 = vld [vmem:[%s2986_s2 + $0x2] sm:$0x1] }
  0xeb   :  { %507 = vmax.xlane.f32.xlu1 %v506_v50  ;;  %v591_v46 = vld [vmem:[%s2986_s2 + $0x3] sm:$0x1]  ;;  %v623_v51 = vrot.slane %v604_v37, %v2561_v55 }
  0xef   :  { %v401_v58 = vpop.f32.mrb[8].mxu1  ;;  %510 = vmax.xlane.f32.xlu1 %v509_v53  ;;  %v355_v59 = vpop.f32.mrb[8].mxu0  ;;  %v1959_v53 = vadd.f32 -1.0, %v590_v45 }
  0xf0   :  { %v2603_v60 = vadd.f32 %v401_v58, %v113_v52  ;;  %v2605_v61 = vadd.f32 %v355_v59, %v109_v54  ;;  %v2081_v62 = vpop.f32.mrb[9].mxu0  ;;  %v2087_v63 = vpop.f32.mrb[9].mxu1  ;;  %v627_v52 = vrot.slane %v605_v41, %v2561_v55  ;;  %v1960_v54 = vadd.f32 -1.0, %v591_v46 }
  0xf1   :  { %v404_v5 = vpop.f32.mrb[10].mxu1  ;;  %v358_v7 = vpop.f32.mrb[10].mxu0  ;;  %v606_v1 = vmul.f32 1e+09, %v1959_v53 }
  0xf2   :  { %v515_v15 = vsel %vm499_vm2, %v2603_v60, -inf  ;;  %v512_v16 = vsel %vm499_vm2, %v2605_v61, -inf  ;;  %v2082_v17 = vpop.f32.mrb[11].mxu0  ;;  %v2088_v18 = vpop.f32.mrb[11].mxu1  ;;  %v607_v2 = vmul.f32 1e+09, %v1960_v54 }
  0xf3   :  { %516 = vmax.xlane.f32.xlu1 %v515_v15  ;;  %513 = vmax.xlane.f32.xlu0 %v512_v16 }
  0xf7   :  { %v447_v27 = vpop.f32.mrb[12].mxu0  ;;  %v493_v28 = vpop.f32.mrb[12].mxu1 }
  0xf8   :  { %v2619_v29 = vadd.f32 %v447_v27, %v117_v19  ;;  %v2621_v30 = vadd.f32 %v493_v28, %v121_v20  ;;  %v2093_v35 = vpop.f32.mrb[13].mxu0  ;;  %v2099_v36 = vpop.f32.mrb[13].mxu1  ;;  %v631_v19 = vrot.slane %v606_v1, %v2561_v55  ;;  %v635_v20 = vrot.slane %v607_v2, %v2561_v55 }
  0xf9   :  { %v496_v43 = vpop.f32.mrb[14].mxu1  ;;  %v450_v44 = vpop.f32.mrb[14].mxu0 }
  0xfa   :  { %v521_v47 = vsel %vm499_vm2, %v2621_v30, -inf  ;;  %v518_v48 = vsel %vm499_vm2, %v2619_v29, -inf  ;;  %v2094_v49 = vpop.f32.mrb[15].mxu0  ;;  %v2100_v50 = vpop.f32.mrb[15].mxu1  ;;  %v608_v43 = vmul.f32 1e+09, %v1961_v25 }
  0xfb   :  { %522 = vmax.xlane.f32.xlu1 %v521_v47  ;;  %519 = vmax.xlane.f32.xlu0 %v518_v48  ;;  %v609_v44 = vmul.f32 1e+09, %v1962_v26  ;;  %v594_v47 = vld [vmem:[%s2986_s2 + $0x6] sm:$0x1]  ;;  %v595_v48 = vld [vmem:[%s2986_s2 + $0x7] sm:$0x1] }
  0xfc   :  { %v639_v53 = vrot.slane %v608_v43, %v2561_v55 }
  0xfd   :  { %v643_v54 = vrot.slane %v609_v44, %v2561_v55 }
  0xff   :  { %v694_v56 = vpop.f32.mrb[16].mxu0  ;;  %v734_v57 = vpop.f32.mrb[16].mxu1 }
 0x100   :  { %v2635_v58 = vadd.f32 %v694_v56, %v623_v51  ;;  %v2637_v59 = vadd.f32 %v734_v57, %v627_v52  ;;  %v2105_v62 = vpop.f32.mrb[17].mxu0  ;;  %v2111_v63 = vpop.f32.mrb[17].mxu1  ;;  %v1963_v56 = vadd.f32 -1.0, %v594_v47  ;;  %v1964_v57 = vadd.f32 -1.0, %v595_v48 }
 0x101   :  { %v737_v5 = vpop.f32.mrb[18].mxu1  ;;  %v697_v7 = vpop.f32.mrb[18].mxu0 }
 0x102   :  { %v983_v15 = vsel %vm499_vm2, %v2637_v59, -inf  ;;  %v980_v16 = vsel %vm499_vm2, %v2635_v58, -inf  ;;  %v2106_v17 = vpop.f32.mrb[19].mxu0  ;;  %v2112_v18 = vpop.f32.mrb[19].mxu1  ;;  %v610_v9 = vmul.f32 1e+09, %v1963_v56 }
 0x103   :  { %984 = vmax.xlane.f32.xlu1 %v983_v15  ;;  %981 = vmax.xlane.f32.xlu0 %v980_v16  ;;  %v611_v10 = vmul.f32 1e+09, %v1964_v57 }
 0x104   :  { %v647_v25 = vrot.slane %v610_v9, %v2561_v55 }
 0x105   :  { %v651_v26 = vrot.slane %v611_v10, %v2561_v55 }
 0x107   :  { %v774_v27 = vpop.f32.mrb[20].mxu0  ;;  %v814_v28 = vpop.f32.mrb[20].mxu1 }
 0x108   :  { %v2651_v35 = vadd.f32 %v774_v27, %v631_v19  ;;  %v2653_v36 = vadd.f32 %v814_v28, %v635_v20  ;;  %v2117_v37 = vpop.f32.mrb[21].mxu0  ;;  %v2123_v41 = vpop.f32.mrb[21].mxu1 }
 0x109   :  { %v817_v45 = vpop.f32.mrb[22].mxu1  ;;  %v777_v46 = vpop.f32.mrb[22].mxu0 }
 0x10a   :  { %v989_v49 = vsel %vm499_vm2, %v2653_v36, -inf  ;;  %v986_v50 = vsel %vm499_vm2, %v2651_v35, -inf  ;;  %v2118_v51 = vpop.f32.mrb[23].mxu0  ;;  %v2124_v52 = vpop.f32.mrb[23].mxu1 }
 0x10b   :  { %990 = vmax.xlane.f32.xlu1 %v989_v49  ;;  %987 = vmax.xlane.f32.xlu0 %v986_v50 }
 0x10f   :  { %v854_v62 = vpop.f32.mrb[24].mxu0  ;;  %v894_v63 = vpop.f32.mrb[24].mxu1 }
 0x110   :  { %v2667_v1 = vadd.f32 %v854_v62, %v639_v53  ;;  %v2669_v2 = vadd.f32 %v894_v63, %v643_v54  ;;  %v2129_v5 = vpop.f32.mrb[25].mxu0  ;;  %v2135_v7 = vpop.f32.mrb[25].mxu1 }
 0x111   :  { %v897_v15 = vpop.f32.mrb[26].mxu1  ;;  %v857_v16 = vpop.f32.mrb[26].mxu0 }
 0x112   :  { %v995_v17 = vsel %vm499_vm2, %v2669_v2, -inf  ;;  %v992_v18 = vsel %vm499_vm2, %v2667_v1, -inf  ;;  %v2130_v19 = vpop.f32.mrb[27].mxu0  ;;  %v2136_v20 = vpop.f32.mrb[27].mxu1 }
 0x113   :  { %996 = vmax.xlane.f32.xlu1 %v995_v17  ;;  %993 = vmax.xlane.f32.xlu0 %v992_v18 }
 0x117   :  { %v934_v27 = vpop.f32.mrb[28].mxu0  ;;  %v974_v28 = vpop.f32.mrb[28].mxu1 }
 0x118   :  { %v2677_v37 = vadd.f32 %v934_v27, %v647_v25  ;;  %v2679_v41 = vadd.f32 %v974_v28, %v651_v26  ;;  %v2141_v43 = vpop.f32.mrb[29].mxu0  ;;  %v2147_v44 = vpop.f32.mrb[29].mxu1 }
 0x119   :  { %v977_v45 = vpop.f32.mrb[30].mxu1  ;;  %v937_v46 = vpop.f32.mrb[30].mxu0 }
 0x11a   :  { %v1001_v47 = vsel %vm499_vm2, %v2679_v41, -inf  ;;  %v998_v48 = vsel %vm499_vm2, %v2677_v37, -inf  ;;  %v2142_v49 = vpop.f32.mrb[31].mxu0  ;;  %v2148_v50 = vpop.f32.mrb[31].mxu1 }
 0x11b   :  { %1002 = vmax.xlane.f32.xlu1 %v1001_v47  ;;  %999 = vmax.xlane.f32.xlu0 %v998_v48 }
 0x170   :  { %v502_v55 = vpop.xlane.xlu0 %501 }
 0x171   :  { %v524_v51 = vsub.f32 %v2571_v6, %v502_v55 }
 0x173   :  { %v532_v52 = vmul.f32 1.442695, %v524_v51 }
 0x174   :  { %v505_v53 = vpop.xlane.xlu0 %504 }
 0x175   :  { %2250 = vpow2.f32 %v532_v52  ;;  %v525_v54 = vsub.f32 %v2573_v8, %v505_v53 }
 0x177   :  { %v534_v56 = vmul.f32 1.442695, %v525_v54 }
 0x178   :  { %v508_v57 = vpop.xlane.xlu1 %507 }
 0x179   :  { %2252 = vpow2.f32 %v534_v56  ;;  %v526_v62 = vsub.f32 %v2587_v38, %v508_v57 }
 0x17b   :  { %v536_v63 = vmul.f32 1.442695, %v526_v62 }
 0x17c   :  { %v511_v5 = vpop.xlane.xlu1 %510 }
 0x17d   :  { %2254 = vpow2.f32 %v536_v63  ;;  %v527_v7 = vsub.f32 %v2589_v42, %v511_v5 }
 0x17f   :  { %v2689_v9 = vpop.eup %2250  ;;  %v538_v10 = vmul.f32 1.442695, %v527_v7 }
 0x180   :  { %v517_v15 = vpop.xlane.xlu1 %516  ;;  %v514_v6 = vpop.xlane.xlu0 %513  ;;  %v548_v16 = vsel %vm499_vm2, %v2689_v9, 0.0 }
 0x181   :  { %2256 = vpow2.f32 %v538_v10  ;;  %v529_v8 = vsub.f32 %v2603_v60, %v517_v15  ;;  %v528_v17 = vsub.f32 %v2605_v61, %v514_v6  ;;  %549 = vadd.xlane.f32.xlu0 %v548_v16  ;;  %v1080_v10 = vsel %vm1079_vm3, %v2365_v3, 0 }
 0x182   :  { %2150 = vmatpush3.bf16.msra.mxu0 %v1080_v10  ;;  %v1443_v10 = vld [vmem:[%s2987_s3 + $0x30] sm:$0xff] }
 0x183   :  { %v2695_v38 = vpop.eup %2252  ;;  %v542_v18 = vmul.f32 1.442695, %v529_v8  ;;  %v540_v19 = vmul.f32 1.442695, %v528_v17  ;;  %2161 = vmatprep.subr.bf16.mxu0 %v2314_v0 }
 0x184   :  { %v551_v42 = vsel %vm499_vm2, %v2695_v38, 0.0 }
 0x185   :  { %2258 = vpow2.f32 %v542_v18  ;;  %552 = vadd.xlane.f32.xlu1 %v551_v42 }
 0x186   :  { %2260 = vpow2.f32 %v540_v19 }
 0x187   :  { %v2699_v20 = vpop.eup %2254 }
 0x188   :  { %v523_v25 = vpop.xlane.xlu1 %522  ;;  %v520_v26 = vpop.xlane.xlu0 %519  ;;  %v554_v60 = vsel %vm499_vm2, %v2699_v20, 0.0 }
 0x189   :  { %v531_v61 = vsub.f32 %v2621_v30, %v523_v25  ;;  %v530_v27 = vsub.f32 %v2619_v29, %v520_v26  ;;  %555 = vadd.xlane.f32.xlu0 %v554_v60 }
 0x18b   :  { %v2705_v28 = vpop.eup %2256  ;;  %v546_v43 = vmul.f32 1.442695, %v531_v61  ;;  %v544_v44 = vmul.f32 1.442695, %v530_v27 }
 0x18c   :  { %v557_v45 = vsel %vm499_vm2, %v2705_v28, 0.0 }
 0x18d   :  { %2262 = vpow2.f32 %v546_v43  ;;  %558 = vadd.xlane.f32.xlu1 %v557_v45 }
 0x18e   :  { %2264 = vpow2.f32 %v544_v44 }
 0x18f   :  { %v2709_v46 = vpop.eup %2258 }
 0x190   :  { %v2711_v47 = vpop.eup %2260  ;;  %v985_v48 = vpop.xlane.xlu1 %984  ;;  %v563_v29 = vsel %vm499_vm2, %v2709_v46, 0.0 }
 0x191   :  { %v982_v49 = vpop.xlane.xlu0 %981  ;;  %v1005_v30 = vsub.f32 %v2637_v59, %v985_v48  ;;  %564 = vadd.xlane.f32.xlu1 %v563_v29  ;;  %v560_v55 = vsel %vm499_vm2, %v2711_v47, 0.0 }
 0x192   :  { %v1004_v50 = vsub.f32 %v2635_v58, %v982_v49  ;;  %561 = vadd.xlane.f32.xlu0 %v560_v55  ;;  %v2316_v55 = vmov 0  }
 0x193   :  { %v1014_v51 = vmul.f32 1.442695, %v1005_v30  ;;  %2249 = vset.pattern.permute.xlu1 %v2316_v55  ;;  %2248 = vset.pattern.permute.xlu0 %v2316_v55 }
 0x194   :  { %v1012_v52 = vmul.f32 1.442695, %v1004_v50 }
 0x195   :  { %2266 = vpow2.f32 %v1014_v51  ;;  %v1438_v51 = vld [vmem:[%s2987_s3 + $0x8] sm:$0xff] }
 0x196   :  { %2268 = vpow2.f32 %v1012_v52  ;;  %v1437_v52 = vld [vmem:[%s2987_s3] sm:$0xff] }
 0x197   :  { %v2719_v53 = vpop.eup %2262 }
 0x198   :  { %v2721_v54 = vpop.eup %2264  ;;  %v991_v56 = vpop.xlane.xlu1 %990  ;;  %v569_v59 = vsel %vm499_vm2, %v2719_v53, 0.0 }
 0x199   :  { %v988_v57 = vpop.xlane.xlu0 %987  ;;  %v1007_v58 = vsub.f32 %v2653_v36, %v991_v56  ;;  %570 = vadd.xlane.f32.xlu1 %v569_v59  ;;  %v566_v63 = vsel %vm499_vm2, %v2721_v54, 0.0  ;;  %v1439_v56 = vld [vmem:[%s2987_s3 + $0x10] sm:$0xff]  ;;  %v1440_v59 = vld [vmem:[%s2987_s3 + $0x18] sm:$0xff] }
 0x19a   :  { %v1006_v62 = vsub.f32 %v2651_v35, %v988_v57  ;;  %567 = vadd.xlane.f32.xlu0 %v566_v63  ;;  %v1125_v35 = vsel %vm1079_vm3, %v2367_v4, 0  ;;  %v1870_v57 = vld [vmem:[%s2988_s5 + $0x8] sm:$0xff] }
 0x19b   :  { %v1018_v5 = vmul.f32 1.442695, %v1007_v58  ;;  %2156 = vmatpush3.bf16.msra.mxu1 %v1125_v35  ;;  %v1872_v58 = vld [vmem:[%s2988_s5 + $0x18] sm:$0xff]  ;;  %v1874_v63 = vld [vmem:[%s2988_s5 + $0x28] sm:$0xff] }
 0x19c   :  { %v1016_v7 = vmul.f32 1.442695, %v1006_v62  ;;  %2167 = vmatprep.subr.bf16.mxu1 %v2314_v0  ;;  %v1441_v62 = vld [vmem:[%s2987_s3 + $0x20] sm:$0xff]  ;;  %v1444_v35 = vld [vmem:[%s2987_s3 + $0x38] sm:$0xff] }
 0x19d   :  { %2270 = vpow2.f32 %v1018_v5  ;;  %v1442_v5 = vld [vmem:[%s2987_s3 + $0x28] sm:$0xff] }
 0x19e   :  { %2272 = vpow2.f32 %v1016_v7  ;;  %v1876_v7 = vld [vmem:[%s2988_s5 + $0x38] sm:$0xff] }
 0x19f   :  { %v2732_v15 = vpop.eup %2266 }
 0x1a0   :  { %v2736_v36 = vpop.eup %2268  ;;  %v997_v6 = vpop.xlane.xlu1 %996  ;;  %v1031_v8 = vsel %vm499_vm2, %v2732_v15, 0.0 }
 0x1a1   :  { %v994_v16 = vpop.xlane.xlu0 %993  ;;  %v1009_v3 = vsub.f32 %v2669_v2, %v997_v6  ;;  %1032 = vadd.xlane.f32.xlu1 %v1031_v8  ;;  %v1028_v18 = vsel %vm499_vm2, %v2736_v36, 0.0  ;;  %v1869_v6 = vld [vmem:[%s2988_s5] sm:$0xff] }
 0x1a2   :  { %v1008_v17 = vsub.f32 %v2667_v1, %v994_v16  ;;  %1029 = vadd.xlane.f32.xlu0 %v1028_v18  ;;  %v1871_v16 = vld [vmem:[%s2988_s5 + $0x10] sm:$0xff]  ;;  %v1873_v8 = vld [vmem:[%s2988_s5 + $0x20] sm:$0xff] }
 0x1a3   :  { %v1022_v4 = vmul.f32 1.442695, %v1009_v3  ;;  %v1875_v3 = vld [vmem:[%s2988_s5 + $0x30] sm:$0xff] }
 0x1a4   :  { %v1020_v19 = vmul.f32 1.442695, %v1008_v17 }
 0x1a5   :  { %2274 = vpow2.f32 %v1022_v4 }
 0x1a6   :  { %2276 = vpow2.f32 %v1020_v19 }
 0x1a7   :  { %v2745_v42 = vpop.eup %2270 }
 0x1a8   :  { %v2747_v25 = vpop.eup %2272  ;;  %v1003_v26 = vpop.xlane.xlu1 %1002  ;;  %v1037_v1 = vsel %vm499_vm2, %v2745_v42, 0.0 }
 0x1a9   :  { %v1000_v60 = vpop.xlane.xlu0 %999  ;;  %v1011_v2 = vsub.f32 %v2679_v41, %v1003_v26  ;;  %1038 = vadd.xlane.f32.xlu1 %v1037_v1  ;;  %v1034_v27 = vsel %vm499_vm2, %v2747_v25, 0.0 }
 0x1aa   :  { %v1010_v61 = vsub.f32 %v2677_v37, %v1000_v60  ;;  %1035 = vadd.xlane.f32.xlu0 %v1034_v27 }
 0x1ab   :  { %v1026_v43 = vmul.f32 1.442695, %v1011_v2  ;;  %v1170_v2 = vsel %vm1079_vm3, %v2391_v11, 0 }
 0x1ac   :  { %v1024_v44 = vmul.f32 1.442695, %v1010_v61 }
 0x1ad   :  { %2278 = vpow2.f32 %v1026_v43 }
 0x1ae   :  { %2280 = vpow2.f32 %v1024_v44 }
 0x1af   :  { %v2755_v45 = vpop.eup %2274 }
 0x1b0   :  { %v2757_v48 = vpop.eup %2276  ;;  %v1043_v49 = vsel %vm499_vm2, %v2755_v45, 0.0 }
 0x1b1   :  { %1044 = vadd.xlane.f32.xlu1 %v1043_v49  ;;  %v1040_v37 = vsel %vm499_vm2, %v2757_v48, 0.0  ;;  %v1215_v49 = vsel %vm1079_vm3, %v2393_v12, 0 }
 0x1b2   :  { %1041 = vadd.xlane.f32.xlu0 %v1040_v37 }
 0x1b7   :  { %v2763_v41 = vpop.eup %2278 }
 0x1b8   :  { %v2765_v29 = vpop.eup %2280  ;;  %v1049_v30 = vsel %vm499_vm2, %v2763_v41, 0.0 }
 0x1b9   :  { %1050 = vadd.xlane.f32.xlu1 %v1049_v30  ;;  %v1046_v50 = vsel %vm499_vm2, %v2765_v29, 0.0  ;;  %v1260_v30 = vsel %vm1079_vm3, %v2423_v21, 0 }
 0x1ba   :  { %1047 = vadd.xlane.f32.xlu0 %v1046_v50 }
 0x1ca   :  { %1452 = vperm.xlu1 %2249, %v1438_v51  }
 0x1ce   :  { %1457 = vperm.xlu1 %2249, %v1439_v56  }
 0x1d0   :  { %1447 = vperm.xlu0 %2248, %v1437_v52   ;;  %v1305_v52 = vsel %vm1079_vm3, %v2425_v22, 0  ;;  %v1350_v22 = vsel %vm1079_vm3, %v2457_v31, 0 }
 0x1d2   :  { %1462 = vperm.xlu1 %2249, %v1440_v59  }
 0x1d4   :  { %1884 = vperm.xlu0 %2248, %v1870_v57  }
 0x1d6   :  { %1467 = vperm.xlu1 %2249, %v1441_v62  }
 0x1d8   :  { %1894 = vperm.xlu0 %2248, %v1872_v58  }
 0x1da   :  { %1472 = vperm.xlu1 %2249, %v1442_v5  }
 0x1dc   :  { %1904 = vperm.xlu0 %2248, %v1874_v63  }
 0x1de   :  { %1477 = vperm.xlu1 %2249, %v1443_v10   ;;  %v1512_v10 = vsel %vm1079_vm3, %v2395_v13, 0 }
 0x1e0   :  { %1914 = vperm.xlu0 %2248, %v1876_v7  }
 0x1e2   :  { %1482 = vperm.xlu1 %2249, %v1444_v35  }
 0x1e6   :  { %1879 = vperm.xlu1 %2249, %v1869_v6  }
 0x1ea   :  { %1889 = vperm.xlu1 %2249, %v1871_v16  }
 0x1ee   :  { %1899 = vperm.xlu1 %2249, %v1873_v8  }
 0x1f2   :  { %1909 = vperm.xlu1 %2249, %v1875_v3  }
 0x20e   :  { %v550_v17 = vpop.xlane.xlu0 %549 }
 0x20f   :  { %2282 = vrcp.f32 %v550_v17  ;;  %v1602_v17 = vsel %vm1079_vm3, %v2429_v23, 0 }
 0x212   :  { %v553_v18 = vpop.xlane.xlu1 %552 }
 0x213   :  { %2284 = vrcp.f32 %v553_v18 }
 0x216   :  { %v556_v4 = vpop.xlane.xlu0 %555 }
 0x217   :  { %2286 = vrcp.f32 %v556_v4 }
 0x219   :  { %v2283_v19 = vpop.eup %2282 }
 0x21a   :  { %v580_v26 = vmul.f32 %v2283_v19, %v2689_v9  ;;  %v559_v60 = vpop.xlane.xlu1 %558 }
 0x21b   :  { %2288 = vrcp.f32 %v559_v60 }
 0x21c   :  { %v1068_v1 = vpack.c.bf16 %v580_v26, %v580_v26 }
 0x21d   :  { %v2285_v61 = vpop.eup %2284 }
 0x21e   :  { %v581_v27 = vmul.f32 %v2285_v61, %v2695_v38  ;;  %v565_v43 = vpop.xlane.xlu1 %564  ;;  %2152 = vmatmul.mubr.msk.bf16.vlgmr.msra.gmra.mrb[32].mxu0 %vm499_vm2, %v1068_v1  ;;  %v1692_v1 = vsel %vm1079_vm3, %v2463_v33, 0 }
 0x21f   :  { %2290 = vrcp.f32 %v565_v43  ;;  %v562_v44 = vpop.xlane.xlu0 %561  ;;  %2162 = vmatpush3.bf16.msra.mxu0 %v1170_v2  ;;  %2163 = vmatprep.mubr.msk.bf16.mxu0 %vm2315_vm1, %v2314_v0 }
 0x220   :  { %2292 = vrcp.f32 %v562_v44  ;;  %v1069_v9 = vpack.c.bf16 %v581_v27, %v581_v27  ;;  %2173 = vmatprep.subr.bf16.mxu0 %v2314_v0 }
 0x221   :  { %v2287_v11 = vpop.eup %2286 }
 0x222   :  { %v582_v37 = vmul.f32 %v2287_v11, %v2699_v20  ;;  %2158 = vmatmul.mubr.msk.bf16.vlgmr.msra.gmra.mrb[32].mxu1 %vm499_vm2, %v1069_v9  ;;  %v1782_v9 = vsel %vm1079_vm3, %v2487_v39, 0  ;;  %v1827_v11 = vsel %vm1079_vm3, %v2489_v40, 0 }
 0x223   :  { %2168 = vmatpush3.bf16.msra.mxu1 %v1215_v49  ;;  %2169 = vmatprep.mubr.msk.bf16.mxu1 %vm2315_vm1, %v2314_v0 }
 0x224   :  { %v1070_v38 = vpack.c.bf16 %v582_v37, %v582_v37  ;;  %2179 = vmatprep.subr.bf16.mxu1 %v2314_v0 }
 0x225   :  { %v2289_v50 = vpop.eup %2288 }
 0x226   :  { %v583_v12 = vmul.f32 %v2289_v50, %v2705_v28  ;;  %v571_v55 = vpop.xlane.xlu1 %570  ;;  %2164 = vmatmul.mubr.msk.bf16.vlgmr.msra.gmra.mrb[36].mxu0 %vm499_vm2, %v1070_v38 }
 0x227   :  { %2294 = vrcp.f32 %v571_v55  ;;  %v568_v20 = vpop.xlane.xlu0 %567  ;;  %2174 = vmatpush3.bf16.msra.mxu0 %v1260_v30  ;;  %2175 = vmatprep.mubr.msk.bf16.mxu0 %vm2315_vm1, %v2314_v0 }
 0x228   :  { %2296 = vrcp.f32 %v568_v20  ;;  %v1071_v51 = vpack.c.bf16 %v583_v12, %v583_v12  ;;  %2185 = vmatprep.subr.bf16.mxu0 %v2314_v0 }
 0x229   :  { %v2291_v21 = vpop.eup %2290 }
 0x22a   :  { %v2293_v56 = vpop.eup %2292  ;;  %2170 = vmatmul.mubr.msk.bf16.vlgmr.msra.gmra.mrb[36].mxu1 %vm499_vm2, %v1071_v51  ;;  %v585_v57 = vmul.f32 %v2291_v21, %v2709_v46 }
 0x22b   :  { %v584_v28 = vmul.f32 %v2293_v56, %v2711_v47  ;;  %2180 = vmatpush3.bf16.msra.mxu1 %v1305_v52  ;;  %2181 = vmatprep.mubr.msk.bf16.mxu1 %vm2315_vm1, %v2314_v0  ;;  %v1395_v47 = vsel %vm1079_vm3, %v2459_v32, 0 }
 0x22c   :  { %2191 = vmatprep.subr.bf16.mxu1 %v2314_v0  ;;  %v1073_v63 = vpack.c.bf16 %v585_v57, %v585_v57 }
 0x22d   :  { %v1072_v59 = vpack.c.bf16 %v584_v28, %v584_v28 }
 0x22e   :  { %v1033_v58 = vpop.xlane.xlu1 %1032 }
 0x22f   :  { %2298 = vrcp.f32 %v1033_v58  ;;  %2176 = vmatmul.mubr.msk.bf16.vlgmr.msra.gmra.mrb[40].mxu0 %vm499_vm2, %v1072_v59  ;;  %v1030_v62 = vpop.xlane.xlu0 %1029 }
 0x230   :  { %2300 = vrcp.f32 %v1030_v62  ;;  %2186 = vmatpush3.bf16.msra.mxu0 %v1350_v22  ;;  %2187 = vmatprep.mubr.msk.bf16.mxu0 %vm2315_vm1, %v2314_v0 }
 0x231   :  { %v2295_v46 = vpop.eup %2294  ;;  %2197 = vmatprep.subr.bf16.mxu0 %v2314_v0 }
 0x232   :  { %v2297_v5 = vpop.eup %2296  ;;  %2182 = vmatmul.mubr.msk.bf16.vlgmr.msra.gmra.mrb[40].mxu1 %vm499_vm2, %v1073_v63  ;;  %v587_v7 = vmul.f32 %v2295_v46, %v2719_v53 }
 0x233   :  { %v586_v31 = vmul.f32 %v2297_v5, %v2721_v54  ;;  %2192 = vmatpush3.bf16.msra.mxu1 %v1395_v47  ;;  %2193 = vmatprep.mubr.msk.bf16.mxu1 %vm2315_vm1, %v2314_v0  ;;  %v1557_v54 = vsel %vm1079_vm3, %v2397_v14, 0 }
 0x234   :  { %2203 = vmatprep.subr.bf16.mxu1 %v2314_v0  ;;  %v1075_v16 = vpack.c.bf16 %v587_v7, %v587_v7 }
 0x235   :  { %v1074_v32 = vpack.c.bf16 %v586_v31, %v586_v31 }
 0x236   :  { %v1039_v35 = vpop.xlane.xlu1 %1038 }
 0x237   :  { %2302 = vrcp.f32 %v1039_v35  ;;  %2188 = vmatmul.mubr.msk.bf16.vlgmr.msra.gmra.mrb[44].mxu0 %vm499_vm2, %v1074_v32  ;;  %v1036_v6 = vpop.xlane.xlu0 %1035 }
 0x238   :  { %2304 = vrcp.f32 %v1036_v6  ;;  %2198 = vmatpush3.bf16.msra.mxu0 %v1512_v10  ;;  %2199 = vmatprep.mubr.msk.bf16.mxu0 %vm2315_vm1, %v2314_v0 }
 0x239   :  { %v2299_v53 = vpop.eup %2298  ;;  %2209 = vmatprep.subr.bf16.mxu0 %v2314_v0 }
 0x23a   :  { %v2301_v8 = vpop.eup %2300  ;;  %2194 = vmatmul.mubr.msk.bf16.vlgmr.msra.gmra.mrb[44].mxu1 %vm499_vm2, %v1075_v16  ;;  %v1061_v3 = vmul.f32 %v2299_v53, %v2732_v15 }
 0x23b   :  { %v1060_v13 = vmul.f32 %v2301_v8, %v2736_v36  ;;  %2204 = vmatpush3.bf16.msra.mxu1 %v1557_v54  ;;  %2205 = vmatprep.mubr.msk.bf16.mxu1 %vm2315_vm1, %v2314_v0  ;;  %v1647_v36 = vsel %vm1079_vm3, %v2431_v24, 0 }
 0x23c   :  { %2215 = vmatprep.subr.bf16.mxu1 %v2314_v0  ;;  %v1502_v19 = vpack.c.bf16 %v1061_v3, %v1061_v3 }
 0x23d   :  { %v1501_v14 = vpack.c.bf16 %v1060_v13, %v1060_v13 }
 0x23e   :  { %v1045_v18 = vpop.xlane.xlu1 %1044 }
 0x23f   :  { %2306 = vrcp.f32 %v1045_v18  ;;  %2200 = vmatmul.mubr.msk.bf16.vlgmr.msra.gmra.mrb[48].mxu0 %vm499_vm2, %v1501_v14  ;;  %v1042_v4 = vpop.xlane.xlu0 %1041 }
 0x240   :  { %2308 = vrcp.f32 %v1042_v4  ;;  %2210 = vmatpush3.bf16.msra.mxu0 %v1602_v17  ;;  %2211 = vmatprep.mubr.msk.bf16.mxu0 %vm2315_vm1, %v2314_v0 }
 0x241   :  { %v2303_v15 = vpop.eup %2302  ;;  %2221 = vmatprep.subr.bf16.mxu0 %v2314_v0 }
 0x242   :  { %v2305_v26 = vpop.eup %2304  ;;  %2206 = vmatmul.mubr.msk.bf16.vlgmr.msra.gmra.mrb[48].mxu1 %vm499_vm2, %v1502_v19  ;;  %v1063_v60 = vmul.f32 %v2303_v15, %v2745_v42 }
 0x243   :  { %v1062_v23 = vmul.f32 %v2305_v26, %v2747_v25  ;;  %2216 = vmatpush3.bf16.msra.mxu1 %v1647_v36  ;;  %2217 = vmatprep.mubr.msk.bf16.mxu1 %vm2315_vm1, %v2314_v0  ;;  %v1737_v25 = vsel %vm1079_vm3, %v2465_v34, 0 }
 0x244   :  { %2227 = vmatprep.subr.bf16.mxu1 %v2314_v0  ;;  %v1504_v27 = vpack.c.bf16 %v1063_v60, %v1063_v60 }
 0x245   :  { %v1503_v24 = vpack.c.bf16 %v1062_v23, %v1062_v23 }
 0x246   :  { %v1051_v2 = vpop.xlane.xlu1 %1050 }
 0x247   :  { %2310 = vrcp.f32 %v1051_v2  ;;  %2212 = vmatmul.mubr.msk.bf16.vlgmr.msra.gmra.mrb[52].mxu0 %vm499_vm2, %v1503_v24  ;;  %v1048_v61 = vpop.xlane.xlu0 %1047 }
 0x248   :  { %2312 = vrcp.f32 %v1048_v61  ;;  %2222 = vmatpush3.bf16.msra.mxu0 %v1692_v1  ;;  %2223 = vmatprep.mubr.msk.bf16.mxu0 %vm2315_vm1, %v2314_v0 }
 0x249   :  { %v2307_v42 = vpop.eup %2306  ;;  %2233 = vmatprep.subr.bf16.mxu0 %v2314_v0 }
 0x24a   :  { %v2309_v43 = vpop.eup %2308  ;;  %2218 = vmatmul.mubr.msk.bf16.vlgmr.msra.gmra.mrb[52].mxu1 %vm499_vm2, %v1504_v27  ;;  %v1065_v44 = vmul.f32 %v2307_v42, %v2755_v45  ;;  %v1453_v40 = vpop.permute.xlu1 %1452 }
 0x24b   :  { %v1064_v33 = vmul.f32 %v2309_v43, %v2757_v48  ;;  %2228 = vmatpush3.bf16.msra.mxu1 %v1737_v25  ;;  %2229 = vmatprep.mubr.msk.bf16.mxu1 %vm2315_vm1, %v2314_v0 }
 0x24c   :  { %2239 = vmatprep.subr.bf16.mxu1 %v2314_v0  ;;  %v1506_v49 = vpack.c.bf16 %v1065_v44, %v1065_v44 }
 0x24d   :  { %v1505_v34 = vpack.c.bf16 %v1064_v33, %v1064_v33 }
 0x24e   :  { %v1458_v50 = vpop.permute.xlu1 %1457 }
 0x24f   :  { %2224 = vmatmul.mubr.msk.bf16.vlgmr.msra.gmra.mrb[56].mxu0 %vm499_vm2, %v1505_v34  ;;  %v1448_v12 = vpop.permute.xlu0 %1447 }
 0x250   :  { %2234 = vmatpush3.bf16.msra.mxu0 %v1782_v9  ;;  %2235 = vmatprep.mubr.msk.bf16.mxu0 %vm2315_vm1, %v2314_v0 }
 0x251   :  { %v2311_v48 = vpop.eup %2310 }
 0x252   :  { %v2313_v37 = vpop.eup %2312  ;;  %2230 = vmatmul.mubr.msk.bf16.vlgmr.msra.gmra.mrb[56].mxu1 %vm499_vm2, %v1506_v49  ;;  %v1067_v39 = vmul.f32 %v2311_v48, %v2763_v41 }
 0x253   :  { %v1066_v45 = vmul.f32 %v2313_v37, %v2765_v29  ;;  %2240 = vmatpush3.bf16.msra.mxu1 %v1827_v11  ;;  %2241 = vmatprep.mubr.msk.bf16.mxu1 %vm2315_vm1, %v2314_v0  ;;  %v1463_v29 = vpop.permute.xlu1 %1462  ;;  %v1885_v33 = vpop.permute.xlu0 %1884 }
 0x254   :  { %v1508_v30 = vpack.c.bf16 %v1067_v39, %v1067_v39 }
 0x255   :  { %v1507_v38 = vpack.c.bf16 %v1066_v45, %v1066_v45 }
 0x257   :  { %2236 = vmatmul.mubr.msk.bf16.vlgmr.msra.gmra.mrb[60].mxu0 %vm499_vm2, %v1507_v38  ;;  %v1468_v22 = vpop.permute.xlu1 %1467 }
 0x25a   :  { %2242 = vmatmul.mubr.msk.bf16.vlgmr.msra.gmra.mrb[60].mxu1 %vm499_vm2, %v1508_v30 }
 0x25b   :  { %v1473_v32 = vpop.permute.xlu1 %1472 }
 0x25f   :  { %v1478_v13 = vpop.permute.xlu1 %1477 }
 0x263   :  { %v1483_v15 = vpop.permute.xlu1 %1482 }
 0x267   :  { %v1880_v27 = vpop.permute.xlu1 %1879 }
 0x26b   :  { %v1890_v45 = vpop.permute.xlu1 %1889 }
 0x2f1   :  { %v1116_v55 = vpop.f32.mrb[32].mxu0 }
 0x2f2   :  { %v1485_v20 = vmul.f32 %v1448_v12, %v1116_v55  ;;  %v2153_v51 = vpop.f32.mrb[33].mxu0 }
 0x2f3   :  { %v1119_v52 = vpop.f32.mrb[34].mxu0 }
 0x2f4   :  { %1493 = vst.msk [vmem:[%s2989_s6] sm:$0xff] %vm130_vm0, %v1485_v20  ;;  %v2154_v0 = vpop.f32.mrb[35].mxu0 }
 0x2f5   :  { %v1161_v41 = vpop.f32.mrb[32].mxu1  ;;  %v1900_v0 = vpop.permute.xlu1 %1899 }
 0x2f6   :  { %v1486_v21 = vmul.f32 %v1453_v40, %v1161_v41  ;;  %v2159_v56 = vpop.f32.mrb[33].mxu1  ;;  %v1895_v40 = vpop.permute.xlu0 %1894 }
 0x2f7   :  { %v1164_v28 = vpop.f32.mrb[34].mxu1 }
 0x2f8   :  { %1494 = vst.msk [vmem:[%s2989_s6 + $0x8] sm:$0xff] %vm130_vm0, %v1486_v21  ;;  %v2160_v57 = vpop.f32.mrb[35].mxu1 }
 0x2f9   :  { %v1206_v59 = vpop.f32.mrb[36].mxu0 }
 0x2fa   :  { %v1487_v58 = vmul.f32 %v1458_v50, %v1206_v59  ;;  %v2165_v62 = vpop.f32.mrb[37].mxu0  ;;  %v1905_v28 = vpop.permute.xlu0 %1904 }
 0x2fb   :  { %v1209_v63 = vpop.f32.mrb[38].mxu0 }
 0x2fc   :  { %1495 = vst.msk [vmem:[%s2989_s6 + $0x10] sm:$0xff] %vm130_vm0, %v1487_v58  ;;  %v2166_v47 = vpop.f32.mrb[39].mxu0 }
 0x2fd   :  { %v1251_v46 = vpop.f32.mrb[36].mxu1 }
 0x2fe   :  { %v1488_v5 = vmul.f32 %v1463_v29, %v1251_v46  ;;  %v2171_v31 = vpop.f32.mrb[37].mxu1  ;;  %v1910_v46 = vpop.permute.xlu1 %1909 }
 0x2ff   :  { %v1254_v7 = vpop.f32.mrb[38].mxu1 }
 0x300   :  { %1496 = vst.msk [vmem:[%s2989_s6 + $0x18] sm:$0xff] %vm130_vm0, %v1488_v5  ;;  %v2172_v10 = vpop.f32.mrb[39].mxu1 }
 0x302   :  { %v1296_v35 = vpop.f32.mrb[40].mxu0 }
 0x303   :  { %v1489_v6 = vmul.f32 %v1468_v22, %v1296_v35  ;;  %v2177_v16 = vpop.f32.mrb[41].mxu0 }
 0x304   :  { %v1299_v54 = vpop.f32.mrb[42].mxu0 }
 0x305   :  { %1497 = vst.msk [vmem:[%s2989_s6 + $0x20] sm:$0xff] %vm130_vm0, %v1489_v6  ;;  %v2178_v53 = vpop.f32.mrb[43].mxu0  ;;  %v1341_v8 = vpop.f32.mrb[40].mxu1 }
 0x306   :  { %v1490_v3 = vmul.f32 %v1473_v32, %v1341_v8  ;;  %v2183_v14 = vpop.f32.mrb[41].mxu1  ;;  %v1915_v32 = vpop.permute.xlu0 %1914 }
 0x307   :  { %v1344_v17 = vpop.f32.mrb[42].mxu1 }
 0x308   :  { %1498 = vst.msk [vmem:[%s2989_s6 + $0x28] sm:$0xff] %vm130_vm0, %v1490_v3  ;;  %v2184_v18 = vpop.f32.mrb[43].mxu1 }
 0x30a   :  { %v1386_v4 = vpop.f32.mrb[44].mxu0 }
 0x30b   :  { %v1491_v19 = vmul.f32 %v1478_v13, %v1386_v4  ;;  %v2189_v36 = vpop.f32.mrb[45].mxu0 }
 0x30c   :  { %v1389_v26 = vpop.f32.mrb[46].mxu0 }
 0x30d   :  { %1499 = vst.msk [vmem:[%s2989_s6 + $0x30] sm:$0xff] %vm130_vm0, %v1491_v19  ;;  %v2190_v23 = vpop.f32.mrb[47].mxu0  ;;  %v1431_v60 = vpop.f32.mrb[44].mxu1 }
 0x30e   :  { %v1492_v24 = vmul.f32 %v1483_v15, %v1431_v60  ;;  %v2195_v1 = vpop.f32.mrb[45].mxu1 }
 0x30f   :  { %v1434_v2 = vpop.f32.mrb[46].mxu1 }
 0x310   :  { %1500 = vst.msk [vmem:[%s2989_s6 + $0x38] sm:$0xff] %vm130_vm0, %v1492_v24  ;;  %v2196_v61 = vpop.f32.mrb[47].mxu1 }
 0x312   :  { %v1548_v25 = vpop.f32.mrb[48].mxu0 }
 0x313   :  { %v1917_v42 = vmul.f32 %v1880_v27, %v1548_v25  ;;  %v2201_v43 = vpop.f32.mrb[49].mxu0 }
 0x314   :  { %v1551_v44 = vpop.f32.mrb[50].mxu0 }
 0x315   :  { %1925 = vst.msk [vmem:[%s2990_s7] sm:$0xff] %vm130_vm0, %v1917_v42  ;;  %v2202_v34 = vpop.f32.mrb[51].mxu0  ;;  %v1593_v9 = vpop.f32.mrb[48].mxu1 }
 0x316   :  { %v1918_v49 = vmul.f32 %v1885_v33, %v1593_v9  ;;  %v2207_v11 = vpop.f32.mrb[49].mxu1 }
 0x317   :  { %v1596_v48 = vpop.f32.mrb[50].mxu1 }
 0x318   :  { %1926 = vst.msk [vmem:[%s2990_s7 + $0x8] sm:$0xff] %vm130_vm0, %v1918_v49  ;;  %v2208_v37 = vpop.f32.mrb[51].mxu1 }
 0x31a   :  { %v1638_v39 = vpop.f32.mrb[52].mxu0 }
 0x31b   :  { %v1919_v38 = vmul.f32 %v1890_v45, %v1638_v39  ;;  %v2213_v30 = vpop.f32.mrb[53].mxu0 }
 0x31c   :  { %v1641_v50 = vpop.f32.mrb[54].mxu0 }
 0x31d   :  { %1927 = vst.msk [vmem:[%s2990_s7 + $0x10] sm:$0xff] %vm130_vm0, %v1919_v38  ;;  %v2214_v12 = vpop.f32.mrb[55].mxu0  ;;  %v1683_v55 = vpop.f32.mrb[52].mxu1 }
 0x31e   :  { %v1920_v20 = vmul.f32 %v1895_v40, %v1683_v55  ;;  %v2219_v51 = vpop.f32.mrb[53].mxu1 }
 0x31f   :  { %v1686_v52 = vpop.f32.mrb[54].mxu1 }
 0x320   :  { %1928 = vst.msk [vmem:[%s2990_s7 + $0x18] sm:$0xff] %vm130_vm0, %v1920_v20  ;;  %v2220_v29 = vpop.f32.mrb[55].mxu1 }
 0x322   :  { %v1728_v41 = vpop.f32.mrb[56].mxu0 }
 0x323   :  { %v1921_v21 = vmul.f32 %v1900_v0, %v1728_v41  ;;  %v2225_v56 = vpop.f32.mrb[57].mxu0 }
 0x324   :  { %v1731_v57 = vpop.f32.mrb[58].mxu0 }
 0x325   :  { %1929 = vst.msk [vmem:[%s2990_s7 + $0x20] sm:$0xff] %vm130_vm0, %v1921_v21  ;;  %v2226_v59 = vpop.f32.mrb[59].mxu0  ;;  %v1773_v22 = vpop.f32.mrb[56].mxu1 }
 0x326   :  { %v1922_v58 = vmul.f32 %v1905_v28, %v1773_v22  ;;  %v2231_v62 = vpop.f32.mrb[57].mxu1 }
 0x327   :  { %v1776_v63 = vpop.f32.mrb[58].mxu1 }
 0x328   :  { %1930 = vst.msk [vmem:[%s2990_s7 + $0x28] sm:$0xff] %vm130_vm0, %v1922_v58  ;;  %v2232_v47 = vpop.f32.mrb[59].mxu1 }
 0x32a   :  { %v1818_v5 = vpop.f32.mrb[60].mxu0 }
 0x32b   :  { %v1923_v31 = vmul.f32 %v1910_v46, %v1818_v5  ;;  %v2237_v7 = vpop.f32.mrb[61].mxu0 }
 0x32c   :  { %v1821_v10 = vpop.f32.mrb[62].mxu0 }
 0x32d   :  { %1931 = vst.msk [vmem:[%s2990_s7 + $0x30] sm:$0xff] %vm130_vm0, %v1923_v31  ;;  %v2238_v35 = vpop.f32.mrb[63].mxu0  ;;  %v1863_v6 = vpop.f32.mrb[60].mxu1 }
 0x32e   :  { %v1924_v16 = vmul.f32 %v1915_v32, %v1863_v6  ;;  %v2243_v54 = vpop.f32.mrb[61].mxu1 }
 0x32f   :  { %v1866_v53 = vpop.f32.mrb[62].mxu1 }
 0x330   :  { %1932 = vst.msk [vmem:[%s2990_s7 + $0x38] sm:$0xff] %vm130_vm0, %v1924_v16  ;;  %v2244_v8 = vpop.f32.mrb[63].mxu1 }

// kernel: esim_forward.15
= control target key start
LH: loop header
LB: loop body
LE: loop exit
PB: predicated region body
PF: predicated region fallthrough
CT: control target
= control target key end

     0   :  { %s706_s12 = smov 0   ;;  %s708_s13 = smov 0   ;;  %s819_s0 = inlined_call_operand.vmem [shape: f32[8,16,64], index: 0, kind: input, shape index: {}]   ;;  %s820_s1 = inlined_call_operand.vmem [shape: f32[8,16,1], index: 1, kind: input, shape index: {}]   ;;  %s821_s2 = inlined_call_operand.vmem [shape: f32[16,64], index: 2, kind: output, shape index: {0}]   ;;  %s822_s3 = inlined_call_operand.vmem [shape: f32[16,64], index: 3, kind: output, shape index: {1}]  }
   0x1   :  { %s710_s14 = smov 0  }
   0x2 LB: > { %s617_s15 = sadd.s32 4294967295, %s683_s14   ;;  %s723_s16 = sadd.s32 1, %s683_s14   ;;  %s683_s14 = sphi %s710_s14, %s826_s14   ;;  %s679_s13 = sphi %s708_s13, %s825_s13   ;;  %s675_s12 = sphi %s706_s12, %s824_s12  }
   0x3   : > { %s18_s17 = ssub.s32 %s683_s14, %s723_s16  ;;  %s21_s18 = sadd.s32 1, %s679_s13 }
   0x4   : > { %p19_p0 = scmp.eq.s32.totalorder %s18_s17, 0  ;;  %p28_p1 = scmp.ne.s32.totalorder %s679_s13, %s675_s12 }
   0x5   : > { %p29_p2 = scmp.eq.s32.totalorder %s683_s14, 0  ;;  %p620_p4 = scmp.ge.s32.totalorder %s683_s14, 2 }
   0x6   : > { %s732_s19 = scalar_select %p19_p0, %s679_s13, %s21_s18  }
   0x7   : > { %p734_p3 = por %p29_p2, %p28_p1  ;;  %132 = sbr.rel (%p620_p4) target bundleno = 30 (0x1e), region = 16 }
   0xe   : > { %135 = sbr.rel (!%p734_p3) target bundleno = 22 (0x16), region = 20  ;;  %s137_s21 = sand.u32 (%p734_p3), 1, %s679_s13  }
   0xf   : > { %s622_s22 = sshll.u32 (%p734_p3), %s683_s14, 3  ;;  %s621_s23 = sshll.u32 (%p734_p3), %s137_s21, 6 }
  0x10   : > { %s141_s26 = scalar_lea.vmem (%p734_p3), %s819_s0, %s622_s22  ;;  %s139_s27 = scalar_lea.vmem (%p734_p3), [#allocation2], %s621_s23 }
  0x11   : > { %v183_v0 = vld [vmem:[%s141_s26] sm:$0xff] (%p734_p3)  ;;  %v185_v1 = vld [vmem:[%s141_s26 + $0x10] sm:$0xff] (%p734_p3) }
  0x12   : > { %v187_v2 = vld [vmem:[%s141_s26 + $0x20] sm:$0xff] (%p734_p3)  ;;  %184 = vst [vmem:[%s139_s27] sm:$0xff] (%p734_p3), %v183_v0  ;;  %186 = vst [vmem:[%s139_s27 + $0x8] sm:$0xff] (%p734_p3), %v185_v1  ;;  %v189_v3 = vld [vmem:[%s141_s26 + $0x30] sm:$0xff] (%p734_p3) }
  0x13   : > { %188 = vst [vmem:[%s139_s27 + $0x10] sm:$0xff] (%p734_p3), %v187_v2  ;;  %v191_v4 = vld [vmem:[%s141_s26 + $0x40] sm:$0xff] (%p734_p3)  ;;  %v193_v5 = vld [vmem:[%s141_s26 + $0x50] sm:$0xff] (%p734_p3)  ;;  %190 = vst [vmem:[%s139_s27 + $0x18] sm:$0xff] (%p734_p3), %v189_v3 }
  0x14   : > { %192 = vst [vmem:[%s139_s27 + $0x20] sm:$0xff] (%p734_p3), %v191_v4  ;;  %194 = vst [vmem:[%s139_s27 + $0x28] sm:$0xff] (%p734_p3), %v193_v5  ;;  %v195_v6 = vld [vmem:[%s141_s26 + $0x60] sm:$0xff] (%p734_p3)  ;;  %v197_v7 = vld [vmem:[%s141_s26 + $0x70] sm:$0xff] (%p734_p3) }
  0x15   : > { %196 = vst [vmem:[%s139_s27 + $0x30] sm:$0xff] %v195_v6  ;;  %198 = vst [vmem:[%s139_s27 + $0x38] sm:$0xff] %v197_v7 }
  0x16 PF: > { %204 = sbr.rel (!%p734_p3) target bundleno = 30 (0x1e), region = 58  ;;  %s206_s28 = sand.u32 (%p734_p3), 1, %s679_s13  }
  0x17   : > { %s624_s29 = sshll.u32 (%p734_p3), %s683_s14, 3  ;;  %s623_s30 = sshll.u32 (%p734_p3), %s206_s28, 6 }
  0x18   : > { %s210_s6 = scalar_lea.vmem (%p734_p3), %s820_s1, %s624_s29  ;;  %s208_s7 = scalar_lea.vmem (%p734_p3), [#allocation3], %s623_s30 }
  0x19   : > { %v252_v8 = vld [vmem:[%s210_s6] sm:$0xff] (%p734_p3)  ;;  %v254_v9 = vld [vmem:[%s210_s6 + $0x10] sm:$0xff] (%p734_p3) }
  0x1a   : > { %v256_v10 = vld [vmem:[%s210_s6 + $0x20] sm:$0xff] (%p734_p3)  ;;  %253 = vst [vmem:[%s208_s7] sm:$0xff] (%p734_p3), %v252_v8  ;;  %255 = vst [vmem:[%s208_s7 + $0x8] sm:$0xff] (%p734_p3), %v254_v9  ;;  %v258_v11 = vld [vmem:[%s210_s6 + $0x30] sm:$0xff] (%p734_p3) }
  0x1b   : > { %257 = vst [vmem:[%s208_s7 + $0x10] sm:$0xff] (%p734_p3), %v256_v10  ;;  %v260_v12 = vld [vmem:[%s210_s6 + $0x40] sm:$0xff] (%p734_p3)  ;;  %v262_v13 = vld [vmem:[%s210_s6 + $0x50] sm:$0xff] (%p734_p3)  ;;  %259 = vst [vmem:[%s208_s7 + $0x18] sm:$0xff] (%p734_p3), %v258_v11 }
  0x1c   : > { %261 = vst [vmem:[%s208_s7 + $0x20] sm:$0xff] (%p734_p3), %v260_v12  ;;  %263 = vst [vmem:[%s208_s7 + $0x28] sm:$0xff] (%p734_p3), %v262_v13  ;;  %v264_v14 = vld [vmem:[%s210_s6 + $0x60] sm:$0xff] (%p734_p3)  ;;  %v266_v15 = vld [vmem:[%s210_s6 + $0x70] sm:$0xff] (%p734_p3) }
  0x1d   : > { %265 = vst [vmem:[%s208_s7 + $0x30] sm:$0xff] %v264_v14  ;;  %267 = vst [vmem:[%s208_s7 + $0x38] sm:$0xff] %v266_v15 }
  0x1e PF: > { %p625_p5 = scmp.ge.s32.totalorder %s683_s14, 1  ;;  %p272_p6 = scmp.lt.s32.totalorder %s683_s14, 3 }
  0x20   : > { %p273_p7 = pnand %p625_p5, %p272_p6 }
  0x21   : > { %s279_s8 = sand.u32 (!%p273_p7), 1, %s675_s12   ;;  %v685_v16 = vmov (!%p273_p7), 0   ;;  %vm388_vm0 = vcmask (!%p273_p7), 7168   ;;  %vm405_vm1 = vcmask (!%p273_p7), 523264   ;;  %p316_p8 = scmp.lt.s32.totalorder (!%p273_p7), %s617_s15, 1 }
  0x22   : > { %276 = sbr.rel (%p273_p7) target bundleno = 203 (0xcb), region = 96  ;;  %658 = vset.pattern.permute.xlu1 (!%p273_p7), %v685_v16  ;;  %657 = vset.pattern.permute.xlu0 (!%p273_p7), %v685_v16  ;;  %s756_s9 = sshll.u32 (!%p273_p7), %s279_s8, 6 }
  0x23   : > { %s288_s10 = scalar_lea.vmem (!%p273_p7), [#allocation3], %s756_s9  ;;  %s768_s11 = scalar_lea.vmem (!%p273_p7), [#allocation2], %s756_s9 }
  0x24   : > { %v334_v17 = vld [vmem:[%s288_s10 + $0x10] sm:$0xff] (!%p273_p7)  ;;  %v332_v18 = vld [vmem:[%s288_s10] sm:$0xff] (!%p273_p7)  ;;  %v333_v20 = vld [vmem:[%s288_s10 + $0x8] sm:$0xff] (!%p273_p7) }
  0x25   : > { %352 = vperm.xlu1 (!%p273_p7), %658, %v334_v17   ;;  %342 = vperm.xlu0 (!%p273_p7), %657, %v332_v18   ;;  %v389_v19 = vsel (!%p273_p7), %vm388_vm0, %v332_v18, 0.0  ;;  %v392_v21 = vsel (!%p273_p7), %vm388_vm0, %v334_v17, 0.0  ;;  %v335_v22 = vld [vmem:[%s288_s10 + $0x18] sm:$0xff] (!%p273_p7)  ;;  %v390_v23 = vsel (!%p273_p7), %vm388_vm0, %v333_v20, 0.0  ;;  %v336_v27 = vld [vmem:[%s288_s10 + $0x20] sm:$0xff] (!%p273_p7)  ;;  %v337_v28 = vld [vmem:[%s288_s10 + $0x28] sm:$0xff] (!%p273_p7) }
  0x26   : > { %v391_v24 = vadd.f32 (!%p273_p7), %v390_v23, %v389_v19  ;;  %v394_v25 = vsel (!%p273_p7), %vm388_vm0, %v335_v22, 0.0  ;;  %v396_v29 = vsel (!%p273_p7), %vm388_vm0, %v336_v27, 0.0  ;;  %v398_v31 = vsel (!%p273_p7), %vm388_vm0, %v337_v28, 0.0  ;;  %v338_v35 = vld [vmem:[%s288_s10 + $0x30] sm:$0xff] (!%p273_p7)  ;;  %v339_v36 = vld [vmem:[%s288_s10 + $0x38] sm:$0xff] (!%p273_p7)  ;;  %v324_v60 = vld [vmem:[%s768_s11] sm:$0xff] (!%p273_p7) }
  0x27   : > { %v429_v32 = vsub.f32 (!%p273_p7), 1.0, %v332_v18  ;;  %v430_v33 = vsub.f32 (!%p273_p7), 1.0, %v333_v20  ;;  %v400_v37 = vsel (!%p273_p7), %vm388_vm0, %v338_v35, 0.0  ;;  %v431_v39 = vsub.f32 (!%p273_p7), 1.0, %v334_v17  ;;  %v326_v61 = vld [vmem:[%s768_s11 + $0x10] sm:$0xff] (!%p273_p7)  ;;  %v325_v62 = vld [vmem:[%s768_s11 + $0x8] sm:$0xff] (!%p273_p7) }
  0x28   : > { %v393_v26 = vadd.f32 (!%p273_p7), %v392_v21, %v391_v24  ;;  %v402_v40 = vsel (!%p273_p7), %vm388_vm0, %v339_v36, 0.0  ;;  %v432_v41 = vsub.f32 (!%p273_p7), 1.0, %v335_v22  ;;  %v434_v46 = vsub.f32 (!%p273_p7), 1.0, %v337_v28  ;;  %v327_v4 = vld [vmem:[%s768_s11 + $0x18] sm:$0xff] (!%p273_p7)  ;;  %v328_v13 = vld [vmem:[%s768_s11 + $0x20] sm:$0xff] (!%p273_p7)  ;;  %v329_v18 = vld [vmem:[%s768_s11 + $0x28] sm:$0xff] (!%p273_p7) }
  0x29   : > { %357 = vperm.xlu1 %658, %v335_v22   ;;  %347 = vperm.xlu0 %657, %v333_v20   ;;  %v438_v43 = vmul.f32 -10000000.0, %v430_v33  ;;  %v437_v44 = vmul.f32 -10000000.0, %v429_v32  ;;  %v433_v47 = vsub.f32 1.0, %v336_v27  ;;  %v436_v51 = vsub.f32 1.0, %v339_v36 }
  0x2a   : > { %v395_v30 = vadd.f32 %v394_v25, %v393_v26  ;;  %v440_v49 = vmul.f32 -10000000.0, %v432_v41  ;;  %v439_v50 = vmul.f32 -10000000.0, %v431_v39  ;;  %v435_v52 = vsub.f32 1.0, %v338_v35  ;;  %v330_v24 = vld [vmem:[%s768_s11 + $0x30] sm:$0xff] }
  0x2b   : > { %v442_v53 = vmul.f32 -10000000.0, %v434_v46  ;;  %v441_v54 = vmul.f32 -10000000.0, %v433_v47  ;;  %v444_v55 = vmul.f32 -10000000.0, %v436_v51 }
  0x2c   : > { %v397_v34 = vadd.f32 %v396_v29, %v395_v30  ;;  %v443_v56 = vmul.f32 -10000000.0, %v435_v52  ;;  %v331_v30 = vld [vmem:[%s768_s11 + $0x38] sm:$0xff]  ;;  %s828_s15 = smov (!%p316_p8, %s617_s15), 1 }
  0x2d   : > { %367 = vperm.xlu1 %658, %v337_v28   ;;  %362 = vperm.xlu0 %657, %v336_v27   ;;  %s628_s12 = sshll.u32 %s828_s15, 3 }
  0x2e   : > { %v399_v38 = vadd.f32 %v398_v31, %v397_v34  ;;  %s319_s18 = scalar_lea.vmem %s821_s2, %s628_s12  ;;  %s323_s21 = scalar_lea.vmem %s822_s3, %s628_s12 }
  0x30   : > { %v401_v42 = vadd.f32 %v400_v37, %v399_v38 }
  0x31   : > { %377 = vperm.xlu1 %658, %v339_v36   ;;  %372 = vperm.xlu0 %657, %v338_v35  }
  0x32   : > { %v403_v45 = vadd.f32 %v402_v40, %v401_v42 }
  0x34   : > { %v404_v48 = vmax.f32 %v403_v45, 1.0 }
  0x35   : > { %452 = vperm.xlu1 %658, %v438_v43   ;;  %447 = vperm.xlu0 %657, %v437_v44  }
  0x36   : > { %659 = vrcp.f32 %v404_v48 }
  0x39   : > { %462 = vperm.xlu1 %658, %v440_v49   ;;  %457 = vperm.xlu0 %657, %v439_v50  }
  0x3d   : > { %472 = vperm.xlu1 %658, %v442_v53   ;;  %467 = vperm.xlu0 %657, %v441_v54  }
  0x40   : > { %v660_v57 = vpop.eup %659 }
  0x41   : > { %482 = vperm.xlu1 %658, %v444_v55   ;;  %477 = vperm.xlu0 %657, %v443_v56  }
  0x45   : > { %424 = vperm.xlu0 %657, %v660_v57  }
  0xa4   : > { %v353_v58 = vpop.permute.xlu1 %352  ;;  %v343_v59 = vpop.permute.xlu0 %342 }
  0xa5   : > { %v380_v63 = vmul.f32 %v343_v59, %v324_v60  ;;  %v382_v2 = vmul.f32 %v353_v58, %v326_v61 }
  0xa7   : > { %v406_v5 = vsel %vm405_vm1, %v380_v63, 0.0  ;;  %v409_v10 = vsel %vm405_vm1, %v382_v2, 0.0 }
  0xa8   : > { %v358_v0 = vpop.permute.xlu1 %357  ;;  %v348_v1 = vpop.permute.xlu0 %347 }
  0xa9   : > { %v381_v3 = vmul.f32 %v348_v1, %v325_v62  ;;  %v383_v11 = vmul.f32 %v358_v0, %v327_v4 }
  0xab   : > { %v407_v6 = vsel %vm405_vm1, %v381_v3, 0.0  ;;  %v411_v16 = vsel %vm405_vm1, %v383_v11, 0.0 }
  0xac   : > { %v408_v7 = vadd.f32 %v407_v6, %v406_v5  ;;  %v368_v8 = vpop.permute.xlu1 %367  ;;  %v363_v9 = vpop.permute.xlu0 %362 }
  0xad   : > { %v384_v17 = vmul.f32 %v363_v9, %v328_v13  ;;  %v385_v22 = vmul.f32 %v368_v8, %v329_v18 }
  0xae   : > { %v410_v12 = vadd.f32 %v409_v10, %v408_v7 }
  0xaf   : > { %v413_v23 = vsel %vm405_vm1, %v384_v17, 0.0  ;;  %v415_v29 = vsel %vm405_vm1, %v385_v22, 0.0 }
  0xb0   : > { %v378_v14 = vpop.permute.xlu1 %377  ;;  %v373_v15 = vpop.permute.xlu0 %372  ;;  %v412_v19 = vadd.f32 %v411_v16, %v410_v12 }
  0xb1   : > { %v386_v26 = vmul.f32 %v373_v15, %v330_v24  ;;  %v387_v32 = vmul.f32 %v378_v14, %v331_v30 }
  0xb2   : > { %v414_v25 = vadd.f32 %v413_v23, %v412_v19 }
  0xb3   : > { %v417_v33 = vsel %vm405_vm1, %v386_v26, 0.0  ;;  %v419_v45 = vsel %vm405_vm1, %v387_v32, 0.0 }
  0xb4   : > { %v453_v20 = vpop.permute.xlu1 %452  ;;  %v448_v21 = vpop.permute.xlu0 %447  ;;  %v416_v31 = vadd.f32 %v415_v29, %v414_v25 }
  0xb5   : > { %v486_v36 = vadd.f32 %v453_v20, %v381_v3  ;;  %v485_v37 = vadd.f32 %v448_v21, %v380_v63 }
  0xb6   : > { %v418_v40 = vadd.f32 %v417_v33, %v416_v31 }
  0xb7   : > { %v494_v48 = vsel %vm405_vm1, %v486_v36, -inf  ;;  %v493_v49 = vsel %vm405_vm1, %v485_v37, -inf }
  0xb8   : > { %v463_v27 = vpop.permute.xlu1 %462  ;;  %v458_v28 = vpop.permute.xlu0 %457  ;;  %v420_v54 = vadd.f32 %v419_v45, %v418_v40 }
  0xb9   : > { %v488_v41 = vadd.f32 %v463_v27, %v383_v11  ;;  %v487_v42 = vadd.f32 %v458_v28, %v382_v2 }
  0xbb   : > { %v496_v55 = vsel %vm405_vm1, %v488_v41, -inf  ;;  %v495_v56 = vsel %vm405_vm1, %v487_v42, -inf }
  0xbc   : > { %v473_v34 = vpop.permute.xlu1 %472  ;;  %v468_v35 = vpop.permute.xlu0 %467 }
  0xbd   : > { %v490_v38 = vadd.f32 %v473_v34, %v385_v22  ;;  %v489_v39 = vadd.f32 %v468_v35, %v384_v17 }
  0xbf   : > { %v499_v43 = vsel %vm405_vm1, %v490_v38, -inf  ;;  %v497_v44 = vsel %vm405_vm1, %v489_v39, -inf }
  0xc0   : > { %v483_v46 = vpop.permute.xlu1 %482  ;;  %v478_v47 = vpop.permute.xlu0 %477  ;;  %v500_v52 = vmax.f32 %v494_v48, %v499_v43  ;;  %v498_v53 = vmax.f32 %v493_v49, %v497_v44 }
  0xc1   : > { %v492_v50 = vadd.f32 %v483_v46, %v387_v32  ;;  %v491_v51 = vadd.f32 %v478_v47, %v386_v26 }
  0xc2   : > { %v505_v63 = vmax.f32 %v498_v53, %v500_v52 }
  0xc3   : > { %v503_v57 = vsel %vm405_vm1, %v492_v50, -inf  ;;  %v501_v58 = vsel %vm405_vm1, %v491_v51, -inf }
  0xc4   : > { %v504_v59 = vmax.f32 %v496_v55, %v503_v57  ;;  %v502_v60 = vmax.f32 %v495_v56, %v501_v58  ;;  %v425_v61 = vpop.permute.xlu0 %424 }
  0xc5   : > { %v427_v62 = vmul.f32 %v425_v61, %v420_v54 }
  0xc6   : > { %v506_v0 = vmax.f32 %v502_v60, %v504_v59 }
  0xc7   : > { %428 = vst.msk [vmem:[%s319_s18] sm:$0xff] %vm405_vm1, %v427_v62 }
  0xc8   : > { %v507_v1 = vmax.f32 %v505_v63, %v506_v0 }
  0xca   : > { %508 = vst.msk [vmem:[%s323_s21] sm:$0xff] %vm405_vm1, %v507_v1 }
  0xcb PF: > { %p11_p9 = scmp.ge.s32.totalorder %s723_s16, 4   ;;  %s824_s12 = smov %s679_s13 }
  0xcc   : > { %s825_s13 = smov %s732_s19  ;;  %s826_s14 = smov %s723_s16 }
  0xcd   :  { %13 = sbr.rel (!%p11_p9) target bundleno = 2 (0x2), region = 159 }

// kernel: esim_forward.10
= control target key start
LH: loop header
LB: loop body
LE: loop exit
PB: predicated region body
PF: predicated region fallthrough
CT: control target
= control target key end

     0   :  { %s2687_s15 = smov 0   ;;  %s2689_s16 = smov 0   ;;  %s3446_s0 = inlined_call_operand.vmem [shape: bf16[8,16,256], index: 0, kind: input, shape index: {}]   ;;  %s3447_s1 = inlined_call_operand.vmem [shape: s32[16,1], index: 1, kind: input, shape index: {}]   ;;  %s3448_s2 = inlined_call_operand.vmem [shape: bf16[32,128], index: 2, kind: input, shape index: {}]   ;;  %s3449_s3 = inlined_call_operand.vmem [shape: bf16[32,128], index: 3, kind: input, shape index: {}]   ;;  %s3450_s4 = inlined_call_operand.vmem [shape: f32[8,16,64], index: 4, kind: output, shape index: {}]  }
   0x1   :  { %s2691_s17 = smov 0  }
   0x2 LB: > { %s2703_s18 = sadd.s32 4294967295, %s2654_s17   ;;  %s2706_s19 = sadd.s32 1, %s2654_s17   ;;  %s2654_s17 = sphi %s2691_s17, %s3454_s17   ;;  %s2650_s16 = sphi %s2689_s16, %s3453_s16   ;;  %s2646_s15 = sphi %s2687_s15, %s3452_s15  }
   0x3   : > { %s18_s20 = ssub.s32 %s2654_s17, %s2706_s19  ;;  %s21_s21 = sadd.s32 1, %s2650_s16 }
   0x4   : > { %p19_p0 = scmp.eq.s32.totalorder %s18_s20, 0  ;;  %p28_p1 = scmp.ne.s32.totalorder %s2650_s16, %s2646_s15 }
   0x5   : > { %p29_p2 = scmp.eq.s32.totalorder %s2654_s17, 0  ;;  %p126_p3 = scmp.eq.s32.totalorder %s2703_s18, 1 }
   0x6   : > { %s2716_s22 = scalar_select %p19_p0, %s2650_s16, %s21_s21  }
   0x7   : > { %p30_p4 = por %p29_p2, %p28_p1  ;;  %p2718_p5 = por %p126_p3, %p28_p1 }
   0x8   : > { %p2210_p6 = scmp.ge.s32.totalorder %s2654_s17, 2 }
   0xa   : > { %154 = sbr.rel (%p2210_p6) target bundleno = 25 (0x19), region = 24 }
  0x11   : > { %157 = sbr.rel (!%p30_p4) target bundleno = 25 (0x19), region = 28  ;;  %s159_s24 = sand.u32 (%p30_p4), 1, %s2650_s16  }
  0x12   : > { %s2286_s25 = sshll.u32 (%p30_p4), %s2654_s17, 3  ;;  %s2211_s26 = sshll.u32 (%p30_p4), %s159_s24, 6 }
  0x13   : > { %s164_s29 = scalar_lea.vmem (%p30_p4), %s3446_s0, %s2286_s25  ;;  %s161_s30 = scalar_lea.vmem (%p30_p4), [#allocation6], %s2211_s26 }
  0x14   : > { %v206_v0 = vld [vmem:[%s164_s29] sm:$0xff] (%p30_p4)  ;;  %v208_v1 = vld [vmem:[%s164_s29 + $0x10] sm:$0xff] (%p30_p4) }
  0x15   : > { %v210_v2 = vld [vmem:[%s164_s29 + $0x20] sm:$0xff] (%p30_p4)  ;;  %207 = vst [vmem:[%s161_s30] sm:$0xff] (%p30_p4), %v206_v0  ;;  %209 = vst [vmem:[%s161_s30 + $0x8] sm:$0xff] (%p30_p4), %v208_v1  ;;  %v212_v3 = vld [vmem:[%s164_s29 + $0x30] sm:$0xff] (%p30_p4) }
  0x16   : > { %211 = vst [vmem:[%s161_s30 + $0x10] sm:$0xff] (%p30_p4), %v210_v2  ;;  %v214_v4 = vld [vmem:[%s164_s29 + $0x40] sm:$0xff] (%p30_p4)  ;;  %v216_v5 = vld [vmem:[%s164_s29 + $0x50] sm:$0xff] (%p30_p4)  ;;  %213 = vst [vmem:[%s161_s30 + $0x18] sm:$0xff] (%p30_p4), %v212_v3 }
  0x17   : > { %215 = vst [vmem:[%s161_s30 + $0x20] sm:$0xff] (%p30_p4), %v214_v4  ;;  %217 = vst [vmem:[%s161_s30 + $0x28] sm:$0xff] (%p30_p4), %v216_v5  ;;  %v218_v6 = vld [vmem:[%s164_s29 + $0x60] sm:$0xff] (%p30_p4)  ;;  %v220_v7 = vld [vmem:[%s164_s29 + $0x70] sm:$0xff] (%p30_p4) }
  0x18   : > { %219 = vst [vmem:[%s161_s30 + $0x30] sm:$0xff] %v218_v6  ;;  %221 = vst [vmem:[%s161_s30 + $0x38] sm:$0xff] %v220_v7 }
  0x19 PF: > { %p2214_p7 = scmp.ge.s32.totalorder %s2654_s17, 1  ;;  %p233_p8 = scmp.lt.s32.totalorder %s2654_s17, 3 }
  0x1b   : > { %p234_p9 = pnand %p2214_p7, %p233_p8 }
  0x1c   : > { %v2733_v8 = vld [vmem:[%s3448_s2] sm:$0xff] (!%p234_p9)   ;;  %v2656_v9 = vmov (!%p234_p9), 0.0   ;;  %v2746_v11 = vld [vmem:[%s3448_s2 + $0x8] sm:$0xff] (!%p234_p9)   ;;  %vm2657_vm0 = vmmov (!%p234_p9), 0   ;;  %vm282_vm1 = vcmask (!%p234_p9), 261120   ;;  %s2658_s13 = smov (!%p234_p9), 32  }
  0x1d   : > { %237 = sbr.rel (%p234_p9) target bundleno = 5766 (0x1686), region = 70  ;;  %2335 = vmatprep.subr.bf16.mxu0 (!%p234_p9), %v2656_v9  ;;  %2343 = vmatprep.subr.bf16.mxu1 (!%p234_p9), %v2656_v9  ;;  %v2740_v10 = vld [vmem:[%s3449_s3] sm:$0xff] (!%p234_p9)   ;;  %v2755_v12 = vld [vmem:[%s3449_s3 + $0x8] sm:$0xff] (!%p234_p9)   ;;  %283 = vst.msk [vmem:[#allocation2] sm:$0xff] (!%p234_p9), %vm282_vm1, %v2656_v9  ;;  %284 = vst.msk [vmem:[#allocation3] sm:$0xff] (!%p234_p9), %vm282_vm1, %v2656_v9  ;;  %s240_s14 = sand.u32 (!%p234_p9), 1, %s2646_s15  }
  0x1e   : > { %2336 = vmatpush3.bf16.msra.mxu0 (!%p234_p9), %v2733_v8  ;;  %2339 = vmatprep.mubr.msk.bf16.mxu0 (!%p234_p9), %vm2657_vm0, %v2656_v9  ;;  %285 = vst.msk [vmem:[#allocation4] sm:$0xff] (!%p234_p9), %vm282_vm1, %v2656_v9  ;;  %286 = vst.msk [vmem:[#allocation5] sm:$0xff] (!%p234_p9), %vm282_vm1, %v2656_v9  ;;  %s2803_s17 = sshll.u32 (!%p234_p9), %s240_s14, 6  ;;  %v2659_v34 = vmov (!%p234_p9), 0   ;;  %s2660_s15 = smov (!%p234_p9), 64  }
  0x1f   : > { %2344 = vmatpush3.bf16.msra.mxu1 (!%p234_p9), %v2740_v10  ;;  %2337 = vmatprep.subr.bf16.mxu0 (!%p234_p9), %v2656_v9  ;;  %s2806_s20 = scalar_lea.vmem (!%p234_p9), [#allocation6], %s2803_s17  ;;  %p268_p10 = scmp.lt.s32.totalorder (!%p234_p9), %s2703_s18, 1 }
  0x20   : > { %2345 = vmatprep.subr.bf16.mxu1 (!%p234_p9), %v2656_v9  ;;  %2347 = vmatprep.mubr.msk.bf16.mxu1 (!%p234_p9), %vm2657_vm0, %v2656_v9  ;;  %v2218_v19 = vld [vmem:[%s2806_s20 + $0x38] sm:$0xff] (!%p234_p9)  ;;  %v2810_v21 = vld [vmem:[%s2806_s20] ss:$8 sps:$4 sm:$0xff] (!%p234_p9)   ;;  %s2661_s28 = smov (!%p234_p9), 96   ;;  %s3377_s11 = scalar_lea.vmem (!%p234_p9), [#allocation7], %s2803_s17 }
  0x21   : > { %v350_v20 = vrot.slane (!%p234_p9), %v2218_v19, 4  ;;  %v290_v22 = vunpack.c.l.bf16 (!%p234_p9), %v2810_v21  ;;  %2494 = vset.pattern.permute.xlu1 (!%p234_p9), %v2659_v34  ;;  %2493 = vset.pattern.permute.xlu0 (!%p234_p9), %v2659_v34 }
  0x22   : > { %2338 = vmatpush3.bf16.msra.mxu0 (!%p234_p9), %v2746_v11 }
  0x23   : > { %2346 = vmatpush3.bf16.msra.mxu1 (!%p234_p9), %v2755_v12  ;;  %2351 = vmatprep.subr.bf16.mxu0 (!%p234_p9), %v2656_v9  ;;  %v352_v23 = vunpack.c.l.bf16 (!%p234_p9), %v350_v20 }
  0x24   : > { %2359 = vmatprep.subr.bf16.mxu1 %v2656_v9  ;;  %v2772_v13 = vld [vmem:[#allocation2] sm:$0xff]  ;;  %v2776_v15 = vld [vmem:[#allocation3] sm:$0xff]  ;;  %s269_s21 = scalar_select %p268_p10, %s2703_s18, 1 }
  0x25   : > { %v2774_v14 = vld [vmem:[#allocation4] sm:$0xff]  ;;  %v292_v16 = vpack.c.bf16 %v2772_v13, %v2772_v13  ;;  %420 = vrot.lane.b32.xlu1 %v2776_v15, %s2658_s13  ;;  %v2784_v18 = vld [vmem:[#allocation5] sm:$0xff]  ;;  %s2283_s12 = sshll.u32 (%p2718_p5), %s2703_s18, 3 }
  0x26   : > { %v354_v17 = vpack.c.bf16 %v2774_v14, %v2774_v14  ;;  %s2217_s24 = sshll.u32 %s269_s21, 3  ;;  %s2078_s17 = scalar_lea.vmem (%p2718_p5), %s3450_s4, %s2283_s12 }
  0x27   : > { %2340 = vmatmul.mubr.msk.bf16.vlgmr.msra.gmra.mrb[0].mxu0 %vm282_vm1, %v292_v16  ;;  %s271_s27 = scalar_lea.vmem %s3447_s1, %s2217_s24 }
  0x28   : > { %2348 = vmatmul.mubr.msk.bf16.vlgmr.msra.gmra.mrb[0].mxu1 %vm282_vm1, %v354_v17  ;;  %2352 = vmatpush3.bf16.msra.mxu0 %v2733_v8  ;;  %v2822_v45 = vld [vmem:[%s271_s27] sm:$0xff] }
  0x29   : > { %2360 = vmatpush3.bf16.msra.mxu1 %v2740_v10  ;;  %449 = vrot.lane.b32.xlu1 %v2784_v18, %s2658_s13  ;;  %vm469_vm2 = vcmp.gt.s32.totalorder %v2822_v45, 0  ;;  %vm470_vm3 = vcmp.gt.s32.totalorder %v2822_v45, 7  ;;  %vm697_vm6 = vcmp.gt.s32.totalorder %v2822_v45, 1  ;;  %vm698_vm7 = vcmp.gt.s32.totalorder %v2822_v45, 6 }
  0x2a   : > { %2353 = vmatprep.subr.bf16.mxu0 %v2656_v9  ;;  %2355 = vmatprep.mubr.msk.bf16.mxu0 %vm2657_vm0, %v2656_v9  ;;  %v471_v49 = vsel %vm469_vm2, 1, %v2659_v34  ;;  %v498_v51 = vsel %vm470_vm3, 1, %v2659_v34  ;;  %vm925_vm10 = vcmp.gt.s32.totalorder %v2822_v45, 2  ;;  %vm926_vm11 = vcmp.gt.s32.totalorder %v2822_v45, 5 }
  0x2b   : > { %2361 = vmatprep.subr.bf16.mxu1 %v2656_v9  ;;  %2363 = vmatprep.mubr.msk.bf16.mxu1 %vm2657_vm0, %v2656_v9  ;;  %vm1153_vm14 = vcmp.gt.s32.totalorder %v2822_v45, 3  ;;  %vm1154_vm15 = vcmp.gt.s32.totalorder %v2822_v45, 4 }
  0x2c   : > { %2354 = vmatpush3.bf16.msra.mxu0 %v2746_v11 }
  0x2d   : > { %2362 = vmatpush3.bf16.msra.mxu1 %v2755_v12  ;;  %2367 = vmatprep.subr.bf16.mxu0 %v2656_v9 }
  0x2e   : > { %2375 = vmatprep.subr.bf16.mxu1 %v2656_v9 }
  0x97   : > { %v421_v52 = vpop.permute.xlu1 %420 }
  0x9b   : > { %v450_v54 = vpop.permute.xlu1 %449 }
  0xfa   : > { %v342_v24 = vpop.f32.mrb[0].mxu0 }
  0xfb   : > { %v404_v25 = vpop.f32.mrb[0].mxu1  ;;  %v348_v26 = vadd.f32 %v342_v24, %v290_v22  ;;  %v2341_v27 = vpop.f32.mrb[1].mxu0 }
  0xfc   : > { %v410_v28 = vadd.f32 %v404_v25, %v352_v23  ;;  %v2349_v29 = vpop.f32.mrb[1].mxu1  ;;  %v345_v30 = vpop.f32.mrb[2].mxu0  ;;  %v542_v27 = vunpack.c.h.bf16 %v2810_v21 }
  0xfd   : > { %v407_v31 = vpop.f32.mrb[2].mxu1  ;;  %2499 = vtanh.f32 %v348_v26  ;;  %v2342_v32 = vpop.f32.mrb[3].mxu0  ;;  %v2225_v37 = vmul.f32 -1.442695, %v348_v26  ;;  %v2229_v26 = vld [vmem:[%s2806_s20 + $0x30] sm:$0xff] }
  0xfe   : > { %v2350_v33 = vpop.f32.mrb[3].mxu1  ;;  %2501 = vtanh.f32 %v410_v28  ;;  %v2226_v38 = vmul.f32 -1.442695, %v410_v28  ;;  %v590_v28 = vrot.slane %v2229_v26, 4 }
  0xff   : > { %2503 = vpow2.f32 %v2225_v37 }
 0x100   : > { %2505 = vpow2.f32 %v2226_v38  ;;  %v592_v32 = vunpack.c.l.bf16 %v590_v28 }
 0x107   : > { %v2500_v35 = vpop.eup %2499 }
 0x108   : > { %425 = vrot.lane.b32.xlu0 %v2500_v35, %s2660_s15  ;;  %v2502_v36 = vpop.eup %2501 }
 0x109   : > { %v2504_v39 = vpop.eup %2503 }
 0x10a   : > { %v415_v40 = vadd.f32 1.0, %v2504_v39  ;;  %v2506_v41 = vpop.eup %2505 }
 0x10b   : > { %v444_v42 = vadd.f32 1.0, %v2506_v41 }
 0x10c   : > { %454 = vrot.lane.b32.xlu0 %v2502_v36, %s2660_s15  ;;  %2507 = vrcp.f32 %v415_v40 }
 0x10d   : > { %2509 = vrcp.f32 %v444_v42 }
 0x116   : > { %v2508_v43 = vpop.eup %2507 }
 0x117   : > { %v2510_v47 = vpop.eup %2509  ;;  %v423_v53 = vmul.f32 %v2508_v43, %v421_v52 }
 0x118   : > { %v452_v57 = vmul.f32 %v2510_v47, %v450_v54 }
 0x17a   : > { %v426_v44 = vpop.permute.xlu0 %425 }
 0x17b   : > { %v428_v46 = vmul.f32 %v2508_v43, %v426_v44 }
 0x17d   : > { %430 = vrot.lane.b32.xlu0 %v428_v46, %s2658_s13 }
 0x17e   : > { %v455_v48 = vpop.permute.xlu0 %454 }
 0x17f   : > { %v457_v50 = vmul.f32 %v2510_v47, %v455_v48 }
 0x181   : > { %459 = vrot.lane.b32.xlu1 %v457_v50, %s2658_s13  ;;  %473 = vperm.xlu0 %2493, %v471_v49  }
 0x185   : > { %500 = vperm.xlu1 %2494, %v498_v51  }
 0x1ef   : > { %v431_v55 = vpop.permute.xlu0 %430 }
 0x1f0   : > { %v433_v56 = vadd.f32 %v431_v55, %v423_v53 }
 0x1f2   : > { %2511 = vtanh.f32 %v433_v56 }
 0x1f3   : > { %v460_v58 = vpop.permute.xlu1 %459 }
 0x1f4   : > { %v462_v59 = vadd.f32 %v460_v58, %v452_v57  ;;  %v726_v58 = vsel %vm698_vm7, 1, %v2659_v34 }
 0x1f6   : > { %2513 = vtanh.f32 %v462_v59 }
 0x1fc   : > { %v2512_v60 = vpop.eup %2511 }
 0x1fd   : > { %436 = vrot.lane.b32.xlu1 %v2512_v60, %s2660_s15 }
 0x200   : > { %v2514_v61 = vpop.eup %2513  ;;  %v2838_v63 = vpop.permute.xlu0 %473 }
 0x201   : > { %465 = vrot.lane.b32.xlu0 %v2514_v61, %s2660_s15  ;;  %477 = vrot.lane.b32.xlu1 %v2772_v13, %s2661_s28  ;;  %vm475_vm4 = vcmp.eq.s32.totalorder %v2838_v63, 1 }
 0x204   : > { %v2836_v62 = vpop.permute.xlu1 %500 }
 0x205   : > { %504 = vrot.lane.b32.xlu0 %v2774_v14, %s2661_s28  ;;  %vm502_vm5 = vcmp.eq.s32.totalorder %v2836_v62, 1 }
 0x26f   : > { %v437_v0 = vpop.permute.xlu1 %436 }
 0x270   : > { %v2840_v1 = vmul.f32 %v2508_v43, %v437_v0 }
 0x273   : > { %v466_v2 = vpop.permute.xlu0 %465  ;;  %v478_v3 = vpop.permute.xlu1 %477 }
 0x274   : > { %v480_v4 = vsel %vm475_vm4, %v2840_v1, %v478_v3  ;;  %v2847_v5 = vmul.f32 %v2510_v47, %v466_v2 }
 0x275   : > { %482 = vrot.lane.b32.xlu1 %v480_v4, %s2658_s13 }
 0x277   : > { %v505_v6 = vpop.permute.xlu0 %504 }
 0x278   : > { %v507_v7 = vsel %vm502_vm5, %v2847_v5, %v505_v6 }
 0x279   : > { %509 = vrot.lane.b32.xlu0 %v507_v7, %s2658_s13  ;;  %488 = vrot.lane.b32.xlu1 %v2776_v15, %s2658_s13 }
 0x27d   : > { %515 = vrot.lane.b32.xlu0 %v2784_v18, %s2658_s13 }
 0x2e7   : > { %v483_v13 = vpop.permute.xlu1 %482 }
 0x2e8   : > { %485 = vst.msk [vmem:[#allocation2] sm:$0xff] %vm282_vm1, %v483_v13 }
 0x2eb   : > { %v510_v14 = vpop.permute.xlu0 %509  ;;  %v489_v16 = vpop.permute.xlu1 %488 }
 0x2ec   : > { %512 = vst.msk [vmem:[#allocation4] sm:$0xff] %vm282_vm1, %v510_v14  ;;  %v491_v17 = vsel %vm475_vm4, %v433_v56, %v489_v16  ;;  %v699_v56 = vsel %vm697_vm6, 1, %v2659_v34 }
 0x2ed   : > { %493 = vrot.lane.b32.xlu1 %v491_v17, %s2661_s28 }
 0x2ef   : > { %v516_v19 = vpop.permute.xlu0 %515  ;;  %v2863_v20 = vld [vmem:[#allocation2] sm:$0xff] }
 0x2f0   : > { %v518_v15 = vsel %vm502_vm5, %v462_v59, %v516_v19  ;;  %v544_v18 = vpack.c.bf16 %v2863_v20, %v2863_v20 }
 0x2f1   : > { %520 = vrot.lane.b32.xlu0 %v518_v15, %s2661_s28 }
 0x2f2   : > { %2356 = vmatmul.mubr.msk.bf16.vlgmr.msra.gmra.mrb[4].mxu0 %vm282_vm1, %v544_v18 }
 0x2f3   : > { %v2871_v22 = vld [vmem:[#allocation4] sm:$0xff]  ;;  %2368 = vmatpush3.bf16.msra.mxu0 %v2733_v8  ;;  %2371 = vmatprep.mubr.msk.bf16.mxu0 %vm2657_vm0, %v2656_v9 }
 0x2f4   : > { %v594_v23 = vpack.c.bf16 %v2871_v22, %v2871_v22  ;;  %2369 = vmatprep.subr.bf16.mxu0 %v2656_v9 }
 0x2f6   : > { %2364 = vmatmul.mubr.msk.bf16.vlgmr.msra.gmra.mrb[4].mxu1 %vm282_vm1, %v594_v23 }
 0x2f7   : > { %2376 = vmatpush3.bf16.msra.mxu1 %v2740_v10  ;;  %2370 = vmatpush3.bf16.msra.mxu0 %v2746_v11 }
 0x2f8   : > { %2377 = vmatprep.subr.bf16.mxu1 %v2656_v9  ;;  %2379 = vmatprep.mubr.msk.bf16.mxu1 %vm2657_vm0, %v2656_v9 }
 0x2f9   : > { %2383 = vmatprep.subr.bf16.mxu0 %v2656_v9 }
 0x2fb   : > { %2378 = vmatpush3.bf16.msra.mxu1 %v2755_v12 }
 0x2fc   : > { %2391 = vmatprep.subr.bf16.mxu1 %v2656_v9 }
 0x35f   : > { %v494_v24 = vpop.permute.xlu1 %493 }
 0x360   : > { %496 = vst.msk [vmem:[#allocation3] sm:$0xff] %vm282_vm1, %v494_v24 }
 0x363   : > { %v521_v25 = vpop.permute.xlu0 %520 }
 0x364   : > { %523 = vst.msk [vmem:[#allocation5] sm:$0xff] %vm282_vm1, %v521_v25 }
 0x367   : > { %v639_v43 = vld [vmem:[#allocation3] sm:$0xff] }
 0x36b   : > { %v668_v21 = vld [vmem:[#allocation5] sm:$0xff] }
 0x3c5   : > { %v582_v29 = vpop.f32.mrb[4].mxu0 }
 0x3c6   : > { %v588_v30 = vadd.f32 %v582_v29, %v542_v27  ;;  %v2357_v31 = vpop.f32.mrb[5].mxu0 }
 0x3c7   : > { %v585_v33 = vpop.f32.mrb[6].mxu0 }
 0x3c8   : > { %2515 = vtanh.f32 %v588_v30  ;;  %v2358_v35 = vpop.f32.mrb[7].mxu0  ;;  %v2232_v44 = vmul.f32 -1.442695, %v588_v30 }
 0x3c9   : > { %v632_v36 = vpop.f32.mrb[4].mxu1 }
 0x3ca   : > { %v638_v37 = vadd.f32 %v632_v36, %v592_v32  ;;  %v2365_v38 = vpop.f32.mrb[5].mxu1 }
 0x3cb   : > { %v635_v39 = vpop.f32.mrb[6].mxu1  ;;  %v2961_v38 = vld [vmem:[%s2806_s20 + $0x10] sm:$0xff] }
 0x3cc   : > { %2517 = vtanh.f32 %v638_v37  ;;  %v2366_v40 = vpop.f32.mrb[7].mxu1  ;;  %v2233_v46 = vmul.f32 -1.442695, %v638_v37  ;;  %v2964_v39 = vld [vmem:[%s2806_s20 + $0x28] sm:$0xff] }
 0x3cd   : > { %2519 = vpow2.f32 %v2232_v44  ;;  %v770_v40 = vunpack.c.l.bf16 %v2961_v38 }
 0x3ce   : > { %2521 = vpow2.f32 %v2233_v46 }
 0x3d2   : > { %v2516_v41 = vpop.eup %2515 }
 0x3d3   : > { %653 = vrot.lane.b32.xlu1 %v2516_v41, %s2660_s15  ;;  %v818_v41 = vrot.slane %v2964_v39, 4 }
 0x3d5   : > { %v820_v44 = vunpack.c.l.bf16 %v818_v41 }
 0x3d6   : > { %v2518_v42 = vpop.eup %2517 }
 0x3d7   : > { %682 = vrot.lane.b32.xlu0 %v2518_v42, %s2660_s15  ;;  %648 = vrot.lane.b32.xlu1 %v639_v43, %s2658_s13  ;;  %v2520_v47 = vpop.eup %2519 }
 0x3d8   : > { %v643_v48 = vadd.f32 1.0, %v2520_v47  ;;  %v2522_v49 = vpop.eup %2521 }
 0x3d9   : > { %v672_v50 = vadd.f32 1.0, %v2522_v49 }
 0x3da   : > { %2523 = vrcp.f32 %v643_v48 }
 0x3db   : > { %677 = vrot.lane.b32.xlu0 %v668_v21, %s2658_s13  ;;  %2525 = vrcp.f32 %v672_v50 }
 0x3e4   : > { %v2524_v51 = vpop.eup %2523 }
 0x3e5   : > { %v2526_v54 = vpop.eup %2525 }
 0x445   : > { %v654_v52 = vpop.permute.xlu1 %653 }
 0x446   : > { %v656_v53 = vmul.f32 %v2524_v51, %v654_v52 }
 0x448   : > { %658 = vrot.lane.b32.xlu1 %v656_v53, %s2658_s13 }
 0x449   : > { %v683_v55 = vpop.permute.xlu0 %682  ;;  %v649_v59 = vpop.permute.xlu1 %648 }
 0x44a   : > { %v685_v57 = vmul.f32 %v2526_v54, %v683_v55  ;;  %v651_v60 = vmul.f32 %v2524_v51, %v649_v59 }
 0x44c   : > { %687 = vrot.lane.b32.xlu0 %v685_v57, %s2658_s13  ;;  %701 = vperm.xlu1 %2494, %v699_v56  }
 0x44d   : > { %v678_v61 = vpop.permute.xlu0 %677 }
 0x44e   : > { %v680_v3 = vmul.f32 %v2526_v54, %v678_v61 }
 0x450   : > { %728 = vperm.xlu0 %2493, %v726_v58  }
 0x4ba   : > { %v659_v0 = vpop.permute.xlu1 %658 }
 0x4bb   : > { %v661_v2 = vadd.f32 %v659_v0, %v651_v60 }
 0x4bd   : > { %2527 = vtanh.f32 %v661_v2 }
 0x4be   : > { %v688_v4 = vpop.permute.xlu0 %687 }
 0x4bf   : > { %v690_v6 = vadd.f32 %v688_v4, %v680_v3 }
 0x4c1   : > { %2529 = vtanh.f32 %v690_v6 }
 0x4c7   : > { %v2528_v7 = vpop.eup %2527 }
 0x4c8   : > { %664 = vrot.lane.b32.xlu1 %v2528_v7, %s2660_s15 }
 0x4cb   : > { %v2530_v13 = vpop.eup %2529  ;;  %v2908_v14 = vpop.permute.xlu1 %701 }
 0x4cc   : > { %693 = vrot.lane.b32.xlu0 %v2530_v13, %s2660_s15  ;;  %705 = vrot.lane.b32.xlu1 %v2863_v20, %s2661_s28  ;;  %vm703_vm8 = vcmp.eq.s32.totalorder %v2908_v14, 1  ;;  %v927_v13 = vsel %vm925_vm10, 1, %v2659_v34 }
 0x4cf   : > { %v2910_v16 = vpop.permute.xlu0 %728 }
 0x4d0   : > { %732 = vrot.lane.b32.xlu0 %v2871_v22, %s2661_s28  ;;  %vm730_vm9 = vcmp.eq.s32.totalorder %v2910_v16, 1 }
 0x53a   : > { %v665_v17 = vpop.permute.xlu1 %664 }
 0x53b   : > { %v2912_v19 = vmul.f32 %v2524_v51, %v665_v17 }
 0x53e   : > { %v694_v15 = vpop.permute.xlu0 %693  ;;  %v706_v18 = vpop.permute.xlu1 %705 }
 0x53f   : > { %v708_v23 = vsel %vm703_vm8, %v2912_v19, %v706_v18  ;;  %v2919_v20 = vmul.f32 %v2526_v54, %v694_v15  ;;  %v954_v15 = vsel %vm926_vm11, 1, %v2659_v34 }
 0x540   : > { %710 = vrot.lane.b32.xlu1 %v708_v23, %s2658_s13 }
 0x542   : > { %v733_v22 = vpop.permute.xlu0 %732 }
 0x543   : > { %v735_v24 = vsel %vm730_vm9, %v2919_v20, %v733_v22 }
 0x544   : > { %737 = vrot.lane.b32.xlu0 %v735_v24, %s2658_s13  ;;  %716 = vrot.lane.b32.xlu1 %v639_v43, %s2658_s13 }
 0x548   : > { %743 = vrot.lane.b32.xlu0 %v668_v21, %s2658_s13 }
 0x5b2   : > { %v711_v25 = vpop.permute.xlu1 %710 }
 0x5b3   : > { %713 = vst.msk [vmem:[#allocation2] sm:$0xff] %vm282_vm1, %v711_v25 }
 0x5b6   : > { %v738_v26 = vpop.permute.xlu0 %737  ;;  %v717_v27 = vpop.permute.xlu1 %716 }
 0x5b7   : > { %740 = vst.msk [vmem:[#allocation4] sm:$0xff] %vm282_vm1, %v738_v26  ;;  %v719_v28 = vsel %vm703_vm8, %v661_v2, %v717_v27 }
 0x5b8   : > { %721 = vrot.lane.b32.xlu1 %v719_v28, %s2661_s28 }
 0x5ba   : > { %v744_v29 = vpop.permute.xlu0 %743  ;;  %v2933_v30 = vld [vmem:[#allocation2] sm:$0xff] }
 0x5bb   : > { %v746_v31 = vsel %vm730_vm9, %v690_v6, %v744_v29  ;;  %v772_v32 = vpack.c.bf16 %v2933_v30, %v2933_v30 }
 0x5bc   : > { %748 = vrot.lane.b32.xlu0 %v746_v31, %s2661_s28 }
 0x5bd   : > { %2372 = vmatmul.mubr.msk.bf16.vlgmr.msra.gmra.mrb[8].mxu0 %vm282_vm1, %v772_v32 }
 0x5be   : > { %v2941_v33 = vld [vmem:[#allocation4] sm:$0xff]  ;;  %2384 = vmatpush3.bf16.msra.mxu0 %v2733_v8  ;;  %2387 = vmatprep.mubr.msk.bf16.mxu0 %vm2657_vm0, %v2656_v9 }
 0x5bf   : > { %v822_v35 = vpack.c.bf16 %v2941_v33, %v2941_v33  ;;  %2385 = vmatprep.subr.bf16.mxu0 %v2656_v9 }
 0x5c1   : > { %2380 = vmatmul.mubr.msk.bf16.vlgmr.msra.gmra.mrb[8].mxu1 %vm282_vm1, %v822_v35 }
 0x5c2   : > { %2392 = vmatpush3.bf16.msra.mxu1 %v2740_v10  ;;  %2386 = vmatpush3.bf16.msra.mxu0 %v2746_v11 }
 0x5c3   : > { %2393 = vmatprep.subr.bf16.mxu1 %v2656_v9  ;;  %2395 = vmatprep.mubr.msk.bf16.mxu1 %vm2657_vm0, %v2656_v9 }
 0x5c4   : > { %2399 = vmatprep.subr.bf16.mxu0 %v2656_v9 }
 0x5c6   : > { %2394 = vmatpush3.bf16.msra.mxu1 %v2755_v12 }
 0x5c7   : > { %2407 = vmatprep.subr.bf16.mxu1 %v2656_v9 }
 0x62a   : > { %v722_v36 = vpop.permute.xlu1 %721 }
 0x62b   : > { %724 = vst.msk [vmem:[#allocation3] sm:$0xff] %vm282_vm1, %v722_v36 }
 0x62e   : > { %v749_v37 = vpop.permute.xlu0 %748 }
 0x62f   : > { %751 = vst.msk [vmem:[#allocation5] sm:$0xff] %vm282_vm1, %v749_v37 }
 0x632   : > { %v867_v55 = vld [vmem:[#allocation3] sm:$0xff] }
 0x636   : > { %v896_v56 = vld [vmem:[#allocation5] sm:$0xff] }
 0x690   : > { %v810_v42 = vpop.f32.mrb[8].mxu0 }
 0x691   : > { %v816_v43 = vadd.f32 %v810_v42, %v770_v40  ;;  %v2373_v21 = vpop.f32.mrb[9].mxu0 }
 0x692   : > { %v813_v46 = vpop.f32.mrb[10].mxu0 }
 0x693   : > { %2531 = vtanh.f32 %v816_v43  ;;  %v2374_v47 = vpop.f32.mrb[11].mxu0  ;;  %v2240_v57 = vmul.f32 -1.442695, %v816_v43 }
 0x694   : > { %v860_v48 = vpop.f32.mrb[8].mxu1 }
 0x695   : > { %v866_v49 = vadd.f32 %v860_v48, %v820_v44  ;;  %v2381_v50 = vpop.f32.mrb[9].mxu1 }
 0x696   : > { %v863_v51 = vpop.f32.mrb[10].mxu1 }
 0x697   : > { %2533 = vtanh.f32 %v866_v49  ;;  %v2382_v52 = vpop.f32.mrb[11].mxu1  ;;  %v2241_v58 = vmul.f32 -1.442695, %v866_v49 }
 0x698   : > { %2535 = vpow2.f32 %v2240_v57  ;;  %v3040_v57 = vld [vmem:[%s2806_s20 + $0x20] sm:$0xff] }
 0x699   : > { %2537 = vpow2.f32 %v2241_v58 }
 0x69d   : > { %v2532_v53 = vpop.eup %2531 }
 0x69e   : > { %881 = vrot.lane.b32.xlu1 %v2532_v53, %s2660_s15 }
 0x6a1   : > { %v2534_v54 = vpop.eup %2533 }
 0x6a2   : > { %910 = vrot.lane.b32.xlu0 %v2534_v54, %s2660_s15  ;;  %876 = vrot.lane.b32.xlu1 %v867_v55, %s2658_s13  ;;  %v2536_v59 = vpop.eup %2535 }
 0x6a3   : > { %v871_v60 = vadd.f32 1.0, %v2536_v59  ;;  %v2538_v61 = vpop.eup %2537  ;;  %v1046_v59 = vrot.slane %v3040_v57, 4 }
 0x6a4   : > { %v900_v0 = vadd.f32 1.0, %v2538_v61 }
 0x6a5   : > { %2539 = vrcp.f32 %v871_v60 }
 0x6a6   : > { %905 = vrot.lane.b32.xlu0 %v896_v56, %s2658_s13  ;;  %2541 = vrcp.f32 %v900_v0 }
 0x6af   : > { %v2540_v2 = vpop.eup %2539 }
 0x6b0   : > { %v2542_v6 = vpop.eup %2541 }
 0x710   : > { %v882_v3 = vpop.permute.xlu1 %881 }
 0x711   : > { %v884_v4 = vmul.f32 %v2540_v2, %v882_v3 }
 0x713   : > { %886 = vrot.lane.b32.xlu1 %v884_v4, %s2658_s13 }
 0x714   : > { %v911_v7 = vpop.permute.xlu0 %910  ;;  %v877_v18 = vpop.permute.xlu1 %876 }
 0x715   : > { %v913_v17 = vmul.f32 %v2542_v6, %v911_v7  ;;  %v879_v23 = vmul.f32 %v2540_v2, %v877_v18 }
 0x717   : > { %915 = vrot.lane.b32.xlu0 %v913_v17, %s2658_s13  ;;  %929 = vperm.xlu1 %2494, %v927_v13  }
 0x718   : > { %v906_v22 = vpop.permute.xlu0 %905 }
 0x719   : > { %v908_v26 = vmul.f32 %v2542_v6, %v906_v22 }
 0x71b   : > { %956 = vperm.xlu0 %2493, %v954_v15  }
 0x785   : > { %v887_v24 = vpop.permute.xlu1 %886 }
 0x786   : > { %v889_v25 = vadd.f32 %v887_v24, %v879_v23 }
 0x788   : > { %2543 = vtanh.f32 %v889_v25 }
 0x789   : > { %v916_v27 = vpop.permute.xlu0 %915 }
 0x78a   : > { %v918_v28 = vadd.f32 %v916_v27, %v908_v26 }
 0x78c   : > { %2545 = vtanh.f32 %v918_v28 }
 0x792   : > { %v2544_v29 = vpop.eup %2543 }
 0x793   : > { %892 = vrot.lane.b32.xlu1 %v2544_v29, %s2660_s15 }
 0x796   : > { %v2546_v31 = vpop.eup %2545  ;;  %v2984_v32 = vpop.permute.xlu1 %929 }
 0x797   : > { %921 = vrot.lane.b32.xlu0 %v2546_v31, %s2660_s15  ;;  %933 = vrot.lane.b32.xlu1 %v2933_v30, %s2661_s28  ;;  %vm931_vm12 = vcmp.eq.s32.totalorder %v2984_v32, 1 }
 0x79a   : > { %v2986_v35 = vpop.permute.xlu0 %956 }
 0x79b   : > { %960 = vrot.lane.b32.xlu0 %v2941_v33, %s2661_s28  ;;  %vm958_vm13 = vcmp.eq.s32.totalorder %v2986_v35, 1 }
 0x805   : > { %v893_v36 = vpop.permute.xlu1 %892 }
 0x806   : > { %v2988_v37 = vmul.f32 %v2540_v2, %v893_v36  ;;  %v1048_v2 = vunpack.c.l.bf16 %v1046_v59 }
 0x809   : > { %v922_v40 = vpop.permute.xlu0 %921  ;;  %v934_v41 = vpop.permute.xlu1 %933 }
 0x80a   : > { %v936_v42 = vsel %vm931_vm12, %v2988_v37, %v934_v41  ;;  %v2995_v30 = vmul.f32 %v2542_v6, %v922_v40 }
 0x80b   : > { %938 = vrot.lane.b32.xlu1 %v936_v42, %s2658_s13 }
 0x80d   : > { %v961_v33 = vpop.permute.xlu0 %960 }
 0x80e   : > { %v963_v43 = vsel %vm958_vm13, %v2995_v30, %v961_v33 }
 0x80f   : > { %965 = vrot.lane.b32.xlu0 %v963_v43, %s2658_s13  ;;  %944 = vrot.lane.b32.xlu1 %v867_v55, %s2658_s13  ;;  %v1155_v43 = vsel %vm1153_vm14, 1, %v2659_v34 }
 0x813   : > { %971 = vrot.lane.b32.xlu0 %v896_v56, %s2658_s13  ;;  %v3037_v56 = vld [vmem:[%s2806_s20 + $0x18] sm:$0xff] }
 0x814   : > { %v998_v58 = vunpack.c.l.bf16 %v3037_v56 }
 0x87d   : > { %v939_v21 = vpop.permute.xlu1 %938 }
 0x87e   : > { %941 = vst.msk [vmem:[#allocation2] sm:$0xff] %vm282_vm1, %v939_v21 }
 0x881   : > { %v966_v44 = vpop.permute.xlu0 %965  ;;  %v945_v46 = vpop.permute.xlu1 %944 }
 0x882   : > { %968 = vst.msk [vmem:[#allocation4] sm:$0xff] %vm282_vm1, %v966_v44  ;;  %v947_v47 = vsel %vm931_vm12, %v889_v25, %v945_v46  ;;  %v1182_v44 = vsel %vm1154_vm15, 1, %v2659_v34 }
 0x883   : > { %949 = vrot.lane.b32.xlu1 %v947_v47, %s2661_s28 }
 0x885   : > { %v972_v48 = vpop.permute.xlu0 %971  ;;  %v3009_v49 = vld [vmem:[#allocation2] sm:$0xff] }
 0x886   : > { %v974_v50 = vsel %vm958_vm13, %v918_v28, %v972_v48  ;;  %v1000_v51 = vpack.c.bf16 %v3009_v49, %v3009_v49 }
 0x887   : > { %976 = vrot.lane.b32.xlu0 %v974_v50, %s2661_s28 }
 0x888   : > { %2388 = vmatmul.mubr.msk.bf16.vlgmr.msra.gmra.mrb[12].mxu0 %vm282_vm1, %v1000_v51 }
 0x889   : > { %v3017_v52 = vld [vmem:[#allocation4] sm:$0xff]  ;;  %2400 = vmatpush3.bf16.msra.mxu0 %v2733_v8  ;;  %2403 = vmatprep.mubr.msk.bf16.mxu0 %vm2657_vm0, %v2656_v9 }
 0x88a   : > { %v1050_v53 = vpack.c.bf16 %v3017_v52, %v3017_v52  ;;  %2401 = vmatprep.subr.bf16.mxu0 %v2656_v9 }
 0x88c   : > { %2396 = vmatmul.mubr.msk.bf16.vlgmr.msra.gmra.mrb[12].mxu1 %vm282_vm1, %v1050_v53 }
 0x88d   : > { %2408 = vmatpush3.bf16.msra.mxu1 %v2740_v10  ;;  %2402 = vmatpush3.bf16.msra.mxu0 %v2746_v11 }
 0x88e   : > { %2409 = vmatprep.subr.bf16.mxu1 %v2656_v9  ;;  %2411 = vmatprep.mubr.msk.bf16.mxu1 %vm2657_vm0, %v2656_v9 }
 0x88f   : > { %2415 = vmatprep.subr.bf16.mxu0 %v2656_v9 }
 0x891   : > { %2410 = vmatpush3.bf16.msra.mxu1 %v2755_v12 }
 0x892   : > { %2423 = vmatprep.subr.bf16.mxu1 %v2656_v9 }
 0x8f5   : > { %v950_v54 = vpop.permute.xlu1 %949 }
 0x8f6   : > { %952 = vst.msk [vmem:[#allocation3] sm:$0xff] %vm282_vm1, %v950_v54 }
 0x8f9   : > { %v977_v55 = vpop.permute.xlu0 %976 }
 0x8fa   : > { %979 = vst.msk [vmem:[#allocation5] sm:$0xff] %vm282_vm1, %v977_v55 }
 0x8fd   : > { %v1095_v22 = vld [vmem:[#allocation3] sm:$0xff] }
 0x901   : > { %v1124_v24 = vld [vmem:[#allocation5] sm:$0xff] }
 0x95b   : > { %v1038_v60 = vpop.f32.mrb[12].mxu0 }
 0x95c   : > { %v1044_v61 = vadd.f32 %v1038_v60, %v998_v58  ;;  %v2389_v0 = vpop.f32.mrb[13].mxu0 }
 0x95d   : > { %v1041_v3 = vpop.f32.mrb[14].mxu0 }
 0x95e   : > { %2547 = vtanh.f32 %v1044_v61  ;;  %v2390_v4 = vpop.f32.mrb[15].mxu0  ;;  %v2248_v25 = vmul.f32 -1.442695, %v1044_v61 }
 0x95f   : > { %v1088_v6 = vpop.f32.mrb[12].mxu1 }
 0x960   : > { %v1094_v7 = vadd.f32 %v1088_v6, %v1048_v2  ;;  %v2397_v13 = vpop.f32.mrb[13].mxu1 }
 0x961   : > { %v1091_v17 = vpop.f32.mrb[14].mxu1 }
 0x962   : > { %2549 = vtanh.f32 %v1094_v7  ;;  %v2398_v15 = vpop.f32.mrb[15].mxu1  ;;  %v2249_v26 = vmul.f32 -1.442695, %v1094_v7 }
 0x963   : > { %2551 = vpow2.f32 %v2248_v25 }
 0x964   : > { %2553 = vpow2.f32 %v2249_v26 }
 0x968   : > { %v2548_v18 = vpop.eup %2547 }
 0x969   : > { %1109 = vrot.lane.b32.xlu1 %v2548_v18, %s2660_s15 }
 0x96c   : > { %v2550_v23 = vpop.eup %2549 }
 0x96d   : > { %1138 = vrot.lane.b32.xlu0 %v2550_v23, %s2660_s15  ;;  %1104 = vrot.lane.b32.xlu1 %v1095_v22, %s2658_s13  ;;  %v2552_v27 = vpop.eup %2551 }
 0x96e   : > { %v1099_v28 = vadd.f32 1.0, %v2552_v27  ;;  %v2554_v29 = vpop.eup %2553 }
 0x96f   : > { %v1128_v31 = vadd.f32 1.0, %v2554_v29 }
 0x970   : > { %2555 = vrcp.f32 %v1099_v28 }
 0x971   : > { %1133 = vrot.lane.b32.xlu0 %v1124_v24, %s2658_s13  ;;  %2557 = vrcp.f32 %v1128_v31 }
 0x97a   : > { %v2556_v36 = vpop.eup %2555 }
 0x97b   : > { %v2558_v42 = vpop.eup %2557 }
 0x9db   : > { %v1110_v40 = vpop.permute.xlu1 %1109 }
 0x9dc   : > { %v1112_v41 = vmul.f32 %v2556_v36, %v1110_v40 }
 0x9de   : > { %1114 = vrot.lane.b32.xlu1 %v1112_v41, %s2658_s13 }
 0x9df   : > { %v1139_v33 = vpop.permute.xlu0 %1138  ;;  %v1105_v46 = vpop.permute.xlu1 %1104 }
 0x9e0   : > { %v1141_v21 = vmul.f32 %v2558_v42, %v1139_v33  ;;  %v1107_v47 = vmul.f32 %v2556_v36, %v1105_v46 }
 0x9e2   : > { %1143 = vrot.lane.b32.xlu0 %v1141_v21, %s2658_s13  ;;  %1157 = vperm.xlu1 %2494, %v1155_v43  }
 0x9e3   : > { %v1134_v48 = vpop.permute.xlu0 %1133 }
 0x9e4   : > { %v1136_v53 = vmul.f32 %v2558_v42, %v1134_v48 }
 0x9e6   : > { %1184 = vperm.xlu0 %2493, %v1182_v44  }
 0xa50   : > { %v1115_v50 = vpop.permute.xlu1 %1114 }
 0xa51   : > { %v1117_v51 = vadd.f32 %v1115_v50, %v1107_v47 }
 0xa53   : > { %2559 = vtanh.f32 %v1117_v51 }
 0xa54   : > { %v1144_v54 = vpop.permute.xlu0 %1143 }
 0xa55   : > { %v1146_v55 = vadd.f32 %v1144_v54, %v1136_v53 }
 0xa57   : > { %2561 = vtanh.f32 %v1146_v55 }
 0xa5d   : > { %v2560_v58 = vpop.eup %2559 }
 0xa5e   : > { %1120 = vrot.lane.b32.xlu1 %v2560_v58, %s2660_s15 }
 0xa61   : > { %v2562_v45 = vpop.eup %2561  ;;  %v3060_v34 = vpop.permute.xlu1 %1157 }
 0xa62   : > { %1149 = vrot.lane.b32.xlu0 %v2562_v45, %s2660_s15  ;;  %1161 = vrot.lane.b32.xlu1 %v3009_v49, %s2661_s28  ;;  %vm1159_vm2 = vcmp.eq.s32.totalorder %v3060_v34, 1 }
 0xa65   : > { %v3062_v59 = vpop.permute.xlu0 %1184 }
 0xa66   : > { %1188 = vrot.lane.b32.xlu0 %v3017_v52, %s2661_s28  ;;  %vm1186_vm3 = vcmp.eq.s32.totalorder %v3062_v59, 1 }
 0xad0   : > { %v1121_v60 = vpop.permute.xlu1 %1120 }
 0xad1   : > { %v3064_v61 = vmul.f32 %v2556_v36, %v1121_v60 }
 0xad4   : > { %v1150_v0 = vpop.permute.xlu0 %1149  ;;  %v1162_v2 = vpop.permute.xlu1 %1161 }
 0xad5   : > { %v1164_v3 = vsel %vm1159_vm2, %v3064_v61, %v1162_v2  ;;  %v3071_v49 = vmul.f32 %v2558_v42, %v1150_v0 }
 0xad6   : > { %1166 = vrot.lane.b32.xlu1 %v1164_v3, %s2658_s13 }
 0xad8   : > { %v1189_v52 = vpop.permute.xlu0 %1188 }
 0xad9   : > { %v1191_v4 = vsel %vm1186_vm3, %v3071_v49, %v1189_v52 }
 0xada   : > { %1193 = vrot.lane.b32.xlu0 %v1191_v4, %s2658_s13  ;;  %1172 = vrot.lane.b32.xlu1 %v1095_v22, %s2658_s13 }
 0xade   : > { %1199 = vrot.lane.b32.xlu0 %v1124_v24, %s2658_s13 }
 0xb48   : > { %v1167_v6 = vpop.permute.xlu1 %1166 }
 0xb49   : > { %1169 = vst.msk [vmem:[#allocation2] sm:$0xff] %vm282_vm1, %v1167_v6 }
 0xb4c   : > { %v1194_v7 = vpop.permute.xlu0 %1193  ;;  %v1173_v13 = vpop.permute.xlu1 %1172 }
 0xb4d   : > { %1196 = vst.msk [vmem:[#allocation4] sm:$0xff] %vm282_vm1, %v1194_v7  ;;  %v1175_v17 = vsel %vm1159_vm2, %v1117_v51, %v1173_v13 }
 0xb4e   : > { %1177 = vrot.lane.b32.xlu1 %v1175_v17, %s2661_s28 }
 0xb50   : > { %v1200_v15 = vpop.permute.xlu0 %1199  ;;  %v3085_v18 = vld [vmem:[#allocation2] sm:$0xff] }
 0xb51   : > { %v1202_v23 = vsel %vm1186_vm3, %v1146_v55, %v1200_v15  ;;  %v1226_v22 = vpack.c.bf16 %v3085_v18, %v3085_v18 }
 0xb52   : > { %1204 = vrot.lane.b32.xlu0 %v1202_v23, %s2661_s28 }
 0xb53   : > { %2404 = vmatmul.mubr.msk.bf16.vlgmr.msra.gmra.mrb[16].mxu0 %vm282_vm1, %v1226_v22 }
 0xb54   : > { %v3093_v24 = vld [vmem:[#allocation4] sm:$0xff]  ;;  %2416 = vmatpush3.bf16.msra.mxu0 %v2733_v8  ;;  %2419 = vmatprep.mubr.msk.bf16.mxu0 %vm2657_vm0, %v2656_v9 }
 0xb55   : > { %v1276_v25 = vpack.c.bf16 %v3093_v24, %v3093_v24  ;;  %2417 = vmatprep.subr.bf16.mxu0 %v2656_v9 }
 0xb57   : > { %2412 = vmatmul.mubr.msk.bf16.vlgmr.msra.gmra.mrb[16].mxu1 %vm282_vm1, %v1276_v25 }
 0xb58   : > { %2424 = vmatpush3.bf16.msra.mxu1 %v2740_v10  ;;  %2418 = vmatpush3.bf16.msra.mxu0 %v2746_v11  ;;  %v1224_v10 = vunpack.c.l.bf16 %v3040_v57  ;;  %v1272_v11 = vrot.slane %v3037_v56, 4 }
 0xb59   : > { %2425 = vmatprep.subr.bf16.mxu1 %v2656_v9  ;;  %2427 = vmatprep.mubr.msk.bf16.mxu1 %vm2657_vm0, %v2656_v9 }
 0xb5a   : > { %2431 = vmatprep.subr.bf16.mxu0 %v2656_v9  ;;  %v1274_v31 = vunpack.c.l.bf16 %v1272_v11 }
 0xb5c   : > { %2426 = vmatpush3.bf16.msra.mxu1 %v2755_v12 }
 0xb5d   : > { %2439 = vmatprep.subr.bf16.mxu1 %v2656_v9 }
 0xbc0   : > { %v1178_v8 = vpop.permute.xlu1 %1177 }
 0xbc1   : > { %1180 = vst.msk [vmem:[#allocation3] sm:$0xff] %vm282_vm1, %v1178_v8 }
 0xbc4   : > { %v1205_v26 = vpop.permute.xlu0 %1204 }
 0xbc5   : > { %1207 = vst.msk [vmem:[#allocation5] sm:$0xff] %vm282_vm1, %v1205_v26 }
 0xbc8   : > { %v1321_v57 = vld [vmem:[#allocation3] sm:$0xff] }
 0xbcc   : > { %v1350_v56 = vld [vmem:[#allocation5] sm:$0xff] }
 0xc26   : > { %v1264_v27 = vpop.f32.mrb[16].mxu0 }
 0xc27   : > { %v1270_v28 = vadd.f32 %v1264_v27, %v1224_v10  ;;  %v2405_v29 = vpop.f32.mrb[17].mxu0 }
 0xc28   : > { %v1267_v36 = vpop.f32.mrb[18].mxu0 }
 0xc29   : > { %2563 = vtanh.f32 %v1270_v28  ;;  %v2406_v40 = vpop.f32.mrb[19].mxu0  ;;  %v2256_v46 = vmul.f32 -1.442695, %v1270_v28 }
 0xc2a   : > { %v1314_v12 = vpop.f32.mrb[16].mxu1 }
 0xc2b   : > { %v1320_v41 = vadd.f32 %v1314_v12, %v1274_v31  ;;  %v2413_v42 = vpop.f32.mrb[17].mxu1 }
 0xc2c   : > { %v1317_v33 = vpop.f32.mrb[18].mxu1 }
 0xc2d   : > { %2565 = vtanh.f32 %v1320_v41  ;;  %v2414_v43 = vpop.f32.mrb[19].mxu1  ;;  %v2257_v47 = vmul.f32 -1.442695, %v1320_v41  ;;  %v3158_v33 = vld [vmem:[%s3448_s2] sm:$0xff]  }
 0xc2e   : > { %2567 = vpow2.f32 %v2256_v46 }
 0xc2f   : > { %2569 = vpow2.f32 %v2257_v47  ;;  %v1436_v47 = vunpack.c.l.bf16 %v2964_v39 }
 0xc33   : > { %v2564_v21 = vpop.eup %2563 }
 0xc34   : > { %1335 = vrot.lane.b32.xlu1 %v2564_v21, %s2660_s15  ;;  %v3170_v21 = vld [vmem:[%s3449_s3] sm:$0xff]  }
 0xc37   : > { %v2566_v44 = vpop.eup %2565 }
 0xc38   : > { %1364 = vrot.lane.b32.xlu0 %v2566_v44, %s2660_s15  ;;  %1330 = vrot.lane.b32.xlu1 %v1321_v57, %s2658_s13  ;;  %v2568_v48 = vpop.eup %2567  ;;  %v3176_v44 = vld [vmem:[%s3448_s2 + $0x8] sm:$0xff]  }
 0xc39   : > { %v1325_v50 = vadd.f32 1.0, %v2568_v48  ;;  %v2570_v51 = vpop.eup %2569  ;;  %v1484_v48 = vrot.slane %v2961_v38, 4 }
 0xc3a   : > { %v1354_v53 = vadd.f32 1.0, %v2570_v51 }
 0xc3b   : > { %2571 = vrcp.f32 %v1325_v50 }
 0xc3c   : > { %1359 = vrot.lane.b32.xlu0 %v1350_v56, %s2658_s13  ;;  %2573 = vrcp.f32 %v1354_v53 }
 0xc45   : > { %v2572_v54 = vpop.eup %2571 }
 0xc46   : > { %v2574_v45 = vpop.eup %2573 }
 0xca6   : > { %v1336_v55 = vpop.permute.xlu1 %1335 }
 0xca7   : > { %v1338_v58 = vmul.f32 %v2572_v54, %v1336_v55 }
 0xca9   : > { %1340 = vrot.lane.b32.xlu1 %v1338_v58, %s2658_s13 }
 0xcaa   : > { %v1365_v60 = vpop.permute.xlu0 %1364  ;;  %v1331_v2 = vpop.permute.xlu1 %1330 }
 0xcab   : > { %v1367_v0 = vmul.f32 %v2574_v45, %v1365_v60  ;;  %v1333_v3 = vmul.f32 %v2572_v54, %v1331_v2 }
 0xcad   : > { %1369 = vrot.lane.b32.xlu0 %v1367_v0, %s2658_s13 }
 0xcae   : > { %v1360_v52 = vpop.permute.xlu0 %1359 }
 0xcaf   : > { %v1362_v7 = vmul.f32 %v2574_v45, %v1360_v52 }
 0xd1b   : > { %v1341_v4 = vpop.permute.xlu1 %1340 }
 0xd1c   : > { %v1343_v6 = vadd.f32 %v1341_v4, %v1333_v3 }
 0xd1e   : > { %2575 = vtanh.f32 %v1343_v6 }
 0xd1f   : > { %v1370_v13 = vpop.permute.xlu0 %1369 }
 0xd20   : > { %v1372_v17 = vadd.f32 %v1370_v13, %v1362_v7 }
 0xd22   : > { %2577 = vtanh.f32 %v1372_v17 }
 0xd28   : > { %v2576_v15 = vpop.eup %2575 }
 0xd29   : > { %1346 = vrot.lane.b32.xlu1 %v2576_v15, %s2660_s15 }
 0xd2c   : > { %v2578_v23 = vpop.eup %2577 }
 0xd2d   : > { %1375 = vrot.lane.b32.xlu0 %v2578_v23, %s2660_s15  ;;  %1380 = vrot.lane.b32.xlu1 %v3085_v18, %s2661_s28 }
 0xd31   : > { %1402 = vrot.lane.b32.xlu0 %v3093_v24, %s2661_s28 }
 0xd9b   : > { %v1347_v22 = vpop.permute.xlu1 %1346 }
 0xd9c   : > { %v3126_v25 = vmul.f32 %v2572_v54, %v1347_v22  ;;  %v1486_v54 = vunpack.c.l.bf16 %v1484_v48 }
 0xd9f   : > { %v1376_v8 = vpop.permute.xlu0 %1375  ;;  %v1381_v26 = vpop.permute.xlu1 %1380 }
 0xda0   : > { %v1383_v10 = vsel %vm1186_vm3, %v3126_v25, %v1381_v26  ;;  %v3132_v11 = vmul.f32 %v2574_v45, %v1376_v8 }
 0xda1   : > { %1385 = vrot.lane.b32.xlu1 %v1383_v10, %s2658_s13 }
 0xda3   : > { %v1403_v27 = vpop.permute.xlu0 %1402 }
 0xda4   : > { %v1405_v18 = vsel %vm1159_vm2, %v3132_v11, %v1403_v27 }
 0xda5   : > { %1407 = vrot.lane.b32.xlu0 %v1405_v18, %s2658_s13  ;;  %1391 = vrot.lane.b32.xlu1 %v1321_v57, %s2658_s13  ;;  %v3186_v57 = vld [vmem:[%s3449_s3 + $0x8] sm:$0xff]  }
 0xda9   : > { %1413 = vrot.lane.b32.xlu0 %v1350_v56, %s2658_s13 }
 0xe13   : > { %v1386_v24 = vpop.permute.xlu1 %1385 }
 0xe14   : > { %1388 = vst.msk [vmem:[#allocation2] sm:$0xff] %vm282_vm1, %v1386_v24 }
 0xe17   : > { %v1408_v28 = vpop.permute.xlu0 %1407  ;;  %v1392_v29 = vpop.permute.xlu1 %1391 }
 0xe18   : > { %1410 = vst.msk [vmem:[#allocation4] sm:$0xff] %vm282_vm1, %v1408_v28  ;;  %v1394_v31 = vsel %vm1186_vm3, %v1343_v6, %v1392_v29 }
 0xe19   : > { %1396 = vrot.lane.b32.xlu1 %v1394_v31, %s2661_s28 }
 0xe1b   : > { %v1414_v36 = vpop.permute.xlu0 %1413  ;;  %v3145_v40 = vld [vmem:[#allocation2] sm:$0xff] }
 0xe1c   : > { %v1416_v12 = vsel %vm1159_vm2, %v1372_v17, %v1414_v36  ;;  %v1438_v41 = vpack.c.bf16 %v3145_v40, %v3145_v40 }
 0xe1d   : > { %1418 = vrot.lane.b32.xlu0 %v1416_v12, %s2661_s28 }
 0xe1e   : > { %2420 = vmatmul.mubr.msk.bf16.vlgmr.msra.gmra.mrb[20].mxu0 %vm282_vm1, %v1438_v41 }
 0xe1f   : > { %v3153_v42 = vld [vmem:[#allocation4] sm:$0xff]  ;;  %2432 = vmatpush3.bf16.msra.mxu0 %v3158_v33  ;;  %2435 = vmatprep.mubr.msk.bf16.mxu0 %vm2657_vm0, %v2656_v9 }
 0xe20   : > { %v1488_v43 = vpack.c.bf16 %v3153_v42, %v3153_v42  ;;  %2433 = vmatprep.subr.bf16.mxu0 %v2656_v9 }
 0xe22   : > { %2428 = vmatmul.mubr.msk.bf16.vlgmr.msra.gmra.mrb[20].mxu1 %vm282_vm1, %v1488_v43 }
 0xe23   : > { %2440 = vmatpush3.bf16.msra.mxu1 %v3170_v21  ;;  %2434 = vmatpush3.bf16.msra.mxu0 %v3176_v44 }
 0xe24   : > { %2441 = vmatprep.subr.bf16.mxu1 %v2656_v9  ;;  %2443 = vmatprep.mubr.msk.bf16.mxu1 %vm2657_vm0, %v2656_v9 }
 0xe25   : > { %2447 = vmatprep.subr.bf16.mxu0 %v2656_v9 }
 0xe27   : > { %2442 = vmatpush3.bf16.msra.mxu1 %v3186_v57 }
 0xe28   : > { %2455 = vmatprep.subr.bf16.mxu1 %v2656_v9 }
 0xe8b   : > { %v1397_v56 = vpop.permute.xlu1 %1396 }
 0xe8c   : > { %1399 = vst.msk [vmem:[#allocation3] sm:$0xff] %vm282_vm1, %v1397_v56 }
 0xe8f   : > { %v1419_v46 = vpop.permute.xlu0 %1418 }
 0xe90   : > { %1421 = vst.msk [vmem:[#allocation5] sm:$0xff] %vm282_vm1, %v1419_v46 }
 0xe93   : > { %v1533_v39 = vld [vmem:[#allocation3] sm:$0xff] }
 0xe97   : > { %v1562_v38 = vld [vmem:[#allocation5] sm:$0xff] }
 0xef1   : > { %v1476_v50 = vpop.f32.mrb[20].mxu0 }
 0xef2   : > { %v1482_v51 = vadd.f32 %v1476_v50, %v1436_v47  ;;  %v2421_v53 = vpop.f32.mrb[21].mxu0 }
 0xef3   : > { %v1479_v55 = vpop.f32.mrb[22].mxu0 }
 0xef4   : > { %2579 = vtanh.f32 %v1482_v51  ;;  %v2422_v58 = vpop.f32.mrb[23].mxu0  ;;  %v2264_v6 = vmul.f32 -1.442695, %v1482_v51 }
 0xef5   : > { %v1526_v45 = vpop.f32.mrb[20].mxu1 }
 0xef6   : > { %v1532_v60 = vadd.f32 %v1526_v45, %v1486_v54  ;;  %v2429_v0 = vpop.f32.mrb[21].mxu1 }
 0xef7   : > { %v1529_v2 = vpop.f32.mrb[22].mxu1 }
 0xef8   : > { %2581 = vtanh.f32 %v1532_v60  ;;  %v2430_v3 = vpop.f32.mrb[23].mxu1  ;;  %v2265_v7 = vmul.f32 -1.442695, %v1532_v60 }
 0xef9   : > { %2583 = vpow2.f32 %v2264_v6  ;;  %v2269_v6 = vld [vmem:[%s2806_s20 + $0x8] sm:$0xff] }
 0xefa   : > { %2585 = vpow2.f32 %v2265_v7  ;;  %v2631_v7 = vld [vmem:[%s2806_s20 + $0x30] sm:$0xff] }
 0xefe   : > { %v2580_v52 = vpop.eup %2579 }
 0xeff   : > { %1547 = vrot.lane.b32.xlu1 %v2580_v52, %s2660_s15 }
 0xf02   : > { %v2582_v4 = vpop.eup %2581 }
 0xf03   : > { %1576 = vrot.lane.b32.xlu0 %v2582_v4, %s2660_s15  ;;  %1542 = vrot.lane.b32.xlu1 %v1533_v39, %s2658_s13  ;;  %v2584_v13 = vpop.eup %2583 }
 0xf04   : > { %v1537_v17 = vadd.f32 1.0, %v2584_v13  ;;  %v2586_v15 = vpop.eup %2585  ;;  %v1648_v13 = vunpack.c.l.bf16 %v2631_v7 }
 0xf05   : > { %v1566_v23 = vadd.f32 1.0, %v2586_v15 }
 0xf06   : > { %2587 = vrcp.f32 %v1537_v17  ;;  %v1696_v17 = vrot.slane %v2269_v6, 4 }
 0xf07   : > { %1571 = vrot.lane.b32.xlu0 %v1562_v38, %s2658_s13  ;;  %2589 = vrcp.f32 %v1566_v23 }
 0xf08   : > { %v1698_v23 = vunpack.c.l.bf16 %v1696_v17 }
 0xf10   : > { %v2588_v22 = vpop.eup %2587 }
 0xf11   : > { %v2590_v10 = vpop.eup %2589 }
 0xf71   : > { %v1548_v8 = vpop.permute.xlu1 %1547 }
 0xf72   : > { %v1550_v26 = vmul.f32 %v2588_v22, %v1548_v8 }
 0xf74   : > { %1552 = vrot.lane.b32.xlu1 %v1550_v26, %s2658_s13 }
 0xf75   : > { %v1577_v27 = vpop.permute.xlu0 %1576  ;;  %v1543_v24 = vpop.permute.xlu1 %1542 }
 0xf76   : > { %v1579_v18 = vmul.f32 %v2590_v10, %v1577_v27  ;;  %v1545_v28 = vmul.f32 %v2588_v22, %v1543_v24 }
 0xf78   : > { %1581 = vrot.lane.b32.xlu0 %v1579_v18, %s2658_s13 }
 0xf79   : > { %v1572_v29 = vpop.permute.xlu0 %1571 }
 0xf7a   : > { %v1574_v12 = vmul.f32 %v2590_v10, %v1572_v29 }
 0xfe6   : > { %v1553_v31 = vpop.permute.xlu1 %1552 }
 0xfe7   : > { %v1555_v36 = vadd.f32 %v1553_v31, %v1545_v28 }
 0xfe9   : > { %2591 = vtanh.f32 %v1555_v36 }
 0xfea   : > { %v1582_v41 = vpop.permute.xlu0 %1581 }
 0xfeb   : > { %v1584_v43 = vadd.f32 %v1582_v41, %v1574_v12 }
 0xfed   : > { %2593 = vtanh.f32 %v1584_v43 }
 0xff3   : > { %v2592_v56 = vpop.eup %2591 }
 0xff4   : > { %1558 = vrot.lane.b32.xlu1 %v2592_v56, %s2660_s15 }
 0xff7   : > { %v2594_v46 = vpop.eup %2593 }
 0xff8   : > { %1587 = vrot.lane.b32.xlu0 %v2594_v46, %s2660_s15  ;;  %1592 = vrot.lane.b32.xlu1 %v3145_v40, %s2661_s28 }
 0xffc   : > { %1614 = vrot.lane.b32.xlu0 %v3153_v42, %s2661_s28 }
0x1066   : > { %v1559_v47 = vpop.permute.xlu1 %1558 }
0x1067   : > { %v3206_v48 = vmul.f32 %v2588_v22, %v1559_v47 }
0x106a   : > { %v1588_v50 = vpop.permute.xlu0 %1587  ;;  %v1593_v51 = vpop.permute.xlu1 %1592 }
0x106b   : > { %v1595_v53 = vsel %vm958_vm13, %v3206_v48, %v1593_v51  ;;  %v3212_v54 = vmul.f32 %v2590_v10, %v1588_v50 }
0x106c   : > { %1597 = vrot.lane.b32.xlu1 %v1595_v53, %s2658_s13 }
0x106d   : > { %v1640_v59 = vsel %vm931_vm12, %v3212_v54, 0.0 }
0x106e   : > { %v1615_v55 = vpop.permute.xlu0 %1614 }
0x106f   : > { %v1617_v40 = vsel %vm931_vm12, %v3212_v54, %v1615_v55 }
0x1070   : > { %1619 = vrot.lane.b32.xlu0 %v1617_v40, %s2658_s13  ;;  %1603 = vrot.lane.b32.xlu1 %v1533_v39, %s2658_s13 }
0x1074   : > { %1625 = vrot.lane.b32.xlu0 %v1562_v38, %s2658_s13 }
0x10de   : > { %v1598_v42 = vpop.permute.xlu1 %1597 }
0x10df   : > { %1600 = vst.msk [vmem:[#allocation2] sm:$0xff] %vm282_vm1, %v1598_v42 }
0x10e2   : > { %v1620_v58 = vpop.permute.xlu0 %1619  ;;  %v1604_v45 = vpop.permute.xlu1 %1603 }
0x10e3   : > { %1622 = vst.msk [vmem:[#allocation4] sm:$0xff] %vm282_vm1, %v1620_v58  ;;  %v1606_v60 = vsel %vm958_vm13, %v1555_v36, %v1604_v45 }
0x10e4   : > { %1608 = vrot.lane.b32.xlu1 %v1606_v60, %s2661_s28 }
0x10e6   : > { %v1626_v0 = vpop.permute.xlu0 %1625  ;;  %v3225_v2 = vld [vmem:[#allocation2] sm:$0xff] }
0x10e7   : > { %v1628_v3 = vsel %vm931_vm12, %v1584_v43, %v1626_v0  ;;  %v1650_v52 = vpack.c.bf16 %v3225_v2, %v3225_v2 }
0x10e8   : > { %1630 = vrot.lane.b32.xlu0 %v1628_v3, %s2661_s28 }
0x10e9   : > { %2436 = vmatmul.mubr.msk.bf16.vlgmr.msra.gmra.mrb[24].mxu0 %vm282_vm1, %v1650_v52 }
0x10ea   : > { %v3233_v4 = vld [vmem:[#allocation4] sm:$0xff]  ;;  %2448 = vmatpush3.bf16.msra.mxu0 %v3158_v33  ;;  %2451 = vmatprep.mubr.msk.bf16.mxu0 %vm2657_vm0, %v2656_v9 }
0x10eb   : > { %v1700_v39 = vpack.c.bf16 %v3233_v4, %v3233_v4  ;;  %2449 = vmatprep.subr.bf16.mxu0 %v2656_v9 }
0x10ed   : > { %2444 = vmatmul.mubr.msk.bf16.vlgmr.msra.gmra.mrb[24].mxu1 %vm282_vm1, %v1700_v39 }
0x10ee   : > { %2456 = vmatpush3.bf16.msra.mxu1 %v3170_v21  ;;  %2450 = vmatpush3.bf16.msra.mxu0 %v3176_v44 }
0x10ef   : > { %2457 = vmatprep.subr.bf16.mxu1 %v2656_v9  ;;  %2459 = vmatprep.mubr.msk.bf16.mxu1 %vm2657_vm0, %v2656_v9  ;;  %vm536_vm0 = vcmask 523520  }
0x10f2   : > { %2458 = vmatpush3.bf16.msra.mxu1 %v3186_v57 }
0x1156   : > { %v1609_v33 = vpop.permute.xlu1 %1608 }
0x1157   : > { %1611 = vst.msk [vmem:[#allocation3] sm:$0xff] %vm282_vm1, %v1609_v33 }
0x115a   : > { %v1631_v38 = vpop.permute.xlu0 %1630 }
0x115b   : > { %1633 = vst.msk [vmem:[#allocation5] sm:$0xff] %vm282_vm1, %v1631_v38 }
0x115e   : > { %v1745_v28 = vld [vmem:[#allocation3] sm:$0xff] }
0x1162   : > { %v1774_v29 = vld [vmem:[#allocation5] sm:$0xff] }
0x11bc   : > { %v1688_v21 = vpop.f32.mrb[24].mxu0 }
0x11bd   : > { %v1694_v15 = vadd.f32 %v1688_v21, %v1648_v13  ;;  %v2437_v44 = vpop.f32.mrb[25].mxu0 }
0x11be   : > { %v1691_v22 = vpop.f32.mrb[26].mxu0 }
0x11bf   : > { %2595 = vtanh.f32 %v1694_v15  ;;  %v2438_v8 = vpop.f32.mrb[27].mxu0  ;;  %v2272_v31 = vmul.f32 -1.442695, %v1694_v15 }
0x11c0   : > { %v1738_v9 = vpop.f32.mrb[24].mxu1 }
0x11c1   : > { %v1744_v26 = vadd.f32 %v1738_v9, %v1698_v23  ;;  %v2445_v57 = vpop.f32.mrb[25].mxu1 }
0x11c2   : > { %v1741_v10 = vpop.f32.mrb[26].mxu1 }
0x11c3   : > { %2597 = vtanh.f32 %v1744_v26  ;;  %v2446_v27 = vpop.f32.mrb[27].mxu1  ;;  %v2273_v36 = vmul.f32 -1.442695, %v1744_v26 }
0x11c4   : > { %2599 = vpow2.f32 %v2272_v31 }
0x11c5   : > { %2601 = vpow2.f32 %v2273_v36 }
0x11c9   : > { %v2596_v18 = vpop.eup %2595 }
0x11ca   : > { %1759 = vrot.lane.b32.xlu1 %v2596_v18, %s2660_s15 }
0x11cd   : > { %v2598_v24 = vpop.eup %2597 }
0x11ce   : > { %1788 = vrot.lane.b32.xlu0 %v2598_v24, %s2660_s15  ;;  %1754 = vrot.lane.b32.xlu1 %v1745_v28, %s2658_s13  ;;  %v2600_v12 = vpop.eup %2599 }
0x11cf   : > { %v1749_v41 = vadd.f32 1.0, %v2600_v12  ;;  %v2602_v43 = vpop.eup %2601 }
0x11d0   : > { %v1778_v56 = vadd.f32 1.0, %v2602_v43 }
0x11d1   : > { %2603 = vrcp.f32 %v1749_v41 }
0x11d2   : > { %1783 = vrot.lane.b32.xlu0 %v1774_v29, %s2658_s13  ;;  %2605 = vrcp.f32 %v1778_v56 }
0x11db   : > { %v2604_v46 = vpop.eup %2603 }
0x11dc   : > { %v2606_v51 = vpop.eup %2605 }
0x123c   : > { %v1760_v47 = vpop.permute.xlu1 %1759 }
0x123d   : > { %v1762_v50 = vmul.f32 %v2604_v46, %v1760_v47 }
0x123f   : > { %1764 = vrot.lane.b32.xlu1 %v1762_v50, %s2658_s13 }
0x1240   : > { %v1789_v53 = vpop.permute.xlu0 %1788  ;;  %v1755_v40 = vpop.permute.xlu1 %1754 }
0x1241   : > { %v1791_v55 = vmul.f32 %v2606_v51, %v1789_v53  ;;  %v1757_v42 = vmul.f32 %v2604_v46, %v1755_v40 }
0x1243   : > { %1793 = vrot.lane.b32.xlu0 %v1791_v55, %s2658_s13 }
0x1244   : > { %v1784_v58 = vpop.permute.xlu0 %1783 }
0x1245   : > { %v1786_v0 = vmul.f32 %v2606_v51, %v1784_v58 }
0x12b1   : > { %v1765_v45 = vpop.permute.xlu1 %1764 }
0x12b2   : > { %v1767_v60 = vadd.f32 %v1765_v45, %v1757_v42 }
0x12b4   : > { %2607 = vtanh.f32 %v1767_v60 }
0x12b5   : > { %v1794_v3 = vpop.permute.xlu0 %1793 }
0x12b6   : > { %v1796_v52 = vadd.f32 %v1794_v3, %v1786_v0 }
0x12b8   : > { %2609 = vtanh.f32 %v1796_v52 }
0x12be   : > { %v2608_v39 = vpop.eup %2607 }
0x12bf   : > { %1770 = vrot.lane.b32.xlu1 %v2608_v39, %s2660_s15 }
0x12c2   : > { %v2610_v33 = vpop.eup %2609 }
0x12c3   : > { %1799 = vrot.lane.b32.xlu0 %v2610_v33, %s2660_s15  ;;  %1804 = vrot.lane.b32.xlu1 %v3225_v2, %s2661_s28 }
0x12c7   : > { %1826 = vrot.lane.b32.xlu0 %v3233_v4, %s2661_s28 }
0x1331   : > { %v1771_v38 = vpop.permute.xlu1 %1770 }
0x1332   : > { %v3264_v6 = vmul.f32 %v2604_v46, %v1771_v38 }
0x1335   : > { %v1800_v7 = vpop.permute.xlu0 %1799  ;;  %v1805_v13 = vpop.permute.xlu1 %1804 }
0x1336   : > { %v1807_v17 = vsel %vm730_vm9, %v3264_v6, %v1805_v13  ;;  %v3270_v21 = vmul.f32 %v2606_v51, %v1800_v7 }
0x1337   : > { %1809 = vrot.lane.b32.xlu1 %v1807_v17, %s2658_s13 }
0x1338   : > { %v1852_v35 = vsel %vm703_vm8, %v3270_v21, 0.0 }
0x1339   : > { %v1827_v15 = vpop.permute.xlu0 %1826 }
0x133a   : > { %v1829_v2 = vsel %vm703_vm8, %v3270_v21, %v1827_v15 }
0x133b   : > { %1831 = vrot.lane.b32.xlu0 %v1829_v2, %s2658_s13  ;;  %1815 = vrot.lane.b32.xlu1 %v1745_v28, %s2658_s13  ;;  %v2276_v28 = vld [vmem:[%s2806_s20 + $0x38] sm:$0xf] }
0x133c   : > { %v1860_v31 = vunpack.c.l.bf16 %v2276_v28 }
0x133f   : > { %1837 = vrot.lane.b32.xlu0 %v1774_v29, %s2658_s13  ;;  %v1859_v29 = vld [vmem:[%s2806_s20] sm:$0xff] }
0x1340   : > { %v1908_v36 = vrot.slane %v1859_v29, 4  ;;  %v530_v29 = vsel %vm502_vm5, %v2847_v5, 0.0  ;;  %v1208_v5 = vsel %vm1159_vm2, %v3064_v61, 0.0  ;;  %v1634_v61 = vsel %vm958_vm13, %v3206_v48, 0.0 }
0x1342   : > { %v1910_v56 = vunpack.c.l.bf16 %v1908_v36 }
0x13a9   : > { %v1810_v4 = vpop.permute.xlu1 %1809 }
0x13aa   : > { %1812 = vst.msk [vmem:[#allocation2] sm:$0xff] %vm282_vm1, %v1810_v4 }
0x13ad   : > { %v1832_v44 = vpop.permute.xlu0 %1831  ;;  %v1816_v23 = vpop.permute.xlu1 %1815 }
0x13ae   : > { %1834 = vst.msk [vmem:[#allocation4] sm:$0xff] %vm282_vm1, %v1832_v44  ;;  %v1818_v22 = vsel %vm730_vm9, %v1767_v60, %v1816_v23 }
0x13af   : > { %1820 = vrot.lane.b32.xlu1 %v1818_v22, %s2661_s28 }
0x13b1   : > { %v1838_v8 = vpop.permute.xlu0 %1837  ;;  %v1861_v9 = vld [vmem:[#allocation2] sm:$0xff] }
0x13b2   : > { %v1840_v26 = vsel %vm703_vm8, %v1796_v52, %v1838_v8  ;;  %v1862_v57 = vpack.c.bf16 %v1861_v9, %v1861_v9 }
0x13b3   : > { %1842 = vrot.lane.b32.xlu0 %v1840_v26, %s2661_s28 }
0x13b4   : > { %2452 = vmatmul.mubr.msk.bf16.vlgmr.msra.gmra.mrb[28].mxu0 %vm282_vm1, %v1862_v57 }
0x13b5   : > { %v3287_v10 = vld [vmem:[#allocation4] sm:$0xff] }
0x13b6   : > { %v1912_v27 = vpack.c.bf16 %v3287_v10, %v3287_v10 }
0x13b8   : > { %2460 = vmatmul.mubr.msk.bf16.vlgmr.msra.gmra.mrb[28].mxu1 %vm282_vm1, %v1912_v27 }
0x1421   : > { %v1821_v18 = vpop.permute.xlu1 %1820 }
0x1422   : > { %1823 = vst.msk [vmem:[#allocation3] sm:$0xff] %vm282_vm1, %v1821_v18 }
0x1425   : > { %v1843_v24 = vpop.permute.xlu0 %1842 }
0x1426   : > { %1845 = vst.msk [vmem:[#allocation5] sm:$0xff] %vm282_vm1, %v1843_v24 }
0x1429   : > { %v1957_v45 = vld [vmem:[#allocation3] sm:$0xff] }
0x142d   : > { %v1986_v60 = vld [vmem:[#allocation5] sm:$0xff] }
0x1487   : > { %v1900_v12 = vpop.f32.mrb[28].mxu0 }
0x1488   : > { %v1906_v41 = vadd.f32 %v1900_v12, %v1860_v31  ;;  %v2453_v43 = vpop.f32.mrb[29].mxu0  ;;  %v752_v31 = vsel %vm703_vm8, %v2912_v19, 0.0  ;;  %v987_v19 = vsel %vm958_vm13, %v2995_v30, 0.0  ;;  %v1428_v30 = vsel %vm1159_vm2, %v3132_v11, 0.0 }
0x1489   : > { %v1903_v46 = vpop.f32.mrb[30].mxu0 }
0x148a   : > { %2611 = vtanh.f32 %v1906_v41  ;;  %v2454_v47 = vpop.f32.mrb[31].mxu0  ;;  %v2279_v0 = vmul.f32 -1.442695, %v1906_v41 }
0x148b   : > { %v1950_v50 = vpop.f32.mrb[28].mxu1 }
0x148c   : > { %v1956_v51 = vadd.f32 %v1950_v50, %v1910_v56  ;;  %v2461_v53 = vpop.f32.mrb[29].mxu1 }
0x148d   : > { %v1953_v55 = vpop.f32.mrb[30].mxu1 }
0x148e   : > { %2613 = vtanh.f32 %v1956_v51  ;;  %v2462_v40 = vpop.f32.mrb[31].mxu1  ;;  %v2280_v3 = vmul.f32 -1.442695, %v1956_v51 }
0x148f   : > { %2615 = vpow2.f32 %v2279_v0 }
0x1490   : > { %2617 = vpow2.f32 %v2280_v3 }
0x1494   : > { %v2612_v42 = vpop.eup %2611 }
0x1495   : > { %1971 = vrot.lane.b32.xlu1 %v2612_v42, %s2660_s15 }
0x1498   : > { %v2614_v58 = vpop.eup %2613 }
0x1499   : > { %2000 = vrot.lane.b32.xlu0 %v2614_v58, %s2660_s15  ;;  %1966 = vrot.lane.b32.xlu1 %v1957_v45, %s2658_s13  ;;  %v2616_v52 = vpop.eup %2615 }
0x149a   : > { %v1961_v39 = vadd.f32 1.0, %v2616_v52  ;;  %v2618_v33 = vpop.eup %2617 }
0x149b   : > { %v1990_v38 = vadd.f32 1.0, %v2618_v33 }
0x149c   : > { %2619 = vrcp.f32 %v1961_v39 }
0x149d   : > { %1995 = vrot.lane.b32.xlu0 %v1986_v60, %s2658_s13  ;;  %2621 = vrcp.f32 %v1990_v38 }
0x14a6   : > { %v2620_v7 = vpop.eup %2619 }
0x14a7   : > { %v2622_v15 = vpop.eup %2621 }
0x1507   : > { %v1972_v13 = vpop.permute.xlu1 %1971 }
0x1508   : > { %v1974_v17 = vmul.f32 %v2620_v7, %v1972_v13 }
0x150a   : > { %1976 = vrot.lane.b32.xlu1 %v1974_v17, %s2658_s13 }
0x150b   : > { %v2001_v2 = vpop.permute.xlu0 %2000  ;;  %v1967_v44 = vpop.permute.xlu1 %1966 }
0x150c   : > { %v2003_v4 = vmul.f32 %v2622_v15, %v2001_v2  ;;  %v1969_v23 = vmul.f32 %v2620_v7, %v1967_v44 }
0x150e   : > { %2005 = vrot.lane.b32.xlu0 %v2003_v4, %s2658_s13  ;;  %2016 = vrot.lane.b32.xlu1 %v1861_v9, %s2661_s28  ;;  %v524_v9 = vsel %vm475_vm4, %v2840_v1, 0.0  ;;  %v759_v1 = vsel %vm730_vm9, %v2919_v20, 0.0  ;;  %v1215_v20 = vsel %vm1186_vm3, %v3071_v49, 0.0  ;;  %v1846_v49 = vsel %vm730_vm9, %v3264_v6, 0.0 }
0x150f   : > { %v1996_v22 = vpop.permute.xlu0 %1995 }
0x1510   : > { %v1998_v57 = vmul.f32 %v2622_v15, %v1996_v22 }
0x1512   : > { %2027 = vrot.lane.b32.xlu0 %v1957_v45, %s2658_s13 }
0x157c   : > { %v1977_v8 = vpop.permute.xlu1 %1976 }
0x157d   : > { %v1979_v26 = vadd.f32 %v1977_v8, %v1969_v23 }
0x157f   : > { %2623 = vtanh.f32 %v1979_v26 }
0x1580   : > { %v2006_v27 = vpop.permute.xlu0 %2005 }
0x1581   : > { %v2008_v18 = vadd.f32 %v2006_v27, %v1998_v57 }
0x1583   : > { %2625 = vtanh.f32 %v2008_v18 }
0x1584   : > { %v2028_v34 = vpop.permute.xlu0 %2027 }
0x1585   : > { %v2030_v32 = vsel %vm502_vm5, %v1979_v26, %v2028_v34 }
0x1589   : > { %v2624_v24 = vpop.eup %2623 }
0x158a   : > { %1982 = vrot.lane.b32.xlu1 %v2624_v24, %s2660_s15 }
0x158d   : > { %v2626_v28 = vpop.eup %2625 }
0x158e   : > { %2011 = vrot.lane.b32.xlu0 %v2626_v28, %s2660_s15  ;;  %2038 = vrot.lane.b32.xlu1 %v3287_v10, %s2661_s28  ;;  %v980_v10 = vsel %vm931_vm12, %v2988_v37, 0.0  ;;  %v1422_v37 = vsel %vm1186_vm3, %v3126_v25, 0.0  ;;  %v2017_v25 = vpop.permute.xlu1 %2016 }
0x1592   : > { %2049 = vrot.lane.b32.xlu0 %v1986_v60, %s2658_s13  ;;  %526 = vrot.lane.b32.xlu1 %v524_v9, %s2658_s13 }
0x1596   : > { %532 = vrot.lane.b32.xlu0 %v530_v29, %s2660_s15  ;;  %754 = vrot.lane.b32.xlu1 %v752_v31, %s2658_s13 }
0x159a   : > { %761 = vrot.lane.b32.xlu0 %v759_v1, %s2660_s15  ;;  %982 = vrot.lane.b32.xlu1 %v980_v10, %s2658_s13 }
0x159e   : > { %989 = vrot.lane.b32.xlu0 %v987_v19, %s2660_s15  ;;  %1210 = vrot.lane.b32.xlu1 %v1208_v5, %s2658_s13 }
0x15a2   : > { %1217 = vrot.lane.b32.xlu0 %v1215_v20, %s2660_s15  ;;  %1424 = vrot.lane.b32.xlu1 %v1422_v37, %s2658_s13 }
0x15a6   : > { %1430 = vrot.lane.b32.xlu0 %v1428_v30, %s2660_s15  ;;  %1636 = vrot.lane.b32.xlu1 %v1634_v61, %s2658_s13 }
0x15aa   : > { %1642 = vrot.lane.b32.xlu0 %v1640_v59, %s2660_s15  ;;  %1848 = vrot.lane.b32.xlu1 %v1846_v49, %s2658_s13 }
0x15ae   : > { %1854 = vrot.lane.b32.xlu0 %v1852_v35, %s2660_s15 }
0x15b2   : > { %2032 = vrot.lane.b32.xlu0 %v2030_v32, %s2661_s28 }
0x15fc   : > { %v1983_v16 = vpop.permute.xlu1 %1982 }
0x15fd   : > { %v1985_v11 = vmul.f32 %v2620_v7, %v1983_v16 }
0x15ff   : > { %v2019_v48 = vsel %vm502_vm5, %v1985_v11, %v2017_v25  ;;  %v2058_v43 = vsel %vm502_vm5, %v1985_v11, 0.0 }
0x1600   : > { %v2012_v54 = vpop.permute.xlu0 %2011  ;;  %2021 = vrot.lane.b32.xlu1 %v2019_v48, %s2658_s13  ;;  %v2039_v14 = vpop.permute.xlu1 %2038 }
0x1601   : > { %v2014_v6 = vmul.f32 %v2622_v15, %v2012_v54 }
0x1603   : > { %v2041_v21 = vsel %vm475_vm4, %v2014_v6, %v2039_v14  ;;  %v2064_v47 = vsel %vm475_vm4, %v2014_v6, 0.0 }
0x1604   : > { %v2050_v36 = vpop.permute.xlu0 %2049  ;;  %2043 = vrot.lane.b32.xlu1 %v2041_v21, %s2658_s13  ;;  %v527_v12 = vpop.permute.xlu1 %526 }
0x1605   : > { %v2052_v41 = vsel %vm475_vm4, %v2008_v18, %v2050_v36  ;;  %529 = vst.msk [vmem:[%s3377_s11] sm:$0xff] %vm282_vm1, %v527_v12 }
0x1606   : > { %2054 = vrot.lane.b32.xlu0 %v2052_v41, %s2661_s28 }
0x1608   : > { %v533_v56 = vpop.permute.xlu0 %532  ;;  %2060 = vrot.lane.b32.xlu1 %v2058_v43, %s2658_s13  ;;  %v755_v46 = vpop.permute.xlu1 %754 }
0x1609   : > { %2227 = vst.msk [vmem:[%s3377_s11 + $0x38] sm:$0xff] %vm536_vm0, %v533_v56 }
0x160a   : > { %2234 = vst.msk [vmem:[%s3377_s11 + $0x8] sm:$0xff] %vm282_vm1, %v755_v46  ;;  %2066 = vrot.lane.b32.xlu0 %v2064_v47, %s2660_s15 }
0x160c   : > { %v762_v62 = vpop.permute.xlu0 %761  ;;  %v983_v50 = vpop.permute.xlu1 %982 }
0x160d   : > { %2235 = vst.msk [vmem:[%s3377_s11 + $0x30] sm:$0xff] %vm536_vm0, %v762_v62 }
0x160e   : > { %2242 = vst.msk [vmem:[%s3377_s11 + $0x10] sm:$0xff] %vm282_vm1, %v983_v50 }
0x1610   : > { %v990_v51 = vpop.permute.xlu0 %989  ;;  %v1211_v63 = vpop.permute.xlu1 %1210 }
0x1611   : > { %2243 = vst.msk [vmem:[%s3377_s11 + $0x28] sm:$0xff] %vm536_vm0, %v990_v51 }
0x1612   : > { %2250 = vst.msk [vmem:[%s3377_s11 + $0x18] sm:$0xff] %vm282_vm1, %v1211_v63 }
0x1614   : > { %v1218_v53 = vpop.permute.xlu0 %1217  ;;  %v1425_v55 = vpop.permute.xlu1 %1424 }
0x1615   : > { %2251 = vst.msk [vmem:[%s3377_s11 + $0x20] sm:$0xff] %vm536_vm0, %v1218_v53 }
0x1616   : > { %2258 = vst.msk [vmem:[%s3377_s11 + $0x20] sm:$0xff] %vm282_vm1, %v1425_v55 }
0x1618   : > { %v1431_v40 = vpop.permute.xlu0 %1430  ;;  %v1637_v42 = vpop.permute.xlu1 %1636 }
0x1619   : > { %2259 = vst.msk [vmem:[%s3377_s11 + $0x18] sm:$0xff] %vm536_vm0, %v1431_v40 }
0x161a   : > { %2266 = vst.msk [vmem:[%s3377_s11 + $0x28] sm:$0xff] %vm282_vm1, %v1637_v42 }
0x161c   : > { %v1643_v58 = vpop.permute.xlu0 %1642  ;;  %v1849_v45 = vpop.permute.xlu1 %1848 }
0x161d   : > { %2267 = vst.msk [vmem:[%s3377_s11 + $0x10] sm:$0xff] %vm536_vm0, %v1643_v58  ;;  %v2128_v2 = vld [vmem:[%s3377_s11 + $0x20] sm:$0xff] (%p2718_p5) }
0x161e   : > { %2274 = vst.msk [vmem:[%s3377_s11 + $0x30] sm:$0xff] %vm282_vm1, %v1849_v45  ;;  %2129 = vst [vmem:[%s2078_s17 + $0x40] sm:$0xff] (%p2718_p5), %v2128_v2 }
0x1620   : > { %v1855_v60 = vpop.permute.xlu0 %1854  ;;  %v2126_v15 = vld [vmem:[%s3377_s11 + $0x18] sm:$0xff] (%p2718_p5) }
0x1621   : > { %2275 = vst.msk [vmem:[%s3377_s11 + $0x8] sm:$0xff] %vm536_vm0, %v1855_v60  ;;  %v2130_v4 = vld [vmem:[%s3377_s11 + $0x28] sm:$0xff] (%p2718_p5)  ;;  %2127 = vst [vmem:[%s2078_s17 + $0x30] sm:$0xff] (%p2718_p5), %v2126_v15 }
0x1622   : > { %2131 = vst [vmem:[%s2078_s17 + $0x50] sm:$0xff] (%p2718_p5), %v2130_v4 }
0x1624   : > { %v2033_v0 = vpop.permute.xlu0 %2032  ;;  %v2124_v17 = vld [vmem:[%s3377_s11 + $0x10] sm:$0xff] (%p2718_p5) }
0x1625   : > { %2035 = vst.msk [vmem:[#allocation3] sm:$0xff] %vm282_vm1, %v2033_v0  ;;  %2125 = vst [vmem:[%s2078_s17 + $0x20] sm:$0xff] (%p2718_p5), %v2124_v17  ;;  %v2132_v44 = vld [vmem:[%s3377_s11 + $0x30] sm:$0xff] (%p2718_p5) }
0x1626   : > { %2133 = vst [vmem:[%s2078_s17 + $0x60] sm:$0xff] (%p2718_p5), %v2132_v44 }
0x1628   : > { %v2122_v13 = vld [vmem:[%s3377_s11 + $0x8] sm:$0xff] (%p2718_p5) }
0x1629   : > { %2123 = vst [vmem:[%s2078_s17 + $0x10] sm:$0xff] (%p2718_p5), %v2122_v13 }
0x1672   : > { %v2022_v3 = vpop.permute.xlu1 %2021 }
0x1673   : > { %2024 = vst.msk [vmem:[#allocation2] sm:$0xff] %vm282_vm1, %v2022_v3 }
0x1676   : > { %v2044_v52 = vpop.permute.xlu1 %2043 }
0x1677   : > { %2046 = vst.msk [vmem:[#allocation4] sm:$0xff] %vm282_vm1, %v2044_v52  ;;  %2076 = sbr.rel (!%p2718_p5) target bundleno = 5766 (0x1686), region = 78 }
0x1678   : > { %v2055_v39 = vpop.permute.xlu0 %2054 }
0x1679   : > { %2057 = vst.msk [vmem:[#allocation5] sm:$0xff] %vm282_vm1, %v2055_v39 }
0x167a   : > { %v2061_v33 = vpop.permute.xlu1 %2060 }
0x167b   : > { %2281 = vst.msk [vmem:[%s3377_s11 + $0x38] sm:$0xff] %vm282_vm1, %v2061_v33 }
0x167c   : > { %v2067_v38 = vpop.permute.xlu0 %2066 }
0x167d   : > { %2069 = vst.msk [vmem:[%s3377_s11] sm:$0xff] %vm536_vm0, %v2067_v38 }
0x1682   : > { %v2134_v23 = vld [vmem:[%s3377_s11 + $0x38] sm:$0xff] }
0x1683   : > { %2135 = vst [vmem:[%s2078_s17 + $0x70] sm:$0xff] %v2134_v23 }
0x1684   : > { %v2120_v7 = vld [vmem:[%s3377_s11] sm:$0xff] }
0x1685   : > { %2121 = vst [vmem:[%s2078_s17] sm:$0xff] %v2120_v7 }
0x1686 PF: > { %p11_p11 = scmp.ge.s32.totalorder %s2706_s19, 4   ;;  %s3452_s15 = smov %s2650_s16 }
0x1687   : > { %s3453_s16 = smov %s2716_s22  ;;  %s3454_s17 = smov %s2706_s19 }
0x1688   :  { %13 = sbr.rel (!%p11_p11) target bundleno = 2 (0x2), region = 164 }

// kernel: esim_forward.16
= control target key start
LH: loop header
LB: loop body
LE: loop exit
PB: predicated region body
PF: predicated region fallthrough
CT: control target
= control target key end

     0   :  { %s342_s1 = inlined_call_operand.vmem [shape: bf16[256,128], index: 1, kind: input, shape index: {}]   ;;  %s343_s0 = inlined_call_operand.vmem [shape: bf16[8,256], index: 0, kind: input, shape index: {}]   ;;  %s344_s2 = inlined_call_operand.vmem [shape: f32[1,128], index: 2, kind: input, shape index: {}]   ;;  %s345_s3 = inlined_call_operand.vmem [shape: f32[8,128], index: 3, kind: output, shape index: {}]  }
   0x1   :  { %v245_v0 = vld [vmem:[%s342_s1 + $0x40] sm:$0xff]   ;;  %v247_v2 = vld [vmem:[%s342_s1 + $0x48] sm:$0xff]   ;;  %v249_v4 = vld [vmem:[%s342_s1 + $0x50] sm:$0xff]  }
   0x2   :  { %v246_v1 = vld [vmem:[%s342_s1] sm:$0xff]   ;;  %223 = vmatprep.subr.bf16.mxu0 %v245_v0  ;;  %v248_v3 = vld [vmem:[%s342_s1 + $0x8] sm:$0xff]   ;;  %v250_v5 = vld [vmem:[%s342_s1 + $0x10] sm:$0xff]  }
   0x3   :  { %224 = vmatpush3.bf16.msra.mxu0 %v246_v1  ;;  %v251_v6 = vld [vmem:[%s342_s1 + $0x58] sm:$0xff]   ;;  %v253_v8 = vld [vmem:[%s342_s1 + $0x60] sm:$0xff]   ;;  %v255_v10 = vld [vmem:[%s342_s1 + $0x68] sm:$0xff]  }
   0x4   :  { %225 = vmatprep.subr.bf16.mxu0 %v247_v2  ;;  %v252_v7 = vld [vmem:[%s342_s1 + $0x18] sm:$0xff]   ;;  %v254_v9 = vld [vmem:[%s342_s1 + $0x20] sm:$0xff]   ;;  %v256_v13 = vld [vmem:[%s342_s1 + $0x28] sm:$0xff]  }
   0x5   :  { %v15_v11 = vld [vmem:[%s343_s0] sm:$0xff]  ;;  %v257_v14 = vld [vmem:[%s342_s1 + $0x70] sm:$0xff]   ;;  %v259_v16 = vld [vmem:[%s342_s1 + $0x78] sm:$0xff]  }
   0x6   :  { %v206_v12 = vcombine.high %v15_v11, %v15_v11  ;;  %v258_v15 = vld [vmem:[%s342_s1 + $0x30] sm:$0xff]   ;;  %v260_v17 = vld [vmem:[%s342_s1 + $0x38] sm:$0xff]   ;;  %v205_v18 = vcombine.low %v15_v11, %v15_v11  ;;  %v204_v20 = vld [vmem:[%s344_s2] ss:$0 sm:$0xff] }
   0x7   :  { %226 = vmatpush3.bf16.msra.mxu0 %v248_v3 }
   0x8   :  { %227 = vmatprep.subr.bf16.mxu0 %v249_v4  ;;  %190 = vmatprep.mubr.bf16.mxu0 %v206_v12 }
   0xb   :  { %228 = vmatpush3.bf16.msra.mxu0 %v250_v5 }
   0xc   :  { %229 = vmatprep.subr.bf16.mxu0 %v251_v6 }
   0xf   :  { %230 = vmatpush3.bf16.msra.mxu0 %v252_v7 }
  0x10   :  { %231 = vmatprep.subr.bf16.mxu0 %v253_v8 }
  0x13   :  { %232 = vmatpush3.bf16.msra.mxu0 %v254_v9 }
  0x14   :  { %233 = vmatprep.subr.bf16.mxu0 %v255_v10 }
  0x17   :  { %234 = vmatpush3.bf16.msra.mxu0 %v256_v13 }
  0x18   :  { %235 = vmatprep.subr.bf16.mxu0 %v257_v14 }
  0x1b   :  { %236 = vmatpush3.bf16.msra.mxu0 %v258_v15 }
  0x1c   :  { %237 = vmatprep.subr.bf16.mxu0 %v259_v16 }
  0x1f   :  { %238 = vmatpush3.bf16.msra.mxu0 %v260_v17 }
  0x22   :  { %191 = vmatmul.mubr.bf16.vlgmr.msra.gmra.mrb[0].mxu0 %v205_v18 }
  0xf5   :  { %v239_v19 = vpop.f32.mrb[0].mxu0 }
  0xf6   :  { %v240_v21 = vpop.f32.mrb[1].mxu0 }
  0xf7   :  { %v241_v22 = vadd.f32 %v240_v21, %v239_v19  ;;  %v242_v23 = vpop.f32.mrb[2].mxu0 }
  0xf8   :  { %v243_v24 = vpop.f32.mrb[3].mxu0 }
  0xf9   :  { %v193_v25 = vadd.f32 %v241_v22, %v204_v20 }
  0xfb   :  { %263 = vtanh.f32 %v193_v25 }
 0x105   :  { %v264_v26 = vpop.eup %263 }
 0x106   :  { %199 = vst [vmem:[%s345_s3] sm:$0xff] %v264_v26 }

// kernel: esim_forward.17
= control target key start
LH: loop header
LB: loop body
LE: loop exit
PB: predicated region body
PF: predicated region fallthrough
CT: control target
= control target key end

     0   :  { %v107_v0 = vmov 0.0   ;;  %vm108_vm0 = vmmov 0   ;;  %vm39_vm1 = vcmask 261120   ;;  %s144_s1 = inlined_call_operand.vmem [shape: bf16[32,128], index: 1, kind: input, shape index: {}]   ;;  %s145_s0 = inlined_call_operand.vmem [shape: bf16[8,32], index: 0, kind: input, shape index: {}]   ;;  %s146_s2 = inlined_call_operand.vmem [shape: f32[1,128], index: 2, kind: input, shape index: {}]   ;;  %s147_s3 = inlined_call_operand.vmem [shape: f32[8,128], index: 3, kind: output, shape index: {}]  }
   0x1   :  { %95 = vmatprep.subr.bf16.mxu0 %v107_v0  ;;  %v105_v1 = vld [vmem:[%s144_s1] sm:$0xff]   ;;  %99 = vmatprep.mubr.msk.bf16.mxu0 %vm108_vm0, %v107_v0  ;;  %v106_v2 = vld [vmem:[%s144_s1 + $0x8] sm:$0xff]  }
   0x2   :  { %96 = vmatpush3.bf16.msra.mxu0 %v105_v1  ;;  %v15_v3 = vld [vmem:[%s145_s0] sm:$0xf] }
   0x3   :  { %97 = vmatprep.subr.bf16.mxu0 %v107_v0  ;;  %v88_v4 = vld [vmem:[%s146_s2] ss:$0 sm:$0xff] }
   0x6   :  { %98 = vmatpush3.bf16.msra.mxu0 %v106_v2 }
   0x9   :  { %100 = vmatmul.mubr.msk.bf16.vlgmr.msra.gmra.mrb[0].mxu0 %vm39_vm1, %v15_v3 }
  0xdc   :  { %v77_v5 = vpop.f32.mrb[0].mxu0 }
  0xdd   :  { %v78_v6 = vadd.f32 %v88_v4, %v77_v5  ;;  %v101_v7 = vpop.f32.mrb[1].mxu0 }
  0xde   :  { %v80_v8 = vpop.f32.mrb[2].mxu0 }
  0xdf   :  { %83 = vst [vmem:[%s147_s3] sm:$0xff] %v78_v6  ;;  %v102_v9 = vpop.f32.mrb[3].mxu0 }

</bundles_post_ra>
